<compile_context>
chip_gen: v5e
topology: v5e:2x2
jax: 0.10.0
libtpu: 0.0.40
codegen_flags: <defaults>
</compile_context>

<pallas_src>
import functools

import jax
import jax.numpy as jnp
from jax.experimental import pallas as pl
from jax.experimental.pallas import tpu as pltpu


def _attention_kernel(x_ref, wqkv_ref, wout_t_ref, bout_ref, o_ref,
                      q_sc, kT_sc, v_sc, *, heads, dim_head, q_tile,
                      proj_chunk, softmax_bf16):
    """One (batch, q-tile) grid step.

    x_ref      : (1, n, c)        bf16  full spatial extent of this batch elem
    wqkv_ref   : (c, 3*hidden)    bf16  QKV weights, scale folded into Q cols
    wout_t_ref : (c, hidden)      bf16  transposed output-projection weights
    bout_ref   : (c, 1)           f32   output bias
    o_ref      : (1, c, q_tile)         lane-dense output tile
    q_sc       : (n, hidden)      bf16  per-batch Q scratch
    kT_sc      : (hidden, n)      bf16  per-batch K^T scratch
    v_sc       : (n, hidden)      bf16  per-batch V scratch
    """
    hidden = heads * dim_head
    n = x_ref.shape[1]
    iq = pl.program_id(1)

    # ---- QKV projection for the whole spatial extent, once per batch ------
    # (requires the q-tile axis to iterate sequentially, see module comment)
    @pl.when(iq == 0)
    def _():
        # Static chunk loop over n keeps the f32 intermediate small and all
        # slices static (no dynamic lane-dim stores).
        for ci in range(n // proj_chunk):
            r0 = ci * proj_chunk
            xc = x_ref[0, r0:r0 + proj_chunk, :]                     # (chunk, c) bf16
            qkv = jnp.dot(xc, wqkv_ref[...],
                          preferred_element_type=jnp.float32)        # (chunk, 3*hidden)
            q_sc[r0:r0 + proj_chunk, :] = qkv[:, :hidden].astype(jnp.bfloat16)
            # K stored transposed (one transpose per chunk per batch element).
            kT_sc[:, r0:r0 + proj_chunk] = (
                qkv[:, hidden:2 * hidden].astype(jnp.bfloat16).T)     # (hidden, chunk)
            v_sc[r0:r0 + proj_chunk, :] = qkv[:, 2 * hidden:].astype(jnp.bfloat16)

    # ---- Q tile from scratch (scale already folded into the weights) ------
    row0 = pl.multiple_of(iq * q_tile, q_tile)
    q_blk = q_sc[pl.ds(row0, q_tile), :]                              # (q_tile, hidden) bf16

    # ---- per-head attention; per-head outputs concatenated so the output
    #      projection is a single K=hidden matmul ----------------------------
    o_heads = []
    for h in range(heads):
        lo = h * dim_head
        hi = lo + dim_head
        q_h = q_blk[:, lo:hi]                                         # (q_tile, dh) bf16
        kT_h = kT_sc[lo:hi, :]                                        # (dh, n) sublane slice
        v_h = v_sc[:, lo:hi]                                          # (n, dh) bf16

        sim = jnp.dot(q_h, kT_h,
                      preferred_element_type=jnp.float32)             # (q_tile, n) f32
        m = jnp.max(sim, axis=-1, keepdims=True)
        if softmax_bf16:
            # bf16 exp/subtract (EUP/VPU bf16 path on v6e/v7x); f32 row-sum.
            p = jnp.exp((sim - m).astype(jnp.bfloat16))
            l = jnp.sum(p.astype(jnp.float32), axis=-1, keepdims=True)
        else:
            p_f32 = jnp.exp(sim - m)
            l = jnp.sum(p_f32, axis=-1, keepdims=True)
            p = p_f32.astype(jnp.bfloat16)

        o_un = jnp.dot(p, v_h, preferred_element_type=jnp.float32)    # (q_tile, dh)
        # post-PV normalization: O(n*hidden) mults, reciprocal on the EUP slot
        o_h = o_un * pl.reciprocal(l, approx=True)
        o_heads.append(o_h.astype(jnp.bfloat16))

    o_all = jnp.concatenate(o_heads, axis=-1)                          # (q_tile, hidden) bf16

    # ---- fused output projection: single matmul, contraction K = hidden ---
    out_cq = jnp.einsum('ck,ik->ci', wout_t_ref[...], o_all,
                        preferred_element_type=jnp.float32)            # (c, q_tile)
    o_ref[0] = (out_cq + bout_ref[...]).astype(o_ref.dtype)


def attention_forward(x_nchw, w_qkv, w_out, b_out, *, heads, dim_head,
                      q_tile=None, softmax_bf16=True):
    """x_nchw: (b, c, h, w); w_qkv: (c, 3*heads*dim_head) ([q|k|v] chunks,
    head-major within each chunk); w_out: (heads*dim_head, c); b_out: (c,).
    Returns (b, c, h, w).  Set softmax_bf16=False on v5e (no bf16 VPU/EUP)."""
    b, c, h, w = x_nchw.shape
    n = h * w
    hidden = heads * dim_head
    scale = dim_head ** (-0.5)
    out_dtype = x_nchw.dtype

    # q_tile = 256 matches the 256-wide MXU on v6e/v7x; use 128 on v5e.
    if q_tile is None:
        if n % 256 == 0:
            q_tile = 256
        elif n % 128 == 0:
            q_tile = 128
        else:
            q_tile = n
    assert n % q_tile == 0
    num_q = n // q_tile

    # Chunk the per-batch QKV projection for large n (caps the f32 intermediate).
    proj_chunk = 512 if (n > 1024 and n % 512 == 0) else n

    # bf16 input halves HBM->VMEM DMA for the dominant operand.
    x = x_nchw.reshape(b, c, n).transpose(0, 2, 1).astype(jnp.bfloat16)   # (b, n, c)
    # Fold the softmax scale into the Q columns of the QKV projection.
    w_qkv_scaled = jnp.concatenate([w_qkv[:, :hidden] * scale,
                                    w_qkv[:, hidden:]], axis=1)
    w_qkv_bf = w_qkv_scaled.astype(jnp.bfloat16)                          # (c, 3*hidden)
    w_out_t = jnp.transpose(w_out).astype(jnp.bfloat16)                   # (c, hidden)
    b_out2d = b_out.reshape(c, 1).astype(jnp.float32)

    kernel = functools.partial(
        _attention_kernel, heads=heads, dim_head=dim_head, q_tile=q_tile,
        proj_chunk=proj_chunk, softmax_bf16=softmax_bf16)

    # ---- VMEM budget (padding-aware), capped at 64 MiB so it is valid on
    #      v7x (64 MiB / TC) as well as v5e/v6e (128 MiB). --------------------
    def _pad_bytes(rows, cols, itemsize):
        sub = 8 * (4 // itemsize)                       # 8 rows f32, 16 rows bf16
        prows = -(-rows // sub) * sub
        pcols = -(-cols // 128) * 128
        return prows * pcols * itemsize

    est = (2 * _pad_bytes(n, c, 2)                                   # x block (dbl-buffered)
           + 2 * (_pad_bytes(c, 3 * hidden, 2)
                  + _pad_bytes(c, hidden, 2)
                  + _pad_bytes(c, 1, 4))                             # weights + bias
           + 2 * _pad_bytes(c, q_tile, 4)                            # output block
           + 2 * _pad_bytes(n, hidden, 2) + _pad_bytes(hidden, n, 2))  # Q/K^T/V scratch
    vmem_limit = int(min(64 * 1024 * 1024, max(32 * 1024 * 1024, 2 * est)))

    out_cn = pl.pallas_call(
        kernel,
        out_shape=jax.ShapeDtypeStruct((b, c, n), out_dtype),
        grid_spec=pltpu.PrefetchScalarGridSpec(
            num_scalar_prefetch=0,
            grid=(b, num_q),
            in_specs=[
                pl.BlockSpec((1, n, c), lambda ib, iq: (ib, 0, 0)),
                pl.BlockSpec((c, 3 * hidden), lambda ib, iq: (0, 0)),
                pl.BlockSpec((c, hidden), lambda ib, iq: (0, 0)),
                pl.BlockSpec((c, 1), lambda ib, iq: (0, 0)),
            ],
            # lane-dense output: last dim is q tiles of n (multiple of 128)
            out_specs=pl.BlockSpec((1, c, q_tile), lambda ib, iq: (ib, 0, iq)),
            scratch_shapes=[
                pltpu.VMEM((n, hidden), jnp.bfloat16),    # Q scratch
                pltpu.VMEM((hidden, n), jnp.bfloat16),    # K^T scratch
                pltpu.VMEM((n, hidden), jnp.bfloat16),    # V scratch
            ],
        ),
        # NOTE: q-tile axis MUST stay "arbitrary" (sequential) — scratch is
        # filled at iq == 0 and reused by later q tiles of the same batch.
        compiler_params=pltpu.CompilerParams(
            dimension_semantics=("parallel", "arbitrary"),
            vmem_limit_bytes=vmem_limit,
        ),
    )(x, w_qkv_bf, w_out_t, b_out2d)

    return out_cn.reshape(b, c, h, w)


def _reference(x_nchw, w_qkv, w_out, b_out, *, heads, dim_head):
    """Pure-JAX (f32) reference mirroring the PyTorch forward."""
    b, c, h, w = x_nchw.shape
    n = h * w
    hidden = heads * dim_head
    scale = dim_head ** (-0.5)
    x = x_nchw.reshape(b, c, n).transpose(0, 2, 1)               # (b, n, c)
    qkv = jnp.einsum('bnc,ck->bnk', x, w_qkv)                    # (b, n, 3*hidden)
    q, k, v = jnp.split(qkv, 3, axis=-1)

    def split_heads(t):                                          # (b, heads, n, dh)
        return t.reshape(b, n, heads, dim_head).transpose(0, 2, 1, 3)

    q, k, v = map(split_heads, (q, k, v))
    sim = jnp.einsum('bhid,bhjd->bhij', q * scale, k)
    attn = jax.nn.softmax(sim, axis=-1)
    out = jnp.einsum('bhij,bhjd->bhid', attn, v)                 # (b, heads, n, dh)
    out = out.transpose(0, 2, 1, 3).reshape(b, n, hidden)
    res = jnp.einsum('bnk,kc->bnc', out, w_out) + b_out[None, None, :]
    return res.transpose(0, 2, 1).reshape(b, c, h, w)


if __name__ == "__main__":
    # Small shapes consistent with the module defaults (heads=4, dim_head=32);
    # dim=8, spatial 16x16 -> n=256 (one 256-row q tile per batch element).
    B, DIM, H, W = 2, 8, 16, 16
    HEADS, DIM_HEAD = 4, 32
    HIDDEN = HEADS * DIM_HEAD

    key = jax.random.PRNGKey(0)
    kx, kq, ko, kb = jax.random.split(key, 4)

    x = jax.random.normal(kx, (B, DIM, H, W), dtype=jnp.float32)
    # to_qkv: Conv2d(dim, 3*hidden, 1, bias=False) -> stored as (dim, 3*hidden)
    # for channels-last matmul ([q|k|v] chunks, head-major within each chunk,
    # matching the PyTorch rearrange).
    w_qkv = jax.random.normal(kq, (DIM, 3 * HIDDEN), dtype=jnp.float32) * 0.05
    # to_out: Conv2d(hidden, dim, 1) -> stored as (hidden, dim) + (dim,).
    w_out = jax.random.normal(ko, (HIDDEN, DIM), dtype=jnp.float32) * 0.05
    b_out = jax.random.normal(kb, (DIM,), dtype=jnp.float32) * 0.05

    y = attention_forward(x, w_qkv, w_out, b_out, heads=HEADS, dim_head=DIM_HEAD)
    jax.block_until_ready(y)

    y_ref = _reference(x, w_qkv, w_out, b_out, heads=HEADS, dim_head=DIM_HEAD)
    assert y.shape == (B, DIM, H, W)
    max_err = float(jnp.max(jnp.abs(y - y_ref)))
    # bf16 MXU operands / bf16 softmax exp (f32 accumulation) -> loose-but-
    # tight-enough tolerance.
    assert jnp.allclose(y, y_ref, atol=2e-2, rtol=2e-2), \
        f"mismatch vs reference (max abs err = {max_err})"

    print("KERNEL_OK")
</pallas_src>

<mosaic_0001>
module attributes {stable_mosaic.version = 11 : i64} {
  func.func @_attention_kernel(%arg0: i32, %arg1: i32, %arg2: memref<1x256x8xbf16, #tpu.memory_space<vmem>>, %arg3: memref<8x384xbf16, #tpu.memory_space<vmem>>, %arg4: memref<8x128xbf16, #tpu.memory_space<vmem>>, %arg5: memref<8x1xf32, #tpu.memory_space<vmem>>, %arg6: memref<1x8x256xf32, #tpu.memory_space<vmem>>, %arg7: memref<256x128xbf16, #tpu.memory_space<vmem>>, %arg8: memref<128x256xbf16, #tpu.memory_space<vmem>>, %arg9: memref<256x128xbf16, #tpu.memory_space<vmem>>) attributes {dimension_semantics = [#tpu.dimension_semantics<parallel>, #tpu.dimension_semantics<arbitrary>], iteration_bounds = array<i64: 2, 1>, scalar_prefetch = 0 : i64, scratch_operands = 3 : i64, tpu.core_type = #tpu.core_type<tc>, window_params = [{transform_indices = @transform_0, window_bounds = array<i64: 1, 256, 8>}, {pipeline_mode = #tpu.pipeline_mode<synchronous>, transform_indices = @transform_1, window_bounds = array<i64: 8, 384>}, {pipeline_mode = #tpu.pipeline_mode<synchronous>, transform_indices = @transform_2, window_bounds = array<i64: 8, 128>}, {pipeline_mode = #tpu.pipeline_mode<synchronous>, transform_indices = @transform_3, window_bounds = array<i64: 8, 1>}, {transform_indices = @transform_4, window_bounds = array<i64: 1, 8, 256>}]} {
    %c0_i32 = arith.constant 0 : i32
    %0 = arith.cmpi eq, %arg1, %c0_i32 : i32
    %1 = arith.extui %0 : i1 to i32
    %c0_i32_0 = arith.constant 0 : i32
    %2 = arith.cmpi ne, %1, %c0_i32_0 : i32
    scf.if %2 {
      %c0_37 = arith.constant 0 : index
      %c0_38 = arith.constant 0 : index
      %c0_39 = arith.constant 0 : index
      %88 = vector.load %arg2[%c0_37, %c0_38, %c0_39] : memref<1x256x8xbf16, #tpu.memory_space<vmem>>, vector<1x256x8xbf16>
      %89 = vector.shape_cast %88 : vector<1x256x8xbf16> to vector<256x8xbf16>
      %c0_40 = arith.constant 0 : index
      %c0_41 = arith.constant 0 : index
      %90 = vector.load %arg3[%c0_40, %c0_41] : memref<8x384xbf16, #tpu.memory_space<vmem>>, vector<8x384xbf16>
      %cst_42 = arith.constant dense<0.000000e+00> : vector<256x384xf32>
      %91 = tpu.matmul %89, %90, %cst_42 {dimension_numbers = #tpu.dot_dimension_numbers<[1], [0], [0], [1], [0, 0, 1, 1], [], []>} : vector<256x8xbf16>, vector<8x384xbf16>, vector<256x384xf32> -> vector<256x384xf32>
      %92 = vector.extract_strided_slice %91 {offsets = [0, 0], sizes = [256, 128], strides = [1, 1]} : vector<256x384xf32> to vector<256x128xf32>
      %93 = arith.truncf %92 : vector<256x128xf32> to vector<256x128xbf16>
      %c0_43 = arith.constant 0 : index
      %c0_44 = arith.constant 0 : index
      %94 = vector.load %arg7[%c0_43, %c0_44] : memref<256x128xbf16, #tpu.memory_space<vmem>>, vector<256x128xbf16>
      tpu.vector_store %arg7[%c0_43, %c0_44], %93 {strides = array<i32>} : memref<256x128xbf16, #tpu.memory_space<vmem>>, vector<256x128xbf16>,
      %95 = vector.extract_strided_slice %91 {offsets = [0, 128], sizes = [256, 128], strides = [1, 1]} : vector<256x384xf32> to vector<256x128xf32>
      %96 = arith.truncf %95 : vector<256x128xf32> to vector<256x128xbf16>
      %97 = tpu.transpose %96, [1, 0] : vector<256x128xbf16> -> vector<128x256xbf16>
      %c0_45 = arith.constant 0 : index
      %c0_46 = arith.constant 0 : index
      %98 = vector.load %arg8[%c0_45, %c0_46] : memref<128x256xbf16, #tpu.memory_space<vmem>>, vector<128x256xbf16>
      tpu.vector_store %arg8[%c0_45, %c0_46], %97 {strides = array<i32>} : memref<128x256xbf16, #tpu.memory_space<vmem>>, vector<128x256xbf16>,
      %99 = vector.extract_strided_slice %91 {offsets = [0, 256], sizes = [256, 128], strides = [1, 1]} : vector<256x384xf32> to vector<256x128xf32>
      %100 = arith.truncf %99 : vector<256x128xf32> to vector<256x128xbf16>
      %c0_47 = arith.constant 0 : index
      %c0_48 = arith.constant 0 : index
      %101 = vector.load %arg9[%c0_47, %c0_48] : memref<256x128xbf16, #tpu.memory_space<vmem>>, vector<256x128xbf16>
      tpu.vector_store %arg9[%c0_47, %c0_48], %100 {strides = array<i32>} : memref<256x128xbf16, #tpu.memory_space<vmem>>, vector<256x128xbf16>,
    } else {
    }
    %c256_i32 = arith.constant 256 : i32
    %3 = arith.muli %arg1, %c256_i32 : i32
    %4 = tpu.assume_multiple %3, 256 : i32
    %5 = arith.index_cast %4 : i32 to index
    %c0 = arith.constant 0 : index
    %6 = vector.load %arg7[%5, %c0] : memref<256x128xbf16, #tpu.memory_space<vmem>>, vector<256x128xbf16>
    %7 = vector.extract_strided_slice %6 {offsets = [0, 0], sizes = [256, 32], strides = [1, 1]} : vector<256x128xbf16> to vector<256x32xbf16>
    %c0_1 = arith.constant 0 : index
    %c0_2 = arith.constant 0 : index
    %8 = vector.load %arg8[%c0_1, %c0_2] : memref<128x256xbf16, #tpu.memory_space<vmem>>, vector<32x256xbf16>
    %c0_3 = arith.constant 0 : index
    %c0_4 = arith.constant 0 : index
    %9 = vector.load %arg9[%c0_3, %c0_4] : memref<256x128xbf16, #tpu.memory_space<vmem>>, vector<256x32xbf16>
    %cst = arith.constant dense<0.000000e+00> : vector<256x256xf32>
    %10 = tpu.matmul %7, %8, %cst {dimension_numbers = #tpu.dot_dimension_numbers<[1], [0], [0], [1], [0, 0, 1, 1], [], []>} : vector<256x32xbf16>, vector<32x256xbf16>, vector<256x256xf32> -> vector<256x256xf32>
    %cst_5 = arith.constant dense<0xFF800000> : vector<256xf32>
    %11 = vector.multi_reduction <maximumf>, %10, %cst_5 [1] : vector<256x256xf32> to vector<256xf32>
    %12 = vector.shape_cast %11 : vector<256xf32> to vector<256x1xf32>
    %13 = vector.broadcast %12 : vector<256x1xf32> to vector<256x256xf32>
    %14 = arith.subf %10, %13 : vector<256x256xf32>
    %15 = arith.truncf %14 : vector<256x256xf32> to vector<256x256xbf16>
    %16 = math.exp %15 : vector<256x256xbf16>
    %17 = arith.extf %16 : vector<256x256xbf16> to vector<256x256xf32>
    %cst_6 = arith.constant dense<0.000000e+00> : vector<256xf32>
    %18 = vector.multi_reduction <add>, %17, %cst_6 [1] : vector<256x256xf32> to vector<256xf32>
    %19 = vector.shape_cast %18 : vector<256xf32> to vector<256x1xf32>
    %cst_7 = arith.constant dense<0.000000e+00> : vector<256x32xf32>
    %20 = tpu.matmul %16, %9, %cst_7 {dimension_numbers = #tpu.dot_dimension_numbers<[1], [0], [0], [1], [0, 0, 1, 1], [], []>} : vector<256x256xbf16>, vector<256x32xbf16>, vector<256x32xf32> -> vector<256x32xf32>
    %21 = tpu.reciprocal %19 {approx = true} : vector<256x1xf32> -> vector<256x1xf32>
    %22 = vector.broadcast %21 : vector<256x1xf32> to vector<256x32xf32>
    %23 = arith.mulf %20, %22 : vector<256x32xf32>
    %24 = arith.truncf %23 : vector<256x32xf32> to vector<256x32xbf16>
    %25 = vector.extract_strided_slice %6 {offsets = [0, 32], sizes = [256, 32], strides = [1, 1]} : vector<256x128xbf16> to vector<256x32xbf16>
    %c32 = arith.constant 32 : index
    %c0_8 = arith.constant 0 : index
    %26 = vector.load %arg8[%c32, %c0_8] : memref<128x256xbf16, #tpu.memory_space<vmem>>, vector<32x256xbf16>
    %c0_9 = arith.constant 0 : index
    %c32_10 = arith.constant 32 : index
    %27 = vector.load %arg9[%c0_9, %c32_10] : memref<256x128xbf16, #tpu.memory_space<vmem>>, vector<256x32xbf16>
    %cst_11 = arith.constant dense<0.000000e+00> : vector<256x256xf32>
    %28 = tpu.matmul %25, %26, %cst_11 {dimension_numbers = #tpu.dot_dimension_numbers<[1], [0], [0], [1], [0, 0, 1, 1], [], []>} : vector<256x32xbf16>, vector<32x256xbf16>, vector<256x256xf32> -> vector<256x256xf32>
    %cst_12 = arith.constant dense<0xFF800000> : vector<256xf32>
    %29 = vector.multi_reduction <maximumf>, %28, %cst_12 [1] : vector<256x256xf32> to vector<256xf32>
    %30 = vector.shape_cast %29 : vector<256xf32> to vector<256x1xf32>
    %31 = vector.broadcast %30 : vector<256x1xf32> to vector<256x256xf32>
    %32 = arith.subf %28, %31 : vector<256x256xf32>
    %33 = arith.truncf %32 : vector<256x256xf32> to vector<256x256xbf16>
    %34 = math.exp %33 : vector<256x256xbf16>
    %35 = arith.extf %34 : vector<256x256xbf16> to vector<256x256xf32>
    %cst_13 = arith.constant dense<0.000000e+00> : vector<256xf32>
    %36 = vector.multi_reduction <add>, %35, %cst_13 [1] : vector<256x256xf32> to vector<256xf32>
    %37 = vector.shape_cast %36 : vector<256xf32> to vector<256x1xf32>
    %cst_14 = arith.constant dense<0.000000e+00> : vector<256x32xf32>
    %38 = tpu.matmul %34, %27, %cst_14 {dimension_numbers = #tpu.dot_dimension_numbers<[1], [0], [0], [1], [0, 0, 1, 1], [], []>} : vector<256x256xbf16>, vector<256x32xbf16>, vector<256x32xf32> -> vector<256x32xf32>
    %39 = tpu.reciprocal %37 {approx = true} : vector<256x1xf32> -> vector<256x1xf32>
    %40 = vector.broadcast %39 : vector<256x1xf32> to vector<256x32xf32>
    %41 = arith.mulf %38, %40 : vector<256x32xf32>
    %42 = arith.truncf %41 : vector<256x32xf32> to vector<256x32xbf16>
    %43 = vector.extract_strided_slice %6 {offsets = [0, 64], sizes = [256, 32], strides = [1, 1]} : vector<256x128xbf16> to vector<256x32xbf16>
    %c64 = arith.constant 64 : index
    %c0_15 = arith.constant 0 : index
    %44 = vector.load %arg8[%c64, %c0_15] : memref<128x256xbf16, #tpu.memory_space<vmem>>, vector<32x256xbf16>
    %c0_16 = arith.constant 0 : index
    %c64_17 = arith.constant 64 : index
    %45 = vector.load %arg9[%c0_16, %c64_17] : memref<256x128xbf16, #tpu.memory_space<vmem>>, vector<256x32xbf16>
    %cst_18 = arith.constant dense<0.000000e+00> : vector<256x256xf32>
    %46 = tpu.matmul %43, %44, %cst_18 {dimension_numbers = #tpu.dot_dimension_numbers<[1], [0], [0], [1], [0, 0, 1, 1], [], []>} : vector<256x32xbf16>, vector<32x256xbf16>, vector<256x256xf32> -> vector<256x256xf32>
    %cst_19 = arith.constant dense<0xFF800000> : vector<256xf32>
    %47 = vector.multi_reduction <maximumf>, %46, %cst_19 [1] : vector<256x256xf32> to vector<256xf32>
    %48 = vector.shape_cast %47 : vector<256xf32> to vector<256x1xf32>
    %49 = vector.broadcast %48 : vector<256x1xf32> to vector<256x256xf32>
    %50 = arith.subf %46, %49 : vector<256x256xf32>
    %51 = arith.truncf %50 : vector<256x256xf32> to vector<256x256xbf16>
    %52 = math.exp %51 : vector<256x256xbf16>
    %53 = arith.extf %52 : vector<256x256xbf16> to vector<256x256xf32>
    %cst_20 = arith.constant dense<0.000000e+00> : vector<256xf32>
    %54 = vector.multi_reduction <add>, %53, %cst_20 [1] : vector<256x256xf32> to vector<256xf32>
    %55 = vector.shape_cast %54 : vector<256xf32> to vector<256x1xf32>
    %cst_21 = arith.constant dense<0.000000e+00> : vector<256x32xf32>
    %56 = tpu.matmul %52, %45, %cst_21 {dimension_numbers = #tpu.dot_dimension_numbers<[1], [0], [0], [1], [0, 0, 1, 1], [], []>} : vector<256x256xbf16>, vector<256x32xbf16>, vector<256x32xf32> -> vector<256x32xf32>
    %57 = tpu.reciprocal %55 {approx = true} : vector<256x1xf32> -> vector<256x1xf32>
    %58 = vector.broadcast %57 : vector<256x1xf32> to vector<256x32xf32>
    %59 = arith.mulf %56, %58 : vector<256x32xf32>
    %60 = arith.truncf %59 : vector<256x32xf32> to vector<256x32xbf16>
    %61 = vector.extract_strided_slice %6 {offsets = [0, 96], sizes = [256, 32], strides = [1, 1]} : vector<256x128xbf16> to vector<256x32xbf16>
    %c96 = arith.constant 96 : index
    %c0_22 = arith.constant 0 : index
    %62 = vector.load %arg8[%c96, %c0_22] : memref<128x256xbf16, #tpu.memory_space<vmem>>, vector<32x256xbf16>
    %c0_23 = arith.constant 0 : index
    %c96_24 = arith.constant 96 : index
    %63 = vector.load %arg9[%c0_23, %c96_24] : memref<256x128xbf16, #tpu.memory_space<vmem>>, vector<256x32xbf16>
    %cst_25 = arith.constant dense<0.000000e+00> : vector<256x256xf32>
    %64 = tpu.matmul %61, %62, %cst_25 {dimension_numbers = #tpu.dot_dimension_numbers<[1], [0], [0], [1], [0, 0, 1, 1], [], []>} : vector<256x32xbf16>, vector<32x256xbf16>, vector<256x256xf32> -> vector<256x256xf32>
    %cst_26 = arith.constant dense<0xFF800000> : vector<256xf32>
    %65 = vector.multi_reduction <maximumf>, %64, %cst_26 [1] : vector<256x256xf32> to vector<256xf32>
    %66 = vector.shape_cast %65 : vector<256xf32> to vector<256x1xf32>
    %67 = vector.broadcast %66 : vector<256x1xf32> to vector<256x256xf32>
    %68 = arith.subf %64, %67 : vector<256x256xf32>
    %69 = arith.truncf %68 : vector<256x256xf32> to vector<256x256xbf16>
    %70 = math.exp %69 : vector<256x256xbf16>
    %71 = arith.extf %70 : vector<256x256xbf16> to vector<256x256xf32>
    %cst_27 = arith.constant dense<0.000000e+00> : vector<256xf32>
    %72 = vector.multi_reduction <add>, %71, %cst_27 [1] : vector<256x256xf32> to vector<256xf32>
    %73 = vector.shape_cast %72 : vector<256xf32> to vector<256x1xf32>
    %cst_28 = arith.constant dense<0.000000e+00> : vector<256x32xf32>
    %74 = tpu.matmul %70, %63, %cst_28 {dimension_numbers = #tpu.dot_dimension_numbers<[1], [0], [0], [1], [0, 0, 1, 1], [], []>} : vector<256x256xbf16>, vector<256x32xbf16>, vector<256x32xf32> -> vector<256x32xf32>
    %75 = tpu.reciprocal %73 {approx = true} : vector<256x1xf32> -> vector<256x1xf32>
    %76 = vector.broadcast %75 : vector<256x1xf32> to vector<256x32xf32>
    %77 = arith.mulf %74, %76 : vector<256x32xf32>
    %78 = arith.truncf %77 : vector<256x32xf32> to vector<256x32xbf16>
    %79 = tpu.concatenate %24, %42, %60, %78 in 1 : vector<256x32xbf16>, vector<256x32xbf16>, vector<256x32xbf16>, vector<256x32xbf16> -> vector<256x128xbf16>
    %c0_29 = arith.constant 0 : index
    %c0_30 = arith.constant 0 : index
    %80 = vector.load %arg4[%c0_29, %c0_30] : memref<8x128xbf16, #tpu.memory_space<vmem>>, vector<8x128xbf16>
    "tpu.trace_start"() <{level = 10 : i32, message = "ck,ik->ci"}> : () -> ()
    %cst_31 = arith.constant dense<0.000000e+00> : vector<8x256xf32>
    %81 = tpu.matmul %80, %79, %cst_31 {dimension_numbers = #tpu.dot_dimension_numbers<[1], [1], [0], [0], [0, 0, 1, 0], [], []>} : vector<8x128xbf16>, vector<256x128xbf16>, vector<8x256xf32> -> vector<8x256xf32>
    "tpu.trace_stop"() : () -> ()
    %c0_32 = arith.constant 0 : index
    %c0_33 = arith.constant 0 : index
    %82 = vector.load %arg5[%c0_32, %c0_33] : memref<8x1xf32, #tpu.memory_space<vmem>>, vector<8x1xf32>
    %83 = vector.broadcast %82 : vector<8x1xf32> to vector<8x256xf32>
    %84 = arith.addf %81, %83 : vector<8x256xf32>
    %c0_34 = arith.constant 0 : index
    %c0_35 = arith.constant 0 : index
    %c0_36 = arith.constant 0 : index
    %85 = vector.load %arg6[%c0_34, %c0_35, %c0_36] : memref<1x8x256xf32, #tpu.memory_space<vmem>>, vector<1x8x256xf32>
    %86 = vector.shape_cast %85 : vector<1x8x256xf32> to vector<8x256xf32>
    %87 = vector.shape_cast %84 : vector<8x256xf32> to vector<1x8x256xf32>
    tpu.vector_store %arg6[%c0_34, %c0_35, %c0_36], %87 {strides = array<i32>} : memref<1x8x256xf32, #tpu.memory_space<vmem>>, vector<1x8x256xf32>,
    return
  }
  func.func @transform_0(%arg0: i32, %arg1: i32) -> (i32, i32, i32) {
    %c0_i32 = arith.constant 0 : i32
    %c0_i32_0 = arith.constant 0 : i32
    %c0_i32_1 = arith.constant 0 : i32
    return %arg0, %c0_i32, %c0_i32_0 : i32, i32, i32
  }
  func.func @transform_1(%arg0: i32, %arg1: i32) -> (i32, i32) {
    %c0_i32 = arith.constant 0 : i32
    %c0_i32_0 = arith.constant 0 : i32
    %c0_i32_1 = arith.constant 0 : i32
    return %c0_i32, %c0_i32_0 : i32, i32
  }
  func.func @transform_2(%arg0: i32, %arg1: i32) -> (i32, i32) {
    %c0_i32 = arith.constant 0 : i32
    %c0_i32_0 = arith.constant 0 : i32
    %c0_i32_1 = arith.constant 0 : i32
    return %c0_i32, %c0_i32_0 : i32, i32
  }
  func.func @transform_3(%arg0: i32, %arg1: i32) -> (i32, i32) {
    %c0_i32 = arith.constant 0 : i32
    %c0_i32_0 = arith.constant 0 : i32
    %c0_i32_1 = arith.constant 0 : i32
    return %c0_i32, %c0_i32_0 : i32, i32
  }
  func.func @transform_4(%arg0: i32, %arg1: i32) -> (i32, i32, i32) {
    %c0_i32 = arith.constant 0 : i32
    %c0_i32_0 = arith.constant 0 : i32
    return %arg0, %c0_i32, %arg1 : i32, i32, i32
  }
}

</mosaic_0001>

<bundles_post_ra>
// kernel: tpu_custom_call.1
= control target key start
LH: loop header
LB: loop body
LE: loop exit
PB: predicated region body
PF: predicated region fallthrough
CT: control target
= control target key end

     0   :  { %9 = vsyncpa [#allocation6], 0  ;;  %s11766_s0 = inlined_call_operand.vmem [shape: bf16[2,256,8], index: 0, kind: input, shape index: {}]   ;;  %s11767_s1 = inlined_call_operand.vmem [shape: bf16[8,384], index: 1, kind: input, shape index: {}]   ;;  %s11768_s2 = inlined_call_operand.vmem [shape: bf16[8,128], index: 2, kind: input, shape index: {}]   ;;  %s11769_s3 = inlined_call_operand.vmem [shape: f32[8,1], index: 3, kind: input, shape index: {}]   ;;  %s11770_s4 = inlined_call_operand.hbm [shape: f32[2,8,256], index: 4, kind: output, shape index: {}]  }
   0x1   :  { %11 = vsyncpa [#allocation6 + $0x1], 0  ;;  %s8168_s15 = smov 0   ;;  %s8170_s16 = smov 0  }
   0x2   :  { %s8172_s17 = smov 0   ;;  %s8174_s18 = smov 0  }
   0x3   :  { %s8176_s19 = smov 0   ;;  %s8178_s20 = smov 0  }
   0x4 LB: > { %s6494_s21 = sadd.s32 4294967295, %s8137_s20   ;;  %s6495_s22 = sadd.s32 4294967294, %s8137_s20   ;;  %s8137_s20 = sphi %s8178_s20, %s17_s20   ;;  %s8133_s19 = sphi %s8176_s19, %s12473_s19   ;;  %s8129_s18 = sphi %s8174_s18, %s12472_s18   ;;  %s8125_s17 = sphi %s8172_s17, %s12471_s17   ;;  %s8121_s16 = sphi %s8170_s16, %s12470_s16   ;;  %s8117_s15 = sphi %s8168_s15, %s12469_s15  }
   0x5   : > { %s29_s23 = sadd.s32 1, %s8133_s19  ;;  %s127_s24 = sadd.s32 1, %s8125_s17 }
   0x6   : > { %p31_p0 = scmp.ge.s32.totalorder %s29_s23, 2  ;;  %p137_p1 = scmp.ne.s32.totalorder %s8125_s17, %s8121_s16 }
   0x7   : > { %p138_p2 = scmp.eq.s32.totalorder %s6494_s21, 1  ;;  %p143_p3 = scmp.ne.s32.totalorder %s8121_s16, %s8117_s15 }
   0x8   : > { %s12475_s23 = smov (%p31_p0, %s29_s23), 0  ;;  %p144_p5 = scmp.eq.s32.totalorder %s6495_s22, 1 }
   0x9   : > { %p8208_p4 = por %p138_p2, %p137_p1  ;;  %s122_s26 = ssub.s32 %s8133_s19, %s12475_s23 }
   0xa   : > { %p6498_p6 = scmp.ge.s32.totalorder %s8137_s20, 1  ;;  %p125_p7 = scmp.eq.s32.totalorder %s122_s26, 0 }
   0xb   : > { %p8215_p8 = por %p144_p5, %p143_p3  ;;  %p179_p9 = scmp.lt.s32.totalorder %s8137_s20, 3 }
   0xc   : > { %s8221_s28 = scalar_select %p125_p7, %s8125_s17, %s127_s24  }
   0xd   : > { %p180_p10 = pnand %p6498_p6, %p179_p9 }
   0xf   : > { %183 = sbr.rel (%p180_p10) target bundleno = 2649 (0xa59), region = 36 }
  0x14   : > { %v248_v0 = vld [vmem:[%s11767_s1] sm:$0xff]  ;;  %v249_v1 = vld [vmem:[%s11767_s1 + $0x8] sm:$0xf]  ;;  %p205_p11 = scmp.lt.s32.totalorder %s8129_s18, 1  ;;  %vm387_vm0 = vcmask 1043456   ;;  %vm338_vm1 = vcmask 64512  }
  0x15   : > { %v332_v2 = vunpack.c.l.b16 %v248_v0  ;;  %v333_v3 = vunpack.c.h.b16 %v248_v0  ;;  %v334_v4 = vunpack.c.l.b16 %v249_v1  ;;  %s8139_s12 = smov 96   ;;  %s8140_s13 = smov 64   ;;  %vm1109_vm2 = vcmask 261120  }
  0x16   : > { %s206_s7 = scalar_select %p205_p11, %s8129_s18, 1  ;;  %vm6286_vm3 = vcmask 523264   ;;  %vm6319_vm4 = vcmask 785408  }
  0x17   : > { %v335_v5 = vpack.c.b16 %v332_v2, %v332_v2  ;;  %v336_v6 = vpack.c.b16 %v333_v3, %v333_v3  ;;  %v337_v7 = vpack.c.b16 %v334_v4, %v334_v4  ;;  %s8141_s14 = smov 32   ;;  %s202_s29 = sand.u32 1, %s8121_s16  }
  0x18   : > { %s6939_s8 = sshll.u32 %s206_s7, 7  ;;  %s6499_s30 = sshll.u32 %s202_s29, 4 }
  0x19   : > { %v389_v8 = vsel %vm387_vm0, %v335_v5, 0  ;;  %v392_v9 = vsel %vm387_vm0, %v336_v6, 0  ;;  %v395_v10 = vsel %vm387_vm0, %v337_v7, 0  ;;  %s8234_s11 = scalar_lea.vmem %s11766_s0, %s6939_s8  ;;  %s204_s5 = scalar_lea.vmem [#allocation5], %s6499_s30 }
  0x1a   : > { %404 = vmatpush.bf16.msra.mxu0 %v389_v8  ;;  %493 = vmatpush.bf16.msra.mxu1 %v392_v9  ;;  %v6940_v11 = vld [vmem:[%s8234_s11] sm:$0xff]  ;;  %v6941_v12 = vld [vmem:[%s8234_s11 + $0x8] sm:$0xff]  ;;  %v6954_v13 = vld [vmem:[%s8234_s11 + $0x70] sm:$0xff]  ;;  %s7004_s6 = sshll.u32 %s8129_s18, 4  ;;  %s6419_s10 = sshll.u32 %s204_s5, 4  ;;  %s6420_s10 = int_to_ptr.vmem [resolvable:$true] %s6419_s10 }
  0x1b   : > { %582 = vmatpush.bf16.msra.mxu2 %v395_v10  ;;  %7195 = vmatpush.bf16.msra.mxu3 %v389_v8  ;;  %v6942_v14 = vld [vmem:[%s8234_s11 + $0x10] sm:$0xff]  ;;  %v6955_v15 = vld [vmem:[%s8234_s11 + $0x78] sm:$0xff]  ;;  %v6944_v17 = vld [vmem:[%s8234_s11 + $0x20] sm:$0xff]  ;;  %s6417_s9 = scalar_lea.hbm %s11770_s4, %s7004_s6  ;;  %s8079_s22 = scalar_lea.hbm %s11770_s4, 32 }
  0x1c   : > { %v6943_v16 = vld [vmem:[%s8234_s11 + $0x18] sm:$0xff]  ;;  %v6945_v18 = vld [vmem:[%s8234_s11 + $0x28] sm:$0xff]  ;;  %v6946_v19 = vld [vmem:[%s8234_s11 + $0x30] sm:$0xff] }
  0x1d   : > { %6566 = vmatmul.msk.bf16.vlgmr.msra.gmra.mxu0 %vm338_vm1, %v6940_v11  ;;  %6582 = vmatmul.msk.bf16.vlgmr.msra.gmra.mxu1 %vm338_vm1, %v6940_v11  ;;  %v6947_v20 = vld [vmem:[%s8234_s11 + $0x38] sm:$0xff]  ;;  %v6948_v21 = vld [vmem:[%s8234_s11 + $0x40] sm:$0xff]  ;;  %v6949_v30 = vld [vmem:[%s8234_s11 + $0x48] sm:$0xff] }
  0x1e   : > { %6598 = vmatmul.msk.bf16.vlgmr.msra.gmra.mxu2 %vm338_vm1, %v6940_v11  ;;  %6580 = vmatmul.msk.bf16.vlgmr.msra.gmra.mxu3 %vm338_vm1, %v6954_v13  ;;  %v6950_v41 = vld [vmem:[%s8234_s11 + $0x50] sm:$0xff]  ;;  %v6951_v52 = vld [vmem:[%s8234_s11 + $0x58] sm:$0xff]  ;;  %v6952_v63 = vld [vmem:[%s8234_s11 + $0x60] sm:$0xff] }
  0x1f   : > { %7196 = vmatpush.bf16.msrb.mxu3 %v392_v9 }
  0x23   : > { %7197 = vmatpush.bf16.msra.mxu3 %v395_v10 }
  0x2d   : > { %6567 = vmatmul.msk.bf16.gmra.mxu0 %vm338_vm1, %v6941_v12  ;;  %6583 = vmatmul.msk.bf16.gmra.mxu1 %vm338_vm1, %v6941_v12 }
  0x2e   : > { %6599 = vmatmul.msk.bf16.gmra.mxu2 %vm338_vm1, %v6941_v12  ;;  %6581 = vmatmul.msk.bf16.gmra.mxu3 %vm338_vm1, %v6955_v15  ;;  %v6953_v12 = vld [vmem:[%s8234_s11 + $0x68] sm:$0xff]  ;;  %s6421_s11 = sshll.u32 %s6417_s9, 4  ;;  %s6422_s11 = int_to_ptr.hbm [resolvable:$true] %s6421_s11 }
  0x3d   : > { %6568 = vmatmul.msk.bf16.gmra.mxu0 %vm338_vm1, %v6942_v14  ;;  %6584 = vmatmul.msk.bf16.gmra.mxu1 %vm338_vm1, %v6942_v14 }
  0x3e   : > { %6600 = vmatmul.msk.bf16.gmra.mxu2 %vm338_vm1, %v6942_v14  ;;  %6596 = vmatmul.msk.bf16.vlgmr.msrb.gmra.mxu3 %vm338_vm1, %v6954_v13 }
  0x4d   : > { %6569 = vmatmul.msk.bf16.gmra.mxu0 %vm338_vm1, %v6943_v16  ;;  %6585 = vmatmul.msk.bf16.gmra.mxu1 %vm338_vm1, %v6943_v16 }
  0x4e   : > { %6601 = vmatmul.msk.bf16.gmra.mxu2 %vm338_vm1, %v6943_v16  ;;  %6597 = vmatmul.msk.bf16.gmra.mxu3 %vm338_vm1, %v6955_v15 }
  0x5d   : > { %6570 = vmatmul.msk.bf16.gmra.mxu0 %vm338_vm1, %v6944_v17  ;;  %6586 = vmatmul.msk.bf16.gmra.mxu1 %vm338_vm1, %v6944_v17 }
  0x5e   : > { %6602 = vmatmul.msk.bf16.gmra.mxu2 %vm338_vm1, %v6944_v17  ;;  %6612 = vmatmul.msk.bf16.vlgmr.msra.gmra.mxu3 %vm338_vm1, %v6954_v13 }
  0x6d   : > { %6571 = vmatmul.msk.bf16.gmra.mxu0 %vm338_vm1, %v6945_v18  ;;  %6587 = vmatmul.msk.bf16.gmra.mxu1 %vm338_vm1, %v6945_v18 }
  0x6e   : > { %6603 = vmatmul.msk.bf16.gmra.mxu2 %vm338_vm1, %v6945_v18  ;;  %6613 = vmatmul.msk.bf16.gmra.mxu3 %vm338_vm1, %v6955_v15 }
  0x7d   : > { %6572 = vmatmul.msk.bf16.gmra.mxu0 %vm338_vm1, %v6946_v19  ;;  %6588 = vmatmul.msk.bf16.gmra.mxu1 %vm338_vm1, %v6946_v19 }
  0x7e   : > { %6604 = vmatmul.msk.bf16.gmra.mxu2 %vm338_vm1, %v6946_v19 }
  0x8d   : > { %6573 = vmatmul.msk.bf16.gmra.mxu0 %vm338_vm1, %v6947_v20  ;;  %6589 = vmatmul.msk.bf16.gmra.mxu1 %vm338_vm1, %v6947_v20 }
  0x8e   : > { %6605 = vmatmul.msk.bf16.gmra.mxu2 %vm338_vm1, %v6947_v20 }
  0x9a   : > { %v406_v22 = vpop.f32.mrf.mxu0  ;;  %v8277_v23 = vpop.f32.mrf.mxu1 }
  0x9d   : > { %6574 = vmatmul.msk.bf16.gmra.mxu0 %vm338_vm1, %v6948_v21  ;;  %6590 = vmatmul.msk.bf16.gmra.mxu1 %vm338_vm1, %v6948_v21 }
  0x9e   : > { %6606 = vmatmul.msk.bf16.gmra.mxu2 %vm338_vm1, %v6948_v21 }
  0xa1   : > { %v584_v24 = vpop.f32.mrf.mxu2  ;;  %v476_v39 = vpop.f32.mrf.mxu3 }
  0xa2   : > { %v408_v25 = vpop.f32.mrf.mxu0  ;;  %v8282_v26 = vpop.f32.mrf.mxu1 }
  0xa3   : > { %v7008_v27 = vpack.c.bf16 %v408_v25, %v406_v22  ;;  %v728_v28 = vpack.c.bf16 %v8282_v26, %v8277_v23 }
  0xa5   : > { %7009 = vst [vmem:[#allocation2 + $0x30] sm:$0xff] %v7008_v27  }
  0xa9   : > { %v586_v29 = vpop.f32.mrf.mxu2  ;;  %v478_v45 = vpop.f32.mrf.mxu3 }
  0xaa   : > { %v7088_v31 = vpack.c.bf16 %v586_v29, %v584_v24  ;;  %v411_v32 = vpop.f32.mrf.mxu0  ;;  %v8287_v33 = vpop.f32.mrf.mxu1  ;;  %v7078_v4 = vpack.c.bf16 %v478_v45, %v476_v39 }
  0xac   : > { %7089 = vst [vmem:[#allocation4 + $0x28] sm:$0xff] %v7088_v31   ;;  %v8321_v5 = vld [vmem:[#allocation2 + $0x30] sm:$0xff] }
  0xad   : > { %6575 = vmatmul.msk.bf16.gmra.mxu0 %vm338_vm1, %v6949_v30  ;;  %6591 = vmatmul.msk.bf16.gmra.mxu1 %vm338_vm1, %v6949_v30  ;;  %7178 = vst [vmem:[#allocation2 + $0x78] sm:$0xff] %v7078_v4  }
  0xae   : > { %6607 = vmatmul.msk.bf16.gmra.mxu2 %vm338_vm1, %v6949_v30  ;;  %2286 = vrot.lane.b32.xlu1 %v8321_v5, %s8139_s12 }
  0xb1   : > { %v589_v34 = vpop.f32.mrf.mxu2  ;;  %v481_v50 = vpop.f32.mrf.mxu3 }
  0xb2   : > { %v413_v35 = vpop.f32.mrf.mxu0  ;;  %v8292_v36 = vpop.f32.mrf.mxu1 }
  0xb3   : > { %v7013_v37 = vpack.c.bf16 %v413_v35, %v411_v32  ;;  %v729_v38 = vpack.c.bf16 %v8292_v36, %v8287_v33  ;;  %v8406_v33 = vld [vmem:[#allocation4 + $0x28] sm:$0xff] }
  0xb5   : > { %7165 = vst [vmem:[#allocation2] sm:$0xff] %v7013_v37  }
  0xb9   : > { %v591_v40 = vpop.f32.mrf.mxu2  ;;  %v483_v56 = vpop.f32.mrf.mxu3 }
  0xba   : > { %v7093_v42 = vpack.c.bf16 %v591_v40, %v589_v34  ;;  %v416_v43 = vpop.f32.mrf.mxu0  ;;  %v8297_v44 = vpop.f32.mrf.mxu1  ;;  %v7083_v17 = vpack.c.bf16 %v483_v56, %v481_v50 }
  0xbc   : > { %7180 = vst [vmem:[#allocation4 + $0x68] sm:$0xff] %v7093_v42   ;;  %v8337_v18 = vld [vmem:[#allocation2] sm:$0xff] }
  0xbd   : > { %6576 = vmatmul.msk.bf16.gmra.mxu0 %vm338_vm1, %v6950_v41  ;;  %6592 = vmatmul.msk.bf16.gmra.mxu1 %vm338_vm1, %v6950_v41  ;;  %7179 = vst [vmem:[#allocation2 + $0x28] sm:$0xff] %v7083_v17  }
  0xbe   : > { %6608 = vmatmul.msk.bf16.gmra.mxu2 %vm338_vm1, %v6950_v41  ;;  %2288 = vrot.lane.b32.xlu2 %v8337_v18, %s8139_s12 }
  0xc1   : > { %v594_v46 = vpop.f32.mrf.mxu2  ;;  %v8312_v61 = vpop.f32.mrf.mxu3 }
  0xc2   : > { %v418_v47 = vpop.f32.mrf.mxu0  ;;  %v8302_v48 = vpop.f32.mrf.mxu1 }
  0xc3   : > { %v7018_v49 = vpack.c.bf16 %v418_v47, %v416_v43 }
  0xc5   : > { %7166 = vst [vmem:[#allocation2 + $0x58] sm:$0xff] %v7018_v49  }
  0xc9   : > { %v596_v51 = vpop.f32.mrf.mxu2  ;;  %v8317_v3 = vpop.f32.mrf.mxu3 }
  0xca   : > { %v7098_v53 = vpack.c.bf16 %v596_v51, %v594_v46  ;;  %v421_v54 = vpop.f32.mrf.mxu0  ;;  %v8305_v55 = vpop.f32.mrf.mxu1 }
  0xcc   : > { %7181 = vst [vmem:[#allocation4 + $0x10] sm:$0xff] %v7098_v53   ;;  %v8348_v34 = vld [vmem:[#allocation2 + $0x58] sm:$0xff] }
  0xcd   : > { %6577 = vmatmul.msk.bf16.gmra.mxu0 %vm338_vm1, %v6951_v52  ;;  %6593 = vmatmul.msk.bf16.gmra.mxu1 %vm338_vm1, %v6951_v52 }
  0xce   : > { %6609 = vmatmul.msk.bf16.gmra.mxu2 %vm338_vm1, %v6951_v52  ;;  %2290 = vrot.lane.b32.xlu1 %v8348_v34, %s8139_s12 }
  0xd1   : > { %v599_v57 = vpop.f32.mrf.mxu2  ;;  %v8328_v10 = vpop.f32.mrf.mxu3 }
  0xd2   : > { %v423_v58 = vpop.f32.mrf.mxu0  ;;  %v8310_v59 = vpop.f32.mrf.mxu1 }
  0xd3   : > { %v7023_v60 = vpack.c.bf16 %v423_v58, %v421_v54 }
  0xd5   : > { %7167 = vst [vmem:[#allocation2 + $0x18] sm:$0xff] %v7023_v60  }
  0xd9   : > { %v601_v62 = vpop.f32.mrf.mxu2  ;;  %v8333_v16 = vpop.f32.mrf.mxu3 }
  0xda   : > { %v7103_v0 = vpack.c.bf16 %v601_v62, %v599_v57  ;;  %v426_v1 = vpop.f32.mrf.mxu0  ;;  %v8315_v2 = vpop.f32.mrf.mxu1 }
  0xdc   : > { %7182 = vst [vmem:[#allocation4 + $0x40] sm:$0xff] %v7103_v0   ;;  %v8346_v32 = vld [vmem:[#allocation2 + $0x18] sm:$0xff] }
  0xdd   : > { %6578 = vmatmul.msk.bf16.gmra.mxu0 %vm338_vm1, %v6952_v63  ;;  %6594 = vmatmul.msk.bf16.gmra.mxu1 %vm338_vm1, %v6952_v63 }
  0xde   : > { %6610 = vmatmul.msk.bf16.gmra.mxu2 %vm338_vm1, %v6952_v63  ;;  %2292 = vrot.lane.b32.xlu2 %v8346_v32, %s8139_s12 }
  0xe1   : > { %v604_v6 = vpop.f32.mrf.mxu2  ;;  %v654_v24 = vpop.f32.mrf.mxu3 }
  0xe2   : > { %v428_v7 = vpop.f32.mrf.mxu0  ;;  %v8326_v8 = vpop.f32.mrf.mxu1 }
  0xe3   : > { %v7028_v9 = vpack.c.bf16 %v428_v7, %v426_v1 }
  0xe5   : > { %7168 = vst [vmem:[#allocation2 + $0x50] sm:$0xff] %v7028_v9  }
  0xe9   : > { %v606_v11 = vpop.f32.mrf.mxu2  ;;  %v656_v31 = vpop.f32.mrf.mxu3 }
  0xea   : > { %v7108_v13 = vpack.c.bf16 %v606_v11, %v604_v6  ;;  %v431_v14 = vpop.f32.mrf.mxu0  ;;  %v8331_v15 = vpop.f32.mrf.mxu1  ;;  %v7158_v63 = vpack.c.bf16 %v656_v31, %v654_v24  ;;  %v8398_v31 = vld [vmem:[#allocation4 + $0x10] sm:$0xff] }
  0xec   : > { %7183 = vst [vmem:[#allocation4 + $0x48] sm:$0xff] %v7108_v13   ;;  %v8367_v0 = vld [vmem:[#allocation2 + $0x50] sm:$0xff] }
  0xed   : > { %6579 = vmatmul.msk.bf16.gmra.mxu0 %vm338_vm1, %v6953_v12  ;;  %6595 = vmatmul.msk.bf16.gmra.mxu1 %vm338_vm1, %v6953_v12  ;;  %7193 = vst [vmem:[#allocation4 + $0x60] sm:$0xff] %v7158_v63   ;;  %v731_v63 = vpack.c.bf16 %v8310_v59, %v8305_v55 }
  0xee   : > { %6611 = vmatmul.msk.bf16.gmra.mxu2 %vm338_vm1, %v6953_v12  ;;  %2294 = vrot.lane.b32.xlu1 %v8367_v0, %s8139_s12 }
  0xf1   : > { %v609_v19 = vpop.f32.mrf.mxu2  ;;  %v659_v41 = vpop.f32.mrf.mxu3 }
  0xf2   : > { %v433_v20 = vpop.f32.mrf.mxu0  ;;  %v8342_v21 = vpop.f32.mrf.mxu1 }
  0xf3   : > { %v7033_v22 = vpack.c.bf16 %v433_v20, %v431_v14  ;;  %v8387_v23 = vld [vmem:[#allocation4 + $0x48] sm:$0xff] }
  0xf5   : > { %7169 = vst [vmem:[#allocation2 + $0x68] sm:$0xff] %v7033_v22  }
  0xf9   : > { %v611_v25 = vpop.f32.mrf.mxu2  ;;  %v661_v49 = vpop.f32.mrf.mxu3 }
  0xfa   : > { %v7113_v27 = vpack.c.bf16 %v611_v25, %v609_v19  ;;  %v436_v29 = vpop.f32.mrf.mxu0  ;;  %v8344_v30 = vpop.f32.mrf.mxu1  ;;  %v7163_v50 = vpack.c.bf16 %v661_v49, %v659_v41 }
  0xfc   : > { %7184 = vst [vmem:[#allocation4 + $0x30] sm:$0xff] %v7113_v27   ;;  %v8356_v42 = vld [vmem:[#allocation2 + $0x68] sm:$0xff] }
  0xfd   : > { %2296 = vrot.lane.b32.xlu2 %v8356_v42, %s8139_s12  ;;  %7194 = vst [vmem:[#allocation4 + $0x50] sm:$0xff] %v7163_v50  }
 0x101   : > { %v614_v35 = vpop.f32.mrf.mxu2 }
 0x102   : > { %v438_v37 = vpop.f32.mrf.mxu0  ;;  %v8354_v39 = vpop.f32.mrf.mxu1 }
 0x103   : > { %v7038_v40 = vpack.c.bf16 %v438_v37, %v436_v29  ;;  %v8380_v20 = vld [vmem:[#allocation4 + $0x30] sm:$0xff]  ;;  %v8390_v29 = vld [vmem:[#allocation4 + $0x40] sm:$0xff] }
 0x104   : > { %v8364_v56 = vld [vmem:[#allocation4 + $0x50] sm:$0xff] }
 0x105   : > { %7170 = vst [vmem:[#allocation2 + $0x8] sm:$0xff] %v7038_v40   ;;  %2097 = vmatpush.bf16.msrb.mxu2 %v8364_v56 }
 0x109   : > { %v616_v43 = vpop.f32.mrf.mxu2 }
 0x10a   : > { %v7118_v45 = vpack.c.bf16 %v616_v43, %v614_v35  ;;  %v441_v46 = vpop.f32.mrf.mxu0  ;;  %v8360_v47 = vpop.f32.mrf.mxu1  ;;  %v8401_v43 = vld [vmem:[#allocation4 + $0x68] sm:$0xff] }
 0x10c   : > { %7185 = vst [vmem:[#allocation4 + $0x70] sm:$0xff] %v7118_v45  }
 0x111   : > { %v619_v51 = vpop.f32.mrf.mxu2 }
 0x112   : > { %v443_v52 = vpop.f32.mrf.mxu0  ;;  %v8362_v53 = vpop.f32.mrf.mxu1 }
 0x113   : > { %v7043_v54 = vpack.c.bf16 %v443_v52, %v441_v46  ;;  %v8376_v12 = vld [vmem:[#allocation4 + $0x70] sm:$0xff]  ;;  %v730_v46 = vpack.c.bf16 %v8302_v48, %v8297_v44 }
 0x115   : > { %7171 = vst [vmem:[#allocation2 + $0x48] sm:$0xff] %v7043_v54  }
 0x119   : > { %v621_v57 = vpop.f32.mrf.mxu2 }
 0x11a   : > { %v7123_v58 = vpack.c.bf16 %v621_v57, %v619_v51  ;;  %v446_v60 = vpop.f32.mrf.mxu0  ;;  %v535_v62 = vpop.f32.mrf.mxu1 }
 0x11c   : > { %7186 = vst [vmem:[#allocation4 + $0x38] sm:$0xff] %v7123_v58   ;;  %v8411_v51 = vld [vmem:[#allocation2 + $0x48] sm:$0xff] }
 0x11d   : > { %2300 = vrot.lane.b32.xlu1 %v8411_v51, %s8139_s12 }
 0x121   : > { %v624_v1 = vpop.f32.mrf.mxu2 }
 0x122   : > { %v448_v4 = vpop.f32.mrf.mxu0  ;;  %v537_v6 = vpop.f32.mrf.mxu1 }
 0x123   : > { %v7048_v7 = vpack.c.bf16 %v448_v4, %v446_v60  ;;  %v736_v9 = vpack.c.bf16 %v537_v6, %v535_v62  ;;  %v8371_v11 = vld [vmem:[#allocation4 + $0x38] sm:$0xff]  ;;  %v8425_v6 = vld [vmem:[#allocation4 + $0x60] sm:$0xff] }
 0x124   : > { %2008 = vmatpush.bf16.msrb.mxu1 %v8371_v11  ;;  %2098 = vmatpush.bf16.msrb.mxu2 %v8425_v6 }
 0x125   : > { %7172 = vst [vmem:[#allocation2 + $0x40] sm:$0xff] %v7048_v7   ;;  %7257 = vxpose.binary.xlu0.c.b16.start [1/16] %v736_v9, %v728_v28, 128 }
 0x128   : > { %2009 = vmatpush.bf16.msrb.mxu1 %v8376_v12 }
 0x129   : > { %v626_v13 = vpop.f32.mrf.mxu2 }
 0x12a   : > { %v7128_v14 = vpack.c.bf16 %v626_v13, %v624_v1  ;;  %v451_v17 = vpop.f32.mrf.mxu0  ;;  %v540_v19 = vpop.f32.mrf.mxu1 }
 0x12c   : > { %7187 = vst [vmem:[#allocation4 + $0x20] sm:$0xff] %v7128_v14   ;;  %v8382_v22 = vld [vmem:[#allocation2 + $0x40] sm:$0xff]  ;;  %2010 = vmatpush.bf16.msrb.mxu1 %v8380_v20 }
 0x12d   : > { %2302 = vrot.lane.b32.xlu2 %v8382_v22, %s8139_s12 }
 0x130   : > { %2011 = vmatpush.bf16.msrb.mxu1 %v8387_v23 }
 0x131   : > { %v629_v26 = vpop.f32.mrf.mxu2 }
 0x132   : > { %v453_v28 = vpop.f32.mrf.mxu0  ;;  %v542_v24 = vpop.f32.mrf.mxu1 }
 0x133   : > { %v7053_v25 = vpack.c.bf16 %v453_v28, %v451_v17  ;;  %v737_v27 = vpack.c.bf16 %v542_v24, %v540_v19 }
 0x134   : > { %2012 = vmatpush.bf16.msrb.mxu1 %v8390_v29 }
 0x135   : > { %7173 = vst [vmem:[#allocation2 + $0x20] sm:$0xff] %v7053_v25   ;;  %7258 = vxpose.binary.xlu0.c.b16.cont [2/16] %v737_v27, %v729_v38, 128 }
 0x136   : > { %3170 = vrot.lane.b32.xlu2 %v8364_v56, %s8139_s12 }
 0x138   : > { %2013 = vmatpush.bf16.msrb.mxu1 %v8398_v31 }
 0x139   : > { %v631_v35 = vpop.f32.mrf.mxu2 }
 0x13a   : > { %v7133_v37 = vpack.c.bf16 %v631_v35, %v629_v26  ;;  %v456_v40 = vpop.f32.mrf.mxu0  ;;  %v545_v41 = vpop.f32.mrf.mxu1  ;;  %v732_v26 = vpack.c.bf16 %v8326_v8, %v8315_v2 }
 0x13b   : > { %v8440_v2 = vpop.permute.xlu2 %2288 }
 0x13c   : > { %7188 = vst [vmem:[#allocation4 + $0x78] sm:$0xff] %v7133_v37   ;;  %2014 = vmatpush.bf16.msrb.mxu1 %v8401_v43 }
 0x13e   : > { %3152 = vrot.lane.b32.xlu2 %v8376_v12, %s8139_s12 }
 0x140   : > { %2015 = vmatpush.bf16.msrb.mxu1 %v8406_v33 }
 0x141   : > { %v634_v36 = vpop.f32.mrf.mxu2 }
 0x142   : > { %v458_v38 = vpop.f32.mrf.mxu0  ;;  %v547_v45 = vpop.f32.mrf.mxu1 }
 0x143   : > { %v7058_v49 = vpack.c.bf16 %v458_v38, %v456_v40  ;;  %v738_v50 = vpack.c.bf16 %v547_v45, %v545_v41  ;;  %v733_v38 = vpack.c.bf16 %v8342_v21, %v8331_v15  ;;  %v742_v15 = vpack.c.bf16 %v8317_v3, %v8312_v61 }
 0x145   : > { %7174 = vst [vmem:[#allocation2 + $0x10] sm:$0xff] %v7058_v49   ;;  %7259 = vxpose.binary.xlu0.c.b16.cont [3/16] %v738_v50, %v730_v46, 128 }
 0x146   : > { %3144 = vrot.lane.b32.xlu2 %v8398_v31, %s8139_s12 }
 0x149   : > { %v636_v52 = vpop.f32.mrf.mxu2 }
 0x14a   : > { %v7138_v54 = vpack.c.bf16 %v636_v52, %v634_v36  ;;  %v461_v57 = vpop.f32.mrf.mxu0  ;;  %v550_v58 = vpop.f32.mrf.mxu1 }
 0x14b   : > { %v8444_v52 = vpop.permute.xlu2 %2292 }
 0x14c   : > { %7189 = vst [vmem:[#allocation4 + $0x18] sm:$0xff] %v7138_v54   ;;  %v8417_v60 = vld [vmem:[#allocation2 + $0x10] sm:$0xff]  ;;  %v734_v54 = vpack.c.bf16 %v8354_v39, %v8344_v30  ;;  %v735_v39 = vpack.c.bf16 %v8362_v53, %v8360_v47 }
 0x14d   : > { %2306 = vrot.lane.b32.xlu1 %v8417_v60, %s8139_s12 }
 0x14e   : > { %3142 = vrot.lane.b32.xlu2 %v8401_v43, %s8139_s12 }
 0x151   : > { %v639_v44 = vpop.f32.mrf.mxu2 }
 0x152   : > { %v463_v48 = vpop.f32.mrf.mxu0  ;;  %v552_v62 = vpop.f32.mrf.mxu1 }
 0x153   : > { %v7063_v1 = vpack.c.bf16 %v463_v48, %v461_v57  ;;  %v739_v4 = vpack.c.bf16 %v552_v62, %v550_v58  ;;  %v8473_v3 = vld [vmem:[#allocation4 + $0x18] sm:$0xff]  ;;  %v6984_v62 = vld [vmem:[#allocation4 + $0x20] sm:$0xff] }
 0x154   : > { %v6985_v48 = vld [vmem:[#allocation4 + $0x78] sm:$0xff] }
 0x155   : > { %7175 = vst [vmem:[#allocation2 + $0x38] sm:$0xff] %v7063_v1   ;;  %7260 = vxpose.binary.xlu0.c.b16.cont [4/16] %v739_v4, %v731_v63, 128 }
 0x156   : > { %3168 = vrot.lane.b32.xlu1 %v8425_v6, %s8139_s12  ;;  %3140 = vrot.lane.b32.xlu2 %v8406_v33, %s8139_s12 }
 0x157   : > { %v8460_v58 = vpop.permute.xlu2 %2296 }
 0x159   : > { %v641_v7 = vpop.f32.mrf.mxu2 }
 0x15a   : > { %v7143_v9 = vpack.c.bf16 %v641_v7, %v639_v44  ;;  %v466_v13 = vpop.f32.mrf.mxu0  ;;  %v555_v14 = vpop.f32.mrf.mxu1  ;;  %v743_v44 = vpack.c.bf16 %v8333_v16, %v8328_v10 }
 0x15b   : > { %v8488_v10 = vpop.permute.xlu1 %2286 }
 0x15c   : > { %7190 = vst [vmem:[#allocation4 + $0x58] sm:$0xff] %v7143_v9   ;;  %v8432_v55 = vld [vmem:[#allocation2 + $0x38] sm:$0xff] }
 0x15e   : > { %2308 = vrot.lane.b32.xlu1 %v8432_v55, %s8139_s12 }
 0x161   : > { %v644_v59 = vpop.f32.mrf.mxu2 }
 0x162   : > { %v468_v17 = vpop.f32.mrf.mxu0  ;;  %v557_v19 = vpop.f32.mrf.mxu1 }
 0x163   : > { %v7068_v28 = vpack.c.bf16 %v468_v17, %v466_v13  ;;  %v740_v24 = vpack.c.bf16 %v557_v19, %v555_v14  ;;  %v8463_v30 = vld [vmem:[#allocation4 + $0x58] sm:$0xff]  ;;  %v8494_v16 = vpop.permute.xlu1 %2290 }
 0x165   : > { %7176 = vst [vmem:[#allocation2 + $0x60] sm:$0xff] %v7068_v28   ;;  %7261 = vxpose.binary.xlu0.c.b16.cont [5/16] %v740_v24, %v732_v26, 128  ;;  %v8524_v28 = vld [vmem:[#allocation2 + $0x8] sm:$0xff] }
 0x169   : > { %v646_v25 = vpop.f32.mrf.mxu2 }
 0x16a   : > { %v7148_v27 = vpack.c.bf16 %v646_v25, %v644_v59  ;;  %v471_v35 = vpop.f32.mrf.mxu0  ;;  %v560_v37 = vpop.f32.mrf.mxu1 }
 0x16b   : > { %v8500_v47 = vpop.permute.xlu1 %2294 }
 0x16c   : > { %7191 = vst [vmem:[#allocation4] sm:$0xff] %v7148_v27  }
 0x171   : > { %v649_v40 = vpop.f32.mrf.mxu2 }
 0x172   : > { %v473_v41 = vpop.f32.mrf.mxu0  ;;  %v562_v36 = vpop.f32.mrf.mxu1 }
 0x173   : > { %v7073_v45 = vpack.c.bf16 %v473_v41, %v471_v35  ;;  %v741_v46 = vpack.c.bf16 %v562_v36, %v560_v37  ;;  %v8458_v57 = vld [vmem:[#allocation4] sm:$0xff] }
 0x175   : > { %7177 = vst [vmem:[#allocation2 + $0x70] sm:$0xff] %v7073_v45   ;;  %7262 = vxpose.binary.xlu0.c.b16.cont [6/16] %v741_v46, %v733_v38, 128 }
 0x179   : > { %v651_v8 = vpop.f32.mrf.mxu2 }
 0x17a   : > { %v7153_v49 = vpack.c.bf16 %v651_v8, %v649_v40 }
 0x17c   : > { %7192 = vst [vmem:[#allocation4 + $0x8] sm:$0xff] %v7153_v49   ;;  %v8442_v50 = vld [vmem:[#allocation2 + $0x70] sm:$0xff]  ;;  %v8542_v49 = vld [vmem:[#allocation2 + $0x28] sm:$0xff] }
 0x17d   : > { %2312 = vrot.lane.b32.xlu2 %v8442_v50, %s8139_s12 }
 0x183   : > { %v8452_v21 = vld [vmem:[#allocation4 + $0x8] sm:$0xff] }
 0x184   : > { %3166 = vrot.lane.b32.xlu1 %v8452_v21, %s8139_s12  ;;  %2099 = vmatpush.bf16.msrb.mxu2 %v8452_v21 }
 0x185   : > { %7263 = vxpose.binary.xlu0.c.b16.cont [7/16] %v742_v15, %v734_v54, 128 }
 0x186   : > { %3466 = vrot.lane.b32.xlu2 %v8321_v5, %s8140_s13 }
 0x187   : > { %v8471_v61 = vpop.permute.xlu2 %2302 }
 0x188   : > { %2100 = vmatpush.bf16.msrb.mxu2 %v8458_v57  ;;  %11894 = vst [vmem:[#allocation8_spill] sm:$0xff] %v8471_v61 }
 0x18c   : > { %3164 = vrot.lane.b32.xlu1 %v8458_v57, %s8139_s12  ;;  %2101 = vmatpush.bf16.msrb.mxu2 %v8463_v30 }
 0x18e   : > { %3476 = vrot.lane.b32.xlu2 %v8356_v42, %s8140_s13 }
 0x18f   : > { %v8506_v53 = vpop.permute.xlu1 %2300 }
 0x190   : > { %2102 = vmatpush.bf16.msrb.mxu2 %v8473_v3  ;;  %v3171_v63 = vpop.permute.xlu2 %3170  ;;  %11895 = vst [vmem:[#allocation9_spill] sm:$0xff] %v8506_v53 }
 0x194   : > { %3150 = vrot.lane.b32.xlu1 %v8380_v20, %s8139_s12  ;;  %2103 = vmatpush.bf16.msrb.mxu2 %v6985_v48 }
 0x195   : > { %7264 = vxpose.binary.xlu0.c.b16.end [8/16] %v743_v44, %v735_v39, 128 }
 0x196   : > { %3486 = vrot.lane.b32.xlu2 %v8417_v60, %s8140_s13 }
 0x198   : > { %2104 = vmatpush.bf16.msrb.mxu2 %v6984_v62  ;;  %v8530_v24 = vpop.permute.xlu2 %3152 }
 0x19c   : > { %3277 = vmatpush.bf16.msra.mxu2 %v3171_v63  ;;  %3162 = vrot.lane.b32.xlu1 %v8463_v30, %s8139_s12 }
 0x19e   : > { %4348 = vrot.lane.b32.xlu2 %v8425_v6, %s8140_s13 }
 0x1a0   : > { %v8535_v36 = vpop.permute.xlu2 %3144 }
 0x1a4   : > { %3148 = vrot.lane.b32.xlu1 %v8387_v23, %s8139_s12 }
 0x1a6   : > { %4334 = vrot.lane.b32.xlu2 %v8371_v11, %s8140_s13 }
 0x1a8   : > { %v8544_v54 = vpop.permute.xlu2 %3142 }
 0x1ac   : > { %3160 = vrot.lane.b32.xlu1 %v8473_v3, %s8139_s12 }
 0x1ae   : > { %4346 = vrot.lane.b32.xlu2 %v8452_v21, %s8140_s13 }
 0x1b4   : > { %3146 = vrot.lane.b32.xlu1 %v8390_v29, %s8139_s12 }
 0x1b6   : > { %4344 = vrot.lane.b32.xlu2 %v8458_v57, %s8140_s13 }
 0x1bc   : > { %3158 = vrot.lane.b32.xlu1 %v6985_v48, %s8139_s12 }
 0x1be   : > { %4330 = vrot.lane.b32.xlu2 %v8380_v20, %s8140_s13 }
 0x1bf   : > { %v8511_v1 = vpop.permute.xlu1 %2306 }
 0x1c0   : > { %11896 = vst [vmem:[#allocation10_spill] sm:$0xff] %v8511_v1 }
 0x1c4   : > { %3156 = vrot.lane.b32.xlu1 %v6984_v62, %s8139_s12 }
 0x1c6   : > { %4342 = vrot.lane.b32.xlu2 %v8463_v30, %s8140_s13 }
 0x1c8   : > { %v3169_v4 = vpop.permute.xlu1 %3168 }
 0x1c9   : > { %3278 = vmatpush.bf16.msra.mxu2 %v3169_v4 }
 0x1cc   : > { %3468 = vrot.lane.b32.xlu1 %v8337_v18, %s8140_s13 }
 0x1ce   : > { %4328 = vrot.lane.b32.xlu2 %v8387_v23, %s8140_s13 }
 0x1d0   : > { %v8539_v46 = vpop.permute.xlu1 %2308 }
 0x1d1   : > { %v7265_v7 = vpop.trf.xlu0  ;;  %11897 = vst [vmem:[#allocation11_spill] sm:$0xff] %v8539_v46 }
 0x1d2   : > { %v792_v13 = vunpack.c.l.b16 %v7265_v7  ;;  %v794_v14 = vunpack.c.h.b16 %v7265_v7 }
 0x1d4   : > { %3470 = vrot.lane.b32.xlu1 %v8348_v34, %s8140_s13 }
 0x1d6   : > { %4340 = vrot.lane.b32.xlu2 %v8473_v3, %s8140_s13 }
 0x1d9   : > { %v7266_v9 = vpop.trf.xlu0 }
 0x1da   : > { %v793_v59 = vunpack.c.l.b16 %v7266_v9  ;;  %v795_v17 = vunpack.c.h.b16 %v7266_v9 }
 0x1dc   : > { %v824_v19 = vpack.c.b16 %v793_v59, %v792_v13  ;;  %v825_v26 = vpack.c.b16 %v795_v17, %v794_v14  ;;  %3478 = vrot.lane.b32.xlu1 %v8524_v28, %s8140_s13 }
 0x1de   : > { %856 = vst [vmem:[#allocation3] sm:$0xff] %v824_v19  ;;  %4326 = vrot.lane.b32.xlu2 %v8390_v29, %s8140_s13 }
 0x1df   : > { %857 = vst [vmem:[#allocation3 + $0x8] sm:$0xff] %v825_v26 }
 0x1e1   : > { %v7267_v25 = vpop.trf.xlu0 }
 0x1e2   : > { %v796_v35 = vunpack.c.l.b16 %v7267_v25  ;;  %v798_v37 = vunpack.c.h.b16 %v7267_v25 }
 0x1e4   : > { %3480 = vrot.lane.b32.xlu1 %v8411_v51, %s8140_s13 }
 0x1e5   : > { %v6680_v7 = vld [vmem:[#allocation3] sm:$0xf]  ;;  %v6972_v13 = vld [vmem:[#allocation3 + $0x4] sm:$0xf] }
 0x1e6   : > { %4338 = vrot.lane.b32.xlu2 %v6985_v48, %s8140_s13  ;;  %v6973_v9 = vld [vmem:[#allocation3 + $0x4] sm:$0xf0]  ;;  %v6682_v14 = vld [vmem:[#allocation3 + $0x8] sm:$0xf0] }
 0x1e7   : > { %v6681_v19 = vor.u32 %v6973_v9, %v6680_v7  ;;  %v6685_v26 = vor.u32 %v6972_v13, %v6682_v14 }
 0x1e9   : > { %v7268_v27 = vpop.trf.xlu0 }
 0x1ea   : > { %v797_v40 = vunpack.c.l.b16 %v7268_v27  ;;  %v799_v41 = vunpack.c.h.b16 %v7268_v27  ;;  %v8550_v27 = vld [vmem:[#allocation2 + $0x60] sm:$0xff] }
 0x1ec   : > { %v826_v38 = vpack.c.b16 %v797_v40, %v796_v35  ;;  %v827_v45 = vpack.c.b16 %v799_v41, %v798_v37  ;;  %4350 = vrot.lane.b32.xlu1 %v8364_v56, %s8140_s13 }
 0x1ee   : > { %858 = vst [vmem:[#allocation3 + $0x10] sm:$0xff] %v826_v38  ;;  %4336 = vrot.lane.b32.xlu2 %v6984_v62, %s8140_s13  ;;  %v8556_v38 = vpop.permute.xlu2 %3140 }
 0x1ef   : > { %859 = vst [vmem:[#allocation3 + $0x18] sm:$0xff] %v827_v45 }
 0x1f1   : > { %v7269_v8 = vpop.trf.xlu0 }
 0x1f2   : > { %v800_v59 = vunpack.c.l.b16 %v7269_v8  ;;  %v802_v17 = vunpack.c.h.b16 %v7269_v8 }
 0x1f4   : > { %4332 = vrot.lane.b32.xlu1 %v8376_v12, %s8140_s13 }
 0x1f5   : > { %v6688_v15 = vld [vmem:[#allocation3 + $0x10] sm:$0xf]  ;;  %v6974_v39 = vld [vmem:[#allocation3 + $0x14] sm:$0xf] }
 0x1f6   : > { %3496 = vrot.lane.b32.xlu2 %v8542_v49, %s8140_s13  ;;  %v6975_v44 = vld [vmem:[#allocation3 + $0x14] sm:$0xf0]  ;;  %v6690_v48 = vld [vmem:[#allocation3 + $0x18] sm:$0xf0]  ;;  %v3167_v62 = vpop.permute.xlu1 %3166 }
 0x1f7   : > { %v6689_v63 = vor.u32 %v6975_v44, %v6688_v15  ;;  %v6693_v4 = vor.u32 %v6974_v39, %v6690_v48  ;;  %3279 = vmatpush.bf16.msra.mxu2 %v3167_v62  ;;  %v8568_v15 = vpop.permute.xlu2 %2312  ;;  %v8572_v44 = vld [vmem:[#allocation2 + $0x20] sm:$0xff] }
 0x1f8   : > { %11898 = vst [vmem:[#allocation12_spill] sm:$0xff] %v8568_v15 }
 0x1f9   : > { %1164 = vmatpush.bf16.msrb.mxu3 %v6689_v63  ;;  %1253 = vmatpush.bf16.msrb.mxu0 %v6693_v4  ;;  %v7270_v25 = vpop.trf.xlu0 }
 0x1fa   : > { %v801_v35 = vunpack.c.l.b16 %v7270_v25  ;;  %v803_v37 = vunpack.c.h.b16 %v7270_v25 }
 0x1fc   : > { %3490 = vrot.lane.b32.xlu1 %v8550_v27, %s8140_s13  ;;  %v828_v40 = vpack.c.b16 %v801_v35, %v800_v59  ;;  %v829_v41 = vpack.c.b16 %v803_v37, %v802_v17 }
 0x1fd   : > { %1165 = vmatpush.bf16.msrb.mxu3 %v6681_v19  ;;  %1254 = vmatpush.bf16.msrb.mxu0 %v6685_v26 }
 0x1fe   : > { %4650 = vrot.lane.b32.xlu2 %v8348_v34, %s8141_s14  ;;  %v3165_v45 = vpop.permute.xlu1 %3164  ;;  %860 = vst [vmem:[#allocation3 + $0x20] sm:$0xff] %v828_v40 }
 0x1ff   : > { %861 = vst [vmem:[#allocation3 + $0x28] sm:$0xff] %v829_v41  ;;  %3280 = vmatpush.bf16.msra.mxu2 %v3165_v45  ;;  %v8584_v14 = vpop.permute.xlu2 %3466  ;;  %v8606_v45 = vld [vmem:[#allocation2 + $0x78] sm:$0xff] }
 0x200   : > { %6694 = vmatmul.msk.bf16.vlgmr.msrb.gmra.mxu3 %vm1109_vm2, %v8321_v5  ;;  %6710 = vmatmul.msk.bf16.vlgmr.msrb.gmra.mxu0 %vm1109_vm2, %v8321_v5  ;;  %11899 = vst [vmem:[#allocation13_spill] sm:$0xff] %v8584_v14 }
 0x201   : > { %v7271_v8 = vpop.trf.xlu0 }
 0x202   : > { %v804_v48 = vunpack.c.l.b16 %v7271_v8  ;;  %v806_v63 = vunpack.c.h.b16 %v7271_v8 }
 0x203   : > { %2298 = vrot.lane.b32.xlu0 %v8524_v28, %s8139_s12 }
 0x204   : > { %4322 = vrot.lane.b32.xlu1 %v8401_v43, %s8140_s13 }
 0x206   : > { %4652 = vrot.lane.b32.xlu2 %v8346_v32, %s8141_s14  ;;  %v8570_v39 = vpop.permute.xlu1 %3150 }
 0x207   : > { %v8594_v26 = vpop.permute.xlu2 %3476 }
 0x208   : > { %11900 = vst [vmem:[#allocation14_spill] sm:$0xff] %v8594_v26 }
 0x209   : > { %v7272_v4 = vpop.trf.xlu0 }
 0x20a   : > { %v805_v7 = vunpack.c.l.b16 %v7272_v4  ;;  %v807_v62 = vunpack.c.h.b16 %v7272_v4 }
 0x20b   : > { %2304 = vrot.lane.b32.xlu0 %v8572_v44, %s8139_s12 }
 0x20c   : > { %4320 = vrot.lane.b32.xlu1 %v8406_v33, %s8140_s13  ;;  %v830_v43 = vpack.c.b16 %v805_v7, %v804_v48  ;;  %v831_v9 = vpack.c.b16 %v807_v62, %v806_v63 }
 0x20e   : > { %4660 = vrot.lane.b32.xlu2 %v8411_v51, %s8141_s14  ;;  %v3163_v13 = vpop.permute.xlu1 %3162  ;;  %862 = vst [vmem:[#allocation3 + $0x30] sm:$0xff] %v830_v43 }
 0x20f   : > { %863 = vst [vmem:[#allocation3 + $0x38] sm:$0xff] %v831_v9  ;;  %3281 = vmatpush.bf16.msra.mxu2 %v3163_v13  ;;  %v8610_v8 = vpop.permute.xlu2 %3486 }
 0x210   : > { %6695 = vmatmul.msk.bf16.gmra.mxu3 %vm1109_vm2, %v8337_v18  ;;  %6711 = vmatmul.msk.bf16.gmra.mxu0 %vm1109_vm2, %v8337_v18  ;;  %11901 = vst [vmem:[#allocation15_spill] sm:$0xff] %v8610_v8  ;;  %v6794_v8 = vld [vmem:[#allocation3 + $0x28] sm:$0xf0] }
 0x211   : > { %v7273_v33 = vpop.trf.xlu0 }
 0x212   : > { %v808_v17 = vunpack.c.l.b16 %v7273_v33  ;;  %v810_v19 = vunpack.c.h.b16 %v7273_v33 }
 0x213   : > { %3154 = vrot.lane.b32.xlu0 %v8371_v11, %s8139_s12 }
 0x214   : > { %3492 = vrot.lane.b32.xlu1 %v8442_v50, %s8140_s13 }
 0x216   : > { %5528 = vrot.lane.b32.xlu2 %v8425_v6, %s8141_s14  ;;  %v8592_v59 = vpop.permute.xlu1 %3148 }
 0x217   : > { %v8624_v9 = vpop.permute.xlu2 %4348 }
 0x219   : > { %v7274_v25 = vpop.trf.xlu0 }
 0x21a   : > { %v809_v35 = vunpack.c.l.b16 %v7274_v25  ;;  %v811_v37 = vunpack.c.h.b16 %v7274_v25 }
 0x21b   : > { %2310 = vrot.lane.b32.xlu0 %v8550_v27, %s8139_s12 }
 0x21c   : > { %4646 = vrot.lane.b32.xlu1 %v8321_v5, %s8141_s14  ;;  %v832_v40 = vpack.c.b16 %v809_v35, %v808_v17  ;;  %v833_v6 = vpack.c.b16 %v811_v37, %v810_v19 }
 0x21e   : > { %5524 = vrot.lane.b32.xlu2 %v8458_v57, %s8141_s14  ;;  %v3161_v41 = vpop.permute.xlu1 %3160  ;;  %864 = vst [vmem:[#allocation3 + $0x40] sm:$0xff] %v832_v40 }
 0x21f   : > { %865 = vst [vmem:[#allocation3 + $0x48] sm:$0xff] %v833_v6  ;;  %3282 = vmatpush.bf16.msra.mxu2 %v3161_v41  ;;  %v8636_v33 = vpop.permute.xlu2 %4334 }
 0x220   : > { %6696 = vmatmul.msk.bf16.gmra.mxu3 %vm1109_vm2, %v8348_v34  ;;  %6712 = vmatmul.msk.bf16.gmra.mxu0 %vm1109_vm2, %v8348_v34 }
 0x221   : > { %v7275_v5 = vpop.trf.xlu0 }
 0x222   : > { %v812_v34 = vunpack.c.l.b16 %v7275_v5  ;;  %v814_v48 = vunpack.c.h.b16 %v7275_v5 }
 0x223   : > { %2314 = vrot.lane.b32.xlu0 %v8606_v45, %s8139_s12 }
 0x224   : > { %4656 = vrot.lane.b32.xlu1 %v8356_v42, %s8141_s14 }
 0x226   : > { %5510 = vrot.lane.b32.xlu2 %v8380_v20, %s8141_s14  ;;  %v8616_v57 = vpop.permute.xlu1 %3146 }
 0x227   : > { %v8650_v6 = vpop.permute.xlu2 %4346 }
 0x229   : > { %v7276_v63 = vpop.trf.xlu0 }
 0x22a   : > { %v813_v4 = vunpack.c.l.b16 %v7276_v63  ;;  %v815_v7 = vunpack.c.h.b16 %v7276_v63 }
 0x22b   : > { %2316 = vrot.lane.b32.xlu0 %v8542_v49, %s8139_s12 }
 0x22c   : > { %4658 = vrot.lane.b32.xlu1 %v8524_v28, %s8141_s14  ;;  %v834_v62 = vpack.c.b16 %v813_v4, %v812_v34  ;;  %v835_v43 = vpack.c.b16 %v815_v7, %v814_v48 }
 0x22e   : > { %5522 = vrot.lane.b32.xlu2 %v8463_v30, %s8141_s14  ;;  %v3159_v20 = vpop.permute.xlu1 %3158  ;;  %866 = vst [vmem:[#allocation3 + $0x50] sm:$0xff] %v834_v62 }
 0x22f   : > { %867 = vst [vmem:[#allocation3 + $0x58] sm:$0xff] %v835_v43  ;;  %3283 = vmatpush.bf16.msra.mxu2 %v3159_v20  ;;  %v8662_v4 = vpop.permute.xlu2 %4344 }
 0x230   : > { %6697 = vmatmul.msk.bf16.gmra.mxu3 %vm1109_vm2, %v8346_v32  ;;  %6713 = vmatmul.msk.bf16.gmra.mxu0 %vm1109_vm2, %v8346_v32 }
 0x231   : > { %v7277_v13 = vpop.trf.xlu0 }
 0x232   : > { %v816_v17 = vunpack.c.l.b16 %v7277_v13  ;;  %v818_v19 = vunpack.c.h.b16 %v7277_v13 }
 0x233   : > { %3472 = vrot.lane.b32.xlu0 %v8346_v32, %s8140_s13 }
 0x234   : > { %4666 = vrot.lane.b32.xlu1 %v8417_v60, %s8141_s14 }
 0x236   : > { %5508 = vrot.lane.b32.xlu2 %v8387_v23, %s8141_s14  ;;  %v3157_v30 = vpop.permute.xlu1 %3156 }
 0x237   : > { %3284 = vmatpush.bf16.msra.mxu2 %v3157_v30  ;;  %v8676_v62 = vpop.permute.xlu2 %4330 }
 0x239   : > { %v7278_v25 = vpop.trf.xlu0 }
 0x23a   : > { %v817_v35 = vunpack.c.l.b16 %v7278_v25  ;;  %v819_v37 = vunpack.c.h.b16 %v7278_v25 }
 0x23b   : > { %3474 = vrot.lane.b32.xlu0 %v8367_v0, %s8140_s13 }
 0x23c   : > { %5530 = vrot.lane.b32.xlu1 %v8364_v56, %s8141_s14  ;;  %v836_v32 = vpack.c.b16 %v817_v35, %v816_v17  ;;  %v837_v23 = vpack.c.b16 %v819_v37, %v818_v19 }
 0x23e   : > { %5520 = vrot.lane.b32.xlu2 %v8473_v3, %s8141_s14  ;;  %v8648_v40 = vpop.permute.xlu1 %3468  ;;  %868 = vst [vmem:[#allocation3 + $0x60] sm:$0xff] %v836_v32 }
 0x23f   : > { %11902 = vst [vmem:[#allocation16_spill] sm:$0xff] %v8648_v40  ;;  %v6996_v40 = vld [vmem:[#allocation3 + $0x44] sm:$0xf] }
 0x240   : > { %6698 = vmatmul.msk.bf16.gmra.mxu3 %vm1109_vm2, %v8367_v0  ;;  %6714 = vmatmul.msk.bf16.gmra.mxu0 %vm1109_vm2, %v8367_v0  ;;  %869 = vst [vmem:[#allocation3 + $0x68] sm:$0xff] %v837_v23 }
 0x241   : > { %v7279_v56 = vpop.trf.xlu0 }
 0x242   : > { %v820_v41 = vunpack.c.l.b16 %v7279_v56  ;;  %v822_v5 = vunpack.c.h.b16 %v7279_v56 }
 0x243   : > { %3482 = vrot.lane.b32.xlu0 %v8382_v22, %s8140_s13 }
 0x244   : > { %5514 = vrot.lane.b32.xlu1 %v8371_v11, %s8141_s14 }
 0x246   : > { %5506 = vrot.lane.b32.xlu2 %v8390_v29, %s8141_s14  ;;  %v8658_v3 = vpop.permute.xlu1 %3470 }
 0x247   : > { %11903 = vst [vmem:[#allocation17_spill] sm:$0xff] %v8658_v3 }
 0x249   : > { %v7280_v34 = vpop.trf.xlu0 }
 0x24a   : > { %v821_v48 = vunpack.c.l.b16 %v7280_v34  ;;  %v823_v63 = vunpack.c.h.b16 %v7280_v34 }
 0x24b   : > { %3484 = vrot.lane.b32.xlu0 %v8572_v44, %s8140_s13 }
 0x24c   : > { %5526 = vrot.lane.b32.xlu1 %v8452_v21, %s8141_s14  ;;  %v838_v7 = vpack.c.b16 %v821_v48, %v820_v41  ;;  %v839_v11 = vpack.c.b16 %v823_v63, %v822_v5 }
 0x24e   : > { %870 = vst [vmem:[#allocation3 + $0x70] sm:$0xff] %v838_v7  ;;  %v8670_v29 = vpop.permute.xlu1 %3478 }
 0x24f   : > { %871 = vst [vmem:[#allocation3 + $0x78] sm:$0xff] %v839_v11 }
 0x250   : > { %6699 = vmatmul.msk.bf16.gmra.mxu3 %vm1109_vm2, %v8356_v42  ;;  %6715 = vmatmul.msk.bf16.gmra.mxu0 %vm1109_vm2, %v8356_v42  ;;  %11904 = vst [vmem:[#allocation18_spill] sm:$0xff] %v8670_v29  ;;  %v8688_v42 = vpop.permute.xlu2 %4342 }
 0x253   : > { %3488 = vrot.lane.b32.xlu0 %v8432_v55, %s8140_s13 }
 0x254   : > { %5512 = vrot.lane.b32.xlu1 %v8376_v12, %s8141_s14 }
 0x255   : > { %v7002_v1 = vld [vmem:[#allocation3 + $0x74] sm:$0xf] }
 0x256   : > { %v8680_v21 = vpop.permute.xlu1 %3480  ;;  %v7003_v46 = vld [vmem:[#allocation3 + $0x74] sm:$0xf0] }
 0x257   : > { %11905 = vst [vmem:[#allocation19_spill] sm:$0xff] %v8680_v21 }
 0x258   : > { %v8694_v43 = vpop.permute.xlu2 %4328 }
 0x25b   : > { %4324 = vrot.lane.b32.xlu0 %v8398_v31, %s8140_s13 }
 0x25c   : > { %4670 = vrot.lane.b32.xlu1 %v8550_v27, %s8141_s14 }
 0x25e   : > { %v8692_v12 = vpop.permute.xlu1 %4350 }
 0x260   : > { %6700 = vmatmul.msk.bf16.gmra.mxu3 %vm1109_vm2, %v8524_v28  ;;  %6716 = vmatmul.msk.bf16.gmra.mxu0 %vm1109_vm2, %v8524_v28  ;;  %v8706_v28 = vpop.permute.xlu2 %4340 }
 0x263   : > { %3494 = vrot.lane.b32.xlu0 %v8606_v45, %s8140_s13 }
 0x266   : > { %v8698_v31 = vpop.permute.xlu1 %4332 }
 0x268   : > { %v8718_v17 = vpop.permute.xlu2 %4326 }
 0x26b   : > { %4648 = vrot.lane.b32.xlu0 %v8337_v18, %s8141_s14 }
 0x26e   : > { %v8710_v13 = vpop.permute.xlu1 %3490 }
 0x26f   : > { %11906 = vst [vmem:[#allocation20_spill] sm:$0xff] %v8710_v13 }
 0x270   : > { %6701 = vmatmul.msk.bf16.gmra.mxu3 %vm1109_vm2, %v8411_v51  ;;  %6717 = vmatmul.msk.bf16.gmra.mxu0 %vm1109_vm2, %v8411_v51  ;;  %v8734_v37 = vpop.permute.xlu2 %4338 }
 0x273   : > { %4654 = vrot.lane.b32.xlu0 %v8367_v0, %s8141_s14 }
 0x275   : > { %v8708_v20 = vpop.permute.xlu0 %2298 }
 0x276   : > { %v8728_v51 = vpop.permute.xlu1 %4322 }
 0x27b   : > { %4662 = vrot.lane.b32.xlu0 %v8382_v22, %s8141_s14 }
 0x27d   : > { %v8714_v18 = vpop.f32.mrf.mxu0  ;;  %v8716_v30 = vpop.permute.xlu0 %2304 }
 0x27e   : > { %11907 = vst [vmem:[#allocation21_spill] sm:$0xff] %v8716_v30  ;;  %v8746_v56 = vpop.permute.xlu1 %4320  ;;  %v6898_v30 = vld [vmem:[#allocation3 + $0x78] sm:$0xf0] }
 0x280   : > { %6702 = vmatmul.msk.bf16.gmra.mxu3 %vm1109_vm2, %v8382_v22  ;;  %6718 = vmatmul.msk.bf16.gmra.mxu0 %vm1109_vm2, %v8382_v22 }
 0x283   : > { %v8724_v0 = vpop.f32.mrf.mxu3  ;;  %4664 = vrot.lane.b32.xlu0 %v8572_v44, %s8141_s14 }
 0x284   : > { %v1336_v19 = vmax.f32 %v8724_v0, %v8714_v18 }
 0x285   : > { %v8732_v25 = vpop.f32.mrf.mxu0  ;;  %v3155_v35 = vpop.permute.xlu0 %3154 }
 0x286   : > { %3188 = vmatpush.bf16.msra.mxu1 %v3155_v35  ;;  %1337 = vmax.xlane.f32.xlu1 %v1336_v19  ;;  %v6800_v19 = vld [vmem:[#allocation3 + $0x30] sm:$0xf]  ;;  %v6994_v35 = vld [vmem:[#allocation3 + $0x34] sm:$0xf] }
 0x28a   : > { %3189 = vmatpush.bf16.msra.mxu1 %v8530_v24  ;;  %v8753_v24 = vpop.permute.xlu2 %4336 }
 0x28b   : > { %v8737_v22 = vpop.f32.mrf.mxu3  ;;  %4668 = vrot.lane.b32.xlu0 %v8432_v55, %s8141_s14 }
 0x28c   : > { %v1339_v23 = vmax.f32 %v8737_v22, %v8732_v25 }
 0x28d   : > { %v8741_v32 = vpop.f32.mrf.mxu0 }
 0x28e   : > { %3190 = vmatpush.bf16.msra.mxu1 %v8570_v39  ;;  %1340 = vmax.xlane.f32.xlu1 %v1339_v23  ;;  %v8762_v39 = vpop.permute.xlu1 %3492 }
 0x28f   : > { %11908 = vst [vmem:[#allocation22_spill] sm:$0xff] %v8762_v39 }
 0x290   : > { %6703 = vmatmul.msk.bf16.gmra.mxu3 %vm1109_vm2, %v8572_v44  ;;  %6719 = vmatmul.msk.bf16.gmra.mxu0 %vm1109_vm2, %v8572_v44 }
 0x292   : > { %3191 = vmatpush.bf16.msra.mxu1 %v8592_v59  ;;  %v8769_v48 = vpop.permute.xlu2 %3496 }
 0x293   : > { %v8755_v41 = vpop.f32.mrf.mxu3  ;;  %11909 = vst [vmem:[#allocation23_spill] sm:$0xff] %v8769_v48  ;;  %v6992_v48 = vld [vmem:[#allocation3 + $0x24] sm:$0xf] }
 0x294   : > { %v1342_v5 = vmax.f32 %v8755_v41, %v8741_v32  ;;  %v6797_v21 = vor.u32 %v6992_v48, %v6794_v8 }
 0x295   : > { %v8759_v34 = vpop.f32.mrf.mxu0 }
 0x296   : > { %1343 = vmax.xlane.f32.xlu2 %v1342_v5  ;;  %3192 = vmatpush.bf16.msra.mxu1 %v8616_v57 }
 0x29a   : > { %3193 = vmatpush.bf16.msra.mxu1 %v8535_v36  ;;  %v8779_v36 = vpop.permute.xlu1 %4646  ;;  %v8787_v23 = vpop.permute.xlu2 %4650 }
 0x29b   : > { %v8765_v44 = vpop.f32.mrf.mxu3  ;;  %11910 = vst [vmem:[#allocation24_spill] sm:$0xff] %v8779_v36  ;;  %v6993_v36 = vld [vmem:[#allocation3 + $0x24] sm:$0xf0] }
 0x29c   : > { %v1345_v59 = vmax.f32 %v8765_v44, %v8759_v34  ;;  %11911 = vst [vmem:[#allocation25_spill] sm:$0xff] %v8787_v23 }
 0x29d   : > { %v8771_v63 = vpop.f32.mrf.mxu0 }
 0x29e   : > { %1346 = vmax.xlane.f32.xlu2 %v1345_v59  ;;  %3194 = vmatpush.bf16.msra.mxu1 %v8544_v54  ;;  %v6995_v54 = vld [vmem:[#allocation3 + $0x34] sm:$0xf0]  ;;  %v6802_v59 = vld [vmem:[#allocation3 + $0x38] sm:$0xf0] }
 0x29f   : > { %v6801_v5 = vor.u32 %v6995_v54, %v6800_v19 }
 0x2a0   : > { %6704 = vmatmul.msk.bf16.gmra.mxu3 %vm1109_vm2, %v8417_v60  ;;  %6720 = vmatmul.msk.bf16.gmra.mxu0 %vm1109_vm2, %v8417_v60  ;;  %v6805_v60 = vor.u32 %v6994_v35, %v6802_v59 }
 0x2a1   : > { %2392 = vmatpush.bf16.msra.mxu3 %v6801_v5 }
 0x2a2   : > { %3195 = vmatpush.bf16.msra.mxu1 %v8556_v38  ;;  %2481 = vmatpush.bf16.msra.mxu0 %v6805_v60  ;;  %v6792_v38 = vld [vmem:[#allocation3 + $0x20] sm:$0xf]  ;;  %v8793_v29 = vpop.permute.xlu1 %4656  ;;  %v8801_v19 = vpop.permute.xlu2 %4652 }
 0x2a3   : > { %v8781_v57 = vpop.f32.mrf.mxu3  ;;  %v6793_v13 = vor.u32 %v6993_v36, %v6792_v38  ;;  %11912 = vst [vmem:[#allocation26_spill] sm:$0xff] %v8793_v29 }
 0x2a4   : > { %v1348_v7 = vmax.f32 %v8781_v57, %v8771_v63  ;;  %11913 = vst [vmem:[#allocation27_spill] sm:$0xff] %v8801_v19  ;;  %v6850_v19 = vld [vmem:[#allocation3 + $0x58] sm:$0xf0] }
 0x2a5   : > { %v8785_v11 = vpop.f32.mrf.mxu0  ;;  %2393 = vmatpush.bf16.msra.mxu3 %v6793_v13 }
 0x2a6   : > { %1349 = vmax.xlane.f32.xlu1 %v1348_v7  ;;  %2482 = vmatpush.bf16.msra.mxu0 %v6797_v21 }
 0x2aa   : > { %v8809_v54 = vpop.permute.xlu1 %4658  ;;  %v8811_v13 = vpop.permute.xlu2 %4660 }
 0x2ab   : > { %v8789_v39 = vpop.f32.mrf.mxu3  ;;  %11914 = vst [vmem:[#allocation28_spill] sm:$0xff] %v8809_v54 }
 0x2ac   : > { %v1351_v7 = vmax.f32 %v8789_v39, %v8785_v11  ;;  %11915 = vst [vmem:[#allocation29_spill] sm:$0xff] %v8811_v13  ;;  %v6998_v13 = vld [vmem:[#allocation3 + $0x54] sm:$0xf] }
 0x2ad   : > { %v8795_v26 = vpop.f32.mrf.mxu0  ;;  %v6853_v23 = vor.u32 %v6998_v13, %v6850_v19 }
 0x2ae   : > { %1352 = vmax.xlane.f32.xlu2 %v1351_v7 }
 0x2af   : > { %3661 = vmatpush.bf16.msrb.mxu0 %v6853_v23 }
 0x2b0   : > { %6705 = vmatmul.msk.bf16.gmra.mxu3 %vm1109_vm2, %v8432_v55  ;;  %6721 = vmatmul.msk.bf16.gmra.mxu0 %vm1109_vm2, %v8432_v55 }
 0x2b2   : > { %v8823_v5 = vpop.permute.xlu1 %4666  ;;  %v8829_v38 = vpop.permute.xlu2 %5528 }
 0x2b3   : > { %v8803_v36 = vpop.f32.mrf.mxu3  ;;  %11916 = vst [vmem:[#allocation30_spill] sm:$0xff] %v8823_v5 }
 0x2b4   : > { %v1354_v8 = vmax.f32 %v8803_v36, %v8795_v26  ;;  %11917 = vst [vmem:[#allocation31_spill] sm:$0xff] %v8829_v38  ;;  %v6840_v38 = vld [vmem:[#allocation3 + $0x40] sm:$0xf] }
 0x2b5   : > { %v8807_v48 = vpop.f32.mrf.mxu0 }
 0x2b6   : > { %1355 = vmax.xlane.f32.xlu1 %v1354_v8  ;;  %v6848_v8 = vld [vmem:[#allocation3 + $0x50] sm:$0xf] }
 0x2ba   : > { %v8833_v54 = vpop.permute.xlu1 %5530  ;;  %v8841_v14 = vpop.permute.xlu2 %5524 }
 0x2bb   : > { %v8813_v21 = vpop.f32.mrf.mxu3  ;;  %11918 = vst [vmem:[#allocation32_spill] sm:$0xff] %v8833_v54  ;;  %v6842_v54 = vld [vmem:[#allocation3 + $0x48] sm:$0xf0] }
 0x2bc   : > { %v1357_v35 = vmax.f32 %v8813_v21, %v8807_v48  ;;  %11919 = vst [vmem:[#allocation33_spill] sm:$0xff] %v8841_v14 }
 0x2bd   : > { %v8817_v55 = vpop.f32.mrf.mxu0 }
 0x2be   : > { %1358 = vmax.xlane.f32.xlu2 %v1357_v35  ;;  %v6999_v35 = vld [vmem:[#allocation3 + $0x54] sm:$0xf0] }
 0x2c0   : > { %6706 = vmatmul.msk.bf16.gmra.mxu3 %vm1109_vm2, %v8550_v27  ;;  %6722 = vmatmul.msk.bf16.gmra.mxu0 %vm1109_vm2, %v8550_v27  ;;  %v6849_v27 = vor.u32 %v6999_v35, %v6848_v8  ;;  %v6845_v8 = vor.u32 %v6996_v40, %v6842_v54  ;;  %v8857_v35 = vpop.permute.xlu0 %2310 }
 0x2c1   : > { %11922 = vst [vmem:[#allocation36_spill] sm:$0xff] %v8857_v35 }
 0x2c2   : > { %3572 = vmatpush.bf16.msrb.mxu3 %v6849_v27  ;;  %3662 = vmatpush.bf16.msrb.mxu0 %v6845_v8  ;;  %v8851_v13 = vpop.permute.xlu1 %5514 }
 0x2c3   : > { %v8825_v59 = vpop.f32.mrf.mxu3  ;;  %11920 = vst [vmem:[#allocation34_spill] sm:$0xff] %v8851_v13 }
 0x2c4   : > { %v1360_v60 = vmax.f32 %v8825_v59, %v8817_v55 }
 0x2c5   : > { %v8831_v7 = vpop.f32.mrf.mxu0 }
 0x2c6   : > { %1361 = vmax.xlane.f32.xlu1 %v1360_v60  ;;  %v6997_v60 = vld [vmem:[#allocation3 + $0x44] sm:$0xf0] }
 0x2c7   : > { %v6841_v15 = vor.u32 %v6997_v60, %v6840_v38  ;;  %v8855_v38 = vpop.permute.xlu2 %5510 }
 0x2c8   : > { %11921 = vst [vmem:[#allocation35_spill] sm:$0xff] %v8855_v38 }
 0x2c9   : > { %3573 = vmatpush.bf16.msrb.mxu3 %v6841_v15 }
 0x2ca   : > { %v8865_v40 = vpop.permute.xlu1 %5526 }
 0x2cb   : > { %v8835_v29 = vpop.f32.mrf.mxu3  ;;  %11924 = vst [vmem:[#allocation38_spill] sm:$0xff] %v8865_v40 }
 0x2cc   : > { %v1363_v5 = vmax.f32 %v8835_v29, %v8831_v7 }
 0x2cd   : > { %v8839_v3 = vpop.f32.mrf.mxu0 }
 0x2ce   : > { %1364 = vmax.xlane.f32.xlu2 %v1363_v5 }
 0x2cf   : > { %v8871_v54 = vpop.permute.xlu2 %5522 }
 0x2d0   : > { %6707 = vmatmul.msk.bf16.gmra.mxu3 %vm1109_vm2, %v8442_v50  ;;  %6723 = vmatmul.msk.bf16.gmra.mxu0 %vm1109_vm2, %v8442_v50  ;;  %11925 = vst [vmem:[#allocation39_spill] sm:$0xff] %v8871_v54 }
 0x2d3   : > { %v8847_v19 = vpop.f32.mrf.mxu3 }
 0x2d4   : > { %v1366_v23 = vmax.f32 %v8847_v19, %v8839_v3 }
 0x2d5   : > { %v8853_v5 = vpop.f32.mrf.mxu0 }
 0x2d6   : > { %1367 = vmax.xlane.f32.xlu2 %v1366_v23  ;;  %v8877_v23 = vpop.permute.xlu0 %2314 }
 0x2d7   : > { %11927 = vst [vmem:[#allocation41_spill] sm:$0xff] %v8877_v23 }
 0x2db   : > { %v8859_v27 = vpop.f32.mrf.mxu3 }
 0x2dc   : > { %v1369_v50 = vmax.f32 %v8859_v27, %v8853_v5 }
 0x2dd   : > { %v8863_v15 = vpop.f32.mrf.mxu0 }
 0x2de   : > { %11923 = vst [vmem:[#allocation37_spill] sm:$0xff] %v8863_v15  ;;  %1370 = vmax.xlane.f32.xlu2 %v1369_v50  ;;  %v8881_v50 = vpop.permute.xlu1 %5512  ;;  %v8891_v13 = vpop.permute.xlu0 %2316 }
 0x2df   : > { %11929 = vst [vmem:[#allocation43_spill] sm:$0xff] %v8881_v50 }
 0x2e0   : > { %6708 = vmatmul.msk.bf16.gmra.mxu3 %vm1109_vm2, %v8606_v45  ;;  %6724 = vmatmul.msk.bf16.gmra.mxu0 %vm1109_vm2, %v8606_v45  ;;  %v8887_v45 = vpop.permute.xlu2 %5508  ;;  %11933 = vst [vmem:[#allocation47_spill] sm:$0xff] %v8891_v13  ;;  %v6896_v13 = vld [vmem:[#allocation3 + $0x70] sm:$0xf] }
 0x2e1   : > { %11931 = vst [vmem:[#allocation45_spill] sm:$0xff] %v8887_v45 }
 0x2e3   : > { %v8873_v60 = vpop.f32.mrf.mxu3 }
 0x2e4   : > { %11926 = vst [vmem:[#allocation40_spill] sm:$0xff] %v8873_v60  ;;  %v1372_v8 = vmax.f32 %v8873_v60, %v8863_v15  ;;  %v8051_v60 = vld [vmem:[#allocation4 + $0x10] sm:$0xff] }
 0x2e5   : > { %v8879_v14 = vpop.f32.mrf.mxu0 }
 0x2e6   : > { %11928 = vst [vmem:[#allocation42_spill] sm:$0xff] %v8879_v14  ;;  %1373 = vmax.xlane.f32.xlu1 %v1372_v8  ;;  %v8897_v8 = vpop.permute.xlu1 %4670 }
 0x2e7   : > { %11934 = vst [vmem:[#allocation48_spill] sm:$0xff] %v8897_v8 }
 0x2e8   : > { %v8905_v45 = vpop.permute.xlu2 %5520 }
 0x2e9   : > { %11937 = vst [vmem:[#allocation51_spill] sm:$0xff] %v8905_v45  ;;  %v7000_v45 = vld [vmem:[#allocation3 + $0x64] sm:$0xf] }
 0x2eb   : > { %v8883_v40 = vpop.f32.mrf.mxu3 }
 0x2ec   : > { %11930 = vst [vmem:[#allocation44_spill] sm:$0xff] %v8883_v40  ;;  %v1375_v38 = vmax.f32 %v8883_v40, %v8879_v14  ;;  %v6888_v14 = vld [vmem:[#allocation3 + $0x60] sm:$0xf]  ;;  %v6890_v40 = vld [vmem:[#allocation3 + $0x68] sm:$0xf0] }
 0x2ed   : > { %v8889_v54 = vpop.f32.mrf.mxu0 }
 0x2ee   : > { %11932 = vst [vmem:[#allocation46_spill] sm:$0xff] %v8889_v54  ;;  %1376 = vmax.xlane.f32.xlu2 %v1375_v38  ;;  %v8907_v38 = vpop.permute.xlu0 %3472 }
 0x2ef   : > { %11938 = vst [vmem:[#allocation52_spill] sm:$0xff] %v8907_v38 }
 0x2f0   : > { %6709 = vmatmul.msk.bf16.gmra.mxu3 %vm1109_vm2, %v8542_v49  ;;  %6725 = vmatmul.msk.bf16.gmra.mxu0 %vm1109_vm2, %v8542_v49  ;;  %v8919_v38 = vpop.permute.xlu2 %5506 }
 0x2f1   : > { %11941 = vst [vmem:[#allocation55_spill] sm:$0xff] %v8919_v38 }
 0x2f3   : > { %v8899_v50 = vpop.f32.mrf.mxu3 }
 0x2f4   : > { %11935 = vst [vmem:[#allocation49_spill] sm:$0xff] %v8899_v50  ;;  %v1378_v23 = vmax.f32 %v8899_v50, %v8889_v54  ;;  %v6897_v54 = vor.u32 %v7003_v46, %v6896_v13  ;;  %v6901_v50 = vor.u32 %v7002_v1, %v6898_v30 }
 0x2f5   : > { %v8903_v35 = vpop.f32.mrf.mxu0 }
 0x2f6   : > { %11936 = vst [vmem:[#allocation50_spill] sm:$0xff] %v8903_v35  ;;  %1379 = vmax.xlane.f32.xlu0 %v1378_v23  ;;  %v7001_v23 = vld [vmem:[#allocation3 + $0x64] sm:$0xf0]  ;;  %v8921_v15 = vpop.permute.xlu0 %3474 }
 0x2f7   : > { %11942 = vst [vmem:[#allocation56_spill] sm:$0xff] %v8921_v15 }
 0x2f9   : > { %v1338_v49 = vpop.xlane.xlu1 %1337 }
 0x2fa   : > { %v1432_v46 = vsub.f32 %v8724_v0, %v1338_v49 }
 0x2fb   : > { %v8909_v61 = vpop.f32.mrf.mxu3 }
 0x2fc   : > { %11939 = vst [vmem:[#allocation53_spill] sm:$0xff] %v8909_v61  ;;  %v1381_v8 = vmax.f32 %v8909_v61, %v8903_v35  ;;  %v6889_v35 = vor.u32 %v7001_v23, %v6888_v14  ;;  %v6893_v61 = vor.u32 %v7000_v45, %v6890_v40 }
 0x2fd   : > { %v8913_v53 = vpop.f32.mrf.mxu0 }
 0x2fe   : > { %11940 = vst [vmem:[#allocation54_spill] sm:$0xff] %v8913_v53  ;;  %1382 = vmax.xlane.f32.xlu2 %v1381_v8  ;;  %v1433_v8 = vsub.f32 %v8714_v18, %v1338_v49 }
 0x300   : > { %6806 = vmatmul.msk.bf16.vlgmr.msra.gmra.mxu3 %vm1109_vm2, %v8488_v10  ;;  %6822 = vmatmul.msk.bf16.vlgmr.msra.gmra.mxu0 %vm1109_vm2, %v8488_v10 }
 0x301   : > { %4752 = vmatpush.bf16.msra.mxu3 %v6897_v54  ;;  %4841 = vmatpush.bf16.msra.mxu0 %v6901_v50  ;;  %v1341_v30 = vpop.xlane.xlu1 %1340 }
 0x302   : > { %v1434_v10 = vsub.f32 %v8737_v22, %v1341_v30  ;;  %v1435_v38 = vsub.f32 %v8732_v25, %v1341_v30 }
 0x303   : > { %v8923_v1 = vpop.f32.mrf.mxu3 }
 0x304   : > { %v1384_v13 = vmax.f32 %v8923_v1, %v8913_v53  ;;  %v1496_v14 = vpack.c.bf16 %v1434_v10, %v1432_v46  ;;  %v1497_v40 = vpack.c.bf16 %v1435_v38, %v1433_v8 }
 0x305   : > { %v8931_v54 = vpop.f32.mrf.mxu0  ;;  %4753 = vmatpush.bf16.msra.mxu3 %v6889_v35  ;;  %4842 = vmatpush.bf16.msra.mxu0 %v6893_v61  ;;  %v8938_v35 = vpop.permute.xlu0 %3482 }
 0x306   : > { %1385 = vmax.xlane.f32.xlu1 %v1384_v13  ;;  %v1528_v50 = vunpack.c.l.bf16 %v1496_v14  ;;  %v1529_v45 = vunpack.c.l.bf16 %v1497_v40  ;;  %v1530_v0 = vunpack.c.h.bf16 %v1496_v14  ;;  %v1531_v23 = vunpack.c.h.bf16 %v1497_v40  ;;  %11943 = vst [vmem:[#allocation57_spill] sm:$0xff] %v8938_v35 }
 0x308   : > { %v1592_v18 = vmul.f32 1.442695, %v1528_v50  ;;  %v1594_v49 = vmul.f32 1.442695, %v1529_v45  ;;  %v1596_v22 = vmul.f32 1.442695, %v1530_v0 }
 0x309   : > { %v1344_v15 = vpop.xlane.xlu2 %1343  ;;  %v1598_v25 = vmul.f32 1.442695, %v1531_v23 }
 0x30a   : > { %5504 = vrot.lane.b32.xlu0 %v8051_v60, %s8141_s14  ;;  %7283 = vpow2.f32 %v1592_v18  ;;  %v1436_v46 = vsub.f32 %v8755_v41, %v1344_v15  ;;  %v1437_v30 = vsub.f32 %v8741_v32, %v1344_v15 }
 0x30b   : > { %v8934_v53 = vpop.f32.mrf.mxu3  ;;  %7285 = vpow2.f32 %v1594_v49 }
 0x30c   : > { %v1387_v61 = vmax.f32 %v8934_v53, %v8931_v54  ;;  %7287 = vpow2.f32 %v1596_v22 }
 0x30d   : > { %v8940_v38 = vpop.f32.mrf.mxu0  ;;  %7289 = vpow2.f32 %v1598_v25  ;;  %v8954_v25 = vpop.permute.xlu0 %3484 }
 0x30e   : > { %1388 = vmax.xlane.f32.xlu2 %v1387_v61  ;;  %11944 = vst [vmem:[#allocation58_spill] sm:$0xff] %v8954_v25 }
 0x310   : > { %6807 = vmatmul.msk.bf16.gmra.mxu3 %vm1109_vm2, %v8440_v2  ;;  %6823 = vmatmul.msk.bf16.gmra.mxu0 %vm1109_vm2, %v8440_v2  ;;  %v7284_v10 = vpop.eup %7283 }
 0x311   : > { %v1347_v60 = vpop.xlane.xlu2 %1346  ;;  %v7286_v40 = vpop.eup %7285 }
 0x312   : > { %v1438_v13 = vsub.f32 %v8765_v44, %v1347_v60  ;;  %v1439_v8 = vsub.f32 %v8759_v34, %v1347_v60  ;;  %v7288_v0 = vpop.eup %7287 }
 0x313   : > { %v8950_v14 = vpop.f32.mrf.mxu3  ;;  %v7290_v18 = vpop.eup %7289  ;;  %v1720_v32 = vpack.c.bf16 %v7288_v0, %v7284_v10 }
 0x314   : > { %v1498_v50 = vpack.c.bf16 %v1438_v13, %v1436_v46  ;;  %v1499_v45 = vpack.c.bf16 %v1439_v8, %v1437_v30  ;;  %v1721_v44 = vpack.c.bf16 %v7290_v18, %v7286_v40 }
 0x315   : > { %v8952_v23 = vpop.f32.mrf.mxu0  ;;  %2016 = vmatmul.bf16.vlgmr.msrb.gmra.mxu1 %v1720_v32  ;;  %v1754_v46 = vunpack.c.h.bf16 %v1720_v32  ;;  %v1752_v13 = vunpack.c.l.bf16 %v1720_v32 }
 0x316   : > { %v1532_v2 = vunpack.c.l.bf16 %v1498_v50  ;;  %v1533_v49 = vunpack.c.l.bf16 %v1499_v45  ;;  %v1534_v22 = vunpack.c.h.bf16 %v1498_v50  ;;  %v1535_v41 = vunpack.c.h.bf16 %v1499_v45  ;;  %2105 = vmatmul.bf16.vlgmr.msrb.gmra.mxu2 %v1721_v44  ;;  %4368 = vmatpush.bf16.msrb.mxu1 %v8636_v33 }
 0x317   : > { %v1755_v30 = vunpack.c.h.bf16 %v1721_v44  ;;  %4457 = vmatpush.bf16.msrb.mxu2 %v8692_v12  ;;  %v1753_v8 = vunpack.c.l.bf16 %v1721_v44 }
 0x318   : > { %v1600_v15 = vmul.f32 1.442695, %v1532_v2  ;;  %v1602_v34 = vmul.f32 1.442695, %v1533_v49  ;;  %v1604_v61 = vmul.f32 1.442695, %v1534_v22  ;;  %v8974_v2 = vpop.permute.xlu0 %3488 }
 0x319   : > { %v1606_v60 = vmul.f32 1.442695, %v1535_v41  ;;  %v8960_v10 = vadd.f32 %v1755_v30, %v1754_v46  ;;  %v8964_v45 = vadd.f32 %v1753_v8, %v1752_v13  ;;  %v1350_v18 = vpop.xlane.xlu1 %1349  ;;  %11947 = vst [vmem:[#allocation61_spill] sm:$0xff] %v8974_v2 }
 0x31a   : > { %7291 = vpow2.f32 %v1600_v15  ;;  %4369 = vmatpush.bf16.msrb.mxu1 %v8698_v31  ;;  %v1440_v49 = vsub.f32 %v8781_v57, %v1350_v18  ;;  %v1441_v32 = vsub.f32 %v8771_v63, %v1350_v18 }
 0x31b   : > { %7293 = vpow2.f32 %v1602_v34  ;;  %v8958_v50 = vpop.f32.mrf.mxu3  ;;  %11945 = vst [vmem:[#allocation59_spill] sm:$0xff] %v8960_v10  ;;  %4458 = vmatpush.bf16.msrb.mxu2 %v8624_v9 }
 0x31c   : > { %7295 = vpow2.f32 %v1604_v61  ;;  %v1393_v40 = vmax.f32 %v8958_v50, %v8952_v23  ;;  %11946 = vst [vmem:[#allocation60_spill] sm:$0xff] %v8964_v45 }
 0x31d   : > { %7297 = vpow2.f32 %v1606_v60  ;;  %v8966_v0 = vpop.f32.mrf.mxu0 }
 0x31e   : > { %1394 = vmax.xlane.f32.xlu1 %v1393_v40  ;;  %4370 = vmatpush.bf16.msrb.mxu1 %v8676_v62 }
 0x31f   : > { %4459 = vmatpush.bf16.msrb.mxu2 %v8650_v6 }
 0x320   : > { %v7292_v33 = vpop.eup %7291  ;;  %6808 = vmatmul.msk.bf16.gmra.mxu3 %vm1109_vm2, %v8494_v16  ;;  %6824 = vmatmul.msk.bf16.gmra.mxu0 %vm1109_vm2, %v8494_v16 }
 0x321   : > { %v7294_v12 = vpop.eup %7293  ;;  %v1353_v22 = vpop.xlane.xlu2 %1352 }
 0x322   : > { %v7296_v41 = vpop.eup %7295  ;;  %v1442_v9 = vsub.f32 %v8789_v39, %v1353_v22  ;;  %v1443_v31 = vsub.f32 %v8785_v11, %v1353_v22  ;;  %4371 = vmatpush.bf16.msrb.mxu1 %v8694_v43  ;;  %v8052_v11 = vld [vmem:[#allocation4 + $0x78] sm:$0xff] }
 0x323   : > { %v7298_v44 = vpop.eup %7297  ;;  %v8982_v15 = vpop.f32.mrf.mxu3  ;;  %v1722_v16 = vpack.c.bf16 %v7296_v41, %v7292_v33  ;;  %4460 = vmatpush.bf16.msrb.mxu2 %v8662_v4 }
 0x324   : > { %v1500_v34 = vpack.c.bf16 %v1442_v9, %v1440_v49  ;;  %v1501_v61 = vpack.c.bf16 %v1443_v31, %v1441_v32  ;;  %v1723_v60 = vpack.c.bf16 %v7298_v44, %v7294_v12  ;;  %v4325_v4 = vpop.permute.xlu0 %4324 }
 0x325   : > { %v8984_v57 = vpop.f32.mrf.mxu0  ;;  %v1756_v46 = vunpack.c.l.bf16 %v1722_v16  ;;  %v1758_v30 = vunpack.c.h.bf16 %v1722_v16  ;;  %2021 = vmatmul.bf16.gmra.mxu1 %v1722_v16 }
 0x326   : > { %v1536_v6 = vunpack.c.l.bf16 %v1500_v34  ;;  %v1537_v62 = vunpack.c.l.bf16 %v1501_v61  ;;  %v1538_v39 = vunpack.c.h.bf16 %v1500_v34  ;;  %v1539_v63 = vunpack.c.h.bf16 %v1501_v61  ;;  %5518 = vrot.lane.b32.xlu2 %v8052_v11, %s8141_s14  ;;  %2110 = vmatmul.bf16.gmra.mxu2 %v1723_v60 }
 0x327   : > { %v1757_v13 = vunpack.c.l.bf16 %v1723_v60  ;;  %v1759_v8 = vunpack.c.h.bf16 %v1723_v60  ;;  %4372 = vmatpush.bf16.msrb.mxu1 %v8718_v17  ;;  %4461 = vmatpush.bf16.msrb.mxu2 %v8688_v42 }
 0x328   : > { %v1608_v40 = vmul.f32 1.442695, %v1536_v6  ;;  %v1610_v18 = vmul.f32 1.442695, %v1537_v62  ;;  %v1612_v33 = vmul.f32 1.442695, %v1538_v39 }
 0x329   : > { %v1614_v12 = vmul.f32 1.442695, %v1539_v63  ;;  %v8989_v49 = vadd.f32 %v1757_v13, %v1756_v46  ;;  %v8991_v43 = vadd.f32 %v1759_v8, %v1758_v30  ;;  %v1356_v32 = vpop.xlane.xlu1 %1355 }
 0x32a   : > { %7299 = vpow2.f32 %v1608_v40  ;;  %v1444_v17 = vsub.f32 %v8803_v36, %v1356_v32  ;;  %v1445_v31 = vsub.f32 %v8795_v26, %v1356_v32 }
 0x32b   : > { %11948 = vst [vmem:[#allocation62_spill] sm:$0xff] %v8989_v49  ;;  %7301 = vpow2.f32 %v1610_v18  ;;  %v8995_v22 = vpop.f32.mrf.mxu3  ;;  %4373 = vmatpush.bf16.msrb.mxu1 %v4325_v4  ;;  %4462 = vmatpush.bf16.msrb.mxu2 %v8706_v28 }
 0x32c   : > { %11949 = vst [vmem:[#allocation63_spill] sm:$0xff] %v8991_v43  ;;  %7303 = vpow2.f32 %v1612_v33  ;;  %v1399_v61 = vmax.f32 %v8995_v22, %v8984_v57  ;;  %v9016_v6 = vpop.permute.xlu0 %3494 }
 0x32d   : > { %7305 = vpow2.f32 %v1614_v12  ;;  %v8997_v41 = vpop.f32.mrf.mxu0  ;;  %11950 = vst [vmem:[#allocation64_spill] sm:$0xff] %v9016_v6  ;;  %v11985_v6 = vld [vmem:[#allocation11_spill] sm:$0xff] }
 0x32f   : > { %4374 = vmatpush.bf16.msrb.mxu1 %v8728_v51  ;;  %4463 = vmatpush.bf16.msrb.mxu2 %v8734_v37 }
 0x330   : > { %v7300_v9 = vpop.eup %7299  ;;  %6809 = vmatmul.msk.bf16.gmra.mxu3 %vm1109_vm2, %v8444_v52  ;;  %6825 = vmatmul.msk.bf16.gmra.mxu0 %vm1109_vm2, %v8444_v52 }
 0x331   : > { %v7302_v42 = vpop.eup %7301  ;;  %v1359_v44 = vpop.xlane.xlu2 %1358 }
 0x332   : > { %v7304_v16 = vpop.eup %7303  ;;  %v1446_v28 = vsub.f32 %v8813_v21, %v1359_v44  ;;  %v1447_v34 = vsub.f32 %v8807_v48, %v1359_v44 }
 0x333   : > { %v7306_v60 = vpop.eup %7305  ;;  %v9012_v52 = vpop.f32.mrf.mxu3  ;;  %v1724_v46 = vpack.c.bf16 %v7304_v16, %v7300_v9  ;;  %4375 = vmatpush.bf16.msrb.mxu1 %v8746_v56  ;;  %4464 = vmatpush.bf16.msrb.mxu2 %v8753_v24 }
 0x334   : > { %v1502_v36 = vpack.c.bf16 %v1446_v28, %v1444_v17  ;;  %v1503_v30 = vpack.c.bf16 %v1447_v34, %v1445_v31  ;;  %1400 = vmax.xlane.f32.xlu0 %v1399_v61  ;;  %v1725_v26 = vpack.c.bf16 %v7306_v60, %v7302_v42  ;;  %v1402_v51 = vmax.f32 %v9012_v52, %v8997_v41  ;;  %v9032_v42 = vpop.permute.xlu0 %4648 }
 0x335   : > { %v9018_v37 = vpop.f32.mrf.mxu0  ;;  %v1762_v21 = vunpack.c.h.bf16 %v1724_v46  ;;  %v1760_v48 = vunpack.c.l.bf16 %v1724_v46  ;;  %2026 = vmatmul.bf16.gmra.mxu1 %v1724_v46  ;;  %11953 = vst [vmem:[#allocation67_spill] sm:$0xff] %v9032_v42 }
 0x336   : > { %v1540_v62 = vunpack.c.l.bf16 %v1502_v36  ;;  %v1541_v39 = vunpack.c.l.bf16 %v1503_v30  ;;  %v1542_v63 = vunpack.c.h.bf16 %v1502_v36  ;;  %v1543_v11 = vunpack.c.h.bf16 %v1503_v30  ;;  %1403 = vmax.xlane.f32.xlu1 %v1402_v51  ;;  %2115 = vmatmul.bf16.gmra.mxu2 %v1725_v26 }
 0x337   : > { %v1763_v13 = vunpack.c.h.bf16 %v1725_v26  ;;  %v1761_v8 = vunpack.c.l.bf16 %v1725_v26 }
 0x338   : > { %v1616_v40 = vmul.f32 1.442695, %v1540_v62  ;;  %v1618_v18 = vmul.f32 1.442695, %v1541_v39  ;;  %v1620_v33 = vmul.f32 1.442695, %v1542_v63 }
 0x339   : > { %v1622_v12 = vmul.f32 1.442695, %v1543_v11  ;;  %v9022_v4 = vadd.f32 %v1763_v13, %v1762_v21  ;;  %v9024_v32 = vadd.f32 %v1761_v8, %v1760_v48  ;;  %v1362_v17 = vpop.xlane.xlu1 %1361 }
 0x33a   : > { %7307 = vpow2.f32 %v1616_v40  ;;  %v1448_v34 = vsub.f32 %v8825_v59, %v1362_v17  ;;  %v1449_v61 = vsub.f32 %v8817_v55, %v1362_v17 }
 0x33b   : > { %11951 = vst [vmem:[#allocation65_spill] sm:$0xff] %v9022_v4  ;;  %7309 = vpow2.f32 %v1618_v18  ;;  %v9026_v56 = vpop.f32.mrf.mxu3 }
 0x33c   : > { %11952 = vst [vmem:[#allocation66_spill] sm:$0xff] %v9024_v32  ;;  %7311 = vpow2.f32 %v1620_v33  ;;  %v1405_v24 = vmax.f32 %v9026_v56, %v9018_v37  ;;  %v9048_v33 = vpop.permute.xlu0 %4654 }
 0x33d   : > { %7313 = vpow2.f32 %v1622_v12  ;;  %v9030_v9 = vpop.f32.mrf.mxu0  ;;  %11954 = vst [vmem:[#allocation68_spill] sm:$0xff] %v9048_v33 }
 0x33e   : > { %1406 = vmax.xlane.f32.xlu1 %v1405_v24 }
 0x340   : > { %v7308_v31 = vpop.eup %7307  ;;  %6810 = vmatmul.msk.bf16.gmra.mxu3 %vm1109_vm2, %v8500_v47  ;;  %6826 = vmatmul.msk.bf16.gmra.mxu0 %vm1109_vm2, %v8500_v47 }
 0x341   : > { %v7310_v44 = vpop.eup %7309  ;;  %v1365_v16 = vpop.xlane.xlu2 %1364 }
 0x342   : > { %v7312_v28 = vpop.eup %7311  ;;  %v1450_v60 = vsub.f32 %v8835_v29, %v1365_v16  ;;  %v1451_v46 = vsub.f32 %v8831_v7, %v1365_v16 }
 0x343   : > { %v7314_v36 = vpop.eup %7313  ;;  %v9042_v30 = vpop.f32.mrf.mxu3  ;;  %v1726_v26 = vpack.c.bf16 %v7312_v28, %v7308_v31  ;;  %v1390_v28 = vmax.f32 %v8950_v14, %v8940_v38 }
 0x344   : > { %v1504_v51 = vpack.c.bf16 %v1450_v60, %v1448_v34  ;;  %v1505_v21 = vpack.c.bf16 %v1451_v46, %v1449_v61  ;;  %v1727_v48 = vpack.c.bf16 %v7314_v36, %v7310_v44  ;;  %v1408_v47 = vmax.f32 %v9042_v30, %v9030_v9 }
 0x345   : > { %v9046_v62 = vpop.f32.mrf.mxu0  ;;  %v1764_v39 = vunpack.c.l.bf16 %v1726_v26  ;;  %v1766_v59 = vunpack.c.h.bf16 %v1726_v26  ;;  %2031 = vmatmul.bf16.gmra.mxu1 %v1726_v26 }
 0x346   : > { %v1544_v63 = vunpack.c.l.bf16 %v1504_v51  ;;  %v1545_v55 = vunpack.c.l.bf16 %v1505_v21  ;;  %v1546_v11 = vunpack.c.h.bf16 %v1504_v51  ;;  %v1547_v29 = vunpack.c.h.bf16 %v1505_v21  ;;  %1409 = vmax.xlane.f32.xlu0 %v1408_v47  ;;  %2120 = vmatmul.bf16.gmra.mxu2 %v1727_v48  ;;  %v9068_v47 = vpop.permute.xlu0 %4662 }
 0x347   : > { %v1765_v7 = vunpack.c.l.bf16 %v1727_v48  ;;  %v1767_v13 = vunpack.c.h.bf16 %v1727_v48  ;;  %11957 = vst [vmem:[#allocation71_spill] sm:$0xff] %v9068_v47 }
 0x348   : > { %v1624_v8 = vmul.f32 1.442695, %v1544_v63  ;;  %v1626_v40 = vmul.f32 1.442695, %v1545_v55  ;;  %v1628_v18 = vmul.f32 1.442695, %v1546_v11 }
 0x349   : > { %v1630_v12 = vmul.f32 1.442695, %v1547_v29  ;;  %v1368_v24 = vpop.xlane.xlu2 %1367  ;;  %v9050_v17 = vadd.f32 %v1765_v7, %v1764_v39  ;;  %v9052_v31 = vadd.f32 %v1767_v13, %v1766_v59 }
 0x34a   : > { %7315 = vpow2.f32 %v1624_v8  ;;  %v1452_v36 = vsub.f32 %v8847_v19, %v1368_v24  ;;  %v1453_v26 = vsub.f32 %v8839_v3, %v1368_v24  ;;  %v1396_v3 = vmax.f32 %v8982_v15, %v8966_v0 }
 0x34b   : > { %11955 = vst [vmem:[#allocation69_spill] sm:$0xff] %v9050_v17  ;;  %7317 = vpow2.f32 %v1626_v40  ;;  %v9054_v44 = vpop.f32.mrf.mxu3 }
 0x34c   : > { %11956 = vst [vmem:[#allocation70_spill] sm:$0xff] %v9052_v31  ;;  %7319 = vpow2.f32 %v1628_v18 }
 0x34d   : > { %7321 = vpow2.f32 %v1630_v12  ;;  %v9056_v16 = vpop.f32.mrf.mxu0 }
 0x34f   : > { %1391 = vmax.xlane.f32.xlu2 %v1390_v28 }
 0x350   : > { %v7316_v34 = vpop.eup %7315  ;;  %6811 = vmatmul.msk.bf16.gmra.mxu3 %vm1109_vm2, %v8460_v58  ;;  %6827 = vmatmul.msk.bf16.gmra.mxu0 %vm1109_vm2, %v8460_v58 }
 0x351   : > { %v7318_v61 = vpop.eup %7317  ;;  %v1371_v60 = vpop.xlane.xlu2 %1370 }
 0x352   : > { %v7320_v46 = vpop.eup %7319  ;;  %v1454_v51 = vsub.f32 %v8859_v27, %v1371_v60  ;;  %v1455_v21 = vsub.f32 %v8853_v5, %v1371_v60 }
 0x353   : > { %v7322_v48 = vpop.eup %7321  ;;  %v9070_v39 = vpop.f32.mrf.mxu3  ;;  %v1728_v59 = vpack.c.bf16 %v7320_v46, %v7316_v34 }
 0x354   : > { %v1506_v63 = vpack.c.bf16 %v1454_v51, %v1452_v36  ;;  %v1507_v55 = vpack.c.bf16 %v1455_v21, %v1453_v26  ;;  %v1729_v11 = vpack.c.bf16 %v7322_v48, %v7318_v61  ;;  %v1414_v58 = vmax.f32 %v9070_v39, %v9056_v16  ;;  %v9084_v36 = vpop.permute.xlu0 %4664 }
 0x355   : > { %v9074_v29 = vpop.f32.mrf.mxu0  ;;  %v1768_v19 = vunpack.c.l.bf16 %v1728_v59  ;;  %v1770_v27 = vunpack.c.h.bf16 %v1728_v59  ;;  %2036 = vmatmul.bf16.gmra.mxu1 %v1728_v59  ;;  %11960 = vst [vmem:[#allocation74_spill] sm:$0xff] %v9084_v36  ;;  %v1411_v51 = vmax.f32 %v9054_v44, %v9046_v62 }
 0x356   : > { %v1548_v5 = vunpack.c.l.bf16 %v1506_v63  ;;  %v1549_v7 = vunpack.c.l.bf16 %v1507_v55  ;;  %v1550_v13 = vunpack.c.h.bf16 %v1506_v63  ;;  %v1551_v8 = vunpack.c.h.bf16 %v1507_v55  ;;  %1415 = vmax.xlane.f32.xlu1 %v1414_v58  ;;  %2125 = vmatmul.bf16.gmra.mxu2 %v1729_v11 }
 0x357   : > { %v1769_v40 = vunpack.c.l.bf16 %v1729_v11  ;;  %v1771_v18 = vunpack.c.h.bf16 %v1729_v11  ;;  %1397 = vmax.xlane.f32.xlu2 %v1396_v3  ;;  %v11961_v11 = vld [vmem:[#allocation40_spill] sm:$0xff]  ;;  %v11962_v3 = vld [vmem:[#allocation37_spill] sm:$0xff] }
 0x358   : > { %v1632_v12 = vmul.f32 1.442695, %v1548_v5  ;;  %v1634_v24 = vmul.f32 1.442695, %v1549_v7  ;;  %v1636_v28 = vmul.f32 1.442695, %v1550_v13 }
 0x359   : > { %v1638_v34 = vmul.f32 1.442695, %v1551_v8  ;;  %v9078_v61 = vadd.f32 %v1769_v40, %v1768_v19  ;;  %v9080_v60 = vadd.f32 %v1771_v18, %v1770_v27  ;;  %v1374_v21 = vpop.xlane.xlu1 %1373  ;;  %v11963_v27 = vld [vmem:[#allocation44_spill] sm:$0xff]  ;;  %v11964_v7 = vld [vmem:[#allocation42_spill] sm:$0xff] }
 0x35a   : > { %7323 = vpow2.f32 %v1632_v12  ;;  %v1456_v58 = vsub.f32 %v11961_v11, %v1374_v21  ;;  %v1457_v19 = vsub.f32 %v11962_v3, %v1374_v21 }
 0x35b   : > { %11958 = vst [vmem:[#allocation72_spill] sm:$0xff] %v9078_v61  ;;  %7325 = vpow2.f32 %v1634_v24  ;;  %v9082_v46 = vpop.f32.mrf.mxu3 }
 0x35c   : > { %11959 = vst [vmem:[#allocation73_spill] sm:$0xff] %v9080_v60  ;;  %7327 = vpow2.f32 %v1636_v28  ;;  %v9106_v45 = vpop.permute.xlu0 %4668 }
 0x35d   : > { %7329 = vpow2.f32 %v1638_v34  ;;  %v9086_v26 = vpop.f32.mrf.mxu0  ;;  %v1417_v34 = vmax.f32 %v9082_v46, %v9074_v29  ;;  %11965 = vst [vmem:[#allocation40_spill] sm:$0xff] %v9106_v45 }
 0x35f   : > { %1412 = vmax.xlane.f32.xlu2 %v1411_v51 }
 0x360   : > { %v7324_v48 = vpop.eup %7323  ;;  %6812 = vmatmul.msk.bf16.gmra.mxu3 %vm1109_vm2, %v8708_v20  ;;  %6828 = vmatmul.msk.bf16.gmra.mxu0 %vm1109_vm2, %v8708_v20 }
 0x361   : > { %v7326_v59 = vpop.eup %7325  ;;  %v1377_v63 = vpop.xlane.xlu2 %1376 }
 0x362   : > { %v7328_v55 = vpop.eup %7327  ;;  %v1458_v5 = vsub.f32 %v11963_v27, %v1377_v63  ;;  %v1459_v13 = vsub.f32 %v11964_v7, %v1377_v63 }
 0x363   : > { %v7330_v8 = vpop.eup %7329  ;;  %v9098_v40 = vpop.f32.mrf.mxu3  ;;  %v1730_v18 = vpack.c.bf16 %v7328_v55, %v7324_v48 }
 0x364   : > { %v1508_v12 = vpack.c.bf16 %v1458_v5, %v1456_v58  ;;  %v1509_v24 = vpack.c.bf16 %v1459_v13, %v1457_v19  ;;  %v1731_v28 = vpack.c.bf16 %v7330_v8, %v7326_v59  ;;  %v1420_v20 = vmax.f32 %v9098_v40, %v9086_v26 }
 0x365   : > { %v9104_v51 = vpop.f32.mrf.mxu0  ;;  %v1774_v21 = vunpack.c.h.bf16 %v1730_v18  ;;  %v1772_v11 = vunpack.c.l.bf16 %v1730_v18  ;;  %2041 = vmatmul.bf16.gmra.mxu1 %v1730_v18 }
 0x366   : > { %v1552_v3 = vunpack.c.l.bf16 %v1508_v12  ;;  %v1553_v27 = vunpack.c.l.bf16 %v1509_v24  ;;  %v1554_v63 = vunpack.c.h.bf16 %v1508_v12  ;;  %v1555_v7 = vunpack.c.h.bf16 %v1509_v24  ;;  %1421 = vmax.xlane.f32.xlu0 %v1420_v20  ;;  %2130 = vmatmul.bf16.gmra.mxu2 %v1731_v28 }
 0x367   : > { %v1775_v48 = vunpack.c.h.bf16 %v1731_v28  ;;  %v1773_v55 = vunpack.c.l.bf16 %v1731_v28  ;;  %1418 = vmax.xlane.f32.xlu2 %v1417_v34 }
 0x368   : > { %v1640_v59 = vmul.f32 1.442695, %v1552_v3  ;;  %v1642_v58 = vmul.f32 1.442695, %v1553_v27  ;;  %v1644_v19 = vmul.f32 1.442695, %v1554_v63 }
 0x369   : > { %v1646_v5 = vmul.f32 1.442695, %v1555_v7  ;;  %v9108_v13 = vadd.f32 %v1775_v48, %v1774_v21  ;;  %v9110_v8 = vadd.f32 %v1773_v55, %v1772_v11  ;;  %v1380_v20 = vpop.xlane.xlu0 %1379  ;;  %v8053_v3 = vld [vmem:[#allocation4 + $0x68] sm:$0xff]  ;;  %v11968_v7 = vld [vmem:[#allocation46_spill] sm:$0xff] }
 0x36a   : > { %7331 = vpow2.f32 %v1640_v59  ;;  %v11966_v27 = vld [vmem:[#allocation9_spill] sm:$0xff]  ;;  %v1461_v48 = vsub.f32 %v11968_v7, %v1380_v20 }
 0x36b   : > { %7333 = vpow2.f32 %v1642_v58  ;;  %v9112_v12 = vpop.f32.mrf.mxu3  ;;  %v11967_v11 = vld [vmem:[#allocation49_spill] sm:$0xff]  ;;  %v11970_v58 = vld [vmem:[#allocation50_spill] sm:$0xff] }
 0x36c   : > { %7335 = vpow2.f32 %v1644_v19  ;;  %v1460_v63 = vsub.f32 %v11967_v11, %v1380_v20  ;;  %v11969_v55 = vld [vmem:[#allocation53_spill] sm:$0xff] }
 0x36d   : > { %7337 = vpow2.f32 %v1646_v5  ;;  %v9114_v24 = vpop.f32.mrf.mxu0 }
 0x36f   : > { %5502 = vrot.lane.b32.xlu1 %v8053_v3, %s8141_s14 }
 0x370   : > { %v7332_v34 = vpop.eup %7331  ;;  %6813 = vmatmul.msk.bf16.gmra.mxu3 %vm1109_vm2, %v11966_v27  ;;  %6829 = vmatmul.msk.bf16.gmra.mxu0 %vm1109_vm2, %v11966_v27 }
 0x371   : > { %v7334_v18 = vpop.eup %7333  ;;  %v1383_v28 = vpop.xlane.xlu2 %1382 }
 0x372   : > { %v7336_v21 = vpop.eup %7335  ;;  %v1462_v59 = vsub.f32 %v11969_v55, %v1383_v28  ;;  %v1463_v19 = vsub.f32 %v11970_v58, %v1383_v28  ;;  %v8054_v55 = vld [vmem:[#allocation4 + $0x28] sm:$0xff] }
 0x373   : > { %v7338_v5 = vpop.eup %7337  ;;  %v9125_v3 = vpop.f32.mrf.mxu3  ;;  %v9127_v10 = vpack.c.bf16 %v7336_v21, %v7332_v34 }
 0x374   : > { %v1510_v43 = vpack.c.bf16 %v1462_v59, %v1460_v63  ;;  %v1511_v49 = vpack.c.bf16 %v1463_v19, %v1461_v48  ;;  %v9129_v32 = vpack.c.bf16 %v7338_v5, %v7334_v18  ;;  %v8055_v48 = vld [vmem:[#allocation2 + $0x78] sm:$0xff]  ;;  %v8056_v59 = vld [vmem:[#allocation2 + $0x70] sm:$0xff]  ;;  %v8057_v5 = vld [vmem:[#allocation4 + $0x20] sm:$0xff] }
 0x375   : > { %v9131_v27 = vpop.f32.mrf.mxu0  ;;  %v1778_v4 = vunpack.c.h.bf16 %v9127_v10  ;;  %2046 = vmatmul.bf16.gmra.mxu1 %v9127_v10 }
 0x376   : > { %v1556_v11 = vunpack.c.l.bf16 %v1510_v43  ;;  %v1557_v31 = vunpack.c.l.bf16 %v1511_v49  ;;  %v1558_v20 = vunpack.c.h.bf16 %v1510_v43  ;;  %v1559_v7 = vunpack.c.h.bf16 %v1511_v49  ;;  %2135 = vmatmul.bf16.gmra.mxu2 %v9129_v32 }
 0x377   : > { %5500 = vrot.lane.b32.xlu1 %v8054_v55, %s8141_s14  ;;  %v1779_v28 = vunpack.c.h.bf16 %v9129_v32  ;;  %v1777_v42 = vunpack.c.l.bf16 %v9129_v32 }
 0x378   : > { %v1648_v58 = vmul.f32 1.442695, %v1556_v11  ;;  %v1650_v34 = vmul.f32 1.442695, %v1557_v31  ;;  %v1652_v21 = vmul.f32 1.442695, %v1558_v20 }
 0x379   : > { %v1654_v63 = vmul.f32 1.442695, %v1559_v7  ;;  %v9138_v18 = vadd.f32 %v1779_v28, %v1778_v4  ;;  %v1386_v31 = vpop.xlane.xlu1 %1385  ;;  %v11971_v4 = vld [vmem:[#allocation8_spill] sm:$0xff]  ;;  %v11972_v28 = vld [vmem:[#allocation54_spill] sm:$0xff] }
 0x37a   : > { %7339 = vpow2.f32 %v1648_v58  ;;  %4674 = vrot.lane.b32.xlu0 %v8055_v48, %s8141_s14  ;;  %v1464_v55 = vsub.f32 %v8923_v1, %v1386_v31  ;;  %v1465_v58 = vsub.f32 %v11972_v28, %v1386_v31 }
 0x37b   : > { %7341 = vpow2.f32 %v1650_v34  ;;  %v9141_v49 = vpop.f32.mrf.mxu3 }
 0x37c   : > { %7343 = vpow2.f32 %v1652_v21 }
 0x37d   : > { %7345 = vpow2.f32 %v1654_v63  ;;  %v9143_v43 = vpop.f32.mrf.mxu0 }
 0x37f   : > { %4672 = vrot.lane.b32.xlu1 %v8056_v59, %s8141_s14  ;;  %5516 = vrot.lane.b32.xlu2 %v8057_v5, %s8141_s14 }
 0x380   : > { %v7340_v19 = vpop.eup %7339  ;;  %6814 = vmatmul.msk.bf16.gmra.mxu3 %vm1109_vm2, %v11971_v4  ;;  %6830 = vmatmul.msk.bf16.gmra.mxu0 %vm1109_vm2, %v11971_v4 }
 0x381   : > { %v7342_v11 = vpop.eup %7341  ;;  %v1389_v20 = vpop.xlane.xlu2 %1388 }
 0x382   : > { %v7344_v7 = vpop.eup %7343  ;;  %v1466_v34 = vsub.f32 %v8934_v53, %v1389_v20  ;;  %v1467_v21 = vsub.f32 %v8931_v54, %v1389_v20 }
 0x383   : > { %v7346_v63 = vpop.eup %7345  ;;  %v9155_v48 = vpop.f32.mrf.mxu3  ;;  %v9157_v59 = vpack.c.bf16 %v7344_v7, %v7340_v19 }
 0x384   : > { %v1512_v5 = vpack.c.bf16 %v1466_v34, %v1464_v55  ;;  %v1513_v17 = vpack.c.bf16 %v1467_v21, %v1465_v58  ;;  %v9159_v60 = vpack.c.bf16 %v7346_v63, %v7342_v11  ;;  %v11973_v55 = vld [vmem:[#allocation21_spill] sm:$0xff] }
 0x385   : > { %v9161_v4 = vpop.f32.mrf.mxu0  ;;  %v1780_v61 = vunpack.c.l.bf16 %v9157_v59  ;;  %2051 = vmatmul.bf16.gmra.mxu1 %v9157_v59  ;;  %v1782_v25 = vunpack.c.h.bf16 %v9157_v59 }
 0x386   : > { %v1560_v1 = vunpack.c.l.bf16 %v1512_v5  ;;  %v1561_v45 = vunpack.c.l.bf16 %v1513_v17  ;;  %v1562_v31 = vunpack.c.h.bf16 %v1512_v5  ;;  %v1563_v28 = vunpack.c.h.bf16 %v1513_v17  ;;  %2140 = vmatmul.bf16.gmra.mxu2 %v9159_v60 }
 0x387   : > { %v1781_v53 = vunpack.c.l.bf16 %v9159_v60 }
 0x388   : > { %v1656_v54 = vmul.f32 1.442695, %v1560_v1  ;;  %v1658_v20 = vmul.f32 1.442695, %v1561_v45  ;;  %v1660_v36 = vmul.f32 1.442695, %v1562_v31 }
 0x389   : > { %v1662_v47 = vmul.f32 1.442695, %v1563_v28  ;;  %v9167_v19 = vadd.f32 %v1781_v53, %v1780_v61 }
 0x38a   : > { %7347 = vpow2.f32 %v1656_v54 }
 0x38b   : > { %7349 = vpow2.f32 %v1658_v20  ;;  %v9169_v11 = vpop.f32.mrf.mxu3 }
 0x38c   : > { %7351 = vpow2.f32 %v1660_v36 }
 0x38d   : > { %7353 = vpow2.f32 %v1662_v47  ;;  %v9171_v7 = vpop.f32.mrf.mxu0 }
 0x390   : > { %v7348_v17 = vpop.eup %7347  ;;  %6815 = vmatmul.msk.bf16.gmra.mxu3 %vm1109_vm2, %v11973_v55  ;;  %6831 = vmatmul.msk.bf16.gmra.mxu0 %vm1109_vm2, %v11973_v55 }
 0x391   : > { %v7350_v45 = vpop.eup %7349 }
 0x392   : > { %v7352_v58 = vpop.eup %7351  ;;  %v2017_v1 = vpop.f32.mrf.mxu1 }
 0x393   : > { %v7354_v34 = vpop.eup %7353  ;;  %v9177_v61 = vpop.f32.mrf.mxu3  ;;  %v1736_v21 = vpack.c.bf16 %v7352_v58, %v7348_v17  ;;  %v11979_v58 = vld [vmem:[#allocation10_spill] sm:$0xff] }
 0x394   : > { %v1737_v63 = vpack.c.bf16 %v7354_v34, %v7350_v45  ;;  %v9197_v34 = vpop.xlane.xlu1 %1394 }
 0x395   : > { %v9179_v5 = vpop.f32.mrf.mxu0  ;;  %v1784_v36 = vunpack.c.l.bf16 %v1736_v21  ;;  %v1786_v47 = vunpack.c.h.bf16 %v1736_v21  ;;  %2056 = vmatmul.bf16.gmra.mxu1 %v1736_v21  ;;  %v2564_v21 = vmax.f32 %v9155_v48, %v9143_v43 }
 0x396   : > { %v1785_v31 = vunpack.c.l.bf16 %v1737_v63  ;;  %v1787_v28 = vunpack.c.h.bf16 %v1737_v63  ;;  %2145 = vmatmul.bf16.gmra.mxu2 %v1737_v63 }
 0x398   : > { %v9181_v53 = vadd.f32 %v1785_v31, %v1784_v36  ;;  %v9183_v54 = vadd.f32 %v1787_v28, %v1786_v47  ;;  %v1423_v31 = vmax.f32 %v9112_v12, %v9104_v51  ;;  %v1426_v28 = vmax.f32 %v9125_v3, %v9114_v24 }
 0x399   : > { %v2106_v55 = vpop.f32.mrf.mxu2 }
 0x39a   : > { %11974 = vst [vmem:[#allocation37_spill] sm:$0xff] %v9181_v53  ;;  %v9187_v33 = vadd.f32 %v2106_v55, %v2017_v1  ;;  %v9191_v45 = vpop.f32.mrf.mxu1  ;;  %v1776_v53 = vunpack.c.l.bf16 %v9127_v10 }
 0x39b   : > { %11975 = vst [vmem:[#allocation44_spill] sm:$0xff] %v9183_v54  ;;  %v9185_v20 = vpop.f32.mrf.mxu3 }
 0x39c   : > { %11976 = vst [vmem:[#allocation42_spill] sm:$0xff] %v9187_v33 }
 0x39d   : > { %v9189_v17 = vpop.f32.mrf.mxu0  ;;  %11978 = vst [vmem:[#allocation49_spill] sm:$0xff] %v9191_v45 }
 0x39e   : > { %11977 = vst [vmem:[#allocation9_spill] sm:$0xff] %v9189_v17 }
 0x3a0   : > { %6816 = vmatmul.msk.bf16.gmra.mxu3 %vm1109_vm2, %v11979_v58  ;;  %6832 = vmatmul.msk.bf16.gmra.mxu0 %vm1109_vm2, %v11979_v58  ;;  %v2573_v58 = vmax.f32 %v9185_v20, %v9179_v5 }
 0x3a1   : > { %v9203_v36 = vpop.f32.mrf.mxu2 }
 0x3a2   : > { %11980 = vst [vmem:[#allocation46_spill] sm:$0xff] %v9203_v36  ;;  %v2022_v1 = vpop.f32.mrf.mxu1 }
 0x3a3   : > { %v9201_v63 = vpop.f32.mrf.mxu3 }
 0x3a4   : > { %2565 = vmax.xlane.f32.xlu0 %v2564_v21 }
 0x3a5   : > { %v9205_v47 = vpop.f32.mrf.mxu0 }
 0x3a6   : > { %11981 = vst [vmem:[#allocation53_spill] sm:$0xff] %v9205_v47 }
 0x3a8   : > { %1427 = vmax.xlane.f32.xlu2 %v1426_v28  ;;  %v2570_v28 = vmax.f32 %v9177_v61, %v9171_v7 }
 0x3a9   : > { %1424 = vmax.xlane.f32.xlu1 %v1423_v31  ;;  %v1404_v55 = vpop.xlane.xlu1 %1403  ;;  %v2111_v54 = vpop.f32.mrf.mxu2  ;;  %v1429_v31 = vmax.f32 %v9141_v49, %v9131_v27 }
 0x3aa   : > { %v9215_v21 = vadd.f32 %v2111_v54, %v2022_v1  ;;  %v9219_v45 = vpop.f32.mrf.mxu1  ;;  %v1852_v1 = vadd.f32 %v1777_v42, %v1776_v53  ;;  %v1476_v10 = vsub.f32 %v9012_v52, %v1404_v55  ;;  %v1477_v32 = vsub.f32 %v8997_v41, %v1404_v55 }
 0x3ab   : > { %v9213_v33 = vpop.f32.mrf.mxu3  ;;  %11984 = vst [vmem:[#allocation54_spill] sm:$0xff] %v9219_v45  ;;  %v2567_v41 = vmax.f32 %v9169_v11, %v9161_v4 }
 0x3ac   : > { %11982 = vst [vmem:[#allocation50_spill] sm:$0xff] %v9213_v33  ;;  %2574 = vmax.xlane.f32.xlu0 %v2573_v58 }
 0x3ad   : > { %11983 = vst [vmem:[#allocation8_spill] sm:$0xff] %v9215_v21  ;;  %v9217_v36 = vpop.f32.mrf.mxu0 }
 0x3b0   : > { %6817 = vmatmul.msk.bf16.gmra.mxu3 %vm1109_vm2, %v11985_v6  ;;  %6833 = vmatmul.msk.bf16.gmra.mxu0 %vm1109_vm2, %v11985_v6  ;;  %v1783_v6 = vunpack.c.h.bf16 %v9159_v60  ;;  %v9245_v60 = vpop.permute.xlu2 %5518 }
 0x3b1   : > { %1430 = vmax.xlane.f32.xlu2 %v1429_v31  ;;  %v1407_v54 = vpop.xlane.xlu1 %1406  ;;  %2571 = vmax.xlane.f32.xlu1 %v2570_v28  ;;  %v9237_v2 = vpop.f32.mrf.mxu2  ;;  %11987 = vst [vmem:[#allocation10_spill] sm:$0xff] %v9245_v60 }
 0x3b2   : > { %v1478_v58 = vsub.f32 %v9026_v56, %v1407_v54  ;;  %v1479_v45 = vsub.f32 %v9018_v37, %v1407_v54  ;;  %11986 = vst [vmem:[#allocation21_spill] sm:$0xff] %v9237_v2  ;;  %v2027_v52 = vpop.f32.mrf.mxu1  ;;  %v1861_v54 = vadd.f32 %v1783_v6, %v1782_v25  ;;  %v2576_v6 = vmax.f32 %v9201_v63, %v9189_v17 }
 0x3b3   : > { %v9235_v21 = vpop.f32.mrf.mxu3 }
 0x3b4   : > { %1853 = vadd.xlane.f32.xlu0 %v1852_v1  ;;  %v1518_v31 = vpack.c.bf16 %v1478_v58, %v1476_v10  ;;  %v1519_v28 = vpack.c.bf16 %v1479_v45, %v1477_v32 }
 0x3b5   : > { %v9241_v42 = vpop.f32.mrf.mxu0 }
 0x3b6   : > { %v1572_v56 = vunpack.c.l.bf16 %v1518_v31  ;;  %v1573_v53 = vunpack.c.l.bf16 %v1519_v28  ;;  %v1574_v37 = vunpack.c.h.bf16 %v1518_v31  ;;  %v1575_v55 = vunpack.c.h.bf16 %v1519_v28  ;;  %v9258_v31 = vpop.permute.xlu0 %5504 }
 0x3b7   : > { %11990 = vst [vmem:[#allocation76_spill] sm:$0xff] %v9258_v31 }
 0x3b8   : > { %v1680_v35 = vmul.f32 1.442695, %v1572_v56  ;;  %v1682_v2 = vmul.f32 1.442695, %v1573_v53  ;;  %v1684_v1 = vmul.f32 1.442695, %v1574_v37  ;;  %v1471_v37 = vsub.f32 %v8952_v23, %v9197_v34 }
 0x3b9   : > { %2568 = vmax.xlane.f32.xlu2 %v2567_v41  ;;  %v1686_v59 = vmul.f32 1.442695, %v1575_v55  ;;  %1862 = vadd.xlane.f32.xlu1 %v1861_v54  ;;  %v2116_v10 = vpop.f32.mrf.mxu2  ;;  %v1470_v41 = vsub.f32 %v8958_v50, %v9197_v34  ;;  %v2579_v23 = vmax.f32 %v9213_v33, %v9205_v47 }
 0x3ba   : > { %7355 = vpow2.f32 %v1680_v35  ;;  %v9250_v32 = vadd.f32 %v2116_v10, %v2027_v52  ;;  %v9254_v25 = vpop.f32.mrf.mxu1  ;;  %v11991_v35 = vld [vmem:[#allocation36_spill] sm:$0xff] }
 0x3bb   : > { %v9247_v45 = vpop.f32.mrf.mxu3  ;;  %7357 = vpow2.f32 %v1682_v2  ;;  %11989 = vst [vmem:[#allocation75_spill] sm:$0xff] %v9254_v25 }
 0x3bc   : > { %1850 = vadd.xlane.f32.xlu0 %v9108_v13  ;;  %7359 = vpow2.f32 %v1684_v1  ;;  %11988 = vst [vmem:[#allocation11_spill] sm:$0xff] %v9250_v32 }
 0x3bd   : > { %v9252_v58 = vpop.f32.mrf.mxu0  ;;  %7361 = vpow2.f32 %v1686_v59 }
 0x3be   : > { %v1401_v34 = vpop.xlane.xlu0 %1400 }
 0x3bf   : > { %v1475_v60 = vsub.f32 %v8984_v57, %v1401_v34 }
 0x3c0   : > { %6818 = vmatmul.msk.bf16.gmra.mxu3 %vm1109_vm2, %v11991_v35  ;;  %v7356_v2 = vpop.eup %7355  ;;  %6834 = vmatmul.msk.bf16.gmra.mxu0 %vm1109_vm2, %v11991_v35 }
 0x3c1   : > { %2577 = vmax.xlane.f32.xlu2 %v2576_v6  ;;  %v7358_v13 = vpop.eup %7357  ;;  %1847 = vadd.xlane.f32.xlu1 %v9110_v8  ;;  %v9271_v55 = vpop.f32.mrf.mxu2 }
 0x3c2   : > { %v7360_v28 = vpop.eup %7359  ;;  %v1392_v52 = vpop.xlane.xlu2 %1391  ;;  %11992 = vst [vmem:[#allocation36_spill] sm:$0xff] %v9271_v55  ;;  %v1474_v55 = vsub.f32 %v8995_v22, %v1401_v34 }
 0x3c3   : > { %v9267_v56 = vpop.f32.mrf.mxu3  ;;  %v7362_v53 = vpop.eup %7361  ;;  %v1468_v54 = vsub.f32 %v8950_v14, %v1392_v52  ;;  %v1469_v1 = vsub.f32 %v8940_v38, %v1392_v52  ;;  %v9275_v59 = vpack.c.bf16 %v7360_v28, %v7356_v2 }
 0x3c4   : > { %v9279_v10 = vpack.c.bf16 %v7362_v53, %v7358_v13  ;;  %v2032_v50 = vpop.f32.mrf.mxu1 }
 0x3c5   : > { %v9277_v8 = vpop.f32.mrf.mxu0  ;;  %v1514_v6 = vpack.c.bf16 %v1470_v41, %v1468_v54  ;;  %v1515_v35 = vpack.c.bf16 %v1471_v37, %v1469_v1  ;;  %v1796_v32 = vunpack.c.l.bf16 %v9275_v59  ;;  %v1798_v25 = vunpack.c.h.bf16 %v9275_v59 }
 0x3c6   : > { %v1797_v14 = vunpack.c.l.bf16 %v9279_v10  ;;  %v1799_v38 = vunpack.c.h.bf16 %v9279_v10 }
 0x3c7   : > { %v1564_v2 = vunpack.c.l.bf16 %v1514_v6  ;;  %v1565_v28 = vunpack.c.l.bf16 %v1515_v35  ;;  %v1566_v52 = vunpack.c.h.bf16 %v1514_v6  ;;  %v1567_v13 = vunpack.c.h.bf16 %v1515_v35 }
 0x3c8   : > { %v9287_v53 = vadd.f32 %v1797_v14, %v1796_v32  ;;  %v9289_v41 = vadd.f32 %v1799_v38, %v1798_v25  ;;  %v2582_v38 = vmax.f32 %v9235_v21, %v9217_v36 }
 0x3c9   : > { %v1664_v37 = vmul.f32 1.442695, %v1564_v2  ;;  %v1666_v54 = vmul.f32 1.442695, %v1565_v28  ;;  %v1668_v1 = vmul.f32 1.442695, %v1566_v52  ;;  %2580 = vmax.xlane.f32.xlu1 %v2579_v23  ;;  %v2121_v17 = vpop.f32.mrf.mxu2 }
 0x3ca   : > { %11993 = vst [vmem:[#allocation77_spill] sm:$0xff] %v9287_v53  ;;  %v1670_v31 = vmul.f32 1.442695, %v1567_v13  ;;  %v1398_v47 = vpop.xlane.xlu2 %1397  ;;  %v9299_v35 = vadd.f32 %v2121_v17, %v2032_v50  ;;  %v11997_v28 = vld [vmem:[#allocation12_spill] sm:$0xff] }
 0x3cb   : > { %11994 = vst [vmem:[#allocation78_spill] sm:$0xff] %v9289_v41  ;;  %v9293_v33 = vpop.f32.mrf.mxu3  ;;  %7363 = vpow2.f32 %v1664_v37  ;;  %v1472_v6 = vsub.f32 %v8982_v15, %v1398_v47  ;;  %v1473_v32 = vsub.f32 %v8966_v0, %v1398_v47  ;;  %v1410_v15 = vpop.xlane.xlu0 %1409 }
 0x3cc   : > { %v2591_v25 = vmax.f32 %v9293_v33, %v9277_v8  ;;  %7365 = vpow2.f32 %v1666_v54  ;;  %11995 = vst [vmem:[#allocation79_spill] sm:$0xff] %v9299_v35  ;;  %v9301_v22 = vpop.f32.mrf.mxu1  ;;  %v1480_v13 = vsub.f32 %v9042_v30, %v1410_v15 }
 0x3cd   : > { %7367 = vpow2.f32 %v1668_v1  ;;  %11996 = vst [vmem:[#allocation80_spill] sm:$0xff] %v9301_v22  ;;  %v1516_v57 = vpack.c.bf16 %v1474_v55, %v1472_v6  ;;  %v1517_v23 = vpack.c.bf16 %v1475_v60, %v1473_v32  ;;  %v9303_v14 = vpop.f32.mrf.mxu0  ;;  %v1481_v6 = vsub.f32 %v9030_v9, %v1410_v15 }
 0x3ce   : > { %2592 = vmax.xlane.f32.xlu0 %v2591_v25  ;;  %7369 = vpow2.f32 %v1670_v31  ;;  %v2585_v9 = vmax.f32 %v9247_v45, %v9241_v42 }
 0x3cf   : > { %v1568_v0 = vunpack.c.l.bf16 %v1516_v57  ;;  %v1569_v47 = vunpack.c.l.bf16 %v1517_v23  ;;  %v1570_v34 = vunpack.c.h.bf16 %v1516_v57  ;;  %v1571_v2 = vunpack.c.h.bf16 %v1517_v23 }
 0x3d0   : > { %6819 = vmatmul.msk.bf16.gmra.mxu3 %vm1109_vm2, %v11997_v28  ;;  %6835 = vmatmul.msk.bf16.gmra.mxu0 %vm1109_vm2, %v11997_v28 }
 0x3d1   : > { %v7364_v17 = vpop.eup %7363  ;;  %v1672_v60 = vmul.f32 1.442695, %v1568_v0  ;;  %v1674_v55 = vmul.f32 1.442695, %v1569_v47  ;;  %v1676_v50 = vmul.f32 1.442695, %v1570_v34  ;;  %2583 = vmax.xlane.f32.xlu1 %v2582_v38  ;;  %v9315_v32 = vpop.f32.mrf.mxu2 }
 0x3d2   : > { %v7366_v52 = vpop.eup %7365  ;;  %v1678_v31 = vmul.f32 1.442695, %v1571_v2  ;;  %v1413_v37 = vpop.xlane.xlu2 %1412  ;;  %11998 = vst [vmem:[#allocation12_spill] sm:$0xff] %v9315_v32 }
 0x3d3   : > { %v9312_v54 = vpop.f32.mrf.mxu3  ;;  %v7368_v1 = vpop.eup %7367  ;;  %7371 = vpow2.f32 %v1672_v60  ;;  %v1482_v25 = vsub.f32 %v9054_v44, %v1413_v37  ;;  %v1483_v57 = vsub.f32 %v9046_v62, %v1413_v37 }
 0x3d4   : > { %v7370_v23 = vpop.eup %7369  ;;  %7373 = vpow2.f32 %v1674_v55  ;;  %v1738_v38 = vpack.c.bf16 %v7368_v1, %v7364_v17  ;;  %v2037_v0 = vpop.f32.mrf.mxu1  ;;  %v8058_v17 = vld [vmem:[#allocation2 + $0x28] sm:$0xff] }
 0x3d5   : > { %7375 = vpow2.f32 %v1676_v50  ;;  %v1520_v30 = vpack.c.bf16 %v1482_v25, %v1480_v13  ;;  %v1521_v47 = vpack.c.bf16 %v1483_v57, %v1481_v6  ;;  %v1739_v34 = vpack.c.bf16 %v7370_v23, %v7366_v52  ;;  %v9319_v2 = vpop.f32.mrf.mxu0  ;;  %v1416_v44 = vpop.xlane.xlu1 %1415 }
 0x3d6   : > { %7377 = vpow2.f32 %v1678_v31  ;;  %2061 = vmatmul.bf16.gmra.mxu1 %v1738_v38  ;;  %v1788_v15 = vunpack.c.l.bf16 %v1738_v38  ;;  %v1790_v28 = vunpack.c.h.bf16 %v1738_v38  ;;  %v1484_v57 = vsub.f32 %v9070_v39, %v1416_v44 }
 0x3d7   : > { %v1576_v60 = vunpack.c.l.bf16 %v1520_v30  ;;  %v1577_v62 = vunpack.c.l.bf16 %v1521_v47  ;;  %v1578_v37 = vunpack.c.h.bf16 %v1520_v30  ;;  %v1579_v55 = vunpack.c.h.bf16 %v1521_v47  ;;  %2150 = vmatmul.bf16.gmra.mxu2 %v1739_v34 }
 0x3d8   : > { %v1789_v50 = vunpack.c.l.bf16 %v1739_v34  ;;  %v1791_v52 = vunpack.c.h.bf16 %v1739_v34 }
 0x3d9   : > { %4676 = vrot.lane.b32.xlu2 %v8058_v17, %s8141_s14  ;;  %v7372_v13 = vpop.eup %7371  ;;  %v1688_v1 = vmul.f32 1.442695, %v1576_v60  ;;  %v1690_v6 = vmul.f32 1.442695, %v1577_v62  ;;  %v1692_v25 = vmul.f32 1.442695, %v1578_v37  ;;  %2586 = vmax.xlane.f32.xlu1 %v2585_v9  ;;  %v1485_v17 = vsub.f32 %v9056_v16, %v1416_v44  ;;  %v2126_v34 = vpop.f32.mrf.mxu2 }
 0x3da   : > { %v7374_v31 = vpop.eup %7373  ;;  %v1694_v23 = vmul.f32 1.442695, %v1579_v55  ;;  %v1419_v38 = vpop.xlane.xlu2 %1418  ;;  %v9327_v30 = vadd.f32 %v1789_v50, %v1788_v15  ;;  %v9329_v47 = vadd.f32 %v1791_v52, %v1790_v28  ;;  %v9334_v39 = vadd.f32 %v2126_v34, %v2037_v0 }
 0x3db   : > { %v9325_v41 = vpop.f32.mrf.mxu3  ;;  %v7376_v53 = vpop.eup %7375  ;;  %7379 = vpow2.f32 %v1688_v1  ;;  %v1486_v60 = vsub.f32 %v9082_v46, %v1419_v38  ;;  %v1487_v9 = vsub.f32 %v9074_v29, %v1419_v38  ;;  %v2588_v16 = vmax.f32 %v9267_v56, %v9252_v58  ;;  %v12003_v38 = vld [vmem:[#allocation41_spill] sm:$0xff] }
 0x3dc   : > { %11999 = vst [vmem:[#allocation81_spill] sm:$0xff] %v9327_v30  ;;  %v7378_v62 = vpop.eup %7377  ;;  %7381 = vpow2.f32 %v1690_v6  ;;  %v1740_v37 = vpack.c.bf16 %v7376_v53, %v7372_v13  ;;  %v9336_v55 = vpop.f32.mrf.mxu1 }
 0x3dd   : > { %12000 = vst [vmem:[#allocation82_spill] sm:$0xff] %v9329_v47  ;;  %7383 = vpow2.f32 %v1692_v25  ;;  %v1522_v15 = vpack.c.bf16 %v1486_v60, %v1484_v57  ;;  %v1523_v28 = vpack.c.bf16 %v1487_v9, %v1485_v17  ;;  %v9338_v50 = vpop.f32.mrf.mxu0  ;;  %v1741_v52 = vpack.c.bf16 %v7378_v62, %v7374_v31  ;;  %v1422_v32 = vpop.xlane.xlu0 %1421 }
 0x3de   : > { %12001 = vst [vmem:[#allocation83_spill] sm:$0xff] %v9334_v39  ;;  %7385 = vpow2.f32 %v1694_v23  ;;  %v1792_v46 = vunpack.c.l.bf16 %v1740_v37  ;;  %v1794_v44 = vunpack.c.h.bf16 %v1740_v37 }
 0x3df   : > { %12002 = vst [vmem:[#allocation84_spill] sm:$0xff] %v9336_v55  ;;  %v1580_v29 = vunpack.c.l.bf16 %v1522_v15  ;;  %v1581_v1 = vunpack.c.l.bf16 %v1523_v28  ;;  %v1582_v6 = vunpack.c.h.bf16 %v1522_v15  ;;  %v1583_v0 = vunpack.c.h.bf16 %v1523_v28 }
 0x3e0   : > { %6820 = vmatmul.msk.bf16.gmra.mxu3 %vm1109_vm2, %v12003_v38  ;;  %6836 = vmatmul.msk.bf16.gmra.mxu0 %vm1109_vm2, %v12003_v38  ;;  %v1793_v53 = vunpack.c.l.bf16 %v1741_v52  ;;  %v1795_v13 = vunpack.c.h.bf16 %v1741_v52 }
 0x3e1   : > { %v7380_v25 = vpop.eup %7379  ;;  %v1696_v31 = vmul.f32 1.442695, %v1580_v29  ;;  %v1698_v57 = vmul.f32 1.442695, %v1581_v1  ;;  %v1700_v17 = vmul.f32 1.442695, %v1582_v6  ;;  %2589 = vmax.xlane.f32.xlu1 %v2588_v16  ;;  %v9352_v28 = vpop.f32.mrf.mxu2 }
 0x3e2   : > { %v7382_v23 = vpop.eup %7381  ;;  %v1702_v34 = vmul.f32 1.442695, %v1583_v0  ;;  %v9348_v9 = vadd.f32 %v1793_v53, %v1792_v46  ;;  %v9350_v62 = vadd.f32 %v1795_v13, %v1794_v44  ;;  %12006 = vst [vmem:[#allocation86_spill] sm:$0xff] %v9352_v28  ;;  %v2594_v46 = vmax.f32 %v9312_v54, %v9303_v14 }
 0x3e3   : > { %v9346_v60 = vpop.f32.mrf.mxu3  ;;  %v7384_v15 = vpop.eup %7383  ;;  %7387 = vpow2.f32 %v1696_v31 }
 0x3e4   : > { %12004 = vst [vmem:[#allocation41_spill] sm:$0xff] %v9348_v9  ;;  %v7386_v38 = vpop.eup %7385  ;;  %7389 = vpow2.f32 %v1698_v57  ;;  %v1744_v47 = vpack.c.bf16 %v7384_v15, %v7380_v25  ;;  %v2042_v29 = vpop.f32.mrf.mxu1 }
 0x3e5   : > { %12005 = vst [vmem:[#allocation85_spill] sm:$0xff] %v9350_v62  ;;  %7391 = vpow2.f32 %v1700_v17  ;;  %v9354_v1 = vpop.f32.mrf.mxu0  ;;  %v1745_v16 = vpack.c.bf16 %v7386_v38, %v7382_v23 }
 0x3e6   : > { %7393 = vpow2.f32 %v1702_v34  ;;  %2066 = vmatmul.bf16.gmra.mxu1 %v1740_v37  ;;  %v1802_v6 = vunpack.c.h.bf16 %v1744_v47  ;;  %v1800_v0 = vunpack.c.l.bf16 %v1744_v47 }
 0x3e7   : > { %2155 = vmatmul.bf16.gmra.mxu2 %v1741_v52  ;;  %v1803_v44 = vunpack.c.h.bf16 %v1745_v16  ;;  %v1801_v53 = vunpack.c.l.bf16 %v1745_v16 }
 0x3e9   : > { %v7388_v13 = vpop.eup %7387  ;;  %2595 = vmax.xlane.f32.xlu1 %v2594_v46  ;;  %v9358_v31 = vadd.f32 %v1803_v44, %v1802_v6  ;;  %v9360_v25 = vadd.f32 %v1801_v53, %v1800_v0  ;;  %v2131_v34 = vpop.f32.mrf.mxu2  ;;  %v2597_v44 = vmax.f32 %v9325_v41, %v9319_v2  ;;  %v12011_v53 = vld [vmem:[#allocation47_spill] sm:$0xff] }
 0x3ea   : > { %v7390_v57 = vpop.eup %7389  ;;  %v9366_v38 = vadd.f32 %v2131_v34, %v2042_v29 }
 0x3eb   : > { %12007 = vst [vmem:[#allocation87_spill] sm:$0xff] %v9358_v31  ;;  %v9362_v17 = vpop.f32.mrf.mxu3  ;;  %v7392_v23 = vpop.eup %7391  ;;  %v12018_v31 = vld [vmem:[#allocation13_spill] sm:$0xff] }
 0x3ec   : > { %12008 = vst [vmem:[#allocation88_spill] sm:$0xff] %v9360_v25  ;;  %v2603_v37 = vmax.f32 %v9362_v17, %v9354_v1  ;;  %v7394_v15 = vpop.eup %7393  ;;  %v1746_v52 = vpack.c.bf16 %v7392_v23, %v7388_v13  ;;  %v9368_v30 = vpop.f32.mrf.mxu1 }
 0x3ed   : > { %12009 = vst [vmem:[#allocation89_spill] sm:$0xff] %v9366_v38  ;;  %v9370_v62 = vpop.f32.mrf.mxu0  ;;  %v1747_v6 = vpack.c.bf16 %v7394_v15, %v7390_v57  ;;  %v2600_v38 = vmax.f32 %v9346_v60, %v9338_v50 }
 0x3ee   : > { %12010 = vst [vmem:[#allocation90_spill] sm:$0xff] %v9368_v30  ;;  %2604 = vmax.xlane.f32.xlu0 %v2603_v37  ;;  %v1804_v0 = vunpack.c.l.bf16 %v1746_v52  ;;  %v1806_v46 = vunpack.c.h.bf16 %v1746_v52  ;;  %v12022_v30 = vld [vmem:[#allocation16_spill] sm:$0xff] }
 0x3ef   : > { %v1805_v9 = vunpack.c.l.bf16 %v1747_v6  ;;  %v1807_v25 = vunpack.c.h.bf16 %v1747_v6 }
 0x3f0   : > { %6821 = vmatmul.msk.bf16.gmra.mxu3 %vm1109_vm2, %v12011_v53  ;;  %6837 = vmatmul.msk.bf16.gmra.mxu0 %vm1109_vm2, %v12011_v53 }
 0x3f1   : > { %2598 = vmax.xlane.f32.xlu1 %v2597_v44  ;;  %v9378_v29 = vadd.f32 %v1805_v9, %v1804_v0  ;;  %v9380_v13 = vadd.f32 %v1807_v25, %v1806_v46  ;;  %v9384_v57 = vpop.f32.mrf.mxu2 }
 0x3f2   : > { %12014 = vst [vmem:[#allocation92_spill] sm:$0xff] %v9384_v57  ;;  %v9426_v57 = vpop.permute.xlu0 %4674 }
 0x3f3   : > { %12012 = vst [vmem:[#allocation47_spill] sm:$0xff] %v9378_v29  ;;  %v9382_v23 = vpop.f32.mrf.mxu3 }
 0x3f4   : > { %12013 = vst [vmem:[#allocation91_spill] sm:$0xff] %v9380_v13  ;;  %v2606_v34 = vmax.f32 %v9382_v23, %v9370_v62  ;;  %v2047_v37 = vpop.f32.mrf.mxu1 }
 0x3f5   : > { %v9388_v15 = vpop.f32.mrf.mxu0  ;;  %12021 = vst [vmem:[#allocation97_spill] sm:$0xff] %v9426_v57 }
 0x3f6   : > { %2607 = vmax.xlane.f32.xlu0 %v2606_v34  ;;  %2071 = vmatmul.bf16.gmra.mxu1 %v9275_v59  ;;  %v9404_v34 = vpop.permute.xlu1 %5502 }
 0x3f7   : > { %2160 = vmatmul.bf16.gmra.mxu2 %v9279_v10 }
 0x3f9   : > { %v2136_v9 = vpop.f32.mrf.mxu2 }
 0x3fa   : > { %v9396_v0 = vadd.f32 %v2136_v9, %v2047_v37 }
 0x3fb   : > { %v9392_v44 = vpop.f32.mrf.mxu3 }
 0x3fc   : > { %v2609_v25 = vmax.f32 %v9392_v44, %v9388_v15  ;;  %12015 = vst [vmem:[#allocation93_spill] sm:$0xff] %v9396_v0  ;;  %v9398_v46 = vpop.f32.mrf.mxu1 }
 0x3fd   : > { %12016 = vst [vmem:[#allocation94_spill] sm:$0xff] %v9398_v46  ;;  %v9400_v53 = vpop.f32.mrf.mxu0 }
 0x3fe   : > { %12017 = vst [vmem:[#allocation95_spill] sm:$0xff] %v9400_v53  ;;  %2610 = vmax.xlane.f32.xlu1 %v2609_v25  ;;  %v9416_v25 = vpop.permute.xlu1 %5500 }
 0x400   : > { %6854 = vmatmul.msk.bf16.vlgmr.msrb.gmra.mxu3 %vm1109_vm2, %v12018_v31  ;;  %6870 = vmatmul.msk.bf16.vlgmr.msrb.gmra.mxu0 %vm1109_vm2, %v12018_v31 }
 0x401   : > { %v9411_v10 = vpop.f32.mrf.mxu2 }
 0x402   : > { %1859 = vadd.xlane.f32.xlu2 %v9167_v19  ;;  %12019 = vst [vmem:[#allocation13_spill] sm:$0xff] %v9411_v10 }
 0x403   : > { %v9409_v59 = vpop.f32.mrf.mxu3 }
 0x404   : > { %v2052_v9 = vpop.f32.mrf.mxu1  ;;  %v2612_v55 = vmax.f32 %v9409_v59, %v9400_v53 }
 0x405   : > { %v9413_v37 = vpop.f32.mrf.mxu0 }
 0x406   : > { %2076 = vmatmul.bf16.gmra.mxu1 %v1744_v47 }
 0x407   : > { %2165 = vmatmul.bf16.gmra.mxu2 %v1745_v16 }
 0x409   : > { %v2141_v35 = vpop.f32.mrf.mxu2 }
 0x40a   : > { %1856 = vadd.xlane.f32.xlu2 %v9138_v18  ;;  %v9420_v31 = vadd.f32 %v2141_v35, %v2052_v9  ;;  %v9436_v35 = vpop.permute.xlu2 %5516  ;;  %v9440_v9 = vpop.permute.xlu1 %4672 }
 0x40b   : > { %v9418_v22 = vpop.f32.mrf.mxu3  ;;  %12025 = vst [vmem:[#allocation99_spill] sm:$0xff] %v9440_v9  ;;  %v12029_v9 = vld [vmem:[#allocation17_spill] sm:$0xff] }
 0x40c   : > { %12020 = vst [vmem:[#allocation96_spill] sm:$0xff] %v9420_v31  ;;  %v9430_v47 = vpop.f32.mrf.mxu1  ;;  %v1489_v31 = vsub.f32 %v9086_v26, %v1422_v32 }
 0x40d   : > { %v9422_v19 = vpop.f32.mrf.mxu0  ;;  %12023 = vst [vmem:[#allocation16_spill] sm:$0xff] %v9430_v47 }
 0x410   : > { %6855 = vmatmul.msk.bf16.gmra.mxu3 %vm1109_vm2, %v12022_v30  ;;  %6871 = vmatmul.msk.bf16.gmra.mxu0 %vm1109_vm2, %v12022_v30 }
 0x411   : > { %v9438_v16 = vpop.f32.mrf.mxu2 }
 0x412   : > { %2601 = vmax.xlane.f32.xlu2 %v2600_v38  ;;  %12024 = vst [vmem:[#allocation98_spill] sm:$0xff] %v9438_v16 }
 0x413   : > { %v9434_v18 = vpop.f32.mrf.mxu3 }
 0x414   : > { %v2057_v30 = vpop.f32.mrf.mxu1 }
 0x415   : > { %v9442_v28 = vpop.f32.mrf.mxu0 }
 0x416   : > { %12026 = vst [vmem:[#allocation100_spill] sm:$0xff] %v9442_v28  ;;  %2081 = vmatmul.bf16.gmra.mxu1 %v1746_v52  ;;  %v1488_v52 = vsub.f32 %v9098_v40, %v1422_v32 }
 0x417   : > { %2170 = vmatmul.bf16.gmra.mxu2 %v1747_v6  ;;  %v9446_v13 = vpop.xlane.xlu0 %2565 }
 0x419   : > { %v2146_v0 = vpop.f32.mrf.mxu2 }
 0x41a   : > { %2613 = vmax.xlane.f32.xlu2 %v2612_v55  ;;  %v9452_v29 = vadd.f32 %v2146_v0, %v2057_v30 }
 0x41b   : > { %v9448_v38 = vpop.f32.mrf.mxu3  ;;  %v1428_v10 = vpop.xlane.xlu2 %1427 }
 0x41c   : > { %12027 = vst [vmem:[#allocation101_spill] sm:$0xff] %v9448_v38  ;;  %v2621_v46 = vmax.f32 %v9448_v38, %v9442_v28  ;;  %v1425_v39 = vpop.xlane.xlu1 %1424 }
 0x41d   : > { %12028 = vst [vmem:[#allocation102_spill] sm:$0xff] %v9452_v29  ;;  %v1490_v6 = vsub.f32 %v9112_v12, %v1425_v39  ;;  %v1491_v16 = vsub.f32 %v9104_v51, %v1425_v39  ;;  %v9458_v55 = vpop.f32.mrf.mxu0  ;;  %v1492_v12 = vsub.f32 %v9125_v3, %v1428_v10  ;;  %v1493_v51 = vsub.f32 %v9114_v24, %v1428_v10 }
 0x41e   : > { %2622 = vmax.xlane.f32.xlu0 %v2621_v46 }
 0x41f   : > { %v1524_v47 = vpack.c.bf16 %v1490_v6, %v1488_v52  ;;  %v1525_v57 = vpack.c.bf16 %v1491_v16, %v1489_v31  ;;  %v2575_v26 = vpop.xlane.xlu0 %2574 }
 0x420   : > { %6856 = vmatmul.msk.bf16.gmra.mxu3 %vm1109_vm2, %v12029_v9  ;;  %6872 = vmatmul.msk.bf16.gmra.mxu0 %vm1109_vm2, %v12029_v9  ;;  %v2666_v6 = vsub.f32 %v9185_v20, %v2575_v26 }
 0x421   : > { %v1584_v0 = vunpack.c.l.bf16 %v1524_v47  ;;  %v1585_v30 = vunpack.c.l.bf16 %v1525_v57  ;;  %v1586_v40 = vunpack.c.h.bf16 %v1524_v47  ;;  %v1587_v29 = vunpack.c.h.bf16 %v1525_v57 }
 0x422   : > { %v2667_v57 = vsub.f32 %v9179_v5, %v2575_v26 }
 0x423   : > { %v9465_v32 = vpop.f32.mrf.mxu3  ;;  %v1704_v39 = vmul.f32 1.442695, %v1584_v0  ;;  %v1706_v46 = vmul.f32 1.442695, %v1585_v30  ;;  %v1708_v31 = vmul.f32 1.442695, %v1586_v40 }
 0x424   : > { %v1431_v16 = vpop.xlane.xlu2 %1430  ;;  %v1710_v52 = vmul.f32 1.442695, %v1587_v29  ;;  %v2572_v47 = vpop.xlane.xlu1 %2571 }
 0x425   : > { %v1494_v9 = vsub.f32 %v9141_v49, %v1431_v16  ;;  %v1495_v28 = vsub.f32 %v9131_v27, %v1431_v16  ;;  %7395 = vpow2.f32 %v1704_v39  ;;  %v2664_v3 = vsub.f32 %v9177_v61, %v2572_v47  ;;  %v9474_v24 = vpop.f32.mrf.mxu0 }
 0x426   : > { %v2665_v38 = vsub.f32 %v9171_v7, %v2572_v47  ;;  %7397 = vpow2.f32 %v1706_v46 }
 0x427   : > { %v1526_v10 = vpack.c.bf16 %v1494_v9, %v1492_v12  ;;  %v1527_v0 = vpack.c.bf16 %v1495_v28, %v1493_v51  ;;  %7399 = vpow2.f32 %v1708_v31  ;;  %v2726_v29 = vpack.c.bf16 %v2666_v6, %v2664_v3 }
 0x428   : > { %v2727_v20 = vpack.c.bf16 %v2667_v57, %v2665_v38  ;;  %7401 = vpow2.f32 %v1710_v52  ;;  %v2660_v38 = vsub.f32 %v9155_v48, %v9446_v13  ;;  %v2661_v31 = vsub.f32 %v9143_v43, %v9446_v13 }
 0x429   : > { %v1588_v49 = vunpack.c.l.bf16 %v1526_v10  ;;  %v1589_v30 = vunpack.c.l.bf16 %v1527_v0  ;;  %v1590_v27 = vunpack.c.h.bf16 %v1526_v10  ;;  %v1591_v40 = vunpack.c.h.bf16 %v1527_v0 }
 0x42a   : > { %v2760_v39 = vunpack.c.l.bf16 %v2726_v29  ;;  %v2761_v16 = vunpack.c.l.bf16 %v2727_v20  ;;  %v2762_v5 = vunpack.c.h.bf16 %v2726_v29  ;;  %v2763_v7 = vunpack.c.h.bf16 %v2727_v20 }
 0x42b   : > { %v1712_v26 = vmul.f32 1.442695, %v1588_v49  ;;  %v1714_v61 = vmul.f32 1.442695, %v1589_v30  ;;  %v1716_v53 = vmul.f32 1.442695, %v1590_v27  ;;  %v9476_v47 = vpop.f32.mrf.mxu3  ;;  %v7396_v46 = vpop.eup %7395 }
 0x42c   : > { %v1718_v12 = vmul.f32 1.442695, %v1591_v40  ;;  %v2569_v28 = vpop.xlane.xlu2 %2568  ;;  %v7398_v51 = vpop.eup %7397  ;;  %v2828_v52 = vmul.f32 1.442695, %v2760_v39  ;;  %v2830_v57 = vmul.f32 1.442695, %v2761_v16 }
 0x42d   : > { %7403 = vpow2.f32 %v1712_v26  ;;  %v9482_v6 = vpop.xlane.xlu1 %1862  ;;  %v7400_v9 = vpop.eup %7399  ;;  %v2662_v3 = vsub.f32 %v9169_v11, %v2569_v28  ;;  %v2663_v10 = vsub.f32 %v9161_v4, %v2569_v28  ;;  %v2832_v20 = vmul.f32 1.442695, %v2762_v5  ;;  %v12031_v27 = vld [vmem:[#allocation52_spill] sm:$0xff] }
 0x42e   : > { %12030 = vst [vmem:[#allocation17_spill] sm:$0xff] %v9482_v6  ;;  %7405 = vpow2.f32 %v1714_v61  ;;  %v9486_v0 = vpop.f32.mrf.mxu0  ;;  %v7402_v29 = vpop.eup %7401  ;;  %v2834_v48 = vmul.f32 1.442695, %v2763_v7  ;;  %v1748_v49 = vpack.c.bf16 %v7400_v9, %v7396_v46 }
 0x42f   : > { %7407 = vpow2.f32 %v1716_v53  ;;  %v2724_v43 = vpack.c.bf16 %v2662_v3, %v2660_v38  ;;  %v2725_v13 = vpack.c.bf16 %v2663_v10, %v2661_v31  ;;  %v1749_v30 = vpack.c.bf16 %v7402_v29, %v7398_v51 }
 0x430   : > { %7409 = vpow2.f32 %v1718_v12  ;;  %6857 = vmatmul.msk.bf16.gmra.mxu3 %vm1109_vm2, %v12031_v27  ;;  %2086 = vmatmul.bf16.gmra.mxu1 %v1748_v49  ;;  %v1808_v4 = vunpack.c.l.bf16 %v1748_v49  ;;  %v1810_v31 = vunpack.c.h.bf16 %v1748_v49 }
 0x431   : > { %7411 = vpow2.f32 %v2828_v52  ;;  %6873 = vmatmul.msk.bf16.gmra.mxu0 %vm1109_vm2, %v12031_v27  ;;  %v2756_v11 = vunpack.c.l.bf16 %v2724_v43  ;;  %v2757_v40 = vunpack.c.l.bf16 %v2725_v13  ;;  %v2758_v53 = vunpack.c.h.bf16 %v2724_v43  ;;  %2175 = vmatmul.bf16.gmra.mxu2 %v1749_v30 }
 0x432   : > { %7413 = vpow2.f32 %v2830_v57  ;;  %v2759_v16 = vunpack.c.h.bf16 %v2725_v13  ;;  %v1809_v26 = vunpack.c.l.bf16 %v1749_v30 }
 0x433   : > { %v7404_v39 = vpop.eup %7403  ;;  %7415 = vpow2.f32 %v2832_v20  ;;  %v9492_v5 = vpop.f32.mrf.mxu3  ;;  %v2820_v7 = vmul.f32 1.442695, %v2756_v11  ;;  %v2822_v46 = vmul.f32 1.442695, %v2757_v40  ;;  %v2824_v12 = vmul.f32 1.442695, %v2758_v53 }
 0x434   : > { %v7406_v61 = vpop.eup %7405  ;;  %7417 = vpow2.f32 %v2834_v48  ;;  %v2826_v51 = vmul.f32 1.442695, %v2759_v16  ;;  %v9498_v3 = vadd.f32 %v1809_v26, %v1808_v4  ;;  %v1811_v20 = vunpack.c.h.bf16 %v1749_v30 }
 0x435   : > { %v7408_v28 = vpop.eup %7407  ;;  %v9494_v38 = vpop.xlane.xlu1 %1847  ;;  %7419 = vpow2.f32 %v2820_v7 }
 0x436   : > { %12032 = vst [vmem:[#allocation52_spill] sm:$0xff] %v9494_v38  ;;  %v7410_v52 = vpop.eup %7409  ;;  %v9496_v9 = vpop.f32.mrf.mxu0  ;;  %v1750_v57 = vpack.c.bf16 %v7408_v28, %v7404_v39  ;;  %7421 = vpow2.f32 %v2822_v46  ;;  %v9500_v49 = vadd.f32 %v1811_v20, %v1810_v31 }
 0x437   : > { %12033 = vst [vmem:[#allocation103_spill] sm:$0xff] %v9498_v3  ;;  %v7412_v10 = vpop.eup %7411  ;;  %v1751_v29 = vpack.c.bf16 %v7410_v52, %v7406_v61  ;;  %7423 = vpow2.f32 %v2824_v12  ;;  %v2578_v39 = vpop.xlane.xlu2 %2577  ;;  %v12039_v3 = vld [vmem:[#allocation56_spill] sm:$0xff] }
 0x438   : > { %v7414_v48 = vpop.eup %7413  ;;  %v1814_v43 = vunpack.c.h.bf16 %v1750_v57  ;;  %v1812_v13 = vunpack.c.l.bf16 %v1750_v57  ;;  %7425 = vpow2.f32 %v2826_v51  ;;  %12034 = vst [vmem:[#allocation104_spill] sm:$0xff] %v9500_v49  ;;  %v2668_v52 = vsub.f32 %v9201_v63, %v2578_v39  ;;  %v9516_v49 = vpop.xlane.xlu0 %1853 }
 0x439   : > { %v7416_v27 = vpop.eup %7415  ;;  %v1815_v11 = vunpack.c.h.bf16 %v1751_v29  ;;  %v1813_v40 = vunpack.c.l.bf16 %v1751_v29 }
 0x43a   : > { %v7418_v53 = vpop.eup %7417  ;;  %v9502_v16 = vpack.c.bf16 %v7416_v27, %v7412_v10  ;;  %v12035_v10 = vld [vmem:[#allocation9_spill] sm:$0xff] }
 0x43b   : > { %v1909_v4 = vadd.f32 %v1815_v11, %v1814_v43  ;;  %v1906_v26 = vadd.f32 %v1813_v40, %v1812_v13  ;;  %v9504_v7 = vpack.c.bf16 %v7418_v53, %v7414_v48  ;;  %v9506_v61 = vpop.f32.mrf.mxu3  ;;  %v7420_v30 = vpop.eup %7419  ;;  %v2669_v20 = vsub.f32 %v12035_v10, %v2578_v39  ;;  %v12036_v43 = vld [vmem:[#allocation50_spill] sm:$0xff]  ;;  %v12037_v48 = vld [vmem:[#allocation53_spill] sm:$0xff]  ;;  %12038 = vst [vmem:[#allocation9_spill] sm:$0xff] %v9516_v49  ;;  %v12048_v49 = vld [vmem:[#allocation43_spill] sm:$0xff] }
 0x43c   : > { %v2986_v46 = vunpack.c.h.bf16 %v9502_v16  ;;  %v7422_v12 = vpop.eup %7421  ;;  %v2615_v39 = vmax.f32 %v9418_v22, %v9413_v37 }
 0x43d   : > { %1910 = vadd.xlane.f32.xlu1 %v1909_v4  ;;  %1907 = vadd.xlane.f32.xlu2 %v1906_v26  ;;  %v2987_v28 = vunpack.c.h.bf16 %v9504_v7  ;;  %v2581_v51 = vpop.xlane.xlu1 %2580  ;;  %v7424_v31 = vpop.eup %7423 }
 0x43e   : > { %v2670_v13 = vsub.f32 %v12036_v43, %v2581_v51  ;;  %v2671_v27 = vsub.f32 %v12037_v48, %v2581_v51  ;;  %v9514_v11 = vpop.f32.mrf.mxu0  ;;  %v7426_v40 = vpop.eup %7425  ;;  %v2948_v38 = vpack.c.bf16 %v7424_v31, %v7420_v30  ;;  %v2624_v30 = vmax.f32 %v9465_v32, %v9458_v55 }
 0x43f   : > { %v3053_v53 = vadd.f32 %v2987_v28, %v2986_v46  ;;  %v2949_v6 = vpack.c.bf16 %v7426_v40, %v7422_v12  ;;  %v2984_v40 = vunpack.c.l.bf16 %v9502_v16 }
 0x440   : > { %v2728_v4 = vpack.c.bf16 %v2670_v13, %v2668_v52  ;;  %v2729_v26 = vpack.c.bf16 %v2671_v27, %v2669_v20  ;;  %6858 = vmatmul.msk.bf16.gmra.mxu3 %vm1109_vm2, %v12039_v3  ;;  %2091 = vmatmul.bf16.gmra.mxu1 %v1750_v57  ;;  %v2982_v63 = vunpack.c.h.bf16 %v2948_v38  ;;  %v2980_v31 = vunpack.c.l.bf16 %v2948_v38 }
 0x441   : > { %3054 = vadd.xlane.f32.xlu0 %v3053_v53  ;;  %2180 = vmatmul.bf16.gmra.mxu2 %v1751_v29  ;;  %v2983_v12 = vunpack.c.h.bf16 %v2949_v6  ;;  %v2981_v29 = vunpack.c.l.bf16 %v2949_v6  ;;  %v2985_v53 = vunpack.c.l.bf16 %v9504_v7 }
 0x442   : > { %v2764_v51 = vunpack.c.l.bf16 %v2728_v4  ;;  %v2765_v10 = vunpack.c.l.bf16 %v2729_v26  ;;  %v2766_v43 = vunpack.c.h.bf16 %v2728_v4  ;;  %6874 = vmatmul.msk.bf16.gmra.mxu0 %vm1109_vm2, %v12039_v3  ;;  %v2767_v46 = vunpack.c.h.bf16 %v2729_v26  ;;  %v9536_v26 = vpop.xlane.xlu0 %1850 }
 0x443   : > { %v9526_v28 = vpop.f32.mrf.mxu3  ;;  %v9528_v27 = vadd.f32 %v2983_v12, %v2982_v63  ;;  %v9534_v4 = vadd.f32 %v2981_v29, %v2980_v31  ;;  %12042 = vst [vmem:[#allocation56_spill] sm:$0xff] %v9536_v26  ;;  %v3050_v63 = vadd.f32 %v2985_v53, %v2984_v40  ;;  %v12044_v26 = vld [vmem:[#allocation14_spill] sm:$0xff] }
 0x444   : > { %v2836_v57 = vmul.f32 1.442695, %v2764_v51  ;;  %v2838_v52 = vmul.f32 1.442695, %v2765_v10  ;;  %v2840_v20 = vmul.f32 1.442695, %v2766_v43  ;;  %v9542_v43 = vpop.f32.mrf.mxu1 }
 0x445   : > { %v2842_v13 = vmul.f32 1.442695, %v2767_v46  ;;  %2625 = vmax.xlane.f32.xlu1 %v2624_v30  ;;  %2616 = vmax.xlane.f32.xlu2 %v2615_v39  ;;  %v2584_v48 = vpop.xlane.xlu1 %2583  ;;  %12040 = vst [vmem:[#allocation50_spill] sm:$0xff] %v9528_v27  ;;  %v2618_v39 = vmax.f32 %v9434_v18, %v9422_v19 }
 0x446   : > { %7427 = vpow2.f32 %v2836_v57  ;;  %v9530_v3 = vpop.f32.mrf.mxu0  ;;  %12041 = vst [vmem:[#allocation53_spill] sm:$0xff] %v9534_v4  ;;  %v2672_v31 = vsub.f32 %v9235_v21, %v2584_v48  ;;  %v2673_v57 = vsub.f32 %v9217_v36, %v2584_v48 }
 0x447   : > { %7429 = vpow2.f32 %v2838_v52  ;;  %12043 = vst [vmem:[#allocation105_spill] sm:$0xff] %v9542_v43 }
 0x448   : > { %7431 = vpow2.f32 %v2840_v20 }
 0x449   : > { %7433 = vpow2.f32 %v2842_v13 }
 0x44a   : > { %v2593_v36 = vpop.xlane.xlu0 %2592 }
 0x44b   : > { %v9540_v51 = vpop.f32.mrf.mxu3 }
 0x44c   : > { %v7428_v10 = vpop.eup %7427 }
 0x44d   : > { %v7430_v30 = vpop.eup %7429  ;;  %3051 = vadd.xlane.f32.xlu1 %v3050_v63  ;;  %2619 = vmax.xlane.f32.xlu2 %v2618_v39  ;;  %v2587_v46 = vpop.xlane.xlu1 %2586 }
 0x44e   : > { %v7432_v12 = vpop.eup %7431  ;;  %v2674_v52 = vsub.f32 %v9247_v45, %v2587_v46  ;;  %v2675_v20 = vsub.f32 %v9241_v42, %v2587_v46  ;;  %v9548_v13 = vpop.f32.mrf.mxu0  ;;  %v12045_v46 = vld [vmem:[#allocation34_spill] sm:$0xff] }
 0x44f   : > { %v7434_v29 = vpop.eup %7433  ;;  %v9550_v40 = vpack.c.bf16 %v7432_v12, %v7428_v10  ;;  %v9558_v10 = vpop.f32.mrf.mxu2  ;;  %v2627_v12 = vmax.f32 %v9476_v47, %v9474_v24 }
 0x450   : > { %v2730_v53 = vpack.c.bf16 %v2674_v52, %v2672_v31  ;;  %v2731_v43 = vpack.c.bf16 %v2675_v20, %v2673_v57  ;;  %6859 = vmatmul.msk.bf16.gmra.mxu3 %vm1109_vm2, %v12044_v26  ;;  %v9554_v39 = vpack.c.bf16 %v7434_v29, %v7430_v30  ;;  %3196 = vmatmul.bf16.vlgmr.msra.gmra.mxu1 %v2948_v38  ;;  %v12047_v31 = vld [vmem:[#allocation32_spill] sm:$0xff] }
 0x451   : > { %v2988_v21 = vunpack.c.l.bf16 %v9550_v40  ;;  %3285 = vmatmul.bf16.vlgmr.msra.gmra.mxu2 %v2949_v6  ;;  %5548 = vmatpush.bf16.msra.mxu1 %v12045_v46  ;;  %12046 = vst [vmem:[#allocation14_spill] sm:$0xff] %v9558_v10  ;;  %v2630_v30 = vmax.f32 %v9492_v5, %v9486_v0  ;;  %v2678_v29 = vsub.f32 %v9293_v33, %v2593_v36  ;;  %v2990_v33 = vunpack.c.h.bf16 %v9550_v40 }
 0x452   : > { %v2768_v48 = vunpack.c.l.bf16 %v2730_v53  ;;  %v2769_v45 = vunpack.c.l.bf16 %v2731_v43  ;;  %v2770_v63 = vunpack.c.h.bf16 %v2730_v53  ;;  %v2771_v42 = vunpack.c.h.bf16 %v2731_v43  ;;  %5637 = vmatpush.bf16.msra.mxu2 %v12047_v31  ;;  %6875 = vmatmul.msk.bf16.gmra.mxu0 %vm1109_vm2, %v12044_v26 }
 0x453   : > { %v2989_v38 = vunpack.c.l.bf16 %v9554_v39  ;;  %v9568_v57 = vpop.f32.mrf.mxu3  ;;  %v2062_v20 = vpop.f32.mrf.mxu1  ;;  %v2679_v31 = vsub.f32 %v9277_v8, %v2593_v36 }
 0x454   : > { %v2844_v6 = vmul.f32 1.442695, %v2768_v48  ;;  %v2846_v43 = vmul.f32 1.442695, %v2769_v45  ;;  %v2848_v52 = vmul.f32 1.442695, %v2770_v63 }
 0x455   : > { %v2850_v53 = vmul.f32 1.442695, %v2771_v42  ;;  %2628 = vmax.xlane.f32.xlu1 %v2627_v12  ;;  %2631 = vmax.xlane.f32.xlu2 %v2630_v30  ;;  %v3056_v46 = vadd.f32 %v2989_v38, %v2988_v21  ;;  %v2590_v10 = vpop.xlane.xlu1 %2589  ;;  %v12049_v45 = vld [vmem:[#allocation31_spill] sm:$0xff]  ;;  %v2991_v21 = vunpack.c.h.bf16 %v9554_v39 }
 0x456   : > { %7435 = vpow2.f32 %v2844_v6  ;;  %5549 = vmatpush.bf16.msra.mxu1 %v12048_v49  ;;  %v2676_v26 = vsub.f32 %v9267_v56, %v2590_v10  ;;  %v2677_v4 = vsub.f32 %v9252_v58, %v2590_v10  ;;  %v9575_v48 = vpop.f32.mrf.mxu0  ;;  %5638 = vmatpush.bf16.msra.mxu2 %v12049_v45  ;;  %v12050_v12 = vld [vmem:[#allocation35_spill] sm:$0xff]  ;;  %v12051_v58 = vld [vmem:[#allocation38_spill] sm:$0xff] }
 0x457   : > { %7437 = vpow2.f32 %v2846_v43  ;;  %3057 = vadd.xlane.f32.xlu0 %v3056_v46  ;;  %v3059_v30 = vadd.f32 %v2991_v21, %v2990_v33 }
 0x458   : > { %7439 = vpow2.f32 %v2848_v52  ;;  %v2732_v63 = vpack.c.bf16 %v2678_v29, %v2676_v26  ;;  %v2733_v8 = vpack.c.bf16 %v2679_v31, %v2677_v4  ;;  %v2633_v29 = vmax.f32 %v9506_v61, %v9496_v9 }
 0x459   : > { %7441 = vpow2.f32 %v2850_v53 }
 0x45a   : > { %v2772_v36 = vunpack.c.l.bf16 %v2732_v63  ;;  %v2773_v49 = vunpack.c.l.bf16 %v2733_v8  ;;  %v2774_v42 = vunpack.c.h.bf16 %v2732_v63  ;;  %v2775_v56 = vunpack.c.h.bf16 %v2733_v8  ;;  %5550 = vmatpush.bf16.msra.mxu1 %v12050_v12  ;;  %5639 = vmatpush.bf16.msra.mxu2 %v12051_v58  ;;  %v2151_v10 = vpop.f32.mrf.mxu2  ;;  %v12053_v8 = vld [vmem:[#allocation45_spill] sm:$0xff]  ;;  %v12056_v58 = vld [vmem:[#allocation55_spill] sm:$0xff] }
 0x45b   : > { %v9582_v38 = vpop.f32.mrf.mxu3  ;;  %v9584_v45 = vadd.f32 %v2151_v10, %v2062_v20  ;;  %v2064_v52 = vpop.f32.mrf.mxu1 }
 0x45c   : > { %v7436_v6 = vpop.eup %7435  ;;  %v2852_v43 = vmul.f32 1.442695, %v2772_v36  ;;  %v2854_v46 = vmul.f32 1.442695, %v2773_v49  ;;  %v2856_v53 = vmul.f32 1.442695, %v2774_v42 }
 0x45d   : > { %12052 = vst [vmem:[#allocation34_spill] sm:$0xff] %v9584_v45  ;;  %v7438_v4 = vpop.eup %7437  ;;  %3060 = vadd.xlane.f32.xlu2 %v3059_v30  ;;  %v2596_v31 = vpop.xlane.xlu1 %2595  ;;  %v2858_v63 = vmul.f32 1.442695, %v2775_v56  ;;  %v12054_v36 = vld [vmem:[#allocation33_spill] sm:$0xff]  ;;  %v12055_v49 = vld [vmem:[#allocation18_spill] sm:$0xff] }
 0x45e   : > { %v7440_v26 = vpop.eup %7439  ;;  %5551 = vmatpush.bf16.msra.mxu1 %v12053_v8  ;;  %v9589_v33 = vpop.f32.mrf.mxu0  ;;  %7443 = vpow2.f32 %v2852_v43  ;;  %5640 = vmatpush.bf16.msra.mxu2 %v12054_v36  ;;  %v2681_v36 = vsub.f32 %v9303_v14, %v2596_v31 }
 0x45f   : > { %v7442_v21 = vpop.eup %7441  ;;  %2634 = vmax.xlane.f32.xlu0 %v2633_v29  ;;  %v9592_v20 = vpack.c.bf16 %v7440_v26, %v7436_v6  ;;  %7445 = vpow2.f32 %v2854_v46  ;;  %v12057_v6 = vld [vmem:[#allocation39_spill] sm:$0xff]  ;;  %v2636_v26 = vmax.f32 %v9526_v28, %v9514_v11 }
 0x460   : > { %6860 = vmatmul.msk.bf16.gmra.mxu3 %vm1109_vm2, %v12055_v49  ;;  %v9596_v42 = vpack.c.bf16 %v7442_v21, %v7438_v4  ;;  %7447 = vpow2.f32 %v2856_v53  ;;  %3201 = vmatmul.bf16.gmra.mxu1 %v9502_v16 }
 0x461   : > { %v2994_v56 = vunpack.c.h.bf16 %v9592_v20  ;;  %v2992_v12 = vunpack.c.l.bf16 %v9592_v20  ;;  %7449 = vpow2.f32 %v2858_v63  ;;  %3290 = vmatmul.bf16.gmra.mxu2 %v9504_v7  ;;  %v2680_v63 = vsub.f32 %v9312_v54, %v2596_v31 }
 0x462   : > { %5552 = vmatpush.bf16.msra.mxu1 %v12056_v58  ;;  %v2995_v10 = vunpack.c.h.bf16 %v9596_v42  ;;  %v2993_v30 = vunpack.c.l.bf16 %v9596_v42  ;;  %5641 = vmatpush.bf16.msra.mxu2 %v12057_v6  ;;  %v2153_v43 = vpop.f32.mrf.mxu2  ;;  %v12059_v58 = vld [vmem:[#allocation76_spill] sm:$0xff] }
 0x463   : > { %6876 = vmatmul.msk.bf16.gmra.mxu0 %vm1109_vm2, %v12055_v49  ;;  %v9608_v16 = vpop.f32.mrf.mxu3  ;;  %v9610_v46 = vadd.f32 %v2153_v43, %v2064_v52  ;;  %v2067_v4 = vpop.f32.mrf.mxu1 }
 0x464   : > { %v3065_v29 = vadd.f32 %v2995_v10, %v2994_v56  ;;  %v3062_v53 = vadd.f32 %v2993_v30, %v2992_v12  ;;  %v7444_v7 = vpop.eup %7443  ;;  %v12060_v12 = vld [vmem:[#allocation51_spill] sm:$0xff] }
 0x465   : > { %12058 = vst [vmem:[#allocation32_spill] sm:$0xff] %v9610_v46  ;;  %v2599_v8 = vpop.xlane.xlu1 %2598  ;;  %v7446_v21 = vpop.eup %7445 }
 0x466   : > { %3066 = vadd.xlane.f32.xlu1 %v3065_v29  ;;  %5553 = vmatpush.bf16.msra.mxu1 %v12059_v58  ;;  %v2682_v49 = vsub.f32 %v9325_v41, %v2599_v8  ;;  %v2683_v52 = vsub.f32 %v9319_v2, %v2599_v8  ;;  %v9619_v6 = vpop.f32.mrf.mxu0  ;;  %v7448_v56 = vpop.eup %7447  ;;  %v2639_v41 = vmax.f32 %v9540_v51, %v9530_v3  ;;  %v12061_v2 = vld [vmem:[#allocation10_spill] sm:$0xff] }
 0x467   : > { %5642 = vmatpush.bf16.msra.mxu2 %v12060_v12  ;;  %3063 = vadd.xlane.f32.xlu2 %v3062_v53  ;;  %v7450_v10 = vpop.eup %7449  ;;  %v9628_v58 = vpack.c.bf16 %v7448_v56, %v7444_v7  ;;  %v9634_v12 = vpop.permute.xlu2 %4676 }
 0x468   : > { %2637 = vmax.xlane.f32.xlu0 %v2636_v26  ;;  %v2734_v54 = vpack.c.bf16 %v2682_v49, %v2680_v63  ;;  %v2735_v30 = vpack.c.bf16 %v2683_v52, %v2681_v36  ;;  %v9630_v53 = vpack.c.bf16 %v7450_v10, %v7446_v21  ;;  %12063 = vst [vmem:[#allocation31_spill] sm:$0xff] %v9634_v12 }
 0x469   : > { %v2998_v7 = vunpack.c.h.bf16 %v9628_v58 }
 0x46a   : > { %v2776_v43 = vunpack.c.l.bf16 %v2734_v54  ;;  %v2777_v46 = vunpack.c.l.bf16 %v2735_v30  ;;  %v2778_v14 = vunpack.c.h.bf16 %v2734_v54  ;;  %v2779_v31 = vunpack.c.h.bf16 %v2735_v30  ;;  %5554 = vmatpush.bf16.msra.mxu1 %v9404_v34  ;;  %v2156_v29 = vpop.f32.mrf.mxu2 }
 0x46b   : > { %5643 = vmatpush.bf16.msra.mxu2 %v12061_v2  ;;  %v9626_v8 = vpop.f32.mrf.mxu3  ;;  %v9632_v49 = vadd.f32 %v2156_v29, %v2067_v4  ;;  %v2069_v52 = vpop.f32.mrf.mxu1  ;;  %v2642_v34 = vmax.f32 %v9568_v57, %v9548_v13  ;;  %v12064_v4 = vld [vmem:[#allocation19_spill] sm:$0xff]  ;;  %v2999_v21 = vunpack.c.h.bf16 %v9630_v53  ;;  %v2997_v56 = vunpack.c.l.bf16 %v9630_v53 }
 0x46c   : > { %v2860_v26 = vmul.f32 1.442695, %v2776_v43  ;;  %v2862_v63 = vmul.f32 1.442695, %v2777_v46  ;;  %v2864_v36 = vmul.f32 1.442695, %v2778_v14  ;;  %v2651_v30 = vmax.f32 %v9626_v8, %v9619_v6  ;;  %v9640_v2 = vpop.xlane.xlu0 %2604 }
 0x46d   : > { %12062 = vst [vmem:[#allocation43_spill] sm:$0xff] %v9632_v49  ;;  %v2866_v54 = vmul.f32 1.442695, %v2779_v31 }
 0x46e   : > { %7451 = vpow2.f32 %v2860_v26  ;;  %2640 = vmax.xlane.f32.xlu1 %v2639_v41  ;;  %5555 = vmatpush.bf16.msra.mxu1 %v9416_v25  ;;  %v9643_v46 = vpop.f32.mrf.mxu0  ;;  %v2996_v25 = vunpack.c.l.bf16 %v9628_v58  ;;  %v3071_v41 = vadd.f32 %v2999_v21, %v2998_v7 }
 0x46f   : > { %7453 = vpow2.f32 %v2862_v63  ;;  %5644 = vmatpush.bf16.msra.mxu2 %v9436_v35  ;;  %2643 = vmax.xlane.f32.xlu2 %v2642_v34 }
 0x470   : > { %7455 = vpow2.f32 %v2864_v36  ;;  %2652 = vmax.xlane.f32.xlu0 %v2651_v30  ;;  %6861 = vmatmul.msk.bf16.gmra.mxu3 %vm1109_vm2, %v12064_v4  ;;  %v3068_v26 = vadd.f32 %v2997_v56, %v2996_v25 }
 0x471   : > { %7457 = vpow2.f32 %v2866_v54  ;;  %3206 = vmatmul.bf16.gmra.mxu1 %v9550_v40  ;;  %3295 = vmatmul.bf16.gmra.mxu2 %v9554_v39  ;;  %v2611_v36 = vpop.xlane.xlu1 %2610 }
 0x472   : > { %v2158_v35 = vpop.f32.mrf.mxu2  ;;  %v2691_v56 = vsub.f32 %v9388_v15, %v2611_v36  ;;  %v12069_v15 = vld [vmem:[#allocation57_spill] sm:$0xff] }
 0x473   : > { %6877 = vmatmul.msk.bf16.gmra.mxu0 %vm1109_vm2, %v12064_v4  ;;  %v9656_v10 = vpop.f32.mrf.mxu3  ;;  %v9658_v14 = vadd.f32 %v2158_v35, %v2069_v52  ;;  %v2072_v31 = vpop.f32.mrf.mxu1  ;;  %v2690_v52 = vsub.f32 %v9392_v44, %v2611_v36 }
 0x474   : > { %v7452_v43 = vpop.eup %7451  ;;  %v2608_v30 = vpop.xlane.xlu0 %2607 }
 0x475   : > { %12065 = vst [vmem:[#allocation35_spill] sm:$0xff] %v9658_v14  ;;  %v7454_v29 = vpop.eup %7453  ;;  %v9660_v40 = vpop.xlane.xlu2 %1859  ;;  %v2688_v25 = vsub.f32 %v9382_v23, %v2608_v30  ;;  %v2689_v44 = vsub.f32 %v9370_v62, %v2608_v30  ;;  %v2654_v30 = vmax.f32 %v9656_v10, %v9643_v46 }
 0x476   : > { %12066 = vst [vmem:[#allocation38_spill] sm:$0xff] %v9660_v40  ;;  %v7456_v63 = vpop.eup %7455  ;;  %3072 = vadd.xlane.f32.xlu1 %v3071_v41  ;;  %v9662_v34 = vpop.f32.mrf.mxu0 }
 0x477   : > { %v7458_v39 = vpop.eup %7457  ;;  %3069 = vadd.xlane.f32.xlu2 %v3068_v26  ;;  %v9664_v54 = vpack.c.bf16 %v7456_v63, %v7452_v43  ;;  %v2738_v63 = vpack.c.bf16 %v2690_v52, %v2688_v25  ;;  %v2739_v23 = vpack.c.bf16 %v2691_v56, %v2689_v44  ;;  %v2648_v25 = vmax.f32 %v9608_v16, %v9589_v33 }
 0x478   : > { %v9666_v4 = vpack.c.bf16 %v7458_v39, %v7454_v29  ;;  %v2645_v29 = vmax.f32 %v9582_v38, %v9575_v48 }
 0x479   : > { %v3002_v7 = vunpack.c.h.bf16 %v9664_v54  ;;  %v2785_v36 = vunpack.c.l.bf16 %v2739_v23  ;;  %v2786_v56 = vunpack.c.h.bf16 %v2738_v63 }
 0x47a   : > { %v3003_v21 = vunpack.c.h.bf16 %v9666_v4  ;;  %v2161_v35 = vpop.f32.mrf.mxu2 }
 0x47b   : > { %v9673_v41 = vpop.f32.mrf.mxu3  ;;  %v9675_v45 = vadd.f32 %v2161_v35, %v2072_v31  ;;  %v2074_v43 = vpop.f32.mrf.mxu1  ;;  %v2784_v31 = vunpack.c.l.bf16 %v2738_v63 }
 0x47c   : > { %v3077_v26 = vadd.f32 %v3003_v21, %v3002_v7 }
 0x47d   : > { %12067 = vst [vmem:[#allocation45_spill] sm:$0xff] %v9675_v45  ;;  %v9680_v39 = vpop.xlane.xlu2 %1856 }
 0x47e   : > { %12068 = vst [vmem:[#allocation33_spill] sm:$0xff] %v9680_v39  ;;  %3078 = vadd.xlane.f32.xlu1 %v3077_v26  ;;  %v9682_v14 = vpop.f32.mrf.mxu0  ;;  %v2687_v26 = vsub.f32 %v9354_v1, %v9640_v2 }
 0x47f   : > { %2646 = vmax.xlane.f32.xlu2 %v2645_v29 }
 0x480   : > { %6862 = vmatmul.msk.bf16.gmra.mxu3 %vm1109_vm2, %v12069_v15 }
 0x481   : > { %3211 = vmatmul.bf16.gmra.mxu1 %v9592_v20  ;;  %3300 = vmatmul.bf16.gmra.mxu2 %v9596_v42  ;;  %v2876_v20 = vmul.f32 1.442695, %v2784_v31  ;;  %v2686_v42 = vsub.f32 %v9362_v17, %v9640_v2  ;;  %v2880_v31 = vmul.f32 1.442695, %v2786_v56  ;;  %v3001_v17 = vunpack.c.l.bf16 %v9666_v4 }
 0x482   : > { %v2163_v7 = vpop.f32.mrf.mxu2 }
 0x483   : > { %6878 = vmatmul.msk.bf16.gmra.mxu0 %vm1109_vm2, %v12069_v15  ;;  %v9690_v62 = vpop.f32.mrf.mxu3  ;;  %v9694_v52 = vadd.f32 %v2163_v7, %v2074_v43  ;;  %v2077_v21 = vpop.f32.mrf.mxu1  ;;  %v2878_v15 = vmul.f32 1.442695, %v2785_v36  ;;  %v2787_v7 = vunpack.c.h.bf16 %v2739_v23  ;;  %7459 = vpow2.f32 %v2876_v20 }
 0x485   : > { %12070 = vst [vmem:[#allocation18_spill] sm:$0xff] %v9694_v52  ;;  %v2602_v35 = vpop.xlane.xlu2 %2601  ;;  %v3000_v52 = vunpack.c.l.bf16 %v9664_v54  ;;  %7461 = vpow2.f32 %v2878_v15 }
 0x486   : > { %2655 = vmax.xlane.f32.xlu1 %v2654_v30  ;;  %v2684_v29 = vsub.f32 %v9346_v60, %v2602_v35  ;;  %v2685_v44 = vsub.f32 %v9338_v50, %v2602_v35  ;;  %v9704_v43 = vpop.f32.mrf.mxu0  ;;  %7463 = vpow2.f32 %v2880_v31 }
 0x487   : > { %2649 = vmax.xlane.f32.xlu2 %v2648_v25  ;;  %v3074_v56 = vadd.f32 %v3001_v17, %v3000_v52 }
 0x488   : > { %v2736_v49 = vpack.c.bf16 %v2686_v42, %v2684_v29  ;;  %v2737_v63 = vpack.c.bf16 %v2687_v26, %v2685_v44  ;;  %v2882_v26 = vmul.f32 1.442695, %v2787_v7 }
 0x489   : > { %v7460_v44 = vpop.eup %7459 }
 0x48a   : > { %v2780_v45 = vunpack.c.l.bf16 %v2736_v49  ;;  %v2781_v1 = vunpack.c.l.bf16 %v2737_v63  ;;  %v2782_v2 = vunpack.c.h.bf16 %v2736_v49  ;;  %v2783_v30 = vunpack.c.h.bf16 %v2737_v63  ;;  %v2166_v60 = vpop.f32.mrf.mxu2 }
 0x48b   : > { %v9708_v50 = vpop.f32.mrf.mxu3  ;;  %v9710_v23 = vadd.f32 %v2166_v60, %v2077_v21  ;;  %v2079_v29 = vpop.f32.mrf.mxu1 }
 0x48c   : > { %v2868_v35 = vmul.f32 1.442695, %v2780_v45  ;;  %v2870_v36 = vmul.f32 1.442695, %v2781_v1  ;;  %v2872_v25 = vmul.f32 1.442695, %v2782_v2  ;;  %v3747_v42 = vmax.f32 %v9708_v50, %v9704_v43  ;;  %v7462_v21 = vpop.eup %7461 }
 0x48d   : > { %12071 = vst [vmem:[#allocation55_spill] sm:$0xff] %v9710_v23  ;;  %v2874_v20 = vmul.f32 1.442695, %v2783_v30  ;;  %v12072_v45 = vld [vmem:[#allocation58_spill] sm:$0xff]  ;;  %v7464_v52 = vpop.eup %7463 }
 0x48e   : > { %7465 = vpow2.f32 %v2868_v35  ;;  %v9714_v49 = vpop.f32.mrf.mxu0  ;;  %3748 = vmax.xlane.f32.xlu0 %v3747_v42 }
 0x48f   : > { %7467 = vpow2.f32 %v2870_v36  ;;  %3075 = vadd.xlane.f32.xlu2 %v3074_v56 }
 0x490   : > { %7469 = vpow2.f32 %v2872_v25  ;;  %6863 = vmatmul.msk.bf16.gmra.mxu3 %vm1109_vm2, %v12072_v45 }
 0x491   : > { %7471 = vpow2.f32 %v2874_v20  ;;  %3216 = vmatmul.bf16.gmra.mxu1 %v9628_v58  ;;  %3305 = vmatmul.bf16.gmra.mxu2 %v9630_v53 }
 0x492   : > { %7473 = vpow2.f32 %v2882_v26  ;;  %v2168_v15 = vpop.f32.mrf.mxu2 }
 0x493   : > { %6879 = vmatmul.msk.bf16.gmra.mxu0 %vm1109_vm2, %v12072_v45  ;;  %v9722_v7 = vpop.f32.mrf.mxu3  ;;  %v9724_v31 = vadd.f32 %v2168_v15, %v2079_v29  ;;  %v2082_v35 = vpop.f32.mrf.mxu1  ;;  %v9730_v45 = vpack.c.bf16 %v7464_v52, %v7460_v44 }
 0x494   : > { %v7466_v63 = vpop.eup %7465 }
 0x495   : > { %12073 = vst [vmem:[#allocation39_spill] sm:$0xff] %v9724_v31  ;;  %v7468_v17 = vpop.eup %7467  ;;  %v3008_v44 = vunpack.c.l.bf16 %v9730_v45 }
 0x496   : > { %v7470_v1 = vpop.eup %7469  ;;  %v9726_v2 = vpop.f32.mrf.mxu0 }
 0x497   : > { %v7472_v30 = vpop.eup %7471  ;;  %v2960_v60 = vpack.c.bf16 %v7470_v1, %v7466_v63  ;;  %v12076_v1 = vld [vmem:[#allocation15_spill] sm:$0xff] }
 0x498   : > { %v7474_v58 = vpop.eup %7473  ;;  %v2961_v36 = vpack.c.bf16 %v7472_v30, %v7468_v17 }
 0x499   : > { %v3006_v53 = vunpack.c.h.bf16 %v2960_v60  ;;  %v3004_v25 = vunpack.c.l.bf16 %v2960_v60  ;;  %v9732_v29 = vpack.c.bf16 %v7474_v58, %v7462_v21 }
 0x49a   : > { %v3007_v20 = vunpack.c.h.bf16 %v2961_v36  ;;  %v3005_v56 = vunpack.c.l.bf16 %v2961_v36  ;;  %v2171_v42 = vpop.f32.mrf.mxu2 }
 0x49b   : > { %v9728_v26 = vpop.f32.mrf.mxu3  ;;  %v9734_v15 = vadd.f32 %v2171_v42, %v2082_v35  ;;  %v3009_v21 = vunpack.c.l.bf16 %v9732_v29  ;;  %v2084_v52 = vpop.f32.mrf.mxu1 }
 0x49c   : > { %v3083_v23 = vadd.f32 %v3007_v20, %v3006_v53  ;;  %v3080_v31 = vadd.f32 %v3005_v56, %v3004_v25  ;;  %v3753_v63 = vmax.f32 %v9728_v26, %v9726_v2  ;;  %v3750_v20 = vmax.f32 %v9722_v7, %v9714_v49 }
 0x49d   : > { %12074 = vst [vmem:[#allocation76_spill] sm:$0xff] %v9734_v15  ;;  %v3086_v35 = vadd.f32 %v3009_v21, %v3008_v44  ;;  %v12082_v44 = vld [vmem:[#allocation61_spill] sm:$0xff]  ;;  %v3010_v21 = vunpack.c.h.bf16 %v9730_v45 }
 0x49e   : > { %3084 = vadd.xlane.f32.xlu1 %v3083_v23  ;;  %3081 = vadd.xlane.f32.xlu2 %v3080_v31  ;;  %v9738_v17 = vpop.f32.mrf.mxu0  ;;  %v2657_v31 = vmax.f32 %v9673_v41, %v9662_v34 }
 0x49f   : > { %12075 = vst [vmem:[#allocation51_spill] sm:$0xff] %v9738_v17  ;;  %3754 = vmax.xlane.f32.xlu0 %v3753_v63 }
 0x4a0   : > { %6864 = vmatmul.msk.bf16.gmra.mxu3 %vm1109_vm2, %v12076_v1 }
 0x4a1   : > { %3221 = vmatmul.bf16.gmra.mxu1 %v9664_v54  ;;  %3310 = vmatmul.bf16.gmra.mxu2 %v9666_v4  ;;  %v2614_v54 = vpop.xlane.xlu2 %2613  ;;  %v3744_v4 = vmax.f32 %v9690_v62, %v9682_v14 }
 0x4a2   : > { %v2173_v30 = vpop.f32.mrf.mxu2 }
 0x4a3   : > { %6880 = vmatmul.msk.bf16.gmra.mxu0 %vm1109_vm2, %v12076_v1  ;;  %v9748_v23 = vpop.f32.mrf.mxu3  ;;  %v9752_v58 = vadd.f32 %v2173_v30, %v2084_v52  ;;  %v3011_v52 = vunpack.c.h.bf16 %v9732_v29 }
 0x4a4   : > { %12077 = vst [vmem:[#allocation10_spill] sm:$0xff] %v9748_v23 }
 0x4a5   : > { %12078 = vst [vmem:[#allocation19_spill] sm:$0xff] %v9752_v58 }
 0x4a6   : > { %2658 = vmax.xlane.f32.xlu1 %v2657_v31  ;;  %3087 = vadd.xlane.f32.xlu2 %v3086_v35  ;;  %v9754_v53 = vpop.f32.mrf.mxu0  ;;  %v3089_v35 = vadd.f32 %v3011_v52, %v3010_v21  ;;  %v2623_v21 = vpop.xlane.xlu0 %2622 }
 0x4a7   : > { %12079 = vst [vmem:[#allocation57_spill] sm:$0xff] %v9754_v53 }
 0x4ab   : > { %v9756_v25 = vpop.f32.mrf.mxu3 }
 0x4ac   : > { %12080 = vst [vmem:[#allocation58_spill] sm:$0xff] %v9756_v25  ;;  %v3759_v31 = vmax.f32 %v9756_v25, %v9754_v53 }
 0x4ad   : > { %v2087_v56 = vpop.f32.mrf.mxu1 }
 0x4ae   : > { %3745 = vmax.xlane.f32.xlu1 %v3744_v4  ;;  %3751 = vmax.xlane.f32.xlu2 %v3750_v20  ;;  %v9762_v42 = vpop.f32.mrf.mxu0 }
 0x4af   : > { %12081 = vst [vmem:[#allocation15_spill] sm:$0xff] %v9762_v42 }
 0x4b0   : > { %v9764_v63 = vpop.xlane.xlu1 %1910  ;;  %v1908_v1 = vpop.xlane.xlu2 %1907  ;;  %6865 = vmatmul.msk.bf16.gmra.mxu3 %vm1109_vm2, %v12082_v44 }
 0x4b1   : > { %3226 = vmatmul.bf16.gmra.mxu1 %v2960_v60  ;;  %3315 = vmatmul.bf16.gmra.mxu2 %v2961_v36  ;;  %v2692_v36 = vsub.f32 %v9409_v59, %v2614_v54 }
 0x4b3   : > { %6881 = vmatmul.msk.bf16.gmra.mxu0 %vm1109_vm2, %v12082_v44  ;;  %v9772_v30 = vpop.f32.mrf.mxu3  ;;  %v12085_v44 = vld [vmem:[#allocation95_spill] sm:$0xff] }
 0x4b4   : > { %12083 = vst [vmem:[#allocation61_spill] sm:$0xff] %v9772_v30  ;;  %v2176_v4 = vpop.f32.mrf.mxu2  ;;  %v2693_v40 = vsub.f32 %v12085_v44, %v2614_v54 }
 0x4b5   : > { %v9776_v20 = vadd.f32 %v2176_v4, %v2087_v56  ;;  %v2089_v58 = vpop.f32.mrf.mxu1 }
 0x4b6   : > { %3090 = vadd.xlane.f32.xlu1 %v3089_v35  ;;  %3760 = vmax.xlane.f32.xlu2 %v3759_v31  ;;  %v9778_v15 = vpop.f32.mrf.mxu0  ;;  %v3756_v31 = vmax.f32 %v9748_v23, %v9738_v17  ;;  %v3762_v35 = vmax.f32 %v9772_v30, %v9762_v42  ;;  %v12089_v30 = vld [vmem:[#allocation20_spill] sm:$0xff] }
 0x4b7   : > { %12084 = vst [vmem:[#allocation106_spill] sm:$0xff] %v9776_v20 }
 0x4b8   : > { %v9780_v39 = vpop.xlane.xlu1 %2625  ;;  %v2617_v60 = vpop.xlane.xlu2 %2616 }
 0x4b9   : > { %v2694_v27 = vsub.f32 %v9418_v22, %v2617_v60  ;;  %v2695_v12 = vsub.f32 %v9413_v37, %v2617_v60  ;;  %v12088_v60 = vld [vmem:[#allocation101_spill] sm:$0xff] }
 0x4bb   : > { %v2740_v52 = vpack.c.bf16 %v2694_v27, %v2692_v36  ;;  %v2741_v56 = vpack.c.bf16 %v2695_v12, %v2693_v40  ;;  %v9786_v4 = vpop.f32.mrf.mxu3  ;;  %v2698_v36 = vsub.f32 %v12088_v60, %v2623_v21 }
 0x4bc   : > { %v2178_v54 = vpop.f32.mrf.mxu2 }
 0x4bd   : > { %v2788_v20 = vunpack.c.l.bf16 %v2740_v52  ;;  %v2789_v53 = vunpack.c.l.bf16 %v2741_v56  ;;  %v2790_v59 = vunpack.c.h.bf16 %v2740_v52  ;;  %v2791_v25 = vunpack.c.h.bf16 %v2741_v56  ;;  %v2092_v22 = vpop.f32.mrf.mxu1  ;;  %v12090_v52 = vld [vmem:[#allocation100_spill] sm:$0xff] }
 0x4be   : > { %v9792_v44 = vadd.f32 %v2178_v54, %v2089_v58  ;;  %3757 = vmax.xlane.f32.xlu1 %v3756_v31  ;;  %3763 = vmax.xlane.f32.xlu2 %v3762_v35  ;;  %v2699_v58 = vsub.f32 %v12090_v52, %v2623_v21 }
 0x4bf   : > { %v2884_v37 = vmul.f32 1.442695, %v2788_v20  ;;  %v2886_v27 = vmul.f32 1.442695, %v2789_v53  ;;  %v2888_v12 = vmul.f32 1.442695, %v2790_v59  ;;  %v9794_v40 = vpop.f32.mrf.mxu0  ;;  %v9805_v53 = vpop.xlane.xlu0 %3054 }
 0x4c0   : > { %12086 = vst [vmem:[#allocation95_spill] sm:$0xff] %v9792_v44  ;;  %v2890_v17 = vmul.f32 1.442695, %v2791_v25  ;;  %v9797_v23 = vpop.xlane.xlu1 %3051  ;;  %v2620_v42 = vpop.xlane.xlu2 %2619  ;;  %6866 = vmatmul.msk.bf16.gmra.mxu3 %vm1109_vm2, %v12089_v30 }
 0x4c1   : > { %12087 = vst [vmem:[#allocation107_spill] sm:$0xff] %v9794_v40  ;;  %7475 = vpow2.f32 %v2884_v37  ;;  %v2696_v56 = vsub.f32 %v9434_v18, %v2620_v42  ;;  %v2697_v20 = vsub.f32 %v9422_v19, %v2620_v42  ;;  %3231 = vmatmul.bf16.gmra.mxu1 %v9730_v45  ;;  %3320 = vmatmul.bf16.gmra.mxu2 %v9732_v29 }
 0x4c2   : > { %7477 = vpow2.f32 %v2886_v27  ;;  %v3765_v18 = vmax.f32 %v9786_v4, %v9778_v15 }
 0x4c3   : > { %7479 = vpow2.f32 %v2888_v12  ;;  %v2742_v25 = vpack.c.bf16 %v2698_v36, %v2696_v56  ;;  %v2743_v31 = vpack.c.bf16 %v2699_v58, %v2697_v20  ;;  %6882 = vmatmul.msk.bf16.gmra.mxu0 %vm1109_vm2, %v12089_v30  ;;  %v9810_v35 = vpop.f32.mrf.mxu3  ;;  %v2701_v20 = vsub.f32 %v9458_v55, %v9780_v39 }
 0x4c4   : > { %12091 = vst [vmem:[#allocation101_spill] sm:$0xff] %v9810_v35  ;;  %7481 = vpow2.f32 %v2890_v17  ;;  %v3768_v19 = vmax.f32 %v9810_v35, %v9794_v40  ;;  %v2181_v29 = vpop.f32.mrf.mxu2 }
 0x4c5   : > { %7483 = vrcp.f32 %v1908_v1  ;;  %v2792_v45 = vunpack.c.l.bf16 %v2742_v25  ;;  %v2793_v42 = vunpack.c.l.bf16 %v2743_v31  ;;  %v2794_v21 = vunpack.c.h.bf16 %v2742_v25  ;;  %v2094_v37 = vpop.f32.mrf.mxu1 }
 0x4c6   : > { %v2795_v59 = vunpack.c.h.bf16 %v2743_v31  ;;  %v2182_v54 = vadd.f32 %v2181_v29, %v2092_v22  ;;  %3766 = vmax.xlane.f32.xlu2 %v3765_v18  ;;  %3769 = vmax.xlane.f32.xlu0 %v3768_v19  ;;  %7485 = vrcp.f32 %v9764_v63  ;;  %v2700_v1 = vsub.f32 %v9465_v32, %v9780_v39 }
 0x4c7   : > { %v7476_v30 = vpop.eup %7475  ;;  %v2892_v27 = vmul.f32 1.442695, %v2792_v45  ;;  %v2894_v12 = vmul.f32 1.442695, %v2793_v42  ;;  %v2896_v17 = vmul.f32 1.442695, %v2794_v21  ;;  %v9816_v60 = vpop.f32.mrf.mxu0 }
 0x4c8   : > { %v7478_v36 = vpop.eup %7477  ;;  %v2898_v52 = vmul.f32 1.442695, %v2795_v59  ;;  %v2629_v58 = vpop.xlane.xlu1 %2628 }
 0x4c9   : > { %v9821_v56 = vpop.xlane.xlu2 %2631  ;;  %v7480_v22 = vpop.eup %7479  ;;  %7487 = vpow2.f32 %v2892_v27  ;;  %v2702_v25 = vsub.f32 %v9476_v47, %v2629_v58  ;;  %v2703_v31 = vsub.f32 %v9474_v24, %v2629_v58 }
 0x4ca   : > { %v7482_v18 = vpop.eup %7481  ;;  %7489 = vpow2.f32 %v2894_v12  ;;  %v9827_v19 = vpop.xlane.xlu0 %3057  ;;  %v2964_v63 = vpack.c.bf16 %v7480_v22, %v7476_v30 }
 0x4cb   : > { %v7484_v45 = vpop.eup %7483  ;;  %7491 = vpow2.f32 %v2896_v17  ;;  %v2744_v32 = vpack.c.bf16 %v2702_v25, %v2700_v1  ;;  %v2745_v42 = vpack.c.bf16 %v2703_v31, %v2701_v20  ;;  %v9829_v21 = vpop.f32.mrf.mxu3  ;;  %v2965_v29 = vpack.c.bf16 %v7482_v18, %v7478_v36 }
 0x4cc   : > { %7493 = vpow2.f32 %v2898_v52  ;;  %v2248_v59 = vmul.f32 %v7484_v45, %v2182_v54  ;;  %v3012_v55 = vunpack.c.l.bf16 %v2964_v63  ;;  %v2183_v24 = vpop.f32.mrf.mxu2  ;;  %v7486_v58 = vpop.eup %7485  ;;  %v3014_v30 = vunpack.c.h.bf16 %v2964_v63 }
 0x4cd   : > { %v2796_v39 = vunpack.c.l.bf16 %v2744_v32  ;;  %v2797_v27 = vunpack.c.l.bf16 %v2745_v42  ;;  %v2798_v47 = vunpack.c.h.bf16 %v2744_v32  ;;  %v2799_v44 = vunpack.c.h.bf16 %v2745_v42  ;;  %v3197_v40 = vpop.f32.mrf.mxu1  ;;  %v12092_v32 = vld [vmem:[#allocation22_spill] sm:$0xff] }
 0x4ce   : > { %v2184_v12 = vadd.f32 %v2183_v24, %v2094_v37  ;;  %v3013_v35 = vunpack.c.l.bf16 %v2965_v29  ;;  %v3015_v25 = vunpack.c.h.bf16 %v2965_v29  ;;  %v2280_v36 = vpack.c.bf16 %v2248_v59, %v2248_v59 }
 0x4cf   : > { %v7488_v22 = vpop.eup %7487  ;;  %v2900_v17 = vmul.f32 1.442695, %v2796_v39  ;;  %v2902_v1 = vmul.f32 1.442695, %v2797_v27  ;;  %v2904_v20 = vmul.f32 1.442695, %v2798_v47  ;;  %v9833_v45 = vpop.f32.mrf.mxu0  ;;  %v2704_v39 = vsub.f32 %v9492_v5, %v9821_v56 }
 0x4d0   : > { %v7490_v31 = vpop.eup %7489  ;;  %v2906_v52 = vmul.f32 1.442695, %v2799_v44  ;;  %v2249_v54 = vmul.f32 %v7486_v58, %v2184_v12  ;;  %6867 = vmatmul.msk.bf16.gmra.mxu3 %vm1109_vm2, %v12092_v32  ;;  %v9837_v37 = vadd.f32 %v3013_v35, %v3012_v55  ;;  %v9841_v27 = vadd.f32 %v3015_v25, %v3014_v30 }
 0x4d1   : > { %v9831_v18 = vpop.xlane.xlu2 %3060  ;;  %v7492_v42 = vpop.eup %7491  ;;  %7495 = vpow2.f32 %v2900_v17  ;;  %3236 = vmatmul.bf16.gmra.mxu1 %v2964_v63  ;;  %v2705_v44 = vsub.f32 %v9486_v0, %v9821_v56  ;;  %3325 = vmatmul.bf16.gmra.mxu2 %v2965_v29  ;;  %v9851_v12 = vunpack.c.l.b16 %v2280_v36 }
 0x4d2   : > { %12093 = vst [vmem:[#allocation20_spill] sm:$0xff] %v9837_v37  ;;  %v7494_v59 = vpop.eup %7493  ;;  %7497 = vpow2.f32 %v2902_v1  ;;  %v2281_v47 = vpack.c.bf16 %v2249_v54, %v2249_v54  ;;  %v2635_v24 = vpop.xlane.xlu0 %2634  ;;  %v2966_v58 = vpack.c.bf16 %v7492_v42, %v7488_v22 }
 0x4d3   : > { %12094 = vst [vmem:[#allocation100_spill] sm:$0xff] %v9841_v27  ;;  %7499 = vpow2.f32 %v2904_v20  ;;  %v2706_v35 = vsub.f32 %v9506_v61, %v2635_v24  ;;  %v2707_v55 = vsub.f32 %v9496_v9, %v2635_v24  ;;  %6883 = vmatmul.msk.bf16.gmra.mxu0 %vm1109_vm2, %v12092_v32  ;;  %v9849_v5 = vpop.f32.mrf.mxu3  ;;  %v2967_v63 = vpack.c.bf16 %v7494_v59, %v7490_v31 }
 0x4d4   : > { %12095 = vst [vmem:[#allocation22_spill] sm:$0xff] %v9851_v12  ;;  %7501 = vpow2.f32 %v2906_v52  ;;  %v9853_v30 = vunpack.c.l.b16 %v2281_v47  ;;  %v3016_v0 = vunpack.c.l.bf16 %v2966_v58  ;;  %v3286_v22 = vpop.f32.mrf.mxu2  ;;  %v3018_v9 = vunpack.c.h.bf16 %v2966_v58 }
 0x4d5   : > { %v2746_v56 = vpack.c.bf16 %v2706_v35, %v2704_v39  ;;  %v2747_v29 = vpack.c.bf16 %v2707_v55, %v2705_v44  ;;  %v3017_v17 = vunpack.c.l.bf16 %v2967_v63  ;;  %v9855_v1 = vadd.f32 %v3286_v22, %v3197_v40  ;;  %v3199_v61 = vpop.f32.mrf.mxu1 }
 0x4d6   : > { %12096 = vst [vmem:[#allocation108_spill] sm:$0xff] %v9853_v30  ;;  %v3019_v20 = vunpack.c.h.bf16 %v2967_v63 }
 0x4d7   : > { %12097 = vst [vmem:[#allocation109_spill] sm:$0xff] %v9855_v1  ;;  %v7496_v54 = vpop.eup %7495  ;;  %v2800_v31 = vunpack.c.l.bf16 %v2746_v56  ;;  %v2801_v36 = vunpack.c.l.bf16 %v2747_v29  ;;  %v2802_v32 = vunpack.c.h.bf16 %v2746_v56  ;;  %v2803_v52 = vunpack.c.h.bf16 %v2747_v29  ;;  %v9859_v59 = vpop.f32.mrf.mxu0 }
 0x4d8   : > { %v7498_v42 = vpop.eup %7497  ;;  %v9861_v39 = vadd.f32 %v3017_v17, %v3016_v0  ;;  %v9863_v44 = vadd.f32 %v3019_v20, %v3018_v9 }
 0x4d9   : > { %v7500_v40 = vpop.eup %7499  ;;  %v2908_v47 = vmul.f32 1.442695, %v2800_v31  ;;  %v2910_v24 = vmul.f32 1.442695, %v2801_v36  ;;  %v2912_v35 = vmul.f32 1.442695, %v2802_v32  ;;  %v9865_v55 = vpop.xlane.xlu1 %3066 }
 0x4da   : > { %12098 = vst [vmem:[#allocation110_spill] sm:$0xff] %v9861_v39  ;;  %v7502_v22 = vpop.eup %7501  ;;  %v2914_v25 = vmul.f32 1.442695, %v2803_v52  ;;  %v9867_v12 = vpop.xlane.xlu2 %3063  ;;  %v9869_v30 = vpack.c.bf16 %v7500_v40, %v7496_v54  ;;  %v12102_v40 = vld [vmem:[#allocation64_spill] sm:$0xff] }
 0x4db   : > { %12099 = vst [vmem:[#allocation111_spill] sm:$0xff] %v9863_v44  ;;  %7503 = vpow2.f32 %v2908_v47  ;;  %v9871_v56 = vpop.f32.mrf.mxu3  ;;  %v9873_v29 = vpack.c.bf16 %v7502_v22, %v7498_v42  ;;  %v2638_v32 = vpop.xlane.xlu0 %2637 }
 0x4dc   : > { %7505 = vpow2.f32 %v2910_v24  ;;  %v3288_v0 = vpop.f32.mrf.mxu2  ;;  %v3022_v17 = vunpack.c.h.bf16 %v9869_v30  ;;  %v3020_v20 = vunpack.c.l.bf16 %v9869_v30 }
 0x4dd   : > { %7507 = vpow2.f32 %v2912_v35  ;;  %v3023_v9 = vunpack.c.h.bf16 %v9873_v29  ;;  %v9878_v31 = vadd.f32 %v3288_v0, %v3199_v61  ;;  %v3202_v36 = vpop.f32.mrf.mxu1  ;;  %v3021_v54 = vunpack.c.l.bf16 %v9873_v29 }
 0x4de   : > { %7509 = vpow2.f32 %v2914_v25  ;;  %v2708_v61 = vsub.f32 %v9526_v28, %v2638_v32  ;;  %v2709_v25 = vsub.f32 %v9514_v11, %v2638_v32 }
 0x4df   : > { %12100 = vst [vmem:[#allocation112_spill] sm:$0xff] %v9878_v31  ;;  %v9881_v52 = vadd.f32 %v3023_v9, %v3022_v17  ;;  %v9887_v47 = vadd.f32 %v3021_v54, %v3020_v20  ;;  %7511 = vrcp.f32 %v9797_v23 }
 0x4e0   : > { %v9883_v42 = vpop.f32.mrf.mxu0  ;;  %6868 = vmatmul.msk.bf16.gmra.mxu3 %vm1109_vm2, %v12102_v40  ;;  %7513 = vrcp.f32 %v9805_v53 }
 0x4e1   : > { %12101 = vst [vmem:[#allocation113_spill] sm:$0xff] %v9881_v52  ;;  %v7504_v24 = vpop.eup %7503  ;;  %v2641_v35 = vpop.xlane.xlu1 %2640  ;;  %3241 = vmatmul.bf16.gmra.mxu1 %v2966_v58  ;;  %3330 = vmatmul.bf16.gmra.mxu2 %v2967_v63 }
 0x4e2   : > { %12103 = vst [vmem:[#allocation64_spill] sm:$0xff] %v9887_v47  ;;  %v7506_v22 = vpop.eup %7505  ;;  %v2710_v0 = vsub.f32 %v9540_v51, %v2641_v35  ;;  %v2711_v17 = vsub.f32 %v9530_v3, %v2641_v35  ;;  %v9893_v9 = vpop.xlane.xlu2 %2643 }
 0x4e3   : > { %v7508_v27 = vpop.eup %7507  ;;  %6884 = vmatmul.msk.bf16.gmra.mxu0 %vm1109_vm2, %v12102_v40  ;;  %v9897_v20 = vpop.f32.mrf.mxu3 }
 0x4e4   : > { %v7510_v54 = vpop.eup %7509  ;;  %v2748_v58 = vpack.c.bf16 %v2710_v0, %v2708_v61  ;;  %v2749_v37 = vpack.c.bf16 %v2711_v17, %v2709_v25  ;;  %v3291_v28 = vpop.f32.mrf.mxu2  ;;  %v9900_v11 = vpack.c.bf16 %v7508_v27, %v7504_v24 }
 0x4e5   : > { %v9902_v51 = vpack.c.bf16 %v7510_v54, %v7506_v22  ;;  %v3204_v44 = vpop.f32.mrf.mxu1  ;;  %v3292_v39 = vadd.f32 %v3291_v28, %v3202_v36  ;;  %v7512_v54 = vpop.eup %7511 }
 0x4e6   : > { %v2804_v3 = vunpack.c.l.bf16 %v2748_v58  ;;  %v2805_v32 = vunpack.c.l.bf16 %v2749_v37  ;;  %v2806_v35 = vunpack.c.h.bf16 %v2748_v58  ;;  %v2807_v63 = vunpack.c.h.bf16 %v2749_v37  ;;  %v7514_v31 = vpop.eup %7513 }
 0x4e7   : > { %v3026_v40 = vunpack.c.h.bf16 %v9900_v11  ;;  %v3027_v1 = vunpack.c.h.bf16 %v9902_v51  ;;  %v3024_v61 = vunpack.c.l.bf16 %v9900_v11  ;;  %v3025_v27 = vunpack.c.l.bf16 %v9902_v51 }
 0x4e8   : > { %v2916_v25 = vmul.f32 1.442695, %v2804_v3  ;;  %v2918_v0 = vmul.f32 1.442695, %v2805_v32  ;;  %v2920_v23 = vmul.f32 1.442695, %v2806_v35  ;;  %v9908_v24 = vpop.f32.mrf.mxu0  ;;  %v3400_v28 = vmul.f32 %v7512_v54, %v3292_v39 }
 0x4e9   : > { %v2922_v22 = vmul.f32 1.442695, %v2807_v63  ;;  %v3113_v17 = vadd.f32 %v3027_v1, %v3026_v40  ;;  %v3110_v37 = vadd.f32 %v3025_v27, %v3024_v61  ;;  %v12104_v61 = vld [vmem:[#allocation23_spill] sm:$0xff] }
 0x4ea   : > { %7515 = vpow2.f32 %v2916_v25  ;;  %v9911_v36 = vpop.xlane.xlu2 %3069  ;;  %v3432_v63 = vpack.c.bf16 %v3400_v28, %v3400_v28 }
 0x4eb   : > { %7517 = vpow2.f32 %v2918_v0  ;;  %3114 = vadd.xlane.f32.xlu1 %v3113_v17  ;;  %v9913_v58 = vpop.f32.mrf.mxu3  ;;  %3111 = vadd.xlane.f32.xlu2 %v3110_v37  ;;  %v3771_v0 = vmax.f32 %v9829_v21, %v9816_v60 }
 0x4ec   : > { %7519 = vpow2.f32 %v2920_v23  ;;  %v3293_v3 = vpop.f32.mrf.mxu2  ;;  %v2712_v23 = vsub.f32 %v9568_v57, %v9893_v9 }
 0x4ed   : > { %7521 = vpow2.f32 %v2922_v22  ;;  %v3294_v32 = vadd.f32 %v3293_v3, %v3204_v44  ;;  %v3774_v44 = vmax.f32 %v9849_v5, %v9833_v45 }
 0x4ee   : > { %v3207_v35 = vpop.f32.mrf.mxu1  ;;  %7523 = vrcp.f32 %v9827_v19 }
 0x4ef   : > { %v3401_v1 = vmul.f32 %v7514_v31, %v3294_v32  ;;  %v2713_v31 = vsub.f32 %v9548_v13, %v9893_v9  ;;  %v9938_v13 = vunpack.c.l.b16 %v3432_v63  ;;  %v9944_v9 = vpop.xlane.xlu1 %3072  ;;  %7525 = vrcp.f32 %v9831_v18 }
 0x4f0   : > { %v7516_v53 = vpop.eup %7515  ;;  %v9915_v40 = vpop.f32.mrf.mxu0  ;;  %6869 = vmatmul.msk.bf16.gmra.mxu3 %vm1109_vm2, %v12104_v61 }
 0x4f1   : > { %v7518_v25 = vpop.eup %7517  ;;  %3246 = vmatmul.bf16.gmra.mxu1 %v9869_v30  ;;  %v3433_v27 = vpack.c.bf16 %v3401_v1, %v3401_v1  ;;  %3335 = vmatmul.bf16.gmra.mxu2 %v9873_v29  ;;  %12105 = vst [vmem:[#allocation23_spill] sm:$0xff] %v9938_v13 }
 0x4f2   : > { %v7520_v39 = vpop.eup %7519  ;;  %v2647_v22 = vpop.xlane.xlu2 %2646 }
 0x4f3   : > { %v7522_v17 = vpop.eup %7521  ;;  %3772 = vmax.xlane.f32.xlu1 %v3771_v0  ;;  %v2714_v37 = vsub.f32 %v9582_v38, %v2647_v22  ;;  %v2715_v30 = vsub.f32 %v9575_v48, %v2647_v22  ;;  %6885 = vmatmul.msk.bf16.gmra.mxu0 %vm1109_vm2, %v12104_v61  ;;  %v9933_v54 = vpop.f32.mrf.mxu3  ;;  %v9935_v28 = vpack.c.bf16 %v7520_v39, %v7516_v53  ;;  %v9940_v57 = vunpack.c.l.b16 %v3433_v27 }
 0x4f4   : > { %3775 = vmax.xlane.f32.xlu2 %v3774_v44  ;;  %v9942_v29 = vpack.c.bf16 %v7522_v17, %v7518_v25  ;;  %v3296_v3 = vpop.f32.mrf.mxu2  ;;  %v2653_v25 = vpop.xlane.xlu0 %2652 }
 0x4f5   : > { %12106 = vst [vmem:[#allocation114_spill] sm:$0xff] %v9940_v57  ;;  %v2750_v38 = vpack.c.bf16 %v2714_v37, %v2712_v23  ;;  %v2751_v48 = vpack.c.bf16 %v2715_v30, %v2713_v31  ;;  %v3030_v32 = vunpack.c.h.bf16 %v9935_v28  ;;  %v3028_v1 = vunpack.c.l.bf16 %v9935_v28 }
 0x4f6   : > { %v3297_v19 = vadd.f32 %v3296_v3, %v3207_v35  ;;  %v3209_v63 = vpop.f32.mrf.mxu1  ;;  %v3031_v61 = vunpack.c.h.bf16 %v9942_v29  ;;  %v3029_v0 = vunpack.c.l.bf16 %v9942_v29  ;;  %v7524_v35 = vpop.eup %7523  ;;  %v2718_v3 = vsub.f32 %v9626_v8, %v2653_v25 }
 0x4f7   : > { %v2808_v39 = vunpack.c.l.bf16 %v2750_v38  ;;  %v2809_v44 = vunpack.c.l.bf16 %v2751_v48  ;;  %v2810_v27 = vunpack.c.h.bf16 %v2750_v38  ;;  %v2811_v23 = vunpack.c.h.bf16 %v2751_v48 }
 0x4f8   : > { %v3119_v31 = vadd.f32 %v3031_v61, %v3030_v32  ;;  %v3116_v22 = vadd.f32 %v3029_v0, %v3028_v1  ;;  %v9952_v17 = vpop.f32.mrf.mxu0  ;;  %v2719_v47 = vsub.f32 %v9619_v6, %v2653_v25  ;;  %v3402_v18 = vmul.f32 %v7524_v35, %v3297_v19 }
 0x4f9   : > { %v2924_v37 = vmul.f32 1.442695, %v2808_v39  ;;  %v2926_v30 = vmul.f32 1.442695, %v2809_v44  ;;  %v2928_v53 = vmul.f32 1.442695, %v2810_v27  ;;  %v7526_v44 = vpop.eup %7525  ;;  %v9961_v27 = vpop.xlane.xlu1 %3078 }
 0x4fa   : > { %v2930_v13 = vmul.f32 1.442695, %v2811_v23  ;;  %3120 = vadd.xlane.f32.xlu0 %v3119_v31  ;;  %v2650_v57 = vpop.xlane.xlu2 %2649 }
 0x4fb   : > { %7527 = vpow2.f32 %v2924_v37  ;;  %3117 = vadd.xlane.f32.xlu1 %v3116_v22  ;;  %v2716_v38 = vsub.f32 %v9608_v16, %v2650_v57  ;;  %v2717_v48 = vsub.f32 %v9589_v33, %v2650_v57  ;;  %v9959_v32 = vpop.f32.mrf.mxu3  ;;  %v3780_v33 = vmax.f32 %v9897_v20, %v9883_v42 }
 0x4fc   : > { %7529 = vpow2.f32 %v2926_v30  ;;  %v3298_v0 = vpop.f32.mrf.mxu2  ;;  %v3434_v57 = vpack.c.bf16 %v3402_v18, %v3402_v18 }
 0x4fd   : > { %7531 = vpow2.f32 %v2928_v53  ;;  %v2752_v1 = vpack.c.bf16 %v2718_v3, %v2716_v38  ;;  %v2753_v61 = vpack.c.bf16 %v2719_v47, %v2717_v48  ;;  %v3299_v8 = vadd.f32 %v3298_v0, %v3209_v63  ;;  %v12108_v53 = vld [vmem:[#allocation24_spill] sm:$0xff] }
 0x4fe   : > { %7533 = vpow2.f32 %v2930_v13  ;;  %v3212_v39 = vpop.f32.mrf.mxu1  ;;  %v3777_v13 = vmax.f32 %v9871_v56, %v9859_v59 }
 0x4ff   : > { %v2812_v6 = vunpack.c.l.bf16 %v2752_v1  ;;  %v2813_v25 = vunpack.c.l.bf16 %v2753_v61  ;;  %v2814_v23 = vunpack.c.h.bf16 %v2752_v1  ;;  %v2815_v16 = vunpack.c.h.bf16 %v2753_v61 }
 0x500   : > { %v3403_v31 = vmul.f32 %v7526_v44, %v3299_v8  ;;  %v9965_v19 = vpop.f32.mrf.mxu0  ;;  %6902 = vmatmul.msk.bf16.vlgmr.msra.gmra.mxu3 %vm1109_vm2, %v12108_v53  ;;  %7535 = vrcp.f32 %v9867_v12  ;;  %v9978_v1 = vunpack.c.l.b16 %v3434_v57 }
 0x501   : > { %12107 = vst [vmem:[#allocation115_spill] sm:$0xff] %v9965_v19  ;;  %v7528_v47 = vpop.eup %7527  ;;  %v2932_v63 = vmul.f32 1.442695, %v2812_v6  ;;  %v2934_v22 = vmul.f32 1.442695, %v2813_v25  ;;  %3251 = vmatmul.bf16.gmra.mxu1 %v9900_v11  ;;  %3340 = vmatmul.bf16.gmra.mxu2 %v9902_v51 }
 0x502   : > { %v2936_v37 = vmul.f32 1.442695, %v2814_v23  ;;  %v7530_v30 = vpop.eup %7529  ;;  %v2938_v35 = vmul.f32 1.442695, %v2815_v16  ;;  %v3435_v3 = vpack.c.bf16 %v3403_v31, %v3403_v31  ;;  %3781 = vmax.xlane.f32.xlu0 %v3780_v33  ;;  %12110 = vst [vmem:[#allocation116_spill] sm:$0xff] %v9978_v1 }
 0x503   : > { %v7532_v38 = vpop.eup %7531  ;;  %7537 = vpow2.f32 %v2932_v63  ;;  %3778 = vmax.xlane.f32.xlu1 %v3777_v13  ;;  %6918 = vmatmul.msk.bf16.vlgmr.msra.gmra.mxu0 %vm1109_vm2, %v12108_v53  ;;  %v9976_v48 = vpop.f32.mrf.mxu3  ;;  %v3786_v53 = vmax.f32 %v9933_v54, %v9915_v40 }
 0x504   : > { %12109 = vst [vmem:[#allocation24_spill] sm:$0xff] %v9976_v48  ;;  %v7534_v18 = vpop.eup %7533  ;;  %7539 = vpow2.f32 %v2934_v22  ;;  %v9980_v11 = vunpack.c.l.b16 %v3435_v3  ;;  %v9982_v12 = vpack.c.bf16 %v7532_v38, %v7528_v47  ;;  %v3301_v61 = vpop.f32.mrf.mxu2 }
 0x505   : > { %7541 = vpow2.f32 %v2936_v37  ;;  %v9984_v0 = vpack.c.bf16 %v7534_v18, %v7530_v30  ;;  %v3302_v8 = vadd.f32 %v3301_v61, %v3212_v39  ;;  %v9997_v47 = vpop.xlane.xlu1 %2655  ;;  %v9999_v39 = vpop.xlane.xlu2 %3075 }
 0x506   : > { %12111 = vst [vmem:[#allocation117_spill] sm:$0xff] %v9980_v11  ;;  %7543 = vpow2.f32 %v2938_v35  ;;  %v3214_v44 = vpop.f32.mrf.mxu1  ;;  %v3034_v6 = vunpack.c.h.bf16 %v9982_v12  ;;  %v3032_v23 = vunpack.c.l.bf16 %v9982_v12  ;;  %v7536_v33 = vpop.eup %7535 }
 0x507   : > { %v3035_v25 = vunpack.c.h.bf16 %v9984_v0  ;;  %v3033_v16 = vunpack.c.l.bf16 %v9984_v0  ;;  %7545 = vrcp.f32 %v9865_v55  ;;  %v3404_v3 = vmul.f32 %v7536_v33, %v3302_v8 }
 0x508   : > { %v9992_v57 = vpop.f32.mrf.mxu0  ;;  %v3783_v8 = vmax.f32 %v9913_v58, %v9908_v24  ;;  %v3789_v33 = vmax.f32 %v9959_v32, %v9952_v17  ;;  %7547 = vrcp.f32 %v9911_v36  ;;  %v2721_v36 = vsub.f32 %v9643_v46, %v9997_v47 }
 0x509   : > { %12112 = vst [vmem:[#allocation118_spill] sm:$0xff] %v9992_v57  ;;  %v7538_v31 = vpop.eup %7537  ;;  %v3125_v13 = vadd.f32 %v3035_v25, %v3034_v6  ;;  %v3122_v63 = vadd.f32 %v3033_v16, %v3032_v23  ;;  %v3436_v23 = vpack.c.bf16 %v3404_v3, %v3404_v3  ;;  %7549 = vrcp.f32 %v9944_v9 }
 0x50a   : > { %v7540_v22 = vpop.eup %7539  ;;  %7551 = vrcp.f32 %v9999_v39 }
 0x50b   : > { %v7542_v37 = vpop.eup %7541  ;;  %3787 = vmax.xlane.f32.xlu1 %v3786_v53  ;;  %3126 = vadd.xlane.f32.xlu2 %v3125_v13  ;;  %v10001_v30 = vpop.f32.mrf.mxu3  ;;  %v12114_v13 = vld [vmem:[#allocation67_spill] sm:$0xff] }
 0x50c   : > { %12113 = vst [vmem:[#allocation119_spill] sm:$0xff] %v10001_v30  ;;  %v7544_v35 = vpop.eup %7543  ;;  %3123 = vadd.xlane.f32.xlu0 %v3122_v63  ;;  %v10003_v38 = vpack.c.bf16 %v7542_v37, %v7538_v31  ;;  %v3303_v55 = vpop.f32.mrf.mxu2 }
 0x50d   : > { %v10005_v18 = vpack.c.bf16 %v7544_v35, %v7540_v22  ;;  %v3304_v61 = vadd.f32 %v3303_v55, %v3214_v44  ;;  %v7546_v6 = vpop.eup %7545  ;;  %v10025_v35 = vunpack.c.l.b16 %v3436_v23 }
 0x50e   : > { %v3217_v51 = vpop.f32.mrf.mxu1  ;;  %v3036_v1 = vunpack.c.l.bf16 %v10003_v38 }
 0x50f   : > { %v3037_v25 = vunpack.c.l.bf16 %v10005_v18  ;;  %v3405_v16 = vmul.f32 %v7546_v6, %v3304_v61  ;;  %12115 = vst [vmem:[#allocation67_spill] sm:$0xff] %v10025_v35  ;;  %v3039_v61 = vunpack.c.h.bf16 %v10005_v18 }
 0x510   : > { %v10009_v53 = vpop.f32.mrf.mxu0  ;;  %6903 = vmatmul.msk.bf16.gmra.mxu3 %vm1109_vm2, %v12114_v13 }
 0x511   : > { %v3128_v44 = vadd.f32 %v3037_v25, %v3036_v1  ;;  %v10017_v31 = vpop.xlane.xlu1 %3084  ;;  %v10019_v63 = vpop.xlane.xlu2 %3081  ;;  %3256 = vmatmul.bf16.gmra.mxu1 %v9935_v28  ;;  %v3437_v22 = vpack.c.bf16 %v3405_v16, %v3405_v16  ;;  %3345 = vmatmul.bf16.gmra.mxu2 %v9942_v29  ;;  %v3038_v28 = vunpack.c.h.bf16 %v10003_v38  ;;  %v3792_v16 = vmax.f32 %v9976_v48, %v9965_v19 }
 0x512   : > { %v10031_v1 = vpop.xlane.xlu0 %3748 }
 0x513   : > { %3790 = vmax.xlane.f32.xlu1 %v3789_v33  ;;  %3784 = vmax.xlane.f32.xlu2 %v3783_v8  ;;  %v10023_v37 = vpop.f32.mrf.mxu3  ;;  %v10027_v3 = vunpack.c.l.b16 %v3437_v22 }
 0x514   : > { %3129 = vadd.xlane.f32.xlu0 %v3128_v44  ;;  %6919 = vmatmul.msk.bf16.gmra.mxu0 %vm1109_vm2, %v12114_v13  ;;  %v3306_v55 = vpop.f32.mrf.mxu2  ;;  %v3131_v13 = vadd.f32 %v3039_v61, %v3038_v28  ;;  %v2720_v44 = vsub.f32 %v9656_v10, %v9997_v47  ;;  %v3798_v39 = vmax.f32 %v10023_v37, %v10009_v53 }
 0x515   : > { %12116 = vst [vmem:[#allocation120_spill] sm:$0xff] %v10027_v3  ;;  %v3307_v6 = vadd.f32 %v3306_v55, %v3217_v51  ;;  %v7548_v55 = vpop.eup %7547 }
 0x516   : > { %v3219_v25 = vpop.f32.mrf.mxu1  ;;  %v7550_v46 = vpop.eup %7549 }
 0x517   : > { %v3406_v61 = vmul.f32 %v7548_v55, %v3307_v6 }
 0x518   : > { %v10038_v23 = vpop.f32.mrf.mxu0 }
 0x519   : > { %v2659_v8 = vpop.xlane.xlu1 %2658  ;;  %v10043_v33 = vpop.xlane.xlu2 %3087 }
 0x51a   : > { %v2722_v51 = vsub.f32 %v9673_v41, %v2659_v8  ;;  %v2723_v22 = vsub.f32 %v9662_v34, %v2659_v8  ;;  %v3755_v11 = vpop.xlane.xlu0 %3754  ;;  %v3842_v34 = vsub.f32 %v9708_v50, %v10031_v1  ;;  %v3843_v41 = vsub.f32 %v9704_v43, %v10031_v1 }
 0x51b   : > { %3793 = vmax.xlane.f32.xlu1 %v3792_v16  ;;  %3132 = vadd.xlane.f32.xlu2 %v3131_v13  ;;  %v10051_v9 = vpop.f32.mrf.mxu3  ;;  %v3846_v16 = vsub.f32 %v9728_v26, %v3755_v11 }
 0x51c   : > { %v2754_v29 = vpack.c.bf16 %v2722_v51, %v2720_v44  ;;  %v2755_v28 = vpack.c.bf16 %v2723_v22, %v2721_v36  ;;  %v3308_v35 = vpop.f32.mrf.mxu2  ;;  %v3438_v36 = vpack.c.bf16 %v3406_v61, %v3406_v61 }
 0x51d   : > { %v3309_v47 = vadd.f32 %v3308_v35, %v3219_v25  ;;  %v3847_v35 = vsub.f32 %v9726_v2, %v3755_v11 }
 0x51e   : > { %v2816_v3 = vunpack.c.l.bf16 %v2754_v29  ;;  %v2817_v52 = vunpack.c.l.bf16 %v2755_v28  ;;  %v2818_v10 = vunpack.c.h.bf16 %v2754_v29  ;;  %v2819_v19 = vunpack.c.h.bf16 %v2755_v28  ;;  %v3222_v48 = vpop.f32.mrf.mxu1  ;;  %v12117_v29 = vld [vmem:[#allocation25_spill] sm:$0xff] }
 0x51f   : > { %v3407_v50 = vmul.f32 %v7550_v46, %v3309_v47 }
 0x520   : > { %v2940_v6 = vmul.f32 1.442695, %v2816_v3  ;;  %v2942_v13 = vmul.f32 1.442695, %v2817_v52  ;;  %v2944_v8 = vmul.f32 1.442695, %v2818_v10  ;;  %v10059_v44 = vpop.f32.mrf.mxu0  ;;  %6904 = vmatmul.msk.bf16.gmra.mxu3 %vm1109_vm2, %v12117_v29 }
 0x521   : > { %v2946_v51 = vmul.f32 1.442695, %v2819_v19  ;;  %v3746_v22 = vpop.xlane.xlu1 %3745  ;;  %v3752_v55 = vpop.xlane.xlu2 %3751  ;;  %3261 = vmatmul.bf16.gmra.mxu1 %v9982_v12  ;;  %3350 = vmatmul.bf16.gmra.mxu2 %v9984_v0  ;;  %v3439_v3 = vpack.c.bf16 %v3407_v50, %v3407_v50 }
 0x522   : > { %7553 = vpow2.f32 %v2940_v6  ;;  %v3840_v43 = vsub.f32 %v9690_v62, %v3746_v22  ;;  %v3841_v26 = vsub.f32 %v9682_v14, %v3746_v22  ;;  %v3844_v52 = vsub.f32 %v9722_v7, %v3752_v55  ;;  %v7552_v14 = vpop.eup %7551 }
 0x523   : > { %7555 = vpow2.f32 %v2942_v13  ;;  %3799 = vmax.xlane.f32.xlu1 %v3798_v39  ;;  %v3845_v19 = vsub.f32 %v9714_v49, %v3752_v55  ;;  %v10072_v1 = vpop.f32.mrf.mxu3  ;;  %v10076_v62 = vunpack.c.l.b16 %v3438_v36  ;;  %v10078_v7 = vunpack.c.l.b16 %v3439_v3 }
 0x524   : > { %7557 = vpow2.f32 %v2944_v8  ;;  %v3904_v12 = vpack.c.bf16 %v3842_v34, %v3840_v43  ;;  %v3905_v25 = vpack.c.bf16 %v3843_v41, %v3841_v26  ;;  %v3906_v28 = vpack.c.bf16 %v3846_v16, %v3844_v52  ;;  %6920 = vmatmul.msk.bf16.gmra.mxu0 %vm1109_vm2, %v12117_v29  ;;  %v3311_v11 = vpop.f32.mrf.mxu2 }
 0x525   : > { %12118 = vst [vmem:[#allocation25_spill] sm:$0xff] %v10076_v62  ;;  %7559 = vpow2.f32 %v2946_v51  ;;  %v3907_v2 = vpack.c.bf16 %v3847_v35, %v3845_v19  ;;  %v3801_v51 = vmax.f32 %v10051_v9, %v10038_v23  ;;  %v3312_v55 = vadd.f32 %v3311_v11, %v3222_v48 }
 0x526   : > { %12119 = vst [vmem:[#allocation121_spill] sm:$0xff] %v10078_v7  ;;  %v3936_v0 = vunpack.c.l.bf16 %v3904_v12  ;;  %v3937_v61 = vunpack.c.l.bf16 %v3905_v25  ;;  %v3938_v49 = vunpack.c.h.bf16 %v3904_v12  ;;  %v3939_v10 = vunpack.c.h.bf16 %v3905_v25  ;;  %v3224_v46 = vpop.f32.mrf.mxu1  ;;  %v12128_v7 = vld [vmem:[#allocation15_spill] sm:$0xff] }
 0x527   : > { %7561 = vrcp.f32 %v9961_v27  ;;  %v3940_v41 = vunpack.c.l.bf16 %v3906_v28  ;;  %v3941_v47 = vunpack.c.l.bf16 %v3907_v2  ;;  %v3942_v29 = vunpack.c.h.bf16 %v3906_v28 }
 0x528   : > { %v7554_v16 = vpop.eup %7553  ;;  %v4000_v6 = vmul.f32 1.442695, %v3936_v0  ;;  %v4002_v13 = vmul.f32 1.442695, %v3937_v61  ;;  %v4004_v8 = vmul.f32 1.442695, %v3938_v49  ;;  %v10083_v36 = vpop.f32.mrf.mxu0  ;;  %v3943_v22 = vunpack.c.h.bf16 %v3907_v2 }
 0x529   : > { %v7556_v39 = vpop.eup %7555  ;;  %v4006_v50 = vmul.f32 1.442695, %v3939_v10  ;;  %v10087_v27 = vpop.xlane.xlu1 %3090  ;;  %v4008_v52 = vmul.f32 1.442695, %v3940_v41  ;;  %v4010_v3 = vmul.f32 1.442695, %v3941_v47  ;;  %v3408_v19 = vmul.f32 %v7552_v14, %v3312_v55 }
 0x52a   : > { %v3761_v43 = vpop.xlane.xlu2 %3760  ;;  %v7558_v26 = vpop.eup %7557  ;;  %7563 = vpow2.f32 %v4000_v6  ;;  %v4012_v28 = vmul.f32 1.442695, %v3942_v29  ;;  %v4014_v2 = vmul.f32 1.442695, %v3943_v22  ;;  %v12122_v55 = vld [vmem:[#allocation57_spill] sm:$0xff] }
 0x52b   : > { %v7560_v35 = vpop.eup %7559  ;;  %7565 = vpow2.f32 %v4002_v13  ;;  %3802 = vmax.xlane.f32.xlu1 %v3801_v51  ;;  %v10089_v12 = vpop.f32.mrf.mxu3  ;;  %v10091_v25 = vpack.c.bf16 %v7558_v26, %v7554_v16  ;;  %v3440_v16 = vpack.c.bf16 %v3408_v19, %v3408_v19  ;;  %v12120_v51 = vld [vmem:[#allocation27_spill] sm:$0xff]  ;;  %v3851_v26 = vsub.f32 %v12122_v55, %v3761_v43 }
 0x52c   : > { %7567 = vpow2.f32 %v4004_v8  ;;  %v10093_v0 = vpack.c.bf16 %v7560_v35, %v7556_v39  ;;  %v3313_v11 = vpop.f32.mrf.mxu2 }
 0x52d   : > { %v7562_v48 = vpop.eup %7561  ;;  %7569 = vpow2.f32 %v4006_v50  ;;  %v3042_v61 = vunpack.c.h.bf16 %v10091_v25  ;;  %v3040_v49 = vunpack.c.l.bf16 %v10091_v25  ;;  %v3314_v10 = vadd.f32 %v3313_v11, %v3224_v46  ;;  %v12121_v46 = vld [vmem:[#allocation58_spill] sm:$0xff]  ;;  %v12124_v11 = vld [vmem:[#allocation51_spill] sm:$0xff] }
 0x52e   : > { %7571 = vpow2.f32 %v4008_v52  ;;  %v3227_v14 = vpop.f32.mrf.mxu1  ;;  %v3043_v41 = vunpack.c.h.bf16 %v10093_v0  ;;  %v3041_v47 = vunpack.c.l.bf16 %v10093_v0  ;;  %v3850_v22 = vsub.f32 %v12121_v46, %v3761_v43 }
 0x52f   : > { %7573 = vpow2.f32 %v4010_v3  ;;  %v3409_v13 = vmul.f32 %v7562_v48, %v3314_v10  ;;  %v10112_v10 = vunpack.c.l.b16 %v3440_v16 }
 0x530   : > { %v7564_v6 = vpop.eup %7563  ;;  %7575 = vpow2.f32 %v4012_v28  ;;  %v3137_v8 = vadd.f32 %v3043_v41, %v3042_v61  ;;  %v3134_v29 = vadd.f32 %v3041_v47, %v3040_v49  ;;  %v10099_v39 = vpop.f32.mrf.mxu0  ;;  %6905 = vmatmul.msk.bf16.gmra.mxu3 %vm1109_vm2, %v12120_v51  ;;  %v12123_v28 = vld [vmem:[#allocation10_spill] sm:$0xff] }
 0x531   : > { %v7566_v50 = vpop.eup %7565  ;;  %7577 = vpow2.f32 %v4014_v2  ;;  %v3758_v52 = vpop.xlane.xlu1 %3757  ;;  %3266 = vmatmul.bf16.gmra.mxu1 %v10003_v38  ;;  %v3441_v19 = vpack.c.bf16 %v3409_v13, %v3409_v13  ;;  %3355 = vmatmul.bf16.gmra.mxu2 %v10005_v18  ;;  %12125 = vst [vmem:[#allocation27_spill] sm:$0xff] %v10112_v10 }
 0x532   : > { %v3764_v35 = vpop.xlane.xlu2 %3763  ;;  %v7568_v3 = vpop.eup %7567  ;;  %3138 = vadd.xlane.f32.xlu2 %v3137_v8  ;;  %3135 = vadd.xlane.f32.xlu0 %v3134_v29  ;;  %v3848_v48 = vsub.f32 %v12123_v28, %v3758_v52  ;;  %v3849_v61 = vsub.f32 %v12124_v11, %v3758_v52  ;;  %7579 = vrcp.f32 %v10017_v31  ;;  %v3795_v8 = vmax.f32 %v10001_v30, %v9992_v57  ;;  %v12130_v57 = vld [vmem:[#allocation68_spill] sm:$0xff] }
 0x533   : > { %v7570_v49 = vpop.eup %7569  ;;  %v10110_v2 = vpop.f32.mrf.mxu3  ;;  %v10114_v41 = vunpack.c.l.b16 %v3441_v19  ;;  %7581 = vrcp.f32 %v10019_v63  ;;  %v10121_v18 = vpack.c.bf16 %v7568_v3, %v7564_v6 }
 0x534   : > { %v7572_v43 = vpop.eup %7571  ;;  %v3908_v38 = vpack.c.bf16 %v3850_v22, %v3848_v48  ;;  %v3909_v47 = vpack.c.bf16 %v3851_v26, %v3849_v61  ;;  %6921 = vmatmul.msk.bf16.gmra.mxu0 %vm1109_vm2, %v12120_v51  ;;  %v3316_v31 = vpop.f32.mrf.mxu2  ;;  %v10127_v48 = vpack.c.bf16 %v7570_v49, %v7566_v50  ;;  %7583 = vrcp.f32 %v10043_v33 }
 0x535   : > { %12126 = vst [vmem:[#allocation58_spill] sm:$0xff] %v10114_v41  ;;  %v7574_v13 = vpop.eup %7573  ;;  %v3317_v51 = vadd.f32 %v3316_v31, %v3227_v14 }
 0x536   : > { %v7576_v29 = vpop.eup %7575  ;;  %v3944_v46 = vunpack.c.l.bf16 %v3908_v38  ;;  %v3945_v55 = vunpack.c.l.bf16 %v3909_v47  ;;  %v3946_v22 = vunpack.c.h.bf16 %v3908_v38  ;;  %v3229_v26 = vpop.f32.mrf.mxu1  ;;  %v3947_v19 = vunpack.c.h.bf16 %v3909_v47  ;;  %v12127_v38 = vld [vmem:[#allocation61_spill] sm:$0xff] }
 0x537   : > { %v7578_v52 = vpop.eup %7577  ;;  %v10125_v28 = vpack.c.bf16 %v7576_v29, %v7572_v43  ;;  %v3852_v62 = vsub.f32 %v12127_v38, %v3764_v35  ;;  %v3853_v47 = vsub.f32 %v12128_v7, %v3764_v35  ;;  %v4162_v43 = vunpack.c.h.bf16 %v10121_v18 }
 0x538   : > { %v4016_v11 = vmul.f32 1.442695, %v3944_v46  ;;  %v4018_v63 = vmul.f32 1.442695, %v3945_v55  ;;  %v4020_v61 = vmul.f32 1.442695, %v3946_v22  ;;  %v10129_v6 = vpop.f32.mrf.mxu0  ;;  %v10131_v3 = vpack.c.bf16 %v7578_v52, %v7574_v13  ;;  %v7580_v34 = vpop.eup %7579 }
 0x539   : > { %v4022_v16 = vmul.f32 1.442695, %v3947_v19  ;;  %v7582_v31 = vpop.eup %7581  ;;  %v4166_v33 = vunpack.c.h.bf16 %v10125_v28  ;;  %v4164_v29 = vunpack.c.l.bf16 %v10125_v28  ;;  %v4163_v46 = vunpack.c.h.bf16 %v10127_v48 }
 0x53a   : > { %v3767_v14 = vpop.xlane.xlu2 %3766  ;;  %7585 = vpow2.f32 %v4016_v11  ;;  %3796 = vmax.xlane.f32.xlu2 %v3795_v8  ;;  %v4167_v8 = vunpack.c.h.bf16 %v10131_v3  ;;  %v4165_v55 = vunpack.c.l.bf16 %v10131_v3  ;;  %v4160_v22 = vunpack.c.l.bf16 %v10121_v18 }
 0x53b   : > { %v3854_v50 = vsub.f32 %v9786_v4, %v3767_v14  ;;  %v3855_v49 = vsub.f32 %v9778_v15, %v3767_v14  ;;  %7587 = vpow2.f32 %v4018_v63  ;;  %v10139_v13 = vpop.f32.mrf.mxu3  ;;  %v3410_v4 = vmul.f32 %v7582_v31, %v3317_v51  ;;  %v7584_v14 = vpop.eup %7583 }
 0x53c   : > { %7589 = vpow2.f32 %v4020_v61  ;;  %v3318_v15 = vpop.f32.mrf.mxu2  ;;  %v10147_v41 = vadd.f32 %v4165_v55, %v4164_v29  ;;  %v4161_v61 = vunpack.c.l.bf16 %v10127_v48 }
 0x53d   : > { %v3910_v7 = vpack.c.bf16 %v3854_v50, %v3852_v62  ;;  %v3911_v35 = vpack.c.bf16 %v3855_v49, %v3853_v47  ;;  %7591 = vpow2.f32 %v4022_v16  ;;  %v3319_v10 = vadd.f32 %v3318_v15, %v3229_v26 }
 0x53e   : > { %v3232_v38 = vpop.f32.mrf.mxu1  ;;  %v10149_v62 = vadd.f32 %v4163_v46, %v4162_v43  ;;  %v4233_v49 = vadd.f32 %v4167_v8, %v4166_v33  ;;  %v10157_v43 = vadd.f32 %v4161_v61, %v4160_v22 }
 0x53f   : > { %v3948_v52 = vunpack.c.l.bf16 %v3910_v7  ;;  %v3949_v19 = vunpack.c.l.bf16 %v3911_v35  ;;  %v3950_v11 = vunpack.c.h.bf16 %v3910_v7  ;;  %v3951_v63 = vunpack.c.h.bf16 %v3911_v35 }
 0x540   : > { %12129 = vst [vmem:[#allocation57_spill] sm:$0xff] %v10149_v62  ;;  %v7586_v16 = vpop.eup %7585  ;;  %v10152_v31 = vpop.f32.mrf.mxu0  ;;  %6906 = vmatmul.msk.bf16.gmra.mxu3 %vm1109_vm2, %v12130_v57  ;;  %v3442_v35 = vpack.c.bf16 %v3410_v4, %v3410_v4  ;;  %v3411_v26 = vmul.f32 %v7580_v34, %v3319_v10 }
 0x541   : > { %v4024_v51 = vmul.f32 1.442695, %v3948_v52  ;;  %v4026_v47 = vmul.f32 1.442695, %v3949_v19  ;;  %v4028_v50 = vmul.f32 1.442695, %v3950_v11  ;;  %v7588_v7 = vpop.eup %7587  ;;  %3271 = vmatmul.bf16.gmra.mxu1 %v10091_v25  ;;  %3360 = vmatmul.bf16.gmra.mxu2 %v10093_v0 }
 0x542   : > { %v4030_v30 = vmul.f32 1.442695, %v3951_v63  ;;  %12131 = vst [vmem:[#allocation10_spill] sm:$0xff] %v10157_v43  ;;  %v7590_v29 = vpop.eup %7589  ;;  %4234 = vadd.xlane.f32.xlu2 %v4233_v49  ;;  %v3443_v15 = vpack.c.bf16 %v3411_v26, %v3411_v26  ;;  %v10168_v25 = vunpack.c.l.b16 %v3442_v35 }
 0x543   : > { %7593 = vpow2.f32 %v4024_v51  ;;  %v7592_v46 = vpop.eup %7591  ;;  %v10160_v33 = vpop.f32.mrf.mxu3  ;;  %v10162_v8 = vpack.c.bf16 %v7590_v29, %v7586_v16 }
 0x544   : > { %7595 = vpow2.f32 %v4026_v47  ;;  %6922 = vmatmul.msk.bf16.gmra.mxu0 %vm1109_vm2, %v12130_v57  ;;  %v10166_v34 = vpack.c.bf16 %v7592_v46, %v7588_v7  ;;  %12132 = vst [vmem:[#allocation51_spill] sm:$0xff] %v10168_v25  ;;  %v10170_v10 = vunpack.c.l.b16 %v3443_v15  ;;  %v3321_v4 = vpop.f32.mrf.mxu2  ;;  %v3807_v57 = vmax.f32 %v10089_v12, %v10083_v36 }
 0x545   : > { %7597 = vpow2.f32 %v4028_v50  ;;  %v4170_v55 = vunpack.c.h.bf16 %v10162_v8  ;;  %v3322_v11 = vadd.f32 %v3321_v4, %v3232_v38  ;;  %v3813_v4 = vmax.f32 %v10139_v13, %v10129_v6 }
 0x546   : > { %7599 = vpow2.f32 %v4030_v30  ;;  %12133 = vst [vmem:[#allocation61_spill] sm:$0xff] %v10170_v10  ;;  %v3234_v22 = vpop.f32.mrf.mxu1  ;;  %v4171_v0 = vunpack.c.h.bf16 %v10166_v34 }
 0x547   : > { %7601 = vrcp.f32 %v10087_v27  ;;  %v3412_v49 = vmul.f32 %v7584_v14, %v3322_v11  ;;  %v3810_v27 = vmax.f32 %v10110_v2, %v10099_v39  ;;  %v12134_v14 = vld [vmem:[#allocation26_spill] sm:$0xff] }
 0x548   : > { %v4239_v63 = vadd.f32 %v4171_v0, %v4170_v55  ;;  %v10178_v61 = vpop.f32.mrf.mxu0 }
 0x549   : > { %v7594_v19 = vpop.eup %7593  ;;  %v3444_v55 = vpack.c.bf16 %v3412_v49, %v3412_v49 }
 0x54a   : > { %v7596_v30 = vpop.eup %7595  ;;  %3808 = vmax.xlane.f32.xlu2 %v3807_v57  ;;  %4240 = vadd.xlane.f32.xlu1 %v4239_v63  ;;  %v4168_v63 = vunpack.c.l.bf16 %v10162_v8 }
 0x54b   : > { %v7598_v16 = vpop.eup %7597  ;;  %v10181_v47 = vpop.f32.mrf.mxu3 }
 0x54c   : > { %v7600_v51 = vpop.eup %7599  ;;  %v10183_v50 = vpack.c.bf16 %v7598_v16, %v7594_v19  ;;  %v3323_v35 = vpop.f32.mrf.mxu2  ;;  %v5948_v16 = vunpack.c.l.b16 %v3444_v55 }
 0x54d   : > { %v10185_v7 = vpack.c.bf16 %v7600_v51, %v7596_v30  ;;  %v3324_v26 = vadd.f32 %v3323_v35, %v3234_v22  ;;  %v7602_v15 = vpop.eup %7601  ;;  %v4169_v30 = vunpack.c.l.bf16 %v10166_v34 }
 0x54e   : > { %v4174_v38 = vunpack.c.h.bf16 %v10183_v50  ;;  %v3237_v29 = vpop.f32.mrf.mxu1  ;;  %v4172_v49 = vunpack.c.l.bf16 %v10183_v50 }
 0x54f   : > { %v4175_v46 = vunpack.c.h.bf16 %v10185_v7  ;;  %v3413_v0 = vmul.f32 %v7602_v15, %v3324_v26 }
 0x550   : > { %v10193_v19 = vpop.f32.mrf.mxu0  ;;  %6907 = vmatmul.msk.bf16.gmra.mxu3 %vm1109_vm2, %v12134_v14 }
 0x551   : > { %v10197_v57 = vadd.f32 %v4175_v46, %v4174_v38  ;;  %4376 = vmatmul.bf16.vlgmr.msrb.gmra.mxu1 %v10121_v18  ;;  %v3445_v22 = vpack.c.bf16 %v3413_v0, %v3413_v0  ;;  %4465 = vmatmul.bf16.vlgmr.msrb.gmra.mxu2 %v10127_v48  ;;  %v4173_v18 = vunpack.c.l.bf16 %v10185_v7  ;;  %v4236_v46 = vadd.f32 %v4169_v30, %v4168_v63  ;;  %v12139_v63 = vld [vmem:[#allocation28_spill] sm:$0xff] }
 0x552   : > { %3811 = vmax.xlane.f32.xlu2 %v3810_v27  ;;  %3814 = vmax.xlane.f32.xlu1 %v3813_v4 }
 0x553   : > { %v10201_v11 = vpop.f32.mrf.mxu3  ;;  %v5949_v51 = vunpack.c.l.b16 %v3445_v22  ;;  %v4242_v15 = vadd.f32 %v4173_v18, %v4172_v49 }
 0x554   : > { %6923 = vmatmul.msk.bf16.gmra.mxu0 %vm1109_vm2, %v12134_v14  ;;  %v3326_v35 = vpop.f32.mrf.mxu2 }
 0x555   : > { %v5973_v38 = vpack.c.b16 %v5949_v51, %v5948_v16  ;;  %v10209_v26 = vadd.f32 %v3326_v35, %v3237_v29  ;;  %v3822_v29 = vmax.f32 %v10201_v11, %v10193_v19  ;;  %v3770_v51 = vpop.xlane.xlu0 %3769 }
 0x556   : > { %v3239_v48 = vpop.f32.mrf.mxu1 }
 0x557   : > { %12135 = vst [vmem:[#allocation15_spill] sm:$0xff] %v10209_v26  ;;  %5996 = vrot.lane.b32.xlu0 %v5973_v38, %s8141_s14 }
 0x558   : > { %v10212_v27 = vpop.f32.mrf.mxu0 }
 0x559   : > { %12136 = vst [vmem:[#allocation68_spill] sm:$0xff] %v10212_v27 }
 0x55a   : > { %4237 = vadd.xlane.f32.xlu2 %v4236_v46  ;;  %4243 = vadd.xlane.f32.xlu1 %v4242_v15  ;;  %v12143_v15 = vld [vmem:[#allocation107_spill] sm:$0xff] }
 0x55b   : > { %v10214_v4 = vpop.f32.mrf.mxu3 }
 0x55c   : > { %v3328_v55 = vpop.f32.mrf.mxu2 }
 0x55d   : > { %v10218_v14 = vadd.f32 %v3328_v55, %v3239_v48  ;;  %v12142_v48 = vld [vmem:[#allocation101_spill] sm:$0xff]  ;;  %v3857_v55 = vsub.f32 %v12143_v15, %v3770_v51 }
 0x55e   : > { %v10216_v0 = vpop.xlane.xlu1 %3114  ;;  %v3242_v22 = vpop.f32.mrf.mxu1  ;;  %v3856_v46 = vsub.f32 %v12142_v48, %v3770_v51 }
 0x55f   : > { %12137 = vst [vmem:[#allocation26_spill] sm:$0xff] %v10218_v14  ;;  %v10240_v26 = vpop.xlane.xlu2 %3111 }
 0x560   : > { %v10222_v16 = vpop.f32.mrf.mxu0  ;;  %6908 = vmatmul.msk.bf16.gmra.mxu3 %vm1109_vm2, %v12139_v63 }
 0x561   : > { %12138 = vst [vmem:[#allocation122_spill] sm:$0xff] %v10222_v16  ;;  %4381 = vmatmul.bf16.gmra.mxu1 %v10125_v28  ;;  %4470 = vmatmul.bf16.gmra.mxu2 %v10131_v3 }
 0x562   : > { %3823 = vmax.xlane.f32.xlu2 %v3822_v29 }
 0x563   : > { %v10228_v30 = vpop.f32.mrf.mxu3 }
 0x564   : > { %12140 = vst [vmem:[#allocation28_spill] sm:$0xff] %v10228_v30  ;;  %6924 = vmatmul.msk.bf16.gmra.mxu0 %vm1109_vm2, %v12139_v63  ;;  %v3331_v49 = vpop.f32.mrf.mxu2 }
 0x565   : > { %v10232_v35 = vadd.f32 %v3331_v49, %v3242_v22 }
 0x566   : > { %v3773_v18 = vpop.xlane.xlu1 %3772  ;;  %v3244_v38 = vpop.f32.mrf.mxu1 }
 0x567   : > { %12141 = vst [vmem:[#allocation123_spill] sm:$0xff] %v10232_v35  ;;  %v3858_v28 = vsub.f32 %v9829_v21, %v3773_v18  ;;  %v3859_v29 = vsub.f32 %v9816_v60, %v3773_v18 }
 0x568   : > { %v10238_v3 = vpop.f32.mrf.mxu0 }
 0x569   : > { %v3912_v52 = vpack.c.bf16 %v3858_v28, %v3856_v46  ;;  %v3913_v14 = vpack.c.bf16 %v3859_v29, %v3857_v55  ;;  %v12146_v55 = vld [vmem:[#allocation29_spill] sm:$0xff] }
 0x56b   : > { %v3952_v63 = vunpack.c.l.bf16 %v3912_v52  ;;  %v3953_v25 = vunpack.c.l.bf16 %v3913_v14  ;;  %v3954_v10 = vunpack.c.h.bf16 %v3912_v52  ;;  %v3955_v22 = vunpack.c.h.bf16 %v3913_v14  ;;  %v10242_v49 = vpop.f32.mrf.mxu3 }
 0x56c   : > { %v3333_v51 = vpop.f32.mrf.mxu2 }
 0x56d   : > { %v4032_v35 = vmul.f32 1.442695, %v3952_v63  ;;  %v4034_v48 = vmul.f32 1.442695, %v3953_v25  ;;  %v4036_v43 = vmul.f32 1.442695, %v3954_v10  ;;  %v10246_v60 = vadd.f32 %v3333_v51, %v3244_v38  ;;  %v3776_v10 = vpop.xlane.xlu2 %3775 }
 0x56e   : > { %v4038_v15 = vmul.f32 1.442695, %v3955_v22  ;;  %v10244_v21 = vpop.xlane.xlu1 %3117  ;;  %v3247_v18 = vpop.f32.mrf.mxu1  ;;  %v3861_v63 = vsub.f32 %v9833_v45, %v3776_v10 }
 0x56f   : > { %12144 = vst [vmem:[#allocation101_spill] sm:$0xff] %v10246_v60  ;;  %7603 = vpow2.f32 %v4032_v35 }
 0x570   : > { %7605 = vpow2.f32 %v4034_v48  ;;  %v10248_v46 = vpop.f32.mrf.mxu0  ;;  %6909 = vmatmul.msk.bf16.gmra.mxu3 %vm1109_vm2, %v12146_v55 }
 0x571   : > { %12145 = vst [vmem:[#allocation107_spill] sm:$0xff] %v10248_v46  ;;  %7607 = vpow2.f32 %v4036_v43  ;;  %4386 = vmatmul.bf16.gmra.mxu1 %v10162_v8  ;;  %4475 = vmatmul.bf16.gmra.mxu2 %v10166_v34  ;;  %v3860_v34 = vsub.f32 %v9849_v5, %v3776_v10 }
 0x572   : > { %7609 = vpow2.f32 %v4038_v15 }
 0x573   : > { %v10254_v25 = vpop.f32.mrf.mxu3  ;;  %7611 = vrcp.f32 %v10240_v26  ;;  %v3825_v26 = vmax.f32 %v10214_v4, %v10212_v27 }
 0x574   : > { %12147 = vst [vmem:[#allocation29_spill] sm:$0xff] %v10254_v25  ;;  %6925 = vmatmul.msk.bf16.gmra.mxu0 %vm1109_vm2, %v12146_v55  ;;  %v3834_v52 = vmax.f32 %v10254_v25, %v10248_v46  ;;  %v3336_v35 = vpop.f32.mrf.mxu2  ;;  %v12150_v25 = vld [vmem:[#allocation71_spill] sm:$0xff] }
 0x575   : > { %v7604_v14 = vpop.eup %7603  ;;  %v10260_v29 = vadd.f32 %v3336_v35, %v3247_v18  ;;  %v10272_v35 = vpop.xlane.xlu0 %3120 }
 0x576   : > { %v7606_v38 = vpop.eup %7605  ;;  %v3779_v28 = vpop.xlane.xlu1 %3778  ;;  %3835 = vmax.xlane.f32.xlu2 %v3834_v52 }
 0x577   : > { %12148 = vst [vmem:[#allocation124_spill] sm:$0xff] %v10260_v29  ;;  %v3249_v43 = vpop.f32.mrf.mxu1  ;;  %v7608_v8 = vpop.eup %7607  ;;  %v3862_v22 = vsub.f32 %v9871_v56, %v3779_v28  ;;  %v3863_v48 = vsub.f32 %v9859_v59, %v3779_v28 }
 0x578   : > { %v7610_v51 = vpop.eup %7609  ;;  %v10266_v15 = vpack.c.bf16 %v7608_v8, %v7604_v14  ;;  %v10268_v55 = vpop.f32.mrf.mxu0 }
 0x579   : > { %v3914_v60 = vpack.c.bf16 %v3862_v22, %v3860_v34  ;;  %v3915_v62 = vpack.c.bf16 %v3863_v48, %v3861_v63  ;;  %v10270_v18 = vpack.c.bf16 %v7610_v51, %v7606_v38  ;;  %v3804_v48 = vmax.f32 %v10072_v1, %v10059_v44 }
 0x57a   : > { %v4176_v52 = vunpack.c.l.bf16 %v10266_v15 }
 0x57b   : > { %v3956_v5 = vunpack.c.l.bf16 %v3914_v60  ;;  %v3957_v29 = vunpack.c.l.bf16 %v3915_v62  ;;  %v10275_v45 = vpop.f32.mrf.mxu3  ;;  %v3958_v56 = vunpack.c.h.bf16 %v3914_v60  ;;  %v4177_v59 = vunpack.c.l.bf16 %v10270_v18 }
 0x57c   : > { %v3959_v10 = vunpack.c.h.bf16 %v3915_v62  ;;  %v3338_v14 = vpop.f32.mrf.mxu2 }
 0x57d   : > { %v4040_v28 = vmul.f32 1.442695, %v3956_v5  ;;  %v4248_v8 = vadd.f32 %v4177_v59, %v4176_v52  ;;  %v10282_v38 = vadd.f32 %v3338_v14, %v3249_v43  ;;  %v4042_v63 = vmul.f32 1.442695, %v3957_v29  ;;  %v3782_v43 = vpop.xlane.xlu0 %3781  ;;  %v7612_v59 = vpop.eup %7611 }
 0x57e   : > { %v10278_v46 = vpop.xlane.xlu1 %3787  ;;  %v10280_v34 = vpop.xlane.xlu2 %3126  ;;  %v4044_v51 = vmul.f32 1.442695, %v3958_v56  ;;  %v4046_v62 = vmul.f32 1.442695, %v3959_v10  ;;  %v3864_v10 = vsub.f32 %v9897_v20, %v3782_v43 }
 0x57f   : > { %12149 = vst [vmem:[#allocation125_spill] sm:$0xff] %v10282_v38  ;;  %v3252_v22 = vpop.f32.mrf.mxu1  ;;  %4249 = vadd.xlane.f32.xlu1 %v4248_v8  ;;  %7613 = vpow2.f32 %v4040_v28 }
 0x580   : > { %v10286_v60 = vpop.f32.mrf.mxu0  ;;  %6910 = vmatmul.msk.bf16.gmra.mxu3 %vm1109_vm2, %v12150_v25  ;;  %7615 = vpow2.f32 %v4042_v63 }
 0x581   : > { %4391 = vmatmul.bf16.gmra.mxu1 %v10183_v50  ;;  %3805 = vmax.xlane.f32.xlu0 %v3804_v48  ;;  %7617 = vpow2.f32 %v4044_v51 }
 0x582   : > { %4480 = vmatmul.bf16.gmra.mxu2 %v10185_v7  ;;  %7619 = vpow2.f32 %v4046_v62  ;;  %v3865_v7 = vsub.f32 %v9883_v42, %v3782_v43 }
 0x583   : > { %v10293_v29 = vpop.f32.mrf.mxu3  ;;  %7621 = vrcp.f32 %v10216_v0 }
 0x584   : > { %6926 = vmatmul.msk.bf16.gmra.mxu0 %vm1109_vm2, %v12150_v25  ;;  %v3341_v52 = vpop.f32.mrf.mxu2  ;;  %7623 = vrcp.f32 %v10244_v21 }
 0x585   : > { %v3342_v50 = vadd.f32 %v3341_v52, %v3252_v22  ;;  %v7614_v63 = vpop.eup %7613 }
 0x586   : > { %v3791_v5 = vpop.xlane.xlu1 %3790  ;;  %v3785_v56 = vpop.xlane.xlu2 %3784 }
 0x587   : > { %v3866_v14 = vsub.f32 %v9913_v58, %v3785_v56  ;;  %v3867_v28 = vsub.f32 %v9908_v24, %v3785_v56  ;;  %v3254_v8 = vpop.f32.mrf.mxu1  ;;  %3826 = vmax.xlane.f32.xlu1 %v3825_v26  ;;  %v7616_v48 = vpop.eup %7615  ;;  %v3870_v42 = vsub.f32 %v9959_v32, %v3791_v5  ;;  %v3420_v43 = vmul.f32 %v7612_v59, %v3342_v50 }
 0x588   : > { %v10303_v25 = vpop.f32.mrf.mxu0  ;;  %v7618_v22 = vpop.eup %7617  ;;  %v3828_v26 = vmax.f32 %v10228_v30, %v10222_v16  ;;  %v3868_v56 = vsub.f32 %v9933_v54, %v10278_v46  ;;  %v3871_v0 = vsub.f32 %v9952_v17, %v3791_v5  ;;  %v3816_v50 = vmax.f32 %v10160_v33, %v10152_v31  ;;  %v12151_v30 = vld [vmem:[#allocation74_spill] sm:$0xff] }
 0x589   : > { %v3916_v51 = vpack.c.bf16 %v3866_v14, %v3864_v10  ;;  %v3917_v62 = vpack.c.bf16 %v3867_v28, %v3865_v7  ;;  %4231 = vadd.xlane.f32.xlu0 %v10147_v41  ;;  %v7620_v20 = vpop.eup %7619  ;;  %v10317_v38 = vpack.c.bf16 %v7618_v22, %v7614_v63  ;;  %v3869_v59 = vsub.f32 %v9915_v40, %v10278_v46 }
 0x58a   : > { %v10319_v32 = vpack.c.bf16 %v7620_v20, %v7616_v48  ;;  %v7622_v27 = vpop.eup %7621  ;;  %v3918_v17 = vpack.c.bf16 %v3870_v42, %v3868_v56 }
 0x58b   : > { %v10307_v52 = vpop.f32.mrf.mxu3  ;;  %v3960_v58 = vunpack.c.l.bf16 %v3916_v51  ;;  %v3961_v24 = vunpack.c.l.bf16 %v3917_v62  ;;  %v3962_v10 = vunpack.c.h.bf16 %v3916_v51  ;;  %v3963_v14 = vunpack.c.h.bf16 %v3917_v62 }
 0x58c   : > { %v3343_v7 = vpop.f32.mrf.mxu2  ;;  %v3452_v51 = vpack.c.bf16 %v3420_v43, %v3420_v43  ;;  %v4180_v46 = vunpack.c.l.bf16 %v10317_v38  ;;  %v4181_v20 = vunpack.c.l.bf16 %v10319_v32  ;;  %v3964_v42 = vunpack.c.l.bf16 %v3918_v17 }
 0x58d   : > { %v3344_v28 = vadd.f32 %v3343_v7, %v3254_v8  ;;  %v4048_v54 = vmul.f32 1.442695, %v3960_v58  ;;  %v4050_v5 = vmul.f32 1.442695, %v3961_v24  ;;  %v3919_v8 = vpack.c.bf16 %v3871_v0, %v3869_v59 }
 0x58e   : > { %v10315_v41 = vpop.xlane.xlu1 %3793  ;;  %v4052_v63 = vmul.f32 1.442695, %v3962_v10  ;;  %v4054_v22 = vmul.f32 1.442695, %v3963_v14  ;;  %v10336_v21 = vunpack.c.l.b16 %v3452_v51  ;;  %v3966_v43 = vunpack.c.h.bf16 %v3918_v17  ;;  %v7624_v14 = vpop.eup %7623 }
 0x58f   : > { %v3257_v16 = vpop.f32.mrf.mxu1  ;;  %3829 = vmax.xlane.f32.xlu1 %v3828_v26  ;;  %v3421_v62 = vmul.f32 %v7622_v27, %v3344_v28  ;;  %7625 = vpow2.f32 %v4048_v54  ;;  %v3965_v24 = vunpack.c.l.bf16 %v3919_v8  ;;  %v4254_v0 = vadd.f32 %v4181_v20, %v4180_v46  ;;  %v10354_v46 = vpop.xlane.xlu2 %3132 }
 0x590   : > { %6911 = vmatmul.msk.bf16.gmra.mxu3 %vm1109_vm2, %v12151_v30  ;;  %7627 = vpow2.f32 %v4050_v5  ;;  %12152 = vst [vmem:[#allocation71_spill] sm:$0xff] %v10336_v21  ;;  %v4056_v59 = vmul.f32 1.442695, %v3964_v42  ;;  %v4060_v51 = vmul.f32 1.442695, %v3966_v43 }
 0x591   : > { %v10328_v48 = vpop.f32.mrf.mxu0  ;;  %4396 = vmatmul.bf16.gmra.mxu1 %v10266_v15  ;;  %v3453_v40 = vpack.c.bf16 %v3421_v62, %v3421_v62  ;;  %3817 = vmax.xlane.f32.xlu0 %v3816_v50  ;;  %7629 = vpow2.f32 %v4052_v63  ;;  %v3967_v50 = vunpack.c.h.bf16 %v3919_v8  ;;  %12154 = vst [vmem:[#allocation126_spill] sm:$0xff] %v10354_v46 }
 0x592   : > { %4485 = vmatmul.bf16.gmra.mxu2 %v10270_v18  ;;  %7631 = vpow2.f32 %v4054_v22 }
 0x593   : > { %v10334_v27 = vpop.f32.mrf.mxu3  ;;  %v10338_v58 = vunpack.c.l.b16 %v3453_v40  ;;  %7633 = vrcp.f32 %v10272_v35  ;;  %v4924_v35 = vmax.f32 %v10293_v29, %v10286_v60 }
 0x594   : > { %6927 = vmatmul.msk.bf16.gmra.mxu0 %vm1109_vm2, %v12151_v30  ;;  %v3346_v26 = vpop.f32.mrf.mxu2  ;;  %v4058_v30 = vmul.f32 1.442695, %v3965_v24  ;;  %7635 = vpow2.f32 %v4056_v59 }
 0x595   : > { %12153 = vst [vmem:[#allocation74_spill] sm:$0xff] %v10338_v58  ;;  %v3347_v7 = vadd.f32 %v3346_v26, %v3257_v16  ;;  %v7626_v54 = vpop.eup %7625  ;;  %v4062_v16 = vmul.f32 1.442695, %v3967_v50 }
 0x596   : > { %v3800_v10 = vpop.xlane.xlu1 %3799  ;;  %v7628_v17 = vpop.eup %7627  ;;  %7637 = vpow2.f32 %v4058_v30  ;;  %v3819_v30 = vmax.f32 %v10181_v47, %v10178_v61 }
 0x597   : > { %v3259_v28 = vpop.f32.mrf.mxu1  ;;  %4255 = vadd.xlane.f32.xlu1 %v4254_v0  ;;  %v7630_v62 = vpop.eup %7629  ;;  %v3422_v40 = vmul.f32 %v7624_v14, %v3347_v7  ;;  %7639 = vpow2.f32 %v4060_v51  ;;  %v3877_v7 = vsub.f32 %v10009_v53, %v3800_v10  ;;  %v12155_v51 = vld [vmem:[#allocation30_spill] sm:$0xff] }
 0x598   : > { %v7632_v22 = vpop.eup %7631  ;;  %v10350_v8 = vpack.c.bf16 %v7630_v62, %v7626_v54  ;;  %7641 = vpow2.f32 %v4062_v16 }
 0x599   : > { %v10345_v5 = vpop.f32.mrf.mxu0  ;;  %4246 = vadd.xlane.f32.xlu0 %v10197_v57  ;;  %v10356_v20 = vpack.c.bf16 %v7632_v22, %v7628_v17  ;;  %v3876_v57 = vsub.f32 %v10023_v37, %v3800_v10  ;;  %v7634_v0 = vpop.eup %7633  ;;  %v3454_v17 = vpack.c.bf16 %v3422_v40, %v3422_v40 }
 0x59a   : > { %v4186_v24 = vunpack.c.h.bf16 %v10350_v8  ;;  %v7636_v10 = vpop.eup %7635 }
 0x59b   : > { %v10348_v63 = vpop.f32.mrf.mxu3  ;;  %v4187_v14 = vunpack.c.h.bf16 %v10356_v20 }
 0x59c   : > { %v3348_v42 = vpop.f32.mrf.mxu2 }
 0x59d   : > { %v3349_v26 = vadd.f32 %v3348_v42, %v3259_v28  ;;  %v4263_v28 = vadd.f32 %v4187_v14, %v4186_v24  ;;  %v7638_v42 = vpop.eup %7637  ;;  %v4179_v14 = vunpack.c.h.bf16 %v10270_v18  ;;  %v3837_v18 = vmax.f32 %v10275_v45, %v10268_v55 }
 0x59e   : > { %v3803_v43 = vpop.xlane.xlu1 %3802  ;;  %v7640_v24 = vpop.eup %7639 }
 0x59f   : > { %v3878_v50 = vsub.f32 %v10051_v9, %v3803_v43  ;;  %v3879_v59 = vsub.f32 %v10038_v23, %v3803_v43  ;;  %v3262_v54 = vpop.f32.mrf.mxu1  ;;  %4925 = vmax.xlane.f32.xlu1 %v4924_v35  ;;  %v3423_v37 = vmul.f32 %v7634_v0, %v3349_v26  ;;  %v3124_v9 = vpop.xlane.xlu0 %3123  ;;  %v4178_v23 = vunpack.c.h.bf16 %v10266_v15  ;;  %4264 = vadd.xlane.f32.xlu2 %v4263_v28 }
 0x5a0   : > { %6912 = vmatmul.msk.bf16.gmra.mxu3 %vm1109_vm2, %v12155_v51  ;;  %v10375_v0 = vunpack.c.l.b16 %v3454_v17  ;;  %7643 = vrcp.f32 %v3124_v9  ;;  %v7642_v28 = vpop.eup %7641  ;;  %v10391_v9 = vpack.c.bf16 %v7640_v24, %v7636_v10 }
 0x5a1   : > { %v3922_v62 = vpack.c.bf16 %v3878_v50, %v3876_v57  ;;  %v3923_v53 = vpack.c.bf16 %v3879_v59, %v3877_v7  ;;  %4401 = vmatmul.bf16.gmra.mxu1 %v10317_v38  ;;  %v3455_v22 = vpack.c.bf16 %v3423_v37, %v3423_v37  ;;  %3820 = vmax.xlane.f32.xlu0 %v3819_v30  ;;  %v10370_v26 = vpop.f32.mrf.mxu0  ;;  %7645 = vrcp.f32 %v10280_v34 }
 0x5a2   : > { %12156 = vst [vmem:[#allocation30_spill] sm:$0xff] %v10370_v26  ;;  %4490 = vmatmul.bf16.gmra.mxu2 %v10319_v32  ;;  %v4251_v56 = vadd.f32 %v4179_v14, %v4178_v23  ;;  %v4190_v14 = vunpack.c.h.bf16 %v10391_v9 }
 0x5a3   : > { %v3972_v16 = vunpack.c.l.bf16 %v3922_v62  ;;  %v3973_v40 = vunpack.c.l.bf16 %v3923_v53  ;;  %v3974_v35 = vunpack.c.h.bf16 %v3922_v62  ;;  %v3975_v43 = vunpack.c.h.bf16 %v3923_v53  ;;  %v10373_v57 = vpop.f32.mrf.mxu3  ;;  %12157 = vst [vmem:[#allocation127_spill] sm:$0xff] %v10375_v0 }
 0x5a4   : > { %v10377_v7 = vunpack.c.l.b16 %v3455_v22  ;;  %6928 = vmatmul.msk.bf16.gmra.mxu0 %vm1109_vm2, %v12155_v51  ;;  %v4936_v15 = vmax.f32 %v10373_v57, %v10370_v26  ;;  %v3351_v53 = vpop.f32.mrf.mxu2 }
 0x5a5   : > { %v4072_v50 = vmul.f32 1.442695, %v3972_v16  ;;  %v4074_v59 = vmul.f32 1.442695, %v3973_v40  ;;  %v4076_v30 = vmul.f32 1.442695, %v3974_v35  ;;  %v10384_v37 = vpop.xlane.xlu2 %3138  ;;  %v3352_v51 = vadd.f32 %v3351_v53, %v3262_v54 }
 0x5a6   : > { %12158 = vst [vmem:[#allocation128_spill] sm:$0xff] %v10377_v7  ;;  %v4078_v17 = vmul.f32 1.442695, %v3975_v43  ;;  %v10393_v16 = vpack.c.bf16 %v7642_v28, %v7638_v42  ;;  %v7644_v34 = vpop.eup %7643  ;;  %v4182_v54 = vunpack.c.h.bf16 %v10317_v38  ;;  %v4183_v35 = vunpack.c.h.bf16 %v10319_v32  ;;  %v12162_v38 = vld [vmem:[#allocation119_spill] sm:$0xff]  ;;  %v12163_v32 = vld [vmem:[#allocation118_spill] sm:$0xff] }
 0x5a7   : > { %12159 = vst [vmem:[#allocation129_spill] sm:$0xff] %v10384_v37  ;;  %7647 = vpow2.f32 %v4072_v50  ;;  %v3264_v22 = vpop.f32.mrf.mxu1  ;;  %4937 = vmax.xlane.f32.xlu1 %v4936_v15  ;;  %3838 = vmax.xlane.f32.xlu2 %v3837_v18  ;;  %v7646_v23 = vpop.eup %7645  ;;  %v3424_v43 = vmul.f32 %v7644_v34, %v3352_v51  ;;  %v12164_v37 = vld [vmem:[#allocation40_spill] sm:$0xff] }
 0x5a8   : > { %7649 = vpow2.f32 %v4074_v59  ;;  %v4191_v10 = vunpack.c.h.bf16 %v10393_v16  ;;  %v4257_v21 = vadd.f32 %v4183_v35, %v4182_v54 }
 0x5a9   : > { %7651 = vpow2.f32 %v4076_v30  ;;  %4252 = vadd.xlane.f32.xlu0 %v4251_v56  ;;  %v10401_v24 = vpop.f32.mrf.mxu0  ;;  %v12160_v56 = vld [vmem:[#allocation24_spill] sm:$0xff]  ;;  %v12161_v30 = vld [vmem:[#allocation115_spill] sm:$0xff]  ;;  %v3456_v0 = vpack.c.bf16 %v3424_v43, %v3424_v43 }
 0x5aa   : > { %7653 = vpow2.f32 %v4078_v17  ;;  %v3872_v59 = vsub.f32 %v12160_v56, %v10315_v41  ;;  %v3873_v28 = vsub.f32 %v12161_v30, %v10315_v41  ;;  %v4269_v26 = vadd.f32 %v4191_v10, %v4190_v14 }
 0x5ab   : > { %v10395_v40 = vpop.f32.mrf.mxu3 }
 0x5ac   : > { %v3353_v51 = vpop.f32.mrf.mxu2 }
 0x5ad   : > { %v7648_v15 = vpop.eup %7647  ;;  %v3797_v42 = vpop.xlane.xlu2 %3796  ;;  %v3354_v34 = vadd.f32 %v3353_v51, %v3264_v22 }
 0x5ae   : > { %v7650_v50 = vpop.eup %7649  ;;  %v3874_v17 = vsub.f32 %v12162_v38, %v3797_v42  ;;  %v3875_v53 = vsub.f32 %v12163_v32, %v3797_v42 }
 0x5af   : > { %v7652_v18 = vpop.eup %7651  ;;  %v3267_v62 = vpop.f32.mrf.mxu1  ;;  %v3425_v41 = vmul.f32 %v7646_v23, %v3354_v34  ;;  %4270 = vadd.xlane.f32.xlu2 %v4269_v26  ;;  %v10420_v23 = vunpack.c.l.b16 %v3456_v0  ;;  %v4930_v34 = vmax.f32 %v10334_v27, %v10328_v48 }
 0x5b0   : > { %v7654_v58 = vpop.eup %7653  ;;  %v3920_v7 = vpack.c.bf16 %v3874_v17, %v3872_v59  ;;  %v3921_v46 = vpack.c.bf16 %v3875_v53, %v3873_v28  ;;  %6913 = vmatmul.msk.bf16.gmra.mxu3 %vm1109_vm2, %v12164_v37  ;;  %v10411_v56 = vpack.c.bf16 %v7652_v18, %v7648_v15  ;;  %v3831_v18 = vmax.f32 %v10242_v49, %v10238_v3 }
 0x5b1   : > { %4406 = vmatmul.bf16.gmra.mxu1 %v10350_v8  ;;  %v10414_v30 = vpack.c.bf16 %v7654_v58, %v7650_v50  ;;  %4258 = vadd.xlane.f32.xlu0 %v4257_v21  ;;  %v3457_v54 = vpack.c.bf16 %v3425_v41, %v3425_v41  ;;  %12165 = vst [vmem:[#allocation24_spill] sm:$0xff] %v10420_v23  ;;  %v10435_v17 = vpop.f32.mrf.mxu0 }
 0x5b2   : > { %v3968_v42 = vunpack.c.l.bf16 %v3920_v7  ;;  %v3969_v38 = vunpack.c.l.bf16 %v3921_v46  ;;  %v3970_v22 = vunpack.c.h.bf16 %v3920_v7  ;;  %v3971_v32 = vunpack.c.h.bf16 %v3921_v46  ;;  %4495 = vmatmul.bf16.gmra.mxu2 %v10356_v20 }
 0x5b3   : > { %v4198_v35 = vunpack.c.h.bf16 %v10411_v56  ;;  %v4199_v43 = vunpack.c.h.bf16 %v10414_v30  ;;  %v4196_v15 = vunpack.c.l.bf16 %v10411_v56  ;;  %v10424_v21 = vunpack.c.l.b16 %v3457_v54  ;;  %v10428_v7 = vpop.f32.mrf.mxu3 }
 0x5b4   : > { %v4064_v14 = vmul.f32 1.442695, %v3968_v42  ;;  %v4066_v58 = vmul.f32 1.442695, %v3969_v38  ;;  %v4068_v10 = vmul.f32 1.442695, %v3970_v22  ;;  %6929 = vmatmul.msk.bf16.gmra.mxu0 %vm1109_vm2, %v12164_v37  ;;  %v4197_v59 = vunpack.c.l.bf16 %v10414_v30  ;;  %v3356_v0 = vpop.f32.mrf.mxu2 }
 0x5b5   : > { %v4070_v46 = vmul.f32 1.442695, %v3971_v32  ;;  %12166 = vst [vmem:[#allocation115_spill] sm:$0xff] %v10424_v21  ;;  %v10426_v26 = vpop.xlane.xlu2 %4234  ;;  %v10430_v50 = vadd.f32 %v4199_v43, %v4198_v35  ;;  %v10437_v37 = vadd.f32 %v3356_v0, %v3267_v62  ;;  %v4184_v42 = vunpack.c.l.bf16 %v10350_v8 }
 0x5b6   : > { %12167 = vst [vmem:[#allocation119_spill] sm:$0xff] %v10426_v26  ;;  %7655 = vpow2.f32 %v4064_v14  ;;  %v10441_v51 = vadd.f32 %v4197_v59, %v4196_v15  ;;  %v4185_v62 = vunpack.c.l.bf16 %v10356_v20  ;;  %v4939_v20 = vmax.f32 %v10395_v40, %v10401_v24 }
 0x5b7   : > { %12168 = vst [vmem:[#allocation118_spill] sm:$0xff] %v10430_v50  ;;  %7657 = vpow2.f32 %v4066_v58  ;;  %v10439_v53 = vpop.f32.mrf.mxu1  ;;  %4931 = vmax.xlane.f32.xlu2 %v4930_v34 }
 0x5b8   : > { %12169 = vst [vmem:[#allocation40_spill] sm:$0xff] %v10437_v37  ;;  %7659 = vpow2.f32 %v4068_v10  ;;  %v4260_v10 = vadd.f32 %v4185_v62, %v4184_v42  ;;  %v4189_v42 = vunpack.c.l.bf16 %v10393_v16 }
 0x5b9   : > { %12170 = vst [vmem:[#allocation130_spill] sm:$0xff] %v10439_v53  ;;  %7661 = vpow2.f32 %v4070_v46  ;;  %3832 = vmax.xlane.f32.xlu0 %v3831_v18  ;;  %v12174_v46 = vld [vmem:[#allocation48_spill] sm:$0xff]  ;;  %v10461_v59 = vpop.f32.mrf.mxu0 }
 0x5ba   : > { %12171 = vst [vmem:[#allocation131_spill] sm:$0xff] %v10441_v51 }
 0x5bb   : > { %v10455_v14 = vpop.f32.mrf.mxu3 }
 0x5bc   : > { %v7656_v41 = vpop.eup %7655  ;;  %v10453_v35 = vpop.f32.mrf.mxu2 }
 0x5bd   : > { %v7658_v38 = vpop.eup %7657  ;;  %v10449_v22 = vpop.xlane.xlu1 %4240  ;;  %12173 = vst [vmem:[#allocation133_spill] sm:$0xff] %v10453_v35 }
 0x5be   : > { %12172 = vst [vmem:[#allocation132_spill] sm:$0xff] %v10449_v22  ;;  %v10451_v32 = vpop.xlane.xlu2 %3808  ;;  %v7660_v54 = vpop.eup %7659 }
 0x5bf   : > { %v7662_v43 = vpop.eup %7661  ;;  %v3272_v15 = vpop.f32.mrf.mxu1  ;;  %v4144_v58 = vpack.c.bf16 %v7660_v54, %v7656_v41  ;;  %4940 = vmax.xlane.f32.xlu2 %v4939_v20  ;;  %v4188_v41 = vunpack.c.l.bf16 %v10391_v9 }
 0x5c0   : > { %6914 = vmatmul.msk.bf16.gmra.mxu3 %vm1109_vm2, %v12174_v46  ;;  %v4145_v8 = vpack.c.bf16 %v7662_v43, %v7658_v38 }
 0x5c1   : > { %4411 = vmatmul.bf16.gmra.mxu1 %v10391_v9  ;;  %v4192_v0 = vunpack.c.l.bf16 %v4144_v58  ;;  %v4194_v18 = vunpack.c.h.bf16 %v4144_v58  ;;  %4261 = vadd.xlane.f32.xlu0 %v4260_v10 }
 0x5c2   : > { %v4193_v34 = vunpack.c.l.bf16 %v4145_v8  ;;  %v4195_v28 = vunpack.c.h.bf16 %v4145_v8  ;;  %4500 = vmatmul.bf16.gmra.mxu2 %v10393_v16 }
 0x5c4   : > { %6930 = vmatmul.msk.bf16.gmra.mxu0 %vm1109_vm2, %v12174_v46  ;;  %v10469_v62 = vadd.f32 %v4193_v34, %v4192_v0  ;;  %v10471_v38 = vadd.f32 %v4195_v28, %v4194_v18  ;;  %v3361_v23 = vpop.f32.mrf.mxu2  ;;  %v4266_v34 = vadd.f32 %v4189_v42, %v4188_v41  ;;  %v4942_v28 = vmax.f32 %v10428_v7, %v10435_v17  ;;  %v10483_v18 = vpop.f32.mrf.mxu3  ;;  %v12180_v42 = vld [vmem:[#allocation99_spill] sm:$0xff] }
 0x5c5   : > { %v3815_v54 = vpop.xlane.xlu1 %3814  ;;  %v10477_v46 = vadd.f32 %v3361_v23, %v3272_v15  ;;  %v4927_v41 = vmax.f32 %v10307_v52, %v10303_v25 }
 0x5c6   : > { %12175 = vst [vmem:[#allocation48_spill] sm:$0xff] %v10469_v62  ;;  %v3812_v43 = vpop.xlane.xlu2 %3811  ;;  %v3886_v10 = vsub.f32 %v10139_v13, %v3815_v54  ;;  %v3887_v26 = vsub.f32 %v10129_v6, %v3815_v54 }
 0x5c7   : > { %12176 = vst [vmem:[#allocation134_spill] sm:$0xff] %v10471_v38  ;;  %v3884_v20 = vsub.f32 %v10110_v2, %v3812_v43  ;;  %v3885_v22 = vsub.f32 %v10099_v39, %v3812_v43  ;;  %v10479_v9 = vpop.f32.mrf.mxu1  ;;  %4943 = vmax.xlane.f32.xlu2 %v4942_v28  ;;  %v10485_v39 = vpop.f32.mrf.mxu0 }
 0x5c8   : > { %12177 = vst [vmem:[#allocation135_spill] sm:$0xff] %v10477_v46 }
 0x5c9   : > { %12178 = vst [vmem:[#allocation136_spill] sm:$0xff] %v10479_v9  ;;  %v3926_v16 = vpack.c.bf16 %v3886_v10, %v3884_v20  ;;  %v3927_v0 = vpack.c.bf16 %v3887_v26, %v3885_v22  ;;  %4267 = vadd.xlane.f32.xlu0 %v4266_v34  ;;  %v4945_v10 = vmax.f32 %v10455_v14, %v10461_v59 }
 0x5cb   : > { %v3980_v13 = vunpack.c.l.bf16 %v3926_v16  ;;  %v3981_v21 = vunpack.c.l.bf16 %v3927_v0  ;;  %v3982_v6 = vunpack.c.h.bf16 %v3926_v16  ;;  %v3983_v54 = vunpack.c.h.bf16 %v3927_v0 }
 0x5cc   : > { %v10487_v26 = vpop.f32.mrf.mxu2 }
 0x5cd   : > { %v4088_v2 = vmul.f32 1.442695, %v3980_v13  ;;  %v4090_v23 = vmul.f32 1.442695, %v3981_v21  ;;  %v4092_v15 = vmul.f32 1.442695, %v3982_v6  ;;  %v10495_v21 = vpop.f32.mrf.mxu3  ;;  %v10543_v37 = vpop.xlane.xlu1 %4243 }
 0x5ce   : > { %v4094_v43 = vmul.f32 1.442695, %v3983_v54  ;;  %12179 = vst [vmem:[#allocation137_spill] sm:$0xff] %v10487_v26  ;;  %v10549_v53 = vpop.xlane.xlu2 %4237 }
 0x5cf   : > { %7663 = vpow2.f32 %v4088_v2  ;;  %v4377_v22 = vpop.f32.mrf.mxu1  ;;  %4946 = vmax.xlane.f32.xlu2 %v4945_v10  ;;  %v10499_v0 = vpop.f32.mrf.mxu0  ;;  %v4933_v2 = vmax.f32 %v10348_v63, %v10345_v5  ;;  %12192 = vst [vmem:[#allocation146_spill] sm:$0xff] %v10543_v37 }
 0x5d0   : > { %7665 = vpow2.f32 %v4090_v23  ;;  %6915 = vmatmul.msk.bf16.gmra.mxu3 %vm1109_vm2, %v12180_v42  ;;  %12194 = vst [vmem:[#allocation148_spill] sm:$0xff] %v10549_v53 }
 0x5d1   : > { %7667 = vpow2.f32 %v4092_v15  ;;  %4416 = vmatmul.bf16.gmra.mxu1 %v4144_v58  ;;  %4928 = vmax.xlane.f32.xlu0 %v4927_v41  ;;  %v10513_v41 = vpop.xlane.xlu0 %3129 }
 0x5d2   : > { %7669 = vpow2.f32 %v4094_v43  ;;  %4505 = vmatmul.bf16.gmra.mxu2 %v4145_v8  ;;  %12183 = vst [vmem:[#allocation139_spill] sm:$0xff] %v10513_v41 }
 0x5d4   : > { %6931 = vmatmul.msk.bf16.gmra.mxu0 %vm1109_vm2, %v12180_v42  ;;  %v4466_v28 = vpop.f32.mrf.mxu2 }
 0x5d5   : > { %v7664_v20 = vpop.eup %7663  ;;  %v10501_v6 = vadd.f32 %v4466_v28, %v4377_v22  ;;  %v10515_v42 = vpop.f32.mrf.mxu3  ;;  %v4951_v28 = vmax.f32 %v10495_v21, %v10499_v0 }
 0x5d6   : > { %v7666_v16 = vpop.eup %7665  ;;  %v3824_v46 = vpop.xlane.xlu2 %3823 }
 0x5d7   : > { %v7668_v34 = vpop.eup %7667  ;;  %12181 = vst [vmem:[#allocation99_spill] sm:$0xff] %v10501_v6  ;;  %v10503_v54 = vpop.f32.mrf.mxu1  ;;  %v3892_v50 = vsub.f32 %v10201_v11, %v3824_v46 }
 0x5d8   : > { %v7670_v13 = vpop.eup %7669  ;;  %12182 = vst [vmem:[#allocation138_spill] sm:$0xff] %v10503_v54  ;;  %v10505_v58 = vpack.c.bf16 %v7668_v34, %v7664_v20  ;;  %v10519_v10 = vpop.f32.mrf.mxu0  ;;  %v12186_v34 = vld [vmem:[#allocation97_spill] sm:$0xff] }
 0x5d9   : > { %v10509_v8 = vpack.c.bf16 %v7670_v13, %v7666_v16  ;;  %4934 = vmax.xlane.f32.xlu0 %v4933_v2  ;;  %12185 = vst [vmem:[#allocation141_spill] sm:$0xff] %v10519_v10  ;;  %v4948_v16 = vmax.f32 %v10483_v18, %v10485_v39 }
 0x5da   : > { %v4204_v23 = vunpack.c.l.bf16 %v10505_v58  ;;  %v4206_v13 = vunpack.c.h.bf16 %v10505_v58 }
 0x5db   : > { %v4205_v15 = vunpack.c.l.bf16 %v10509_v8  ;;  %v4207_v2 = vunpack.c.h.bf16 %v10509_v8 }
 0x5dc   : > { %v10517_v22 = vpop.f32.mrf.mxu2 }
 0x5dd   : > { %v4290_v43 = vadd.f32 %v4205_v15, %v4204_v23  ;;  %12184 = vst [vmem:[#allocation140_spill] sm:$0xff] %v10517_v22  ;;  %v10533_v23 = vpop.xlane.xlu0 %3135 }
 0x5de   : > { %12187 = vst [vmem:[#allocation97_spill] sm:$0xff] %v10533_v23 }
 0x5df   : > { %4291 = vadd.xlane.f32.xlu1 %v4290_v43  ;;  %v4382_v20 = vpop.f32.mrf.mxu1  ;;  %v10535_v43 = vpop.f32.mrf.mxu3 }
 0x5e0   : > { %6916 = vmatmul.msk.bf16.gmra.mxu3 %vm1109_vm2, %v12186_v34  ;;  %12188 = vst [vmem:[#allocation142_spill] sm:$0xff] %v10535_v43  ;;  %v10541_v38 = vpop.f32.mrf.mxu0 }
 0x5e1   : > { %4421 = vmatmul.bf16.gmra.mxu1 %v10411_v56  ;;  %4949 = vmax.xlane.f32.xlu0 %v4948_v16  ;;  %12191 = vst [vmem:[#allocation145_spill] sm:$0xff] %v10541_v38 }
 0x5e2   : > { %4510 = vmatmul.bf16.gmra.mxu2 %v10414_v30  ;;  %v4293_v30 = vadd.f32 %v4207_v2, %v4206_v13 }
 0x5e4   : > { %6932 = vmatmul.msk.bf16.gmra.mxu0 %vm1109_vm2, %v12186_v34  ;;  %v4471_v15 = vpop.f32.mrf.mxu2  ;;  %v4954_v34 = vmax.f32 %v10515_v42, %v10519_v10 }
 0x5e5   : > { %v10537_v56 = vadd.f32 %v4471_v15, %v4382_v20  ;;  %v10547_v35 = vpop.permute.xlu0 %5996  ;;  %v12196_v15 = vld [vmem:[#allocation31_spill] sm:$0xff] }
 0x5e6   : > { %12193 = vst [vmem:[#allocation147_spill] sm:$0xff] %v10547_v35 }
 0x5e7   : > { %4952 = vmax.xlane.f32.xlu1 %v4951_v28  ;;  %12189 = vst [vmem:[#allocation143_spill] sm:$0xff] %v10537_v56  ;;  %v10539_v16 = vpop.f32.mrf.mxu1  ;;  %v10555_v13 = vpop.f32.mrf.mxu3 }
 0x5e8   : > { %12190 = vst [vmem:[#allocation144_spill] sm:$0xff] %v10539_v16  ;;  %v10557_v2 = vpop.f32.mrf.mxu0 }
 0x5e9   : > { %4294 = vadd.xlane.f32.xlu0 %v4293_v30  ;;  %12197 = vst [vmem:[#allocation31_spill] sm:$0xff] %v10557_v2  ;;  %v4960_v56 = vmax.f32 %v10555_v13, %v10557_v2 }
 0x5ec   : > { %v10551_v28 = vpop.f32.mrf.mxu2 }
 0x5ed   : > { %12195 = vst [vmem:[#allocation149_spill] sm:$0xff] %v10551_v28  ;;  %v3883_v28 = vsub.f32 %v10083_v36, %v10451_v32  ;;  %v3893_v36 = vsub.f32 %v10193_v19, %v3824_v46 }
 0x5ef   : > { %4955 = vmax.xlane.f32.xlu1 %v4954_v34  ;;  %v4387_v20 = vpop.f32.mrf.mxu1  ;;  %v3882_v34 = vsub.f32 %v10089_v12, %v10451_v32 }
 0x5f0   : > { %6917 = vmatmul.msk.bf16.gmra.mxu3 %vm1109_vm2, %v12196_v15  ;;  %v10586_v19 = vpop.f32.mrf.mxu0 }
 0x5f1   : > { %12205 = vst [vmem:[#allocation153_spill] sm:$0xff] %v10586_v19 }
 0x5f2   : > { %v10559_v30 = vpop.xlane.xlu1 %4249 }
 0x5f3   : > { %12198 = vst [vmem:[#allocation150_spill] sm:$0xff] %v10559_v30 }
 0x5f4   : > { %6933 = vmatmul.msk.bf16.gmra.mxu0 %vm1109_vm2, %v12196_v15  ;;  %v3806_v16 = vpop.xlane.xlu0 %3805  ;;  %v4476_v41 = vpop.f32.mrf.mxu2 }
 0x5f5   : > { %v3880_v53 = vsub.f32 %v10072_v1, %v3806_v16  ;;  %v3881_v37 = vsub.f32 %v10059_v44, %v3806_v16  ;;  %v10571_v30 = vadd.f32 %v4476_v41, %v4387_v20  ;;  %v12201_v44 = vld [vmem:[#allocation68_spill] sm:$0xff]  ;;  %v10579_v20 = vpop.f32.mrf.mxu3 }
 0x5f7   : > { %4961 = vmax.xlane.f32.xlu1 %v4960_v56  ;;  %12199 = vst [vmem:[#allocation151_spill] sm:$0xff] %v10571_v30  ;;  %v10573_v62 = vpop.f32.mrf.mxu1  ;;  %v3924_v26 = vpack.c.bf16 %v3882_v34, %v3880_v53  ;;  %v3925_v15 = vpack.c.bf16 %v3883_v28, %v3881_v37  ;;  %v12203_v34 = vld [vmem:[#allocation50_spill] sm:$0xff] }
 0x5f8   : > { %12200 = vst [vmem:[#allocation152_spill] sm:$0xff] %v10573_v62 }
 0x5f9   : > { %v3976_v9 = vunpack.c.l.bf16 %v3924_v26  ;;  %v3977_v23 = vunpack.c.l.bf16 %v3925_v15  ;;  %v3978_v51 = vunpack.c.h.bf16 %v3924_v26  ;;  %v3979_v12 = vunpack.c.h.bf16 %v3925_v15 }
 0x5fa   : > { %v3827_v32 = vpop.xlane.xlu1 %3826 }
 0x5fb   : > { %v3894_v1 = vsub.f32 %v10214_v4, %v3827_v32  ;;  %v3895_v56 = vsub.f32 %v12201_v44, %v3827_v32  ;;  %v4080_v41 = vmul.f32 1.442695, %v3976_v9  ;;  %v4082_v16 = vmul.f32 1.442695, %v3977_v23 }
 0x5fc   : > { %v4084_v30 = vmul.f32 1.442695, %v3978_v51  ;;  %v10581_v53 = vpop.xlane.xlu0 %4231  ;;  %v4086_v26 = vmul.f32 1.442695, %v3979_v12  ;;  %v10584_v11 = vpop.f32.mrf.mxu2 }
 0x5fd   : > { %12202 = vst [vmem:[#allocation68_spill] sm:$0xff] %v10581_v53  ;;  %v3930_v37 = vpack.c.bf16 %v3894_v1, %v3892_v50  ;;  %v3931_v28 = vpack.c.bf16 %v3895_v56, %v3893_v36  ;;  %7671 = vpow2.f32 %v4080_v41 }
 0x5fe   : > { %12204 = vst [vmem:[#allocation50_spill] sm:$0xff] %v10584_v11  ;;  %7673 = vpow2.f32 %v4082_v16  ;;  %v10588_v16 = vpop.f32.mrf.mxu3 }
 0x5ff   : > { %3048 = vadd.xlane.f32.xlu1 %v12203_v34  ;;  %v4392_v4 = vpop.f32.mrf.mxu1  ;;  %v3988_v46 = vunpack.c.l.bf16 %v3930_v37  ;;  %v3989_v9 = vunpack.c.l.bf16 %v3931_v28  ;;  %v3990_v23 = vunpack.c.h.bf16 %v3930_v37  ;;  %v3991_v15 = vunpack.c.h.bf16 %v3931_v28  ;;  %12206 = vst [vmem:[#allocation154_spill] sm:$0xff] %v10588_v16 }
 0x600   : > { %7675 = vpow2.f32 %v4084_v30 }
 0x601   : > { %v4104_v51 = vmul.f32 1.442695, %v3988_v46  ;;  %v4106_v32 = vmul.f32 1.442695, %v3989_v9  ;;  %v4108_v44 = vmul.f32 1.442695, %v3990_v23  ;;  %7677 = vpow2.f32 %v4086_v26  ;;  %v10596_v26 = vpop.f32.mrf.mxu0 }
 0x602   : > { %v4110_v50 = vmul.f32 1.442695, %v3991_v15  ;;  %12209 = vst [vmem:[#allocation157_spill] sm:$0xff] %v10596_v26 }
 0x603   : > { %v7672_v36 = vpop.eup %7671  ;;  %7679 = vpow2.f32 %v4104_v51 }
 0x604   : > { %v7674_v12 = vpop.eup %7673  ;;  %7681 = vpow2.f32 %v4106_v32  ;;  %v3818_v1 = vpop.xlane.xlu0 %3817 }
 0x605   : > { %7683 = vpow2.f32 %v4108_v44  ;;  %v4481_v56 = vpop.f32.mrf.mxu2 }
 0x606   : > { %v7676_v41 = vpop.eup %7675  ;;  %7685 = vpow2.f32 %v4110_v50  ;;  %v10590_v34 = vadd.f32 %v4481_v56, %v4392_v4  ;;  %v10616_v11 = vpop.f32.mrf.mxu3 }
 0x607   : > { %v10592_v37 = vpop.f32.mrf.mxu1  ;;  %v7678_v30 = vpop.eup %7677  ;;  %v10594_v28 = vpack.c.bf16 %v7676_v41, %v7672_v36  ;;  %12212 = vst [vmem:[#allocation160_spill] sm:$0xff] %v10616_v11 }
 0x608   : > { %12207 = vst [vmem:[#allocation155_spill] sm:$0xff] %v10590_v34  ;;  %v10598_v46 = vpack.c.bf16 %v7678_v30, %v7674_v12 }
 0x609   : > { %12208 = vst [vmem:[#allocation156_spill] sm:$0xff] %v10592_v37  ;;  %v7680_v9 = vpop.eup %7679  ;;  %4426 = vmatmul.bf16.gmra.mxu1 %v10594_v28  ;;  %v4202_v23 = vunpack.c.h.bf16 %v10594_v28  ;;  %v10618_v34 = vpop.f32.mrf.mxu0 }
 0x60a   : > { %v7682_v15 = vpop.eup %7681  ;;  %4515 = vmatmul.bf16.gmra.mxu2 %v10598_v46  ;;  %v4203_v4 = vunpack.c.h.bf16 %v10598_v46  ;;  %12213 = vst [vmem:[#allocation161_spill] sm:$0xff] %v10618_v34 }
 0x60b   : > { %v7684_v51 = vpop.eup %7683 }
 0x60c   : > { %v7686_v32 = vpop.eup %7685  ;;  %v10604_v44 = vpack.c.bf16 %v7684_v51, %v7680_v9  ;;  %v10606_v50 = vpop.xlane.xlu0 %4246  ;;  %v10608_v36 = vadd.f32 %v4203_v4, %v4202_v23  ;;  %v3888_v51 = vsub.f32 %v10160_v33, %v3818_v1  ;;  %v3889_v23 = vsub.f32 %v10152_v31, %v3818_v1 }
 0x60d   : > { %12210 = vst [vmem:[#allocation158_spill] sm:$0xff] %v10606_v50  ;;  %v10610_v12 = vpack.c.bf16 %v7686_v32, %v7682_v15  ;;  %v10612_v56 = vpop.f32.mrf.mxu2 }
 0x60e   : > { %12211 = vst [vmem:[#allocation159_spill] sm:$0xff] %v10612_v56  ;;  %v4214_v41 = vunpack.c.h.bf16 %v10604_v44  ;;  %v10631_v31 = vpop.f32.mrf.mxu3 }
 0x60f   : > { %v4397_v30 = vpop.f32.mrf.mxu1  ;;  %v4215_v53 = vunpack.c.h.bf16 %v10610_v12  ;;  %12216 = vst [vmem:[#allocation164_spill] sm:$0xff] %v10631_v31 }
 0x611   : > { %v4305_v62 = vadd.f32 %v4215_v53, %v4214_v41  ;;  %v4963_v53 = vmax.f32 %v10579_v20, %v10586_v19 }
 0x613   : > { %4306 = vadd.xlane.f32.xlu1 %v4305_v62 }
 0x614   : > { %v3821_v9 = vpop.xlane.xlu0 %3820 }
 0x615   : > { %v4486_v15 = vpop.f32.mrf.mxu2  ;;  %v3890_v4 = vsub.f32 %v10181_v47, %v3821_v9  ;;  %v3891_v32 = vsub.f32 %v10178_v61, %v3821_v9 }
 0x616   : > { %v10624_v56 = vadd.f32 %v4486_v15, %v4397_v30  ;;  %v10634_v30 = vpop.f32.mrf.mxu0  ;;  %v10644_v15 = vpop.f32.mrf.mxu3 }
 0x617   : > { %v10626_v37 = vpop.f32.mrf.mxu1  ;;  %v3928_v50 = vpack.c.bf16 %v3890_v4, %v3888_v51  ;;  %v3929_v6 = vpack.c.bf16 %v3891_v32, %v3889_v23  ;;  %12217 = vst [vmem:[#allocation165_spill] sm:$0xff] %v10634_v30 }
 0x618   : > { %12214 = vst [vmem:[#allocation162_spill] sm:$0xff] %v10624_v56 }
 0x619   : > { %12215 = vst [vmem:[#allocation163_spill] sm:$0xff] %v10626_v37  ;;  %v3984_v62 = vunpack.c.l.bf16 %v3928_v50  ;;  %v3985_v41 = vunpack.c.l.bf16 %v3929_v6  ;;  %v3986_v22 = vunpack.c.h.bf16 %v3928_v50  ;;  %v3987_v33 = vunpack.c.h.bf16 %v3929_v6  ;;  %4431 = vmatmul.bf16.gmra.mxu1 %v10505_v58  ;;  %v10640_v50 = vpop.xlane.xlu2 %3835 }
 0x61a   : > { %4520 = vmatmul.bf16.gmra.mxu2 %v10509_v8  ;;  %v4966_v58 = vmax.f32 %v10588_v16, %v10596_v26  ;;  %12220 = vst [vmem:[#allocation168_spill] sm:$0xff] %v10644_v15  ;;  %v12226_v26 = vld [vmem:[#allocation28_spill] sm:$0xff] }
 0x61b   : > { %4964 = vmax.xlane.f32.xlu1 %v4963_v53  ;;  %v4096_v61 = vmul.f32 1.442695, %v3984_v62  ;;  %v4098_v47 = vmul.f32 1.442695, %v3985_v41  ;;  %v4100_v1 = vmul.f32 1.442695, %v3986_v22 }
 0x61c   : > { %v4102_v9 = vmul.f32 1.442695, %v3987_v33  ;;  %v10636_v51 = vpop.xlane.xlu0 %4252 }
 0x61d   : > { %12218 = vst [vmem:[#allocation166_spill] sm:$0xff] %v10636_v51  ;;  %7687 = vpow2.f32 %v4096_v61  ;;  %v10638_v23 = vpop.f32.mrf.mxu2 }
 0x61e   : > { %12219 = vst [vmem:[#allocation167_spill] sm:$0xff] %v10638_v23  ;;  %7689 = vpow2.f32 %v4098_v47  ;;  %v10648_v41 = vpop.f32.mrf.mxu0 }
 0x61f   : > { %v4402_v6 = vpop.f32.mrf.mxu1  ;;  %7691 = vpow2.f32 %v4100_v1  ;;  %12222 = vst [vmem:[#allocation170_spill] sm:$0xff] %v10648_v41 }
 0x620   : > { %7693 = vpow2.f32 %v4102_v9 }
 0x621   : > { %v10654_v1 = vpop.xlane.xlu2 %4264 }
 0x623   : > { %v7688_v8 = vpop.eup %7687  ;;  %4967 = vmax.xlane.f32.xlu1 %v4966_v58  ;;  %v3830_v58 = vpop.xlane.xlu1 %3829 }
 0x624   : > { %v7690_v22 = vpop.eup %7689  ;;  %v10646_v4 = vpop.xlane.xlu0 %4258 }
 0x625   : > { %12221 = vst [vmem:[#allocation169_spill] sm:$0xff] %v10646_v4  ;;  %v7692_v32 = vpop.eup %7691  ;;  %v4491_v53 = vpop.f32.mrf.mxu2  ;;  %v12225_v4 = vld [vmem:[#allocation113_spill] sm:$0xff] }
 0x626   : > { %v7694_v62 = vpop.eup %7693  ;;  %v10650_v33 = vadd.f32 %v4491_v53, %v4402_v6  ;;  %v4152_v47 = vpack.c.bf16 %v7692_v32, %v7688_v8  ;;  %v3896_v6 = vsub.f32 %v12226_v26, %v3830_v58 }
 0x627   : > { %v10652_v61 = vpop.f32.mrf.mxu1  ;;  %v4153_v9 = vpack.c.bf16 %v7694_v62, %v7690_v22  ;;  %v10663_v62 = vpop.f32.mrf.mxu3 }
 0x628   : > { %12223 = vst [vmem:[#allocation171_spill] sm:$0xff] %v10650_v33  ;;  %v4210_v56 = vunpack.c.h.bf16 %v4152_v47  ;;  %v4208_v37 = vunpack.c.l.bf16 %v4152_v47  ;;  %v12227_v33 = vld [vmem:[#allocation122_spill] sm:$0xff] }
 0x629   : > { %12224 = vst [vmem:[#allocation172_spill] sm:$0xff] %v10652_v61  ;;  %4436 = vmatmul.bf16.gmra.mxu1 %v4152_v47  ;;  %v4211_v23 = vunpack.c.h.bf16 %v4153_v9  ;;  %v4209_v51 = vunpack.c.l.bf16 %v4153_v9  ;;  %v3897_v61 = vsub.f32 %v12227_v33, %v3830_v58 }
 0x62a   : > { %4525 = vmatmul.bf16.gmra.mxu2 %v4153_v9 }
 0x62b   : > { %3108 = vadd.xlane.f32.xlu1 %v12225_v4  ;;  %v4299_v54 = vadd.f32 %v4211_v23, %v4210_v56  ;;  %v4296_v35 = vadd.f32 %v4209_v51, %v4208_v37  ;;  %v10665_v56 = vpop.f32.mrf.mxu0  ;;  %v3839_v37 = vpop.xlane.xlu2 %3838 }
 0x62c   : > { %v3833_v53 = vpop.xlane.xlu0 %3832 }
 0x62d   : > { %4300 = vadd.xlane.f32.xlu2 %v4299_v54  ;;  %4297 = vadd.xlane.f32.xlu0 %v4296_v35  ;;  %v10659_v8 = vpop.f32.mrf.mxu2  ;;  %v3898_v22 = vsub.f32 %v10242_v49, %v3833_v53  ;;  %v3899_v32 = vsub.f32 %v10238_v3, %v3833_v53  ;;  %v4957_v35 = vmax.f32 %v10535_v43, %v10541_v38 }
 0x62e   : > { %12228 = vst [vmem:[#allocation113_spill] sm:$0xff] %v10659_v8  ;;  %v4969_v49 = vmax.f32 %v10616_v11, %v10618_v34  ;;  %v3902_v53 = vsub.f32 %v10275_v45, %v3839_v37  ;;  %v3903_v8 = vsub.f32 %v10268_v55, %v3839_v37  ;;  %v4201_v45 = vunpack.c.l.bf16 %v10598_v46 }
 0x62f   : > { %v4407_v47 = vpop.f32.mrf.mxu1  ;;  %v3932_v9 = vpack.c.bf16 %v3898_v22, %v3896_v6  ;;  %v3933_v4 = vpack.c.bf16 %v3899_v32, %v3897_v61  ;;  %v12229_v22 = vld [vmem:[#allocation29_spill] sm:$0xff] }
 0x630   : > { %v3900_v32 = vsub.f32 %v12229_v22, %v10640_v50 }
 0x631   : > { %v3992_v26 = vunpack.c.l.bf16 %v3932_v9  ;;  %v3993_v51 = vunpack.c.l.bf16 %v3933_v4  ;;  %v3994_v23 = vunpack.c.h.bf16 %v3932_v9  ;;  %v3995_v33 = vunpack.c.h.bf16 %v3933_v4  ;;  %v10676_v4 = vpop.xlane.xlu1 %4255 }
 0x632   : > { %12230 = vst [vmem:[#allocation28_spill] sm:$0xff] %v10676_v4  ;;  %v3934_v22 = vpack.c.bf16 %v3902_v53, %v3900_v32  ;;  %v10689_v4 = vpop.f32.mrf.mxu3 }
 0x633   : > { %v4112_v54 = vmul.f32 1.442695, %v3992_v26  ;;  %v4114_v3 = vmul.f32 1.442695, %v3993_v51  ;;  %v4116_v58 = vmul.f32 1.442695, %v3994_v23  ;;  %v4200_v51 = vunpack.c.l.bf16 %v10594_v28  ;;  %v10692_v28 = vpop.f32.mrf.mxu0 }
 0x634   : > { %v4118_v6 = vmul.f32 1.442695, %v3995_v33  ;;  %v10672_v61 = vpop.xlane.xlu0 %4261  ;;  %v4212_v33 = vunpack.c.l.bf16 %v10604_v44 }
 0x635   : > { %7695 = vpow2.f32 %v4112_v54  ;;  %4958 = vmax.xlane.f32.xlu2 %v4957_v35  ;;  %4970 = vmax.xlane.f32.xlu0 %v4969_v49  ;;  %v4496_v9 = vpop.f32.mrf.mxu2  ;;  %v4213_v35 = vunpack.c.l.bf16 %v10610_v12  ;;  %v12231_v49 = vld [vmem:[#allocation107_spill] sm:$0xff] }
 0x636   : > { %7697 = vpow2.f32 %v4114_v3  ;;  %v10683_v23 = vadd.f32 %v4496_v9, %v4407_v47  ;;  %v3901_v54 = vsub.f32 %v12231_v49, %v10640_v50  ;;  %v4284_v47 = vadd.f32 %v4201_v45, %v4200_v51  ;;  %v4271_v51 = vpop.xlane.xlu2 %4270 }
 0x637   : > { %v10679_v26 = vpop.f32.mrf.mxu1  ;;  %7699 = vpow2.f32 %v4116_v58  ;;  %v4302_v37 = vadd.f32 %v4213_v35, %v4212_v33  ;;  %v3996_v58 = vunpack.c.l.bf16 %v3934_v22 }
 0x638   : > { %7701 = vpow2.f32 %v4118_v6  ;;  %v3935_v55 = vpack.c.bf16 %v3903_v8, %v3901_v54 }
 0x639   : > { %4441 = vmatmul.bf16.gmra.mxu1 %v10604_v44  ;;  %v3998_v44 = vunpack.c.h.bf16 %v3934_v22  ;;  %v10697_v54 = vpop.xlane.xlu1 %4925  ;;  %v4120_v34 = vmul.f32 1.442695, %v3996_v58 }
 0x63a   : > { %4530 = vmatmul.bf16.gmra.mxu2 %v10610_v12  ;;  %v3997_v6 = vunpack.c.l.bf16 %v3935_v55  ;;  %v3999_v12 = vunpack.c.h.bf16 %v3935_v55  ;;  %v10699_v11 = vpop.f32.mrf.mxu3 }
 0x63b   : > { %v7696_v46 = vpop.eup %7695  ;;  %7703 = vpow2.f32 %v4120_v34  ;;  %v10703_v22 = vpop.f32.mrf.mxu0 }
 0x63c   : > { %v7698_v3 = vpop.eup %7697  ;;  %v4268_v9 = vpop.xlane.xlu0 %4267  ;;  %v4122_v35 = vmul.f32 1.442695, %v3997_v6  ;;  %v4126_v19 = vmul.f32 1.442695, %v3999_v12 }
 0x63d   : > { %v7700_v16 = vpop.eup %7699  ;;  %4285 = vadd.xlane.f32.xlu0 %v4284_v47  ;;  %4303 = vadd.xlane.f32.xlu2 %v4302_v37  ;;  %v10695_v50 = vpop.f32.mrf.mxu2  ;;  %v4975_v47 = vmax.f32 %v10644_v15, %v10648_v41  ;;  %v4124_v37 = vmul.f32 1.442695, %v3998_v44  ;;  %7705 = vrcp.f32 %v4268_v9 }
 0x63e   : > { %v7702_v53 = vpop.eup %7701  ;;  %v4156_v8 = vpack.c.bf16 %v7700_v16, %v7696_v46  ;;  %7707 = vpow2.f32 %v4122_v35  ;;  %v12232_v46 = vld [vmem:[#allocation53_spill] sm:$0xff]  ;;  %v4932_v12 = vpop.xlane.xlu2 %4931 }
 0x63f   : > { %v4412_v32 = vpop.f32.mrf.mxu1  ;;  %v4157_v49 = vpack.c.bf16 %v7702_v53, %v7698_v3  ;;  %7709 = vpow2.f32 %v4124_v37 }
 0x640   : > { %v4218_v45 = vunpack.c.h.bf16 %v4156_v8  ;;  %7711 = vpow2.f32 %v4126_v19  ;;  %v4216_v6 = vunpack.c.l.bf16 %v4156_v8 }
 0x641   : > { %v4219_v33 = vunpack.c.h.bf16 %v4157_v49  ;;  %v10706_v58 = vpop.xlane.xlu1 %4937  ;;  %v4217_v44 = vunpack.c.l.bf16 %v4157_v49  ;;  %7713 = vrcp.f32 %v4271_v51  ;;  %v7704_v34 = vpop.eup %7703  ;;  %v5020_v51 = vsub.f32 %v10293_v29, %v10697_v54 }
 0x642   : > { %v10711_v35 = vpop.f32.mrf.mxu3  ;;  %v5021_v29 = vsub.f32 %v10286_v60, %v10697_v54 }
 0x643   : > { %v4311_v2 = vadd.f32 %v4219_v33, %v4218_v45  ;;  %v7706_v9 = vpop.eup %7705 }
 0x644   : > { %v4929_v16 = vpop.xlane.xlu0 %4928  ;;  %v7708_v33 = vpop.eup %7707 }
 0x645   : > { %4976 = vmax.xlane.f32.xlu0 %v4975_v47  ;;  %4312 = vadd.xlane.f32.xlu1 %v4311_v2  ;;  %v4501_v55 = vpop.f32.mrf.mxu2  ;;  %v4972_v2 = vmax.f32 %v10631_v31, %v10634_v30  ;;  %v5022_v45 = vsub.f32 %v10307_v52, %v4929_v16  ;;  %v4308_v47 = vadd.f32 %v4217_v44, %v4216_v6  ;;  %v10718_v52 = vpop.f32.mrf.mxu0 }
 0x646   : > { %3045 = vadd.xlane.f32.xlu2 %v12232_v46  ;;  %v4502_v53 = vadd.f32 %v4501_v55, %v4412_v32  ;;  %v7710_v32 = vpop.eup %7709  ;;  %v5025_v30 = vsub.f32 %v10328_v48, %v4932_v12  ;;  %v4941_v43 = vpop.xlane.xlu2 %4940 }
 0x647   : > { %v4414_v3 = vpop.f32.mrf.mxu1  ;;  %v7712_v46 = vpop.eup %7711  ;;  %v4158_v31 = vpack.c.bf16 %v7710_v32, %v7704_v34 }
 0x648   : > { %v4592_v19 = vmul.f32 %v7706_v9, %v4502_v53  ;;  %v7714_v44 = vpop.eup %7713 }
 0x649   : > { %4446 = vmatmul.bf16.gmra.mxu1 %v4156_v8  ;;  %v5024_v8 = vsub.f32 %v10334_v27, %v4932_v12  ;;  %v5084_v27 = vpack.c.bf16 %v5022_v45, %v5020_v51 }
 0x64a   : > { %4535 = vmatmul.bf16.gmra.mxu2 %v4157_v49  ;;  %v5023_v49 = vsub.f32 %v10303_v25, %v4929_v16  ;;  %v4624_v9 = vpack.c.bf16 %v4592_v19, %v4592_v19  ;;  %v10727_v34 = vpop.f32.mrf.mxu3 }
 0x64b   : > { %v5116_v38 = vunpack.c.l.bf16 %v5084_v27 }
 0x64c   : > { %v4935_v37 = vpop.xlane.xlu0 %4934  ;;  %v5085_v48 = vpack.c.bf16 %v5023_v49, %v5021_v29  ;;  %v6060_v10 = vunpack.c.l.b16 %v4624_v9  ;;  %v4220_v29 = vunpack.c.l.bf16 %v4158_v31  ;;  %v5031_v9 = vsub.f32 %v10401_v24, %v4941_v43 }
 0x64d   : > { %4973 = vmax.xlane.f32.xlu1 %v4972_v2  ;;  %v4503_v55 = vpop.f32.mrf.mxu2  ;;  %v5026_v53 = vsub.f32 %v10348_v63, %v4935_v37  ;;  %v5027_v6 = vsub.f32 %v10345_v5, %v4935_v37 }
 0x64e   : > { %4309 = vadd.xlane.f32.xlu2 %v4308_v47  ;;  %v4504_v41 = vadd.f32 %v4503_v55, %v4414_v3  ;;  %v4159_v47 = vpack.c.bf16 %v7712_v46, %v7708_v33  ;;  %v5117_v19 = vunpack.c.l.bf16 %v5085_v48  ;;  %v5118_v33 = vunpack.c.h.bf16 %v5084_v27 }
 0x64f   : > { %v5086_v2 = vpack.c.bf16 %v5026_v53, %v5024_v8  ;;  %v5087_v15 = vpack.c.bf16 %v5027_v6, %v5025_v30  ;;  %v4417_v12 = vpop.f32.mrf.mxu1  ;;  %v4222_v8 = vunpack.c.h.bf16 %v4158_v31  ;;  %v12234_v53 = vld [vmem:[#allocation64_spill] sm:$0xff]  ;;  %v5030_v6 = vsub.f32 %v10395_v40, %v4941_v43  ;;  %v12236_v40 = vld [vmem:[#allocation30_spill] sm:$0xff] }
 0x650   : > { %v4593_v16 = vmul.f32 %v7714_v44, %v4504_v41  ;;  %v12233_v41 = vld [vmem:[#allocation57_spill] sm:$0xff]  ;;  %v4223_v49 = vunpack.c.h.bf16 %v4159_v47  ;;  %v5119_v44 = vunpack.c.h.bf16 %v5085_v48  ;;  %v4221_v27 = vunpack.c.l.bf16 %v4159_v47 }
 0x651   : > { %v5120_v55 = vunpack.c.l.bf16 %v5086_v2  ;;  %v5121_v63 = vunpack.c.l.bf16 %v5087_v15  ;;  %v5122_v5 = vunpack.c.h.bf16 %v5086_v2  ;;  %v5123_v37 = vunpack.c.h.bf16 %v5087_v15 }
 0x652   : > { %v10724_v25 = vpop.xlane.xlu1 %4291  ;;  %v4625_v3 = vpack.c.bf16 %v4593_v16, %v4593_v16  ;;  %v10734_v16 = vpop.f32.mrf.mxu0  ;;  %v5180_v2 = vmul.f32 1.442695, %v5116_v38  ;;  %v5029_v48 = vsub.f32 %v12236_v40, %v10706_v58  ;;  %v5186_v38 = vmul.f32 1.442695, %v5119_v44  ;;  %v12239_v40 = vld [vmem:[#allocation10_spill] sm:$0xff] }
 0x653   : > { %v5188_v54 = vmul.f32 1.442695, %v5120_v55  ;;  %v5190_v45 = vmul.f32 1.442695, %v5121_v63  ;;  %v5192_v51 = vmul.f32 1.442695, %v5122_v5  ;;  %v4317_v63 = vadd.f32 %v4223_v49, %v4222_v8 }
 0x654   : > { %v6061_v60 = vunpack.c.l.b16 %v4625_v3  ;;  %v5194_v46 = vmul.f32 1.442695, %v5123_v37  ;;  %v5182_v55 = vmul.f32 1.442695, %v5117_v19  ;;  %v5089_v5 = vpack.c.bf16 %v5031_v9, %v5029_v48  ;;  %v10747_v19 = vpop.f32.mrf.mxu3 }
 0x655   : > { %4228 = vadd.xlane.f32.xlu1 %v12233_v41  ;;  %v4506_v30 = vpop.f32.mrf.mxu2  ;;  %7715 = vpow2.f32 %v5188_v54  ;;  %v4314_v37 = vadd.f32 %v4221_v27, %v4220_v29 }
 0x656   : > { %v6085_v32 = vpack.c.b16 %v6061_v60, %v6060_v10  ;;  %3105 = vadd.xlane.f32.xlu2 %v12234_v53  ;;  %v10730_v15 = vadd.f32 %v4506_v30, %v4417_v12  ;;  %7717 = vpow2.f32 %v5190_v45  ;;  %v5028_v10 = vsub.f32 %v10373_v57, %v10706_v58 }
 0x657   : > { %7719 = vpow2.f32 %v5192_v51  ;;  %v5184_v12 = vmul.f32 1.442695, %v5118_v33  ;;  %v10743_v43 = vpop.f32.mrf.mxu1  ;;  %v5125_v45 = vunpack.c.l.bf16 %v5089_v5  ;;  %v5127_v8 = vunpack.c.h.bf16 %v5089_v5 }
 0x658   : > { %12235 = vst [vmem:[#allocation122_spill] sm:$0xff] %v10730_v15  ;;  %7721 = vpow2.f32 %v5194_v46  ;;  %v5088_v24 = vpack.c.bf16 %v5030_v6, %v5028_v10 }
 0x659   : > { %4451 = vmatmul.bf16.gmra.mxu1 %v4158_v31  ;;  %6108 = vrot.lane.b32.xlu0 %v6085_v32, %s8140_s13  ;;  %12237 = vst [vmem:[#allocation29_spill] sm:$0xff] %v10743_v43  ;;  %7723 = vpow2.f32 %v5180_v2  ;;  %v4978_v32 = vmax.f32 %v10663_v62, %v10665_v56  ;;  %v5198_v29 = vmul.f32 1.442695, %v5125_v45 }
 0x65a   : > { %v10736_v3 = vpop.xlane.xlu1 %4952  ;;  %4540 = vmatmul.bf16.gmra.mxu2 %v4159_v47  ;;  %7725 = vpow2.f32 %v5182_v55  ;;  %v5124_v54 = vunpack.c.l.bf16 %v5088_v24  ;;  %v5126_v41 = vunpack.c.h.bf16 %v5088_v24  ;;  %v10751_v49 = vpop.f32.mrf.mxu0  ;;  %v5202_v55 = vmul.f32 1.442695, %v5127_v8 }
 0x65b   : > { %v7716_v57 = vpop.eup %7715  ;;  %7727 = vpow2.f32 %v5184_v12 }
 0x65c   : > { %v7718_v60 = vpop.eup %7717  ;;  %7729 = vpow2.f32 %v5186_v38  ;;  %v5196_v46 = vmul.f32 1.442695, %v5124_v54  ;;  %v5200_v2 = vmul.f32 1.442695, %v5126_v41 }
 0x65d   : > { %4318 = vadd.xlane.f32.xlu1 %v4317_v63  ;;  %v10745_v31 = vpop.f32.mrf.mxu2  ;;  %v7720_v58 = vpop.eup %7719 }
 0x65e   : > { %12238 = vst [vmem:[#allocation107_spill] sm:$0xff] %v10745_v31  ;;  %4315 = vadd.xlane.f32.xlu2 %v4314_v37  ;;  %v7722_v47 = vpop.eup %7721  ;;  %v5310_v53 = vpack.c.bf16 %v7720_v58, %v7716_v57  ;;  %7731 = vpow2.f32 %v5196_v46  ;;  %v4944_v63 = vpop.xlane.xlu2 %4943 }
 0x65f   : > { %v7724_v30 = vpop.eup %7723  ;;  %v5311_v6 = vpack.c.bf16 %v7722_v47, %v7718_v60  ;;  %v4422_v27 = vpop.f32.mrf.mxu1  ;;  %7733 = vpow2.f32 %v5198_v29 }
 0x660   : > { %v7726_v33 = vpop.eup %7725  ;;  %v5346_v24 = vunpack.c.h.bf16 %v5310_v53  ;;  %7735 = vpow2.f32 %v5200_v2  ;;  %v10765_v57 = vpop.f32.mrf.mxu3 }
 0x661   : > { %v7728_v44 = vpop.eup %7727  ;;  %v5347_v38 = vunpack.c.h.bf16 %v5311_v6  ;;  %7737 = vpow2.f32 %v5202_v55 }
 0x662   : > { %v10749_v51 = vpop.xlane.xlu1 %4955  ;;  %v7730_v9 = vpop.eup %7729  ;;  %v10758_v12 = vpack.c.bf16 %v7728_v44, %v7724_v30  ;;  %v4984_v44 = vmax.f32 %v10699_v11, %v10703_v22 }
 0x663   : > { %v10762_v37 = vpack.c.bf16 %v7730_v9, %v7726_v33  ;;  %v5413_v60 = vadd.f32 %v5347_v38, %v5346_v24  ;;  %v10768_v58 = vpop.f32.mrf.mxu0  ;;  %v4987_v33 = vmax.f32 %v10711_v35, %v10718_v52  ;;  %v5033_v24 = vsub.f32 %v10435_v17, %v4944_v63  ;;  %v12241_v38 = vld [vmem:[#allocation112_spill] sm:$0xff] }
 0x664   : > { %v7732_v54 = vpop.eup %7731 }
 0x665   : > { %4979 = vmax.xlane.f32.xlu1 %v4978_v32  ;;  %v4511_v10 = vpop.f32.mrf.mxu2  ;;  %v7734_v47 = vpop.eup %7733 }
 0x666   : > { %4225 = vadd.xlane.f32.xlu2 %v12239_v40  ;;  %v10756_v48 = vadd.f32 %v4511_v10, %v4422_v27  ;;  %v7736_v45 = vpop.eup %7735  ;;  %v4947_v8 = vpop.xlane.xlu2 %4946  ;;  %v5032_v10 = vsub.f32 %v10428_v7, %v4944_v63 }
 0x667   : > { %v7738_v41 = vpop.eup %7737  ;;  %v10773_v32 = vpack.c.bf16 %v7736_v45, %v7732_v54  ;;  %v5034_v9 = vsub.f32 %v10455_v14, %v4947_v8  ;;  %v5344_v54 = vunpack.c.l.bf16 %v5310_v53  ;;  %v5345_v14 = vunpack.c.l.bf16 %v5311_v6 }
 0x668   : > { %12240 = vst [vmem:[#allocation53_spill] sm:$0xff] %v10756_v48  ;;  %v10775_v46 = vpack.c.bf16 %v7738_v41, %v7734_v47  ;;  %v10779_v29 = vpop.f32.mrf.mxu3  ;;  %v12268_v48 = vld [vmem:[#allocation109_spill] sm:$0xff] }
 0x669   : > { %5556 = vmatmul.bf16.vlgmr.msra.gmra.mxu1 %v10758_v12  ;;  %v5348_v55 = vunpack.c.l.bf16 %v10773_v32  ;;  %v5090_v47 = vpack.c.bf16 %v5034_v9, %v5032_v10  ;;  %v5410_v41 = vadd.f32 %v5345_v14, %v5344_v54  ;;  %v4950_v10 = vpop.xlane.xlu0 %4949 }
 0x66a   : > { %v10760_v5 = vpop.xlane.xlu1 %4961  ;;  %5645 = vmatmul.bf16.vlgmr.msra.gmra.mxu2 %v10762_v37  ;;  %v5349_v40 = vunpack.c.l.bf16 %v10775_v46  ;;  %v5036_v54 = vsub.f32 %v10483_v18, %v4950_v10  ;;  %v5342_v18 = vunpack.c.h.bf16 %v10758_v12 }
 0x66b   : > { %v10783_v2 = vpop.f32.mrf.mxu0  ;;  %v5130_v17 = vunpack.c.h.bf16 %v5090_v47 }
 0x66c   : > { %v5416_v45 = vadd.f32 %v5349_v40, %v5348_v55  ;;  %v4996_v40 = vmax.f32 %v10765_v57, %v10768_v58 }
 0x66d   : > { %5414 = vadd.xlane.f32.xlu1 %v5413_v60  ;;  %v5208_v55 = vmul.f32 1.442695, %v5130_v17  ;;  %v10805_v14 = vpop.f32.mrf.mxu2  ;;  %v5343_v17 = vunpack.c.h.bf16 %v10762_v37 }
 0x66e   : > { %4288 = vadd.xlane.f32.xlu2 %v10608_v36  ;;  %v5035_v36 = vsub.f32 %v10461_v59, %v4947_v8  ;;  %12243 = vst [vmem:[#allocation64_spill] sm:$0xff] %v10805_v14 }
 0x670   : > { %v5091_v59 = vpack.c.bf16 %v5035_v36, %v5033_v24  ;;  %v10792_v8 = vpop.f32.mrf.mxu3 }
 0x672   : > { %v3049_v30 = vpop.xlane.xlu1 %3048  ;;  %v5129_v7 = vunpack.c.l.bf16 %v5091_v59  ;;  %v5131_v63 = vunpack.c.h.bf16 %v5091_v59 }
 0x673   : > { %7739 = vrcp.f32 %v3049_v30  ;;  %v5128_v30 = vunpack.c.l.bf16 %v5090_v47  ;;  %v5037_v47 = vsub.f32 %v10485_v39, %v4950_v10  ;;  %v4990_v39 = vmax.f32 %v10727_v34, %v10734_v16 }
 0x674   : > { %v5206_v36 = vmul.f32 1.442695, %v5129_v7  ;;  %v5210_v24 = vmul.f32 1.442695, %v5131_v63  ;;  %v5351_v10 = vunpack.c.h.bf16 %v10775_v46 }
 0x675   : > { %4988 = vmax.xlane.f32.xlu1 %v4987_v33  ;;  %v10794_v33 = vpop.f32.mrf.mxu1  ;;  %v5204_v9 = vmul.f32 1.442695, %v5128_v30  ;;  %v5039_v30 = vsub.f32 %v10499_v0, %v10736_v3 }
 0x676   : > { %4985 = vmax.xlane.f32.xlu2 %v4984_v44  ;;  %12242 = vst [vmem:[#allocation57_spill] sm:$0xff] %v10794_v33  ;;  %v10796_v44 = vpop.f32.mrf.mxu0 }
 0x677   : > { %7741 = vpow2.f32 %v5204_v9 }
 0x678   : > { %7743 = vpow2.f32 %v5206_v36  ;;  %v10814_v7 = vpop.f32.mrf.mxu3  ;;  %v5350_v36 = vunpack.c.h.bf16 %v10773_v32 }
 0x679   : > { %v7740_v27 = vpop.eup %7739  ;;  %5561 = vmatmul.bf16.gmra.mxu1 %v5310_v53  ;;  %v5341_v53 = vunpack.c.l.bf16 %v10762_v37  ;;  %7745 = vpow2.f32 %v5208_v55 }
 0x67a   : > { %v10790_v60 = vmul.f32 %v7740_v27, %v12241_v38  ;;  %5650 = vmatmul.bf16.gmra.mxu2 %v5311_v6  ;;  %v5340_v27 = vunpack.c.l.bf16 %v10758_v12  ;;  %v4981_v6 = vmax.f32 %v10689_v4, %v10692_v28  ;;  %7747 = vpow2.f32 %v5210_v24 }
 0x67b   : > { %v5407_v12 = vadd.f32 %v5343_v17, %v5342_v18  ;;  %7749 = vrcp.f32 %v10654_v1  ;;  %v5419_v18 = vadd.f32 %v5351_v10, %v5350_v36  ;;  %v4295_v36 = vpop.xlane.xlu0 %4294 }
 0x67c   : > { %v5404_v38 = vadd.f32 %v5341_v53, %v5340_v27  ;;  %v5093_v27 = vpack.c.bf16 %v5039_v30, %v5037_v47  ;;  %7751 = vrcp.f32 %v10672_v61 }
 0x67d   : > { %5417 = vadd.xlane.f32.xlu1 %v5416_v45 }
 0x67e   : > { %5411 = vadd.xlane.f32.xlu2 %v5410_v41  ;;  %v5038_v41 = vsub.f32 %v10495_v21, %v10736_v3  ;;  %v10821_v53 = vpop.f32.mrf.mxu0  ;;  %v7742_v21 = vpop.eup %7741 }
 0x67f   : > { %v5005_v0 = vmax.f32 %v10814_v7, %v10821_v53  ;;  %v7744_v3 = vpop.eup %7743 }
 0x680   : > { %v5092_v63 = vpack.c.bf16 %v5038_v41, %v5036_v54  ;;  %v5135_v41 = vunpack.c.h.bf16 %v5093_v27 }
 0x682   : > { %v5132_v37 = vunpack.c.l.bf16 %v5092_v63  ;;  %v5134_v47 = vunpack.c.h.bf16 %v5092_v63 }
 0x683   : > { %4982 = vmax.xlane.f32.xlu0 %v4981_v6  ;;  %v7746_v6 = vpop.eup %7745 }
 0x684   : > { %v7748_v55 = vpop.eup %7747  ;;  %v5212_v30 = vmul.f32 1.442695, %v5132_v37  ;;  %v5314_v17 = vpack.c.bf16 %v7746_v6, %v7742_v21 }
 0x685   : > { %4997 = vmax.xlane.f32.xlu1 %v4996_v40  ;;  %v5133_v40 = vunpack.c.l.bf16 %v5093_v27 }
 0x686   : > { %v10808_v59 = vpop.xlane.xlu1 %4306  ;;  %5405 = vadd.xlane.f32.xlu2 %v5404_v38  ;;  %v4427_v45 = vpop.f32.mrf.mxu1  ;;  %7753 = vpow2.f32 %v5212_v30  ;;  %v5352_v63 = vunpack.c.l.bf16 %v5314_v17 }
 0x689   : > { %5566 = vmatmul.bf16.gmra.mxu1 %v10773_v32  ;;  %v5315_v32 = vpack.c.bf16 %v7748_v55, %v7744_v3 }
 0x68a   : > { %5655 = vmatmul.bf16.gmra.mxu2 %v10775_v46  ;;  %v5216_v46 = vmul.f32 1.442695, %v5134_v47 }
 0x68b   : > { %4991 = vmax.xlane.f32.xlu0 %v4990_v39  ;;  %v5214_v39 = vmul.f32 1.442695, %v5133_v40  ;;  %v5353_v61 = vunpack.c.l.bf16 %v5315_v32 }
 0x68d   : > { %v4516_v9 = vpop.f32.mrf.mxu2  ;;  %5006 = vmax.xlane.f32.xlu1 %v5005_v0  ;;  %v4499_v0 = vadd.f32 %v10695_v50, %v10679_v26  ;;  %7755 = vpow2.f32 %v5214_v39  ;;  %v5354_v26 = vunpack.c.h.bf16 %v5314_v17  ;;  %v5355_v50 = vunpack.c.h.bf16 %v5315_v32 }
 0x68e   : > { %v10828_v24 = vpop.xlane.xlu1 %4964  ;;  %v10830_v38 = vadd.f32 %v4516_v9, %v4427_v45  ;;  %5408 = vadd.xlane.f32.xlu2 %v5407_v12  ;;  %v4429_v54 = vpop.f32.mrf.mxu1  ;;  %v4993_v45 = vmax.f32 %v10747_v19, %v10751_v49  ;;  %v5218_v12 = vmul.f32 1.442695, %v5135_v41  ;;  %7757 = vpow2.f32 %v5216_v46 }
 0x68f   : > { %v7750_v9 = vpop.eup %7749  ;;  %v5422_v10 = vadd.f32 %v5353_v61, %v5352_v63  ;;  %v5425_v30 = vadd.f32 %v5355_v50, %v5354_v26 }
 0x690   : > { %v7752_v27 = vpop.eup %7751  ;;  %v4591_v6 = vmul.f32 %v7750_v9, %v4499_v0  ;;  %7759 = vpow2.f32 %v5218_v12 }
 0x691   : > { %v4590_v55 = vmul.f32 %v7752_v27, %v10683_v23  ;;  %v7754_v40 = vpop.eup %7753  ;;  %7761 = vrcp.f32 %v10724_v25  ;;  %v4999_v23 = vmax.f32 %v10779_v29, %v10783_v2 }
 0x692   : > { %v4623_v41 = vpack.c.bf16 %v4591_v6, %v4591_v6  ;;  %v5046_v6 = vsub.f32 %v10579_v20, %v10828_v24  ;;  %v5040_v20 = vsub.f32 %v10515_v42, %v10749_v51  ;;  %v12250_v42 = vld [vmem:[#allocation153_spill] sm:$0xff] }
 0x693   : > { %5420 = vadd.xlane.f32.xlu0 %v5419_v18  ;;  %v7756_v47 = vpop.eup %7755  ;;  %v4622_v46 = vpack.c.bf16 %v4590_v55, %v4590_v55 }
 0x695   : > { %v4518_v1 = vpop.f32.mrf.mxu2  ;;  %v6058_v61 = vunpack.c.l.b16 %v4622_v46 }
 0x696   : > { %v10838_v37 = vpop.xlane.xlu1 %4967  ;;  %v10840_v21 = vadd.f32 %v4518_v1, %v4429_v54  ;;  %4994 = vmax.xlane.f32.xlu2 %v4993_v45  ;;  %v4432_v3 = vpop.f32.mrf.mxu1 }
 0x697   : > { %v7758_v54 = vpop.eup %7757 }
 0x698   : > { %v7760_v39 = vpop.eup %7759  ;;  %v5316_v1 = vpack.c.bf16 %v7758_v54, %v7754_v40  ;;  %v12244_v40 = vld [vmem:[#allocation125_spill] sm:$0xff] }
 0x699   : > { %5571 = vmatmul.bf16.gmra.mxu1 %v5314_v17  ;;  %v6059_v17 = vunpack.c.l.b16 %v4623_v41  ;;  %v5317_v63 = vpack.c.bf16 %v7760_v39, %v7756_v47  ;;  %v7762_v25 = vpop.eup %7761  ;;  %v12245_v39 = vld [vmem:[#allocation17_spill] sm:$0xff] }
 0x69a   : > { %5660 = vmatmul.bf16.gmra.mxu2 %v5315_v32  ;;  %v5356_v55 = vunpack.c.l.bf16 %v5316_v1  ;;  %v5358_v46 = vunpack.c.h.bf16 %v5316_v1 }
 0x69b   : > { %5423 = vadd.xlane.f32.xlu0 %v5422_v10  ;;  %v6084_v27 = vpack.c.b16 %v6059_v17, %v6058_v61  ;;  %v5357_v41 = vunpack.c.l.bf16 %v5317_v63  ;;  %v12246_v61 = vld [vmem:[#allocation141_spill] sm:$0xff] }
 0x69d   : > { %v4521_v18 = vpop.f32.mrf.mxu2 }
 0x69e   : > { %v3109_v0 = vpop.xlane.xlu1 %3108  ;;  %v4522_v45 = vadd.f32 %v4521_v18, %v4432_v3  ;;  %5426 = vadd.xlane.f32.xlu2 %v5425_v30  ;;  %v4434_v12 = vpop.f32.mrf.mxu1  ;;  %v5002_v3 = vmax.f32 %v10792_v8, %v10796_v44 }
 0x69f   : > { %7763 = vrcp.f32 %v3109_v0 }
 0x6a0   : > { %v10844_v9 = vpop.xlane.xlu2 %4300  ;;  %7765 = vrcp.f32 %v4295_v36  ;;  %v4298_v32 = vpop.xlane.xlu0 %4297  ;;  %v4600_v26 = vmul.f32 %v7762_v25, %v4522_v45  ;;  %v5044_v36 = vsub.f32 %v10555_v13, %v10760_v5  ;;  %v12247_v25 = vld [vmem:[#allocation142_spill] sm:$0xff] }
 0x6a1   : > { %7767 = vrcp.f32 %v12245_v39  ;;  %v12249_v39 = vld [vmem:[#allocation38_spill] sm:$0xff] }
 0x6a2   : > { %v10861_v0 = vpack.c.bf16 %v5046_v6, %v5044_v36  ;;  %v4632_v45 = vpack.c.bf16 %v4600_v26, %v4600_v26  ;;  %7769 = vrcp.f32 %v12249_v39  ;;  %v5047_v6 = vsub.f32 %v12250_v42, %v10828_v24  ;;  %v12257_v24 = vld [vmem:[#allocation161_spill] sm:$0xff] }
 0x6a3   : > { %5000 = vmax.xlane.f32.xlu0 %v4999_v23  ;;  %v5359_v23 = vunpack.c.h.bf16 %v5317_v63  ;;  %7771 = vrcp.f32 %v4298_v32 }
 0x6a4   : > { %7773 = vrcp.f32 %v10844_v9  ;;  %v5142_v9 = vunpack.c.h.bf16 %v10861_v0 }
 0x6a5   : > { %v7764_v50 = vpop.eup %7763  ;;  %v4523_v10 = vpop.f32.mrf.mxu2  ;;  %7775 = vrcp.f32 %v10808_v59  ;;  %v12260_v59 = vld [vmem:[#allocation157_spill] sm:$0xff] }
 0x6a6   : > { %v10855_v47 = vmul.f32 %v7764_v50, %v12244_v40  ;;  %v4524_v30 = vadd.f32 %v4523_v10, %v4434_v12  ;;  %5003 = vmax.xlane.f32.xlu2 %v5002_v3  ;;  %v4437_v54 = vpop.f32.mrf.mxu1  ;;  %6106 = vrot.lane.b32.xlu1 %v6084_v27, %s8140_s13  ;;  %v7766_v18 = vpop.eup %7765  ;;  %v5041_v12 = vsub.f32 %v12246_v61, %v10749_v51  ;;  %v12248_v50 = vld [vmem:[#allocation145_spill] sm:$0xff]  ;;  %v10871_v51 = vunpack.c.l.b16 %v4632_v45 }
 0x6a7   : > { %v5428_v10 = vadd.f32 %v5357_v41, %v5356_v55  ;;  %v12253_v55 = vld [vmem:[#allocation31_spill] sm:$0xff] }
 0x6a8   : > { %v4601_v17 = vmul.f32 %v7766_v18, %v4524_v30  ;;  %v4959_v13 = vpop.xlane.xlu2 %4958  ;;  %v4971_v26 = vpop.xlane.xlu0 %4970  ;;  %v5140_v18 = vunpack.c.l.bf16 %v10861_v0  ;;  %12251 = vst [vmem:[#allocation30_spill] sm:$0xff] %v10871_v51 }
 0x6a9   : > { %v5042_v3 = vsub.f32 %v12247_v25, %v4959_v13  ;;  %v5043_v27 = vsub.f32 %v12248_v50, %v4959_v13  ;;  %5576 = vmatmul.bf16.gmra.mxu1 %v5316_v1  ;;  %v5431_v13 = vadd.f32 %v5359_v23, %v5358_v46  ;;  %v7768_v1 = vpop.eup %7767  ;;  %v12254_v50 = vld [vmem:[#allocation16_spill] sm:$0xff]  ;;  %v10883_v23 = vpop.f32.mrf.mxu0 }
 0x6aa   : > { %v4633_v40 = vpack.c.bf16 %v4601_v17, %v4601_v17  ;;  %5665 = vmatmul.bf16.gmra.mxu2 %v5317_v63  ;;  %v5045_v63 = vsub.f32 %v12253_v55, %v10760_v5  ;;  %v10877_v17 = vpop.f32.mrf.mxu3  ;;  %v7770_v39 = vpop.eup %7769 }
 0x6ab   : > { %v5094_v36 = vpack.c.bf16 %v5042_v3, %v5040_v20  ;;  %v5095_v30 = vpack.c.bf16 %v5043_v27, %v5041_v12  ;;  %5429 = vadd.xlane.f32.xlu0 %v5428_v10  ;;  %v12255_v27 = vld [vmem:[#allocation98_spill] sm:$0xff]  ;;  %v5228_v10 = vmul.f32 1.442695, %v5140_v18  ;;  %v5008_v42 = vmax.f32 %v10877_v17, %v10883_v23 }
 0x6ac   : > { %v10873_v61 = vunpack.c.l.b16 %v4633_v40  ;;  %v5097_v45 = vpack.c.bf16 %v5047_v6, %v5045_v63  ;;  %v2144_v46 = vadd.f32 %v12255_v27, %v12254_v50  ;;  %v12256_v50 = vld [vmem:[#allocation160_spill] sm:$0xff]  ;;  %v5051_v18 = vsub.f32 %v12257_v24, %v4971_v26 }
 0x6ad   : > { %v4526_v41 = vpop.f32.mrf.mxu2  ;;  %v5136_v20 = vunpack.c.l.bf16 %v5094_v36  ;;  %v5137_v12 = vunpack.c.l.bf16 %v5095_v30  ;;  %v5138_v3 = vunpack.c.h.bf16 %v5094_v36  ;;  %v5139_v5 = vunpack.c.h.bf16 %v5095_v30  ;;  %v7772_v36 = vpop.eup %7771  ;;  %v12261_v24 = vld [vmem:[#allocation72_spill] sm:$0xff] }
 0x6ae   : > { %12252 = vst [vmem:[#allocation10_spill] sm:$0xff] %v10873_v61  ;;  %5432 = vadd.xlane.f32.xlu2 %v5431_v13  ;;  %v4439_v25 = vpop.f32.mrf.mxu1  ;;  %v4527_v32 = vadd.f32 %v4526_v41, %v4437_v54  ;;  %v2233_v13 = vmul.f32 %v7768_v1, %v2144_v46  ;;  %v5141_v63 = vunpack.c.l.bf16 %v5097_v45  ;;  %v5050_v27 = vsub.f32 %v12256_v50, %v4971_v26  ;;  %v12258_v54 = vld [vmem:[#allocation96_spill] sm:$0xff]  ;;  %v12259_v1 = vld [vmem:[#allocation154_spill] sm:$0xff] }
 0x6af   : > { %v5220_v55 = vmul.f32 1.442695, %v5136_v20  ;;  %v5222_v6 = vmul.f32 1.442695, %v5137_v12  ;;  %v5224_v30 = vmul.f32 1.442695, %v5138_v3  ;;  %v2232_v41 = vmul.f32 %v7770_v39, %v12258_v54 }
 0x6b0   : > { %v4304_v40 = vpop.xlane.xlu2 %4303  ;;  %7777 = vpow2.f32 %v5228_v10  ;;  %v5226_v51 = vmul.f32 1.442695, %v5139_v5  ;;  %v4602_v61 = vmul.f32 %v7772_v36, %v4527_v32  ;;  %v5048_v20 = vsub.f32 %v12259_v1, %v10838_v37  ;;  %v4286_v46 = vpop.xlane.xlu0 %4285 }
 0x6b1   : > { %v5049_v12 = vsub.f32 %v12260_v59, %v10838_v37  ;;  %7779 = vpow2.f32 %v5220_v55  ;;  %v5143_v31 = vunpack.c.h.bf16 %v5097_v45  ;;  %v7774_v10 = vpop.eup %7773  ;;  %v5230_v5 = vmul.f32 1.442695, %v5141_v63  ;;  %v10925_v15 = vpop.f32.mrf.mxu0 }
 0x6b2   : > { %7781 = vpow2.f32 %v5222_v6  ;;  %v5098_v32 = vpack.c.bf16 %v5050_v27, %v5048_v20  ;;  %v10898_v0 = vpop.eup %7775  ;;  %v2264_v55 = vpack.c.bf16 %v2232_v41, %v2232_v41  ;;  %v2265_v54 = vpack.c.bf16 %v2233_v13, %v2233_v13 }
 0x6b3   : > { %5009 = vmax.xlane.f32.xlu0 %v5008_v42  ;;  %v5099_v39 = vpack.c.bf16 %v5051_v18, %v5049_v12  ;;  %7783 = vpow2.f32 %v5224_v30  ;;  %v4634_v42 = vpack.c.bf16 %v4602_v61, %v4602_v61  ;;  %v5232_v45 = vmul.f32 1.442695, %v5142_v9 }
 0x6b4   : > { %7785 = vpow2.f32 %v5226_v51  ;;  %v5234_v27 = vmul.f32 1.442695, %v5143_v31  ;;  %v5144_v18 = vunpack.c.l.bf16 %v5098_v32  ;;  %v5146_v51 = vunpack.c.h.bf16 %v5098_v32 }
 0x6b5   : > { %v4528_v50 = vpop.f32.mrf.mxu2  ;;  %7787 = vrcp.f32 %v4286_v46  ;;  %v5145_v30 = vunpack.c.l.bf16 %v5099_v39  ;;  %v10904_v61 = vunpack.c.l.b16 %v4634_v42  ;;  %v10908_v41 = vunpack.c.l.b16 %v2264_v55 }
 0x6b6   : > { %v4529_v26 = vadd.f32 %v4528_v50, %v4439_v25  ;;  %1841 = vadd.xlane.f32.xlu2 %v12261_v24  ;;  %v4442_v3 = vpop.f32.mrf.mxu1  ;;  %v10902_v6 = vpop.eup %7777  ;;  %7789 = vrcp.f32 %v4304_v40  ;;  %v10910_v9 = vunpack.c.l.b16 %v2265_v54  ;;  %v3431_v40 = vpack.c.bf16 %v10790_v60, %v10790_v60 }
 0x6b7   : > { %v7780_v63 = vpop.eup %7779  ;;  %7791 = vpow2.f32 %v5230_v5  ;;  %12262 = vst [vmem:[#allocation112_spill] sm:$0xff] %v10904_v61  ;;  %v5147_v46 = vunpack.c.h.bf16 %v5099_v39  ;;  %v5236_v32 = vmul.f32 1.442695, %v5144_v18  ;;  %v5238_v42 = vmul.f32 1.442695, %v5145_v30  ;;  %v10919_v50 = vpop.f32.mrf.mxu3  ;;  %v12264_v18 = vld [vmem:[#allocation164_spill] sm:$0xff] }
 0x6b8   : > { %v4603_v36 = vmul.f32 %v7774_v10, %v4529_v26  ;;  %v10900_v37 = vpop.xlane.xlu1 %4312  ;;  %v7782_v20 = vpop.eup %7781  ;;  %v12267_v61 = vld [vmem:[#allocation165_spill] sm:$0xff] }
 0x6b9   : > { %v3046_v25 = vpop.xlane.xlu2 %3045  ;;  %v7784_v13 = vpop.eup %7783 }
 0x6ba   : > { %v4635_v1 = vpack.c.bf16 %v4603_v36, %v4603_v36  ;;  %7793 = vrcp.f32 %v3046_v25  ;;  %v7786_v31 = vpop.eup %7785  ;;  %v5318_v26 = vpack.c.bf16 %v7784_v13, %v7780_v63  ;;  %v4977_v36 = vpop.xlane.xlu0 %4976  ;;  %v5240_v25 = vmul.f32 1.442695, %v5146_v51  ;;  %v12265_v51 = vld [vmem:[#allocation168_spill] sm:$0xff] }
 0x6bb   : > { %7795 = vpow2.f32 %v5232_v45  ;;  %v7788_v5 = vpop.eup %7787  ;;  %v5319_v55 = vpack.c.bf16 %v7786_v31, %v7782_v20  ;;  %v5054_v31 = vsub.f32 %v12265_v51, %v4977_v36  ;;  %v10930_v51 = vunpack.c.l.b16 %v3431_v40 }
 0x6bc   : > { %v10906_v59 = vunpack.c.l.b16 %v4635_v1  ;;  %7797 = vpow2.f32 %v5234_v27  ;;  %v7790_v54 = vpop.eup %7789  ;;  %v10917_v60 = vmul.f32 %v7788_v5, %v10830_v38  ;;  %5581 = vmatmul.bf16.gmra.mxu1 %v5318_v26  ;;  %v5362_v45 = vunpack.c.h.bf16 %v5318_v26  ;;  %v12266_v38 = vld [vmem:[#allocation170_spill] sm:$0xff] }
 0x6bd   : > { %v4531_v12 = vpop.f32.mrf.mxu2  ;;  %v5360_v39 = vunpack.c.l.bf16 %v5318_v26  ;;  %v7792_v43 = vpop.eup %7791  ;;  %5670 = vmatmul.bf16.gmra.mxu2 %v5319_v55  ;;  %v5363_v63 = vunpack.c.h.bf16 %v5319_v55  ;;  %v5361_v27 = vunpack.c.l.bf16 %v5319_v55  ;;  %v5055_v5 = vsub.f32 %v12266_v38, %v4977_v36  ;;  %12269 = vst [vmem:[#allocation17_spill] sm:$0xff] %v10930_v51 }
 0x6be   : > { %12263 = vst [vmem:[#allocation125_spill] sm:$0xff] %v10906_v59  ;;  %v4532_v24 = vadd.f32 %v4531_v12, %v4442_v3  ;;  %v4444_v10 = vpop.f32.mrf.mxu1  ;;  %v5242_v12 = vmul.f32 1.442695, %v5147_v46  ;;  %7799 = vpow2.f32 %v5236_v32  ;;  %v5893_v46 = vpack.c.b16 %v10910_v9, %v10908_v41 }
 0x6bf   : > { %7801 = vpow2.f32 %v5238_v42 }
 0x6c0   : > { %v4974_v1 = vpop.xlane.xlu1 %4973  ;;  %v4604_v3 = vmul.f32 %v7790_v54, %v4532_v24  ;;  %v7794_v20 = vpop.eup %7793  ;;  %v5437_v24 = vadd.f32 %v5363_v63, %v5362_v45  ;;  %v5434_v54 = vadd.f32 %v5361_v27, %v5360_v39  ;;  %7803 = vpow2.f32 %v5240_v25 }
 0x6c1   : > { %v5052_v30 = vsub.f32 %v12264_v18, %v4974_v1  ;;  %v4310_v13 = vpop.xlane.xlu2 %4309  ;;  %v5053_v59 = vsub.f32 %v12267_v61, %v4974_v1  ;;  %v7796_v26 = vpop.eup %7795  ;;  %v3398_v14 = vmul.f32 %v7794_v20, %v12268_v48  ;;  %7805 = vpow2.f32 %v5242_v12 }
 0x6c2   : > { %v7798_v33 = vpop.eup %7797  ;;  %5438 = vadd.xlane.f32.xlu2 %v5437_v24  ;;  %5435 = vadd.xlane.f32.xlu0 %v5434_v54  ;;  %7807 = vrcp.f32 %v4310_v13  ;;  %v5011_v24 = vmax.f32 %v10919_v50, %v10925_v15  ;;  %v10941_v13 = vpop.f32.mrf.mxu3 }
 0x6c3   : > { %v5100_v55 = vpack.c.bf16 %v5054_v31, %v5052_v30  ;;  %v5101_v18 = vpack.c.bf16 %v5055_v5, %v5053_v59  ;;  %v3430_v36 = vpack.c.bf16 %v3398_v14, %v3398_v14  ;;  %v4636_v14 = vpack.c.bf16 %v4604_v3, %v4604_v3  ;;  %v12271_v5 = vld [vmem:[#allocation147_spill] sm:$0xff] }
 0x6c4   : > { %v7800_v40 = vpop.eup %7799 }
 0x6c5   : > { %v4533_v61 = vpop.f32.mrf.mxu2  ;;  %v5148_v1 = vunpack.c.l.bf16 %v5100_v55  ;;  %v5149_v32 = vunpack.c.l.bf16 %v5101_v18  ;;  %v5150_v38 = vunpack.c.h.bf16 %v5100_v55  ;;  %v5151_v48 = vunpack.c.h.bf16 %v5101_v18  ;;  %v7802_v31 = vpop.eup %7801 }
 0x6c6   : > { %v4447_v45 = vpop.f32.mrf.mxu1  ;;  %v10932_v42 = vunpack.c.l.b16 %v3430_v36  ;;  %v4534_v59 = vadd.f32 %v4533_v61, %v4444_v10  ;;  %v7804_v12 = vpop.eup %7803  ;;  %v6261_v10 = vsel %vm1109_vm2, %v5893_v46, %v12271_v5  ;;  %v10946_v55 = vpack.c.bf16 %v7798_v33, %v7792_v43 }
 0x6c7   : > { %v5244_v39 = vmul.f32 1.442695, %v5148_v1  ;;  %v5246_v63 = vmul.f32 1.442695, %v5149_v32  ;;  %v5248_v41 = vmul.f32 1.442695, %v5150_v38  ;;  %v7806_v36 = vpop.eup %7805  ;;  %v10951_v61 = vpop.f32.mrf.mxu0  ;;  %v10953_v46 = vunpack.c.l.b16 %v4636_v14 }
 0x6c8   : > { %12270 = vst [vmem:[#allocation141_spill] sm:$0xff] %v10932_v42  ;;  %v4229_v9 = vpop.xlane.xlu1 %4228  ;;  %v5250_v25 = vmul.f32 1.442695, %v5151_v48  ;;  %v4605_v27 = vmul.f32 %v10898_v0, %v4534_v59  ;;  %v10944_v0 = vpack.c.bf16 %v7796_v26, %v10902_v6  ;;  %v12272_v32 = vld [vmem:[#allocation103_spill] sm:$0xff]  ;;  %v7808_v48 = vpop.eup %7807  ;;  %v5014_v43 = vmax.f32 %v10941_v13, %v10951_v61 }
 0x6c9   : > { %v3106_v30 = vpop.xlane.xlu2 %3105  ;;  %7809 = vpow2.f32 %v5244_v39  ;;  %v5365_v14 = vunpack.c.l.bf16 %v10946_v55  ;;  %v10979_v26 = vpack.c.bf16 %v7806_v36, %v7802_v31 }
 0x6ca   : > { %7811 = vpow2.f32 %v5246_v63  ;;  %v4637_v3 = vpack.c.bf16 %v4605_v27, %v4605_v27  ;;  %5012 = vmax.xlane.f32.xlu2 %v5011_v24  ;;  %1901 = vadd.xlane.f32.xlu0 %v12272_v32  ;;  %v3451_v24 = vpack.c.bf16 %v10855_v47, %v10855_v47  ;;  %v12273_v32 = vld [vmem:[#allocation124_spill] sm:$0xff] }
 0x6cb   : > { %v6109_v54 = vpop.permute.xlu0 %6108  ;;  %7813 = vpow2.f32 %v5248_v41  ;;  %v5364_v41 = vunpack.c.l.bf16 %v10944_v0 }
 0x6cc   : > { %v10949_v18 = vsel %vm6286_vm3, %v6261_v10, %v6109_v54  ;;  %7815 = vpow2.f32 %v5250_v25  ;;  %v10955_v1 = vunpack.c.l.b16 %v4637_v3  ;;  %5586 = vmatmul.bf16.gmra.mxu1 %v10944_v0 }
 0x6cd   : > { %v4536_v38 = vpop.f32.mrf.mxu2  ;;  %7817 = vrcp.f32 %v3106_v30  ;;  %5675 = vmatmul.bf16.gmra.mxu2 %v10946_v55  ;;  %v5440_v3 = vadd.f32 %v5365_v14, %v5364_v41 }
 0x6ce   : > { %v4537_v33 = vadd.f32 %v4536_v38, %v4447_v45  ;;  %v4449_v6 = vpop.f32.mrf.mxu1  ;;  %7819 = vrcp.f32 %v10900_v37 }
 0x6cf   : > { %v7810_v59 = vpop.eup %7809  ;;  %7821 = vrcp.f32 %v4229_v9 }
 0x6d0   : > { %v4606_v39 = vmul.f32 %v7808_v48, %v4537_v33  ;;  %v4319_v63 = vpop.xlane.xlu1 %4318  ;;  %5015 = vmax.xlane.f32.xlu1 %v5014_v43  ;;  %v7812_v25 = vpop.eup %7811  ;;  %v12274_v48 = vld [vmem:[#allocation73_spill] sm:$0xff]  ;;  %v10975_v43 = vpack.c.bf16 %v7804_v12, %v7800_v40 }
 0x6d1   : > { %v4316_v45 = vpop.xlane.xlu2 %4315  ;;  %v7814_v27 = vpop.eup %7813 }
 0x6d2   : > { %v7816_v30 = vpop.eup %7815  ;;  %v10967_v5 = vpack.c.bf16 %v7814_v27, %v7810_v59  ;;  %1844 = vadd.xlane.f32.xlu2 %v12274_v48  ;;  %7823 = vrcp.f32 %v4316_v45  ;;  %v12277_v45 = vld [vmem:[#allocation104_spill] sm:$0xff] }
 0x6d3   : > { %v7818_v10 = vpop.eup %7817  ;;  %v10971_v54 = vpack.c.bf16 %v7816_v30, %v7812_v25  ;;  %v4638_v25 = vpack.c.bf16 %v4606_v39, %v4606_v39  ;;  %v5369_v39 = vunpack.c.l.bf16 %v10979_v26 }
 0x6d4   : > { %v3418_v38 = vmul.f32 %v7818_v10, %v12273_v32  ;;  %v5374_v33 = vunpack.c.h.bf16 %v10967_v5  ;;  %v5372_v59 = vunpack.c.l.bf16 %v10967_v5  ;;  %v7820_v41 = vpop.eup %7819  ;;  %v10989_v32 = vunpack.c.l.b16 %v3451_v24 }
 0x6d5   : > { %v4538_v37 = vpop.f32.mrf.mxu2  ;;  %v5375_v47 = vunpack.c.h.bf16 %v10971_v54  ;;  %v5373_v9 = vunpack.c.l.bf16 %v10971_v54  ;;  %v7822_v36 = vpop.eup %7821 }
 0x6d6   : > { %v4539_v27 = vadd.f32 %v4538_v37, %v4449_v6  ;;  %v4452_v20 = vpop.f32.mrf.mxu1  ;;  %v3450_v14 = vpack.c.bf16 %v3418_v38, %v3418_v38  ;;  %v5368_v38 = vunpack.c.l.bf16 %v10975_v43  ;;  %v12275_v37 = vld [vmem:[#allocation138_spill] sm:$0xff] }
 0x6d7   : > { %v10985_v40 = vadd.f32 %v5375_v47, %v5374_v33  ;;  %v10987_v12 = vadd.f32 %v5373_v9, %v5372_v59  ;;  %v10999_v59 = vunpack.c.l.b16 %v4638_v25 }
 0x6d8   : > { %v4607_v30 = vmul.f32 %v7820_v41, %v4539_v27  ;;  %v10983_v10 = vpop.xlane.xlu1 %4979  ;;  %5441 = vadd.xlane.f32.xlu1 %v5440_v3  ;;  %v10991_v6 = vunpack.c.l.b16 %v3450_v14  ;;  %v12276_v27 = vld [vmem:[#allocation140_spill] sm:$0xff]  ;;  %v7824_v42 = vpop.eup %7823 }
 0x6d9   : > { %v4226_v31 = vpop.xlane.xlu2 %4225  ;;  %v4469_v3 = vadd.f32 %v12276_v27, %v12275_v37 }
 0x6da   : > { %v4639_v48 = vpack.c.bf16 %v4607_v30, %v4607_v30  ;;  %7825 = vrcp.f32 %v4226_v31  ;;  %1904 = vadd.xlane.f32.xlu2 %v12277_v45  ;;  %v5446_v31 = vadd.f32 %v5369_v39, %v5368_v38  ;;  %v12280_v45 = vld [vmem:[#allocation51_spill] sm:$0xff] }
 0x6db   : > { %v4579_v47 = vmul.f32 %v7822_v36, %v4469_v3  ;;  %7827 = vrcp.f32 %v4319_v63  ;;  %v12278_v36 = vld [vmem:[#allocation99_spill] sm:$0xff]  ;;  %v12279_v3 = vld [vmem:[#allocation61_spill] sm:$0xff] }
 0x6dc   : > { %v11001_v24 = vunpack.c.l.b16 %v4639_v48  ;;  %5591 = vmatmul.bf16.gmra.mxu1 %v10975_v43 }
 0x6dd   : > { %v4541_v9 = vpop.f32.mrf.mxu2  ;;  %v4611_v25 = vpack.c.bf16 %v4579_v47, %v4579_v47  ;;  %5680 = vmatmul.bf16.gmra.mxu2 %v10979_v26 }
 0x6de   : > { %v4542_v14 = vadd.f32 %v4541_v9, %v4452_v20  ;;  %v4454_v30 = vpop.f32.mrf.mxu1  ;;  %v12281_v20 = vpack.c.b16 %v12279_v3, %v12280_v45 }
 0x6df   : > { %v11015_v9 = vunpack.c.l.b16 %v4611_v25 }
 0x6e0   : > { %v7826_v51 = vpop.eup %7825  ;;  %v4608_v37 = vmul.f32 %v7824_v42, %v4542_v14  ;;  %v11007_v27 = vpop.xlane.xlu1 %5414  ;;  %5447 = vadd.xlane.f32.xlu1 %v5446_v31  ;;  %5994 = vrot.lane.b32.xlu0 %v12281_v20, %s8141_s14  ;;  %v12284_v14 = vld [vmem:[#allocation110_spill] sm:$0xff] }
 0x6e1   : > { %v4578_v48 = vmul.f32 %v7826_v51, %v12278_v36  ;;  %v4289_v38 = vpop.xlane.xlu2 %4288  ;;  %12282 = vst [vmem:[#allocation142_spill] sm:$0xff] %v11015_v9  ;;  %v7828_v51 = vpop.eup %7827 }
 0x6e2   : > { %7829 = vrcp.f32 %v4289_v38  ;;  %3099 = vadd.xlane.f32.xlu2 %v12284_v14  ;;  %v4640_v41 = vpack.c.bf16 %v4608_v37, %v4608_v37 }
 0x6e3   : > { %v4610_v39 = vpack.c.bf16 %v4578_v48, %v4578_v48  ;;  %v4630_v48 = vpack.c.bf16 %v10917_v60, %v10917_v60 }
 0x6e5   : > { %v11017_v42 = vunpack.c.l.b16 %v4610_v39  ;;  %v4543_v47 = vpop.f32.mrf.mxu2  ;;  %v11033_v60 = vunpack.c.l.b16 %v4630_v48 }
 0x6e6   : > { %v4544_v63 = vadd.f32 %v4543_v47, %v4454_v30  ;;  %v5557_v31 = vpop.f32.mrf.mxu1 }
 0x6e7   : > { %12283 = vst [vmem:[#allocation145_spill] sm:$0xff] %v11017_v42  ;;  %v11029_v42 = vunpack.c.l.b16 %v4640_v41 }
 0x6e8   : > { %v7830_v33 = vpop.eup %7829  ;;  %v4609_v3 = vmul.f32 %v7828_v51, %v4544_v63  ;;  %v4989_v45 = vpop.xlane.xlu1 %4988  ;;  %12285 = vst [vmem:[#allocation38_spill] sm:$0xff] %v11033_v60 }
 0x6e9   : > { %v4599_v25 = vmul.f32 %v7830_v33, %v10840_v21  ;;  %v5062_v20 = vsub.f32 %v10711_v35, %v4989_v45  ;;  %v5063_v38 = vsub.f32 %v10718_v52, %v4989_v45  ;;  %v4986_v39 = vpop.xlane.xlu2 %4985  ;;  %v12286_v35 = vld [vmem:[#allocation111_spill] sm:$0xff] }
 0x6ea   : > { %v4641_v30 = vpack.c.bf16 %v4609_v3, %v4609_v3  ;;  %v5060_v14 = vsub.f32 %v10699_v11, %v4986_v39  ;;  %v5061_v47 = vsub.f32 %v10703_v22, %v4986_v39  ;;  %3102 = vadd.xlane.f32.xlu2 %v12286_v35  ;;  %v5057_v35 = vsub.f32 %v10665_v56, %v10983_v10 }
 0x6eb   : > { %v4631_v36 = vpack.c.bf16 %v4599_v25, %v4599_v25 }
 0x6ec   : > { %v11031_v37 = vunpack.c.l.b16 %v4641_v30  ;;  %v5104_v63 = vpack.c.bf16 %v5062_v20, %v5060_v14  ;;  %v5105_v51 = vpack.c.bf16 %v5063_v38, %v5061_v47  ;;  %5596 = vmatmul.bf16.gmra.mxu1 %v10967_v5  ;;  %v12287_v14 = vld [vmem:[#allocation118_spill] sm:$0xff] }
 0x6ed   : > { %v11035_v21 = vunpack.c.l.b16 %v4631_v36  ;;  %v5646_v52 = vpop.f32.mrf.mxu2  ;;  %5685 = vmatmul.bf16.gmra.mxu2 %v10971_v54 }
 0x6ee   : > { %v5156_v11 = vunpack.c.l.bf16 %v5104_v63  ;;  %v5157_v3 = vunpack.c.l.bf16 %v5105_v51  ;;  %v5158_v22 = vunpack.c.h.bf16 %v5104_v63  ;;  %v11040_v45 = vpop.f32.mrf.mxu1  ;;  %v5159_v41 = vunpack.c.h.bf16 %v5105_v51 }
 0x6ef   : > { %v5647_v25 = vadd.f32 %v5646_v52, %v5557_v31  ;;  %v5056_v51 = vsub.f32 %v10663_v62, %v10983_v10 }
 0x6f0   : > { %v5260_v48 = vmul.f32 1.442695, %v5156_v11  ;;  %v5262_v38 = vmul.f32 1.442695, %v5157_v3  ;;  %v5264_v36 = vmul.f32 1.442695, %v5158_v22 }
 0x6f1   : > { %v5266_v39 = vmul.f32 1.442695, %v5159_v41  ;;  %v5412_v30 = vpop.xlane.xlu2 %5411 }
 0x6f2   : > { %7831 = vpow2.f32 %v5260_v48  ;;  %4282 = vadd.xlane.f32.xlu2 %v12287_v14 }
 0x6f3   : > { %7833 = vpow2.f32 %v5262_v38 }
 0x6f4   : > { %7835 = vpow2.f32 %v5264_v36 }
 0x6f5   : > { %7837 = vpow2.f32 %v5266_v39  ;;  %v5648_v47 = vpop.f32.mrf.mxu2 }
 0x6f6   : > { %v5562_v31 = vpop.f32.mrf.mxu1  ;;  %v4983_v63 = vpop.xlane.xlu0 %4982  ;;  %7839 = vrcp.f32 %v5412_v30 }
 0x6f7   : > { %v5058_v5 = vsub.f32 %v10689_v4, %v4983_v63  ;;  %v5059_v54 = vsub.f32 %v10692_v28, %v4983_v63 }
 0x6f8   : > { %v7832_v52 = vpop.eup %7831 }
 0x6f9   : > { %v7834_v11 = vpop.eup %7833  ;;  %v5102_v3 = vpack.c.bf16 %v5058_v5, %v5056_v51  ;;  %v5103_v22 = vpack.c.bf16 %v5059_v54, %v5057_v35  ;;  %v5406_v41 = vpop.xlane.xlu2 %5405 }
 0x6fa   : > { %v7836_v48 = vpop.eup %7835  ;;  %7841 = vrcp.f32 %v5406_v41 }
 0x6fb   : > { %v7838_v38 = vpop.eup %7837  ;;  %v5152_v36 = vunpack.c.l.bf16 %v5102_v3  ;;  %v5153_v39 = vunpack.c.l.bf16 %v5103_v22  ;;  %v5154_v14 = vunpack.c.h.bf16 %v5102_v3  ;;  %v5155_v62 = vunpack.c.h.bf16 %v5103_v22 }
 0x6fc   : > { %v11053_v20 = vpack.c.bf16 %v7836_v48, %v7832_v52  ;;  %v11055_v56 = vpack.c.bf16 %v7838_v38, %v7834_v11  ;;  %7843 = vrcp.f32 %v11007_v27  ;;  %v7840_v3 = vpop.eup %7839 }
 0x6fd   : > { %v5252_v4 = vmul.f32 1.442695, %v5152_v36  ;;  %v5254_v28 = vmul.f32 1.442695, %v5153_v39  ;;  %v5256_v10 = vmul.f32 1.442695, %v5154_v14  ;;  %v5651_v30 = vpop.f32.mrf.mxu2  ;;  %v5367_v36 = vunpack.c.h.bf16 %v10946_v55  ;;  %v5418_v14 = vpop.xlane.xlu1 %5417 }
 0x6fe   : > { %v5258_v63 = vmul.f32 1.442695, %v5155_v62  ;;  %v5652_v51 = vadd.f32 %v5651_v30, %v5562_v31  ;;  %v5564_v35 = vpop.f32.mrf.mxu1  ;;  %v5380_v5 = vunpack.c.l.bf16 %v11053_v20  ;;  %v5381_v54 = vunpack.c.l.bf16 %v11055_v56  ;;  %v4992_v41 = vpop.xlane.xlu0 %4991 }
 0x6ff   : > { %7845 = vpow2.f32 %v5252_v4  ;;  %v5366_v31 = vunpack.c.h.bf16 %v10944_v0  ;;  %v5064_v55 = vsub.f32 %v10727_v34, %v4992_v41 }
 0x700   : > { %v7842_v52 = vpop.eup %7841  ;;  %7847 = vpow2.f32 %v5254_v28  ;;  %v5760_v11 = vmul.f32 %v7840_v3, %v5652_v51  ;;  %v5464_v22 = vadd.f32 %v5381_v54, %v5380_v5 }
 0x701   : > { %7849 = vpow2.f32 %v5256_v10  ;;  %v5758_v27 = vmul.f32 %v7842_v52, %v5647_v25  ;;  %v5409_v48 = vpop.xlane.xlu2 %5408  ;;  %v5443_v10 = vadd.f32 %v5367_v36, %v5366_v31 }
 0x702   : > { %7851 = vpow2.f32 %v5258_v63  ;;  %5465 = vadd.xlane.f32.xlu2 %v5464_v22  ;;  %v7844_v38 = vpop.eup %7843  ;;  %v5792_v5 = vpack.c.bf16 %v5760_v11, %v5760_v11  ;;  %v5649_v63 = vadd.f32 %v5648_v47, %v11040_v45  ;;  %v5065_v22 = vsub.f32 %v10734_v16, %v4992_v41  ;;  %v11079_v41 = vpop.f32.mrf.mxu0 }
 0x703   : > { %7853 = vrcp.f32 %v5409_v48  ;;  %v5790_v52 = vpack.c.bf16 %v5758_v27, %v5758_v27 }
 0x704   : > { %7855 = vrcp.f32 %v5418_v14  ;;  %v11074_v47 = vunpack.c.l.b16 %v5792_v5 }
 0x705   : > { %v7846_v39 = vpop.eup %7845  ;;  %v5653_v62 = vpop.f32.mrf.mxu2  ;;  %v11085_v14 = vunpack.c.l.b16 %v5790_v52 }
 0x706   : > { %v7848_v30 = vpop.eup %7847  ;;  %v5654_v4 = vadd.f32 %v5653_v62, %v5564_v35  ;;  %v5567_v33 = vpop.f32.mrf.mxu1  ;;  %12288 = vst [vmem:[#allocation153_spill] sm:$0xff] %v11074_v47 }
 0x707   : > { %v5421_v28 = vpop.xlane.xlu0 %5420  ;;  %v7850_v51 = vpop.eup %7849  ;;  %12290 = vst [vmem:[#allocation16_spill] sm:$0xff] %v11085_v14  ;;  %v12319_v14 = vld [vmem:[#allocation28_spill] sm:$0xff] }
 0x708   : > { %v7852_v25 = vpop.eup %7851  ;;  %v5761_v54 = vmul.f32 %v7844_v38, %v5654_v4  ;;  %v11063_v3 = vpack.c.bf16 %v7850_v51, %v7846_v39  ;;  %v11069_v62 = vpop.f32.mrf.mxu3  ;;  %7857 = vrcp.f32 %v5421_v28 }
 0x709   : > { %v7854_v0 = vpop.eup %7853  ;;  %v4995_v48 = vpop.xlane.xlu2 %4994  ;;  %v11067_v35 = vpack.c.bf16 %v7852_v25, %v7848_v30 }
 0x70a   : > { %v5759_v11 = vmul.f32 %v7854_v0, %v5649_v63  ;;  %v5793_v31 = vpack.c.bf16 %v5761_v54, %v5761_v54  ;;  %v5066_v36 = vsub.f32 %v10747_v19, %v4995_v48  ;;  %v5067_v45 = vsub.f32 %v10751_v49, %v4995_v48  ;;  %5601 = vmatmul.bf16.gmra.mxu1 %v11063_v3  ;;  %v7856_v51 = vpop.eup %7855 }
 0x70b   : > { %5444 = vadd.xlane.f32.xlu0 %v5443_v10  ;;  %5690 = vmatmul.bf16.gmra.mxu2 %v11067_v35  ;;  %v5376_v34 = vunpack.c.l.bf16 %v11063_v3  ;;  %v5377_v16 = vunpack.c.l.bf16 %v11067_v35  ;;  %v5017_v49 = vmax.f32 %v11069_v62, %v11079_v41 }
 0x70c   : > { %v5791_v27 = vpack.c.bf16 %v5759_v11, %v5759_v11  ;;  %v11081_v38 = vunpack.c.l.b16 %v5793_v31  ;;  %v5106_v39 = vpack.c.bf16 %v5066_v36, %v5064_v55  ;;  %v5107_v19 = vpack.c.bf16 %v5067_v45, %v5065_v22 }
 0x70d   : > { %v5656_v30 = vpop.f32.mrf.mxu2  ;;  %v5458_v4 = vadd.f32 %v5377_v16, %v5376_v34  ;;  %v5382_v11 = vunpack.c.h.bf16 %v11053_v20  ;;  %v5383_v36 = vunpack.c.h.bf16 %v11055_v56 }
 0x70e   : > { %12289 = vst [vmem:[#allocation31_spill] sm:$0xff] %v11081_v38  ;;  %v11087_v5 = vunpack.c.l.b16 %v5791_v27  ;;  %v5160_v25 = vunpack.c.l.bf16 %v5106_v39  ;;  %v5161_v63 = vunpack.c.l.bf16 %v5107_v19  ;;  %v5569_v54 = vpop.f32.mrf.mxu1  ;;  %v5162_v48 = vunpack.c.h.bf16 %v5106_v39  ;;  %v4998_v39 = vpop.xlane.xlu1 %4997 }
 0x70f   : > { %v5424_v0 = vpop.xlane.xlu0 %5423  ;;  %v5163_v55 = vunpack.c.h.bf16 %v5107_v19  ;;  %v5657_v22 = vadd.f32 %v5656_v30, %v5567_v33  ;;  %5459 = vadd.xlane.f32.xlu1 %v5458_v4  ;;  %v5370_v19 = vunpack.c.h.bf16 %v10975_v43  ;;  %v5371_v30 = vunpack.c.h.bf16 %v10979_v26  ;;  %v7858_v28 = vpop.eup %7857 }
 0x710   : > { %12291 = vst [vmem:[#allocation98_spill] sm:$0xff] %v11087_v5  ;;  %v5268_v52 = vmul.f32 1.442695, %v5160_v25  ;;  %v5270_v31 = vmul.f32 1.442695, %v5161_v63  ;;  %v5467_v4 = vadd.f32 %v5383_v36, %v5382_v11 }
 0x711   : > { %v5272_v34 = vmul.f32 1.442695, %v5162_v48  ;;  %v5274_v16 = vmul.f32 1.442695, %v5163_v55  ;;  %v5762_v27 = vmul.f32 %v7856_v51, %v5657_v22  ;;  %v5427_v10 = vpop.xlane.xlu2 %5426  ;;  %v5068_v48 = vsub.f32 %v10765_v57, %v4998_v39 }
 0x712   : > { %7859 = vpow2.f32 %v5268_v52  ;;  %v5069_v51 = vsub.f32 %v10768_v58, %v4998_v39 }
 0x713   : > { %7861 = vpow2.f32 %v5270_v31  ;;  %5018 = vmax.xlane.f32.xlu0 %v5017_v49  ;;  %v5794_v52 = vpack.c.bf16 %v5762_v27, %v5762_v27 }
 0x714   : > { %7863 = vpow2.f32 %v5272_v34  ;;  %v5449_v34 = vadd.f32 %v5371_v30, %v5370_v19 }
 0x715   : > { %7865 = vpow2.f32 %v5274_v16  ;;  %v5658_v33 = vpop.f32.mrf.mxu2 }
 0x716   : > { %v5659_v25 = vadd.f32 %v5658_v33, %v5569_v54  ;;  %v5572_v63 = vpop.f32.mrf.mxu1  ;;  %7867 = vrcp.f32 %v5424_v0 }
 0x717   : > { %v5001_v45 = vpop.xlane.xlu0 %5000  ;;  %5468 = vadd.xlane.f32.xlu1 %v5467_v4  ;;  %7869 = vrcp.f32 %v5427_v10 }
 0x718   : > { %v5070_v49 = vsub.f32 %v10779_v29, %v5001_v45  ;;  %v5071_v55 = vsub.f32 %v10783_v2, %v5001_v45  ;;  %v7860_v22 = vpop.eup %7859  ;;  %v5763_v31 = vmul.f32 %v7858_v28, %v5659_v25  ;;  %v11105_v45 = vunpack.c.l.b16 %v5794_v52 }
 0x719   : > { %v7862_v43 = vpop.eup %7861  ;;  %v11101_v54 = vpop.xlane.xlu2 %5003 }
 0x71a   : > { %v5108_v26 = vpack.c.bf16 %v5070_v49, %v5068_v48  ;;  %v5109_v11 = vpack.c.bf16 %v5071_v55, %v5069_v51  ;;  %v7864_v36 = vpop.eup %7863  ;;  %v5795_v16 = vpack.c.bf16 %v5763_v31, %v5763_v31  ;;  %5606 = vmatmul.bf16.gmra.mxu1 %v11053_v20  ;;  %v12292_v31 = vld [vmem:[#allocation131_spill] sm:$0xff] }
 0x71b   : > { %v7866_v57 = vpop.eup %7865  ;;  %5450 = vadd.xlane.f32.xlu0 %v5449_v34  ;;  %5695 = vmatmul.bf16.gmra.mxu2 %v11055_v56  ;;  %v5330_v33 = vpack.c.bf16 %v7864_v36, %v7860_v22 }
 0x71c   : > { %v5164_v58 = vunpack.c.l.bf16 %v5108_v26  ;;  %v5165_v29 = vunpack.c.l.bf16 %v5109_v11  ;;  %v5166_v39 = vunpack.c.h.bf16 %v5108_v26  ;;  %v5167_v2 = vunpack.c.h.bf16 %v5109_v11  ;;  %v7868_v49 = vpop.eup %7867 }
 0x71d   : > { %v11107_v27 = vunpack.c.l.b16 %v5795_v16  ;;  %v5661_v0 = vpop.f32.mrf.mxu2  ;;  %v5331_v28 = vpack.c.bf16 %v7866_v57, %v7862_v43  ;;  %v5386_v56 = vunpack.c.h.bf16 %v5330_v33  ;;  %v7870_v34 = vpop.eup %7869  ;;  %v5384_v36 = vunpack.c.l.bf16 %v5330_v33 }
 0x71e   : > { %v5276_v19 = vmul.f32 1.442695, %v5164_v58  ;;  %v5278_v30 = vmul.f32 1.442695, %v5165_v29  ;;  %v5280_v4 = vmul.f32 1.442695, %v5166_v39  ;;  %v5662_v48 = vadd.f32 %v5661_v0, %v5572_v63  ;;  %v5574_v51 = vpop.f32.mrf.mxu1 }
 0x71f   : > { %v5282_v25 = vmul.f32 1.442695, %v5167_v2  ;;  %v5387_v22 = vunpack.c.h.bf16 %v5331_v28  ;;  %v5385_v16 = vunpack.c.l.bf16 %v5331_v28  ;;  %v5430_v63 = vpop.xlane.xlu0 %5429 }
 0x720   : > { %7871 = vpow2.f32 %v5276_v19  ;;  %v5764_v55 = vmul.f32 %v7868_v49, %v5662_v48  ;;  %v5378_v19 = vunpack.c.h.bf16 %v11063_v3 }
 0x721   : > { %7873 = vpow2.f32 %v5278_v30  ;;  %v5433_v52 = vpop.xlane.xlu2 %5432  ;;  %v5473_v10 = vadd.f32 %v5387_v22, %v5386_v56  ;;  %v5379_v30 = vunpack.c.h.bf16 %v11067_v35  ;;  %v5072_v35 = vsub.f32 %v10792_v8, %v11101_v54 }
 0x722   : > { %7875 = vpow2.f32 %v5280_v4  ;;  %v5796_v39 = vpack.c.bf16 %v5764_v55, %v5764_v55  ;;  %v5470_v4 = vadd.f32 %v5385_v16, %v5384_v36 }
 0x723   : > { %7877 = vpow2.f32 %v5282_v25  ;;  %4279 = vadd.xlane.f32.xlu0 %v12292_v31  ;;  %5474 = vadd.xlane.f32.xlu2 %v5473_v10  ;;  %v5461_v3 = vadd.f32 %v5379_v30, %v5378_v19  ;;  %v5073_v31 = vsub.f32 %v10796_v44, %v11101_v54  ;;  %v12293_v44 = vld [vmem:[#allocation58_spill] sm:$0xff]  ;;  %v12294_v54 = vld [vmem:[#allocation27_spill] sm:$0xff]  ;;  %v12297_v30 = vld [vmem:[#allocation69_spill] sm:$0xff] }
 0x724   : > { %7879 = vrcp.f32 %v5430_v63  ;;  %v11118_v55 = vunpack.c.l.b16 %v5796_v39 }
 0x725   : > { %v5663_v11 = vpop.f32.mrf.mxu2 }
 0x726   : > { %v7872_v26 = vpop.eup %7871  ;;  %v5664_v57 = vadd.f32 %v5663_v11, %v5574_v51  ;;  %v5577_v0 = vpop.f32.mrf.mxu1 }
 0x727   : > { %v7874_v43 = vpop.eup %7873  ;;  %v5007_v51 = vpop.xlane.xlu1 %5006 }
 0x728   : > { %v7876_v58 = vpop.eup %7875  ;;  %v5765_v2 = vmul.f32 %v7870_v34, %v5664_v57  ;;  %v5074_v36 = vsub.f32 %v10814_v7, %v5007_v51  ;;  %v5010_v8 = vpop.xlane.xlu0 %5009  ;;  %v12295_v57 = vpack.c.b16 %v12293_v44, %v12294_v54 }
 0x729   : > { %v7878_v29 = vpop.eup %7877  ;;  %v1842_v25 = vpop.xlane.xlu2 %1841  ;;  %v11114_v49 = vpack.c.bf16 %v7876_v58, %v7872_v26 }
 0x72a   : > { %v5797_v48 = vpack.c.bf16 %v5765_v2, %v5765_v2  ;;  %7881 = vrcp.f32 %v1842_v25  ;;  %5611 = vmatmul.bf16.gmra.mxu1 %v5330_v33  ;;  %v11116_v56 = vpack.c.bf16 %v7878_v29, %v7874_v43  ;;  %v7880_v11 = vpop.eup %7879  ;;  %v5075_v43 = vsub.f32 %v10821_v53, %v5007_v51  ;;  %v12296_v29 = vld [vmem:[#allocation83_spill] sm:$0xff] }
 0x72b   : > { %5471 = vadd.xlane.f32.xlu0 %v5470_v4  ;;  %5700 = vmatmul.bf16.gmra.mxu2 %v5331_v28  ;;  %v5388_v28 = vunpack.c.l.bf16 %v11114_v49  ;;  %v5110_v58 = vpack.c.bf16 %v5074_v36, %v5072_v35  ;;  %7883 = vrcp.f32 %v5433_v52 }
 0x72c   : > { %v11120_v22 = vunpack.c.l.b16 %v5797_v48  ;;  %5462 = vadd.xlane.f32.xlu2 %v5461_v3  ;;  %v5389_v26 = vunpack.c.l.bf16 %v11116_v56  ;;  %v5111_v2 = vpack.c.bf16 %v5075_v43, %v5073_v31  ;;  %v12300_v43 = vld [vmem:[#allocation33_spill] sm:$0xff] }
 0x72d   : > { %v5666_v34 = vpop.f32.mrf.mxu2  ;;  %v5168_v4 = vunpack.c.l.bf16 %v5110_v58  ;;  %v5170_v51 = vunpack.c.h.bf16 %v5110_v58 }
 0x72e   : > { %v5667_v10 = vadd.f32 %v5666_v34, %v5577_v0  ;;  %v5476_v19 = vadd.f32 %v5389_v26, %v5388_v28  ;;  %v5579_v7 = vpop.f32.mrf.mxu1  ;;  %v5169_v53 = vunpack.c.l.bf16 %v5111_v2  ;;  %v5171_v3 = vunpack.c.h.bf16 %v5111_v2  ;;  %v12298_v26 = vld [vmem:[#allocation9_spill] sm:$0xff] }
 0x72f   : > { %7885 = vrcp.f32 %v12298_v26  ;;  %v5288_v36 = vmul.f32 1.442695, %v5170_v51  ;;  %v5076_v2 = vsub.f32 %v10877_v17, %v5010_v8 }
 0x730   : > { %v7882_v16 = vpop.eup %7881  ;;  %v5766_v63 = vmul.f32 %v7880_v11, %v5667_v10  ;;  %5992 = vrot.lane.b32.xlu1 %v12295_v57, %s8141_s14  ;;  %v5284_v11 = vmul.f32 1.442695, %v5168_v4  ;;  %v5286_v31 = vmul.f32 1.442695, %v5169_v53  ;;  %7887 = vrcp.f32 %v12300_v43 }
 0x731   : > { %v11137_v39 = vmul.f32 %v7882_v16, %v12296_v29  ;;  %v7884_v48 = vpop.eup %7883  ;;  %v12299_v16 = vld [vmem:[#allocation70_spill] sm:$0xff]  ;;  %v12301_v29 = vld [vmem:[#allocation20_spill] sm:$0xff]  ;;  %v5077_v4 = vsub.f32 %v10883_v23, %v5010_v8 }
 0x732   : > { %v5798_v34 = vpack.c.bf16 %v5766_v63, %v5766_v63  ;;  %v5290_v63 = vmul.f32 1.442695, %v5171_v3  ;;  %7889 = vpow2.f32 %v5284_v11  ;;  %v12303_v11 = vld [vmem:[#allocation94_spill] sm:$0xff] }
 0x733   : > { %1835 = vadd.xlane.f32.xlu0 %v12297_v30  ;;  %7891 = vpow2.f32 %v5286_v31  ;;  %v12304_v31 = vld [vmem:[#allocation13_spill] sm:$0xff] }
 0x734   : > { %5477 = vadd.xlane.f32.xlu2 %v5476_v19  ;;  %v11149_v44 = vunpack.c.l.b16 %v5798_v34  ;;  %7893 = vpow2.f32 %v5288_v36  ;;  %v12302_v34 = vld [vmem:[#allocation47_spill] sm:$0xff]  ;;  %v2139_v17 = vadd.f32 %v12304_v31, %v12303_v11 }
 0x735   : > { %v5668_v0 = vpop.f32.mrf.mxu2  ;;  %v11140_v10 = vpop.xlane.xlu0 %5435  ;;  %7895 = vpow2.f32 %v5290_v63  ;;  %v12305_v63 = vld [vmem:[#allocation100_spill] sm:$0xff] }
 0x736   : > { %v5669_v25 = vadd.f32 %v5668_v0, %v5579_v7  ;;  %v11142_v52 = vpop.xlane.xlu2 %5438  ;;  %v7886_v7 = vpop.eup %7885 }
 0x738   : > { %v5767_v35 = vmul.f32 %v7884_v48, %v5669_v25  ;;  %v7888_v25 = vpop.eup %7887 }
 0x739   : > { %v11153_v57 = vpop.f32.mrf.mxu1  ;;  %v7890_v48 = vpop.eup %7889  ;;  %v2231_v43 = vmul.f32 %v7888_v25, %v2139_v17 }
 0x73a   : > { %v5799_v28 = vpack.c.bf16 %v5767_v35, %v5767_v35  ;;  %5616 = vmatmul.bf16.gmra.mxu1 %v11114_v49  ;;  %v7892_v35 = vpop.eup %7891 }
 0x73b   : > { %1838 = vadd.xlane.f32.xlu0 %v12299_v16  ;;  %5705 = vmatmul.bf16.gmra.mxu2 %v11116_v56  ;;  %v7894_v26 = vpop.eup %7893  ;;  %v2263_v25 = vpack.c.bf16 %v2231_v43, %v2231_v43 }
 0x73c   : > { %v11151_v54 = vunpack.c.l.b16 %v5799_v28  ;;  %3093 = vadd.xlane.f32.xlu2 %v12301_v29  ;;  %v11174_v20 = vpack.c.bf16 %v7894_v26, %v7890_v48 }
 0x73d   : > { %v1902_v19 = vpop.xlane.xlu0 %1901  ;;  %v5867_v26 = vunpack.c.l.b16 %v2263_v25 }
 0x73e   : > { %v5013_v30 = vpop.xlane.xlu2 %5012  ;;  %7897 = vrcp.f32 %v1902_v19  ;;  %v5394_v48 = vunpack.c.h.bf16 %v11174_v20 }
 0x73f   : > { %v5078_v0 = vsub.f32 %v10919_v50, %v5013_v30  ;;  %v5079_v53 = vsub.f32 %v10925_v15, %v5013_v30  ;;  %v7896_v15 = vpop.eup %7895 }
 0x740   : > { %v11165_v28 = vpop.f32.mrf.mxu2 }
 0x741   : > { %v5112_v51 = vpack.c.bf16 %v5078_v0, %v5076_v2  ;;  %v5113_v3 = vpack.c.bf16 %v5079_v53, %v5077_v4  ;;  %v11167_v50 = vpop.f32.mrf.mxu1  ;;  %v12306_v4 = vld [vmem:[#allocation93_spill] sm:$0xff]  ;;  %v12307_v53 = vld [vmem:[#allocation106_spill] sm:$0xff] }
 0x742   : > { %v2230_v0 = vmul.f32 %v7886_v7, %v12306_v4  ;;  %v12311_v4 = vld [vmem:[#allocation129_spill] sm:$0xff] }
 0x743   : > { %1895 = vadd.xlane.f32.xlu0 %v12302_v34  ;;  %v5172_v36 = vunpack.c.l.bf16 %v5112_v51  ;;  %v5173_v23 = vunpack.c.l.bf16 %v5113_v3  ;;  %v5174_v8 = vunpack.c.h.bf16 %v5112_v51  ;;  %v5175_v16 = vunpack.c.h.bf16 %v5113_v3  ;;  %v12308_v3 = vld [vmem:[#allocation91_spill] sm:$0xff] }
 0x744   : > { %3096 = vadd.xlane.f32.xlu2 %v12305_v63  ;;  %v7898_v29 = vpop.eup %7897  ;;  %v11176_v51 = vpack.c.bf16 %v7896_v15, %v7892_v35  ;;  %v2262_v17 = vpack.c.bf16 %v2230_v0, %v2230_v0 }
 0x745   : > { %v5292_v2 = vmul.f32 1.442695, %v5172_v36  ;;  %v5294_v19 = vmul.f32 1.442695, %v5173_v23  ;;  %v5296_v30 = vmul.f32 1.442695, %v5174_v8  ;;  %v11172_v34 = vmul.f32 %v7898_v29, %v12307_v53 }
 0x746   : > { %v5298_v11 = vmul.f32 1.442695, %v5175_v16  ;;  %v1845_v31 = vpop.xlane.xlu2 %1844  ;;  %v5395_v35 = vunpack.c.h.bf16 %v11176_v51  ;;  %v5866_v15 = vunpack.c.l.b16 %v2262_v17  ;;  %v5391_v17 = vunpack.c.h.bf16 %v11116_v56 }
 0x747   : > { %7899 = vpow2.f32 %v5292_v2  ;;  %v12309_v2 = vld [vmem:[#allocation84_spill] sm:$0xff] }
 0x748   : > { %7901 = vpow2.f32 %v5294_v19  ;;  %v11181_v7 = vpop.f32.mrf.mxu2  ;;  %v5485_v63 = vadd.f32 %v5395_v35, %v5394_v48  ;;  %v12310_v19 = vld [vmem:[#allocation86_spill] sm:$0xff]  ;;  %v5892_v0 = vpack.c.b16 %v5867_v26, %v5866_v15  ;;  %v12312_v35 = vld [vmem:[#allocation97_spill] sm:$0xff] }
 0x749   : > { %7903 = vpow2.f32 %v5296_v30  ;;  %v11183_v36 = vpop.f32.mrf.mxu1  ;;  %v2129_v30 = vadd.f32 %v12310_v19, %v12309_v2  ;;  %v12314_v15 = vld [vmem:[#allocation137_spill] sm:$0xff]  ;;  %v6107_v19 = vpop.permute.xlu1 %6106 }
 0x74a   : > { %5621 = vmatmul.bf16.gmra.mxu1 %v11174_v20  ;;  %7905 = vpow2.f32 %v5298_v11 }
 0x74b   : > { %1898 = vadd.xlane.f32.xlu0 %v12308_v3  ;;  %5710 = vmatmul.bf16.gmra.mxu2 %v11176_v51  ;;  %7907 = vrcp.f32 %v1845_v31  ;;  %v2258_v31 = vpack.c.bf16 %v11137_v39, %v11137_v39  ;;  %v5390_v3 = vunpack.c.h.bf16 %v11114_v49 }
 0x74d   : > { %v7900_v23 = vpop.eup %7899 }
 0x74e   : > { %v7902_v8 = vpop.eup %7901  ;;  %v1905_v16 = vpop.xlane.xlu2 %1904 }
 0x74f   : > { %v7904_v43 = vpop.eup %7903  ;;  %7909 = vrcp.f32 %v1905_v16 }
 0x750   : > { %v7906_v29 = vpop.eup %7905  ;;  %7911 = vrcp.f32 %v12311_v4  ;;  %v11190_v53 = vpack.c.bf16 %v7904_v43, %v7900_v23  ;;  %v11200_v26 = vpop.f32.mrf.mxu2  ;;  %v12313_v23 = vld [vmem:[#allocation136_spill] sm:$0xff]  ;;  %v11211_v4 = vunpack.c.l.b16 %v2258_v31 }
 0x751   : > { %v7908_v11 = vpop.eup %7907  ;;  %v11196_v48 = vpack.c.bf16 %v7906_v29, %v7902_v8  ;;  %7913 = vrcp.f32 %v12312_v35  ;;  %v3364_v43 = vadd.f32 %v12314_v15, %v12313_v23  ;;  %v11204_v39 = vpop.f32.mrf.mxu1 }
 0x752   : > { %v5995_v25 = vpop.permute.xlu0 %5994  ;;  %v2227_v16 = vmul.f32 %v7908_v11, %v2129_v30  ;;  %v5479_v30 = vadd.f32 %v5391_v17, %v5390_v3  ;;  %v2278_v11 = vpack.c.bf16 %v11172_v34, %v11172_v34  ;;  %v12316_v3 = vld [vmem:[#allocation135_spill] sm:$0xff] }
 0x753   : > { %5486 = vadd.xlane.f32.xlu0 %v5485_v63  ;;  %v6258_v2 = vsel %vm1109_vm2, %v5892_v0, %v5995_v25  ;;  %v5396_v63 = vunpack.c.l.bf16 %v11190_v53  ;;  %v5397_v56 = vunpack.c.l.bf16 %v11196_v48  ;;  %v12315_v25 = vld [vmem:[#allocation95_spill] sm:$0xff] }
 0x754   : > { %v2259_v49 = vpack.c.bf16 %v2227_v16, %v2227_v16  ;;  %v11209_v8 = vsel %vm6286_vm3, %v6258_v2, %v6107_v19  ;;  %v5392_v19 = vunpack.c.l.bf16 %v11174_v20 }
 0x755   : > { %v7910_v29 = vpop.eup %7909  ;;  %v11216_v15 = vadd.f32 %v5397_v56, %v5396_v63  ;;  %v5393_v63 = vunpack.c.l.bf16 %v11176_v51 }
 0x756   : > { %v7912_v0 = vpop.eup %7911  ;;  %v2247_v35 = vmul.f32 %v7910_v29, %v12315_v25  ;;  %v3100_v23 = vpop.xlane.xlu2 %3099  ;;  %v11218_v33 = vunpack.c.l.b16 %v2259_v49  ;;  %v11227_v49 = vunpack.c.l.b16 %v2278_v11 }
 0x757   : > { %v3429_v16 = vmul.f32 %v7912_v0, %v3364_v43  ;;  %7915 = vrcp.f32 %v3100_v23  ;;  %v7914_v58 = vpop.eup %7913 }
 0x758   : > { %v2279_v2 = vpack.c.bf16 %v2247_v35, %v2247_v35  ;;  %v3428_v17 = vmul.f32 %v7914_v58, %v12316_v3  ;;  %v5678_v34 = vpop.f32.mrf.mxu2  ;;  %v12317_v58 = vld [vmem:[#allocation123_spill] sm:$0xff]  ;;  %v5482_v3 = vadd.f32 %v5393_v63, %v5392_v19  ;;  %v12321_v19 = vld [vmem:[#allocation172_spill] sm:$0xff]  ;;  %v12322_v63 = vld [vmem:[#allocation113_spill] sm:$0xff] }
 0x759   : > { %v3461_v56 = vpack.c.bf16 %v3429_v16, %v3429_v16  ;;  %v11231_v29 = vpop.f32.mrf.mxu1 }
 0x75a   : > { %5480 = vadd.xlane.f32.xlu1 %v5479_v30  ;;  %5626 = vmatmul.bf16.gmra.mxu1 %v11190_v53  ;;  %v11229_v43 = vunpack.c.l.b16 %v2279_v2  ;;  %v3460_v25 = vpack.c.bf16 %v3428_v17, %v3428_v17  ;;  %v12318_v2 = vld [vmem:[#allocation169_spill] sm:$0xff] }
 0x75b   : > { %5715 = vmatmul.bf16.gmra.mxu2 %v11196_v48  ;;  %v5965_v31 = vunpack.c.l.b16 %v3461_v56  ;;  %v12320_v17 = vld [vmem:[#allocation101_spill] sm:$0xff]  ;;  %v4494_v56 = vadd.f32 %v12322_v63, %v12321_v19 }
 0x75c   : > { %v5964_v20 = vunpack.c.l.b16 %v3460_v25  ;;  %v5016_v25 = vpop.xlane.xlu1 %5015 }
 0x75d   : > { %v7916_v0 = vpop.eup %7915 }
 0x75e   : > { %v3416_v35 = vmul.f32 %v7916_v0, %v12317_v58  ;;  %v3103_v23 = vpop.xlane.xlu2 %3102  ;;  %v5981_v11 = vpack.c.b16 %v5965_v31, %v5964_v20 }
 0x75f   : > { %7917 = vrcp.f32 %v3103_v23 }
 0x760   : > { %v11236_v51 = vpop.f32.mrf.mxu2  ;;  %7919 = vrcp.f32 %v12318_v2  ;;  %v3448_v30 = vpack.c.bf16 %v3416_v35, %v3416_v35  ;;  %v12324_v35 = vld [vmem:[#allocation171_spill] sm:$0xff] }
 0x761   : > { %7921 = vrcp.f32 %v12319_v14  ;;  %v11242_v0 = vpop.f32.mrf.mxu1 }
 0x762   : > { %5483 = vadd.xlane.f32.xlu1 %v5482_v3  ;;  %v11246_v3 = vunpack.c.l.b16 %v3448_v30 }
 0x764   : > { %12323 = vst [vmem:[#allocation160_spill] sm:$0xff] %v11246_v3  ;;  %v5442_v63 = vpop.xlane.xlu1 %5441 }
 0x765   : > { %v7918_v16 = vpop.eup %7917  ;;  %7923 = vrcp.f32 %v5442_v63  ;;  %v5081_v63 = vsub.f32 %v10951_v61, %v5016_v25  ;;  %v5399_v61 = vunpack.c.h.bf16 %v11196_v48 }
 0x766   : > { %v3417_v5 = vmul.f32 %v7918_v16, %v12320_v17  ;;  %v7920_v23 = vpop.eup %7919 }
 0x767   : > { %6012 = vrot.lane.b32.xlu0 %v5981_v11, %s8141_s14  ;;  %v4589_v11 = vmul.f32 %v7920_v23, %v4494_v56  ;;  %v7922_v2 = vpop.eup %7921 }
 0x768   : > { %v3449_v58 = vpack.c.bf16 %v3417_v5, %v3417_v5  ;;  %v11250_v20 = vpop.f32.mrf.mxu2  ;;  %v4588_v16 = vmul.f32 %v7922_v2, %v12324_v35 }
 0x769   : > { %v4621_v17 = vpack.c.bf16 %v4589_v11, %v4589_v11  ;;  %v5597_v9 = vpop.f32.mrf.mxu1  ;;  %v5677_v11 = vadd.f32 %v11200_v26, %v11183_v36  ;;  %v4283_v26 = vpop.xlane.xlu2 %4282 }
 0x76a   : > { %v11248_v31 = vunpack.c.l.b16 %v3449_v58  ;;  %v4620_v47 = vpack.c.bf16 %v4588_v16, %v4588_v16 }
 0x76b   : > { %v6057_v5 = vunpack.c.l.b16 %v4621_v17  ;;  %v7924_v3 = vpop.eup %7923 }
 0x76c   : > { %v6056_v30 = vunpack.c.l.b16 %v4620_v47  ;;  %v11260_v2 = vpop.xlane.xlu1 %5447  ;;  %v5770_v35 = vmul.f32 %v7924_v3, %v5677_v11  ;;  %v5398_v3 = vunpack.c.h.bf16 %v11190_v53 }
 0x76e   : > { %v6083_v58 = vpack.c.b16 %v6057_v5, %v6056_v30  ;;  %v5802_v16 = vpack.c.bf16 %v5770_v35, %v5770_v35  ;;  %v5080_v5 = vsub.f32 %v10941_v13, %v5016_v25  ;;  %v12325_v35 = vld [vmem:[#allocation52_spill] sm:$0xff] }
 0x770   : > { %v5686_v19 = vpop.f32.mrf.mxu2 }
 0x771   : > { %v11255_v38 = vadd.f32 %v5686_v19, %v5597_v9  ;;  %v5599_v56 = vpop.f32.mrf.mxu1  ;;  %v5679_v9 = vadd.f32 %v5678_v34, %v11204_v39 }
 0x778   : > { %v5688_v23 = vpop.f32.mrf.mxu2 }
 0x779   : > { %v11258_v60 = vadd.f32 %v5688_v23, %v5599_v56  ;;  %v6170_v23 = vunpack.c.l.b16 %v5802_v16 }
 0x77b   : > { %6104 = vrot.lane.b32.xlu1 %v6083_v58, %s8140_s13 }
 0x77e   : > { %v5445_v14 = vpop.xlane.xlu0 %5444 }
 0x77f   : > { %7925 = vrcp.f32 %v5445_v14 }
 0x780   : > { %7927 = vrcp.f32 %v11140_v10  ;;  %v5674_v10 = vadd.f32 %v11181_v7, %v11167_v50  ;;  %v5491_v50 = vadd.f32 %v5399_v61, %v5398_v3 }
 0x781   : > { %7929 = vrcp.f32 %v11142_v52 }
 0x782   : > { %v5460_v56 = vpop.xlane.xlu1 %5459 }
 0x783   : > { %7931 = vrcp.f32 %v5460_v56 }
 0x784   : > { %7933 = vrcp.f32 %v12325_v35 }
 0x785   : > { %v7926_v47 = vpop.eup %7925 }
 0x786   : > { %v5771_v17 = vmul.f32 %v7926_v47, %v5679_v9  ;;  %v5019_v19 = vpop.xlane.xlu0 %5018  ;;  %v12326_v9 = vld [vmem:[#allocation56_spill] sm:$0xff]  ;;  %v7928_v16 = vpop.eup %7927 }
 0x787   : > { %v5082_v30 = vsub.f32 %v11069_v62, %v5019_v19  ;;  %v5083_v58 = vsub.f32 %v11079_v41, %v5019_v19  ;;  %v5602_v14 = vpop.f32.mrf.mxu1  ;;  %7935 = vrcp.f32 %v12326_v9  ;;  %v5672_v19 = vadd.f32 %v11165_v28, %v11153_v57 }
 0x788   : > { %v5803_v36 = vpack.c.bf16 %v5771_v17, %v5771_v17  ;;  %7937 = vrcp.f32 %v4283_v26 }
 0x789   : > { %v5114_v39 = vpack.c.bf16 %v5082_v30, %v5080_v5  ;;  %v5115_v34 = vpack.c.bf16 %v5083_v58, %v5081_v63  ;;  %v7930_v30 = vpop.eup %7929  ;;  %v5768_v28 = vmul.f32 %v7928_v16, %v5672_v19 }
 0x78a   : > { %v6171_v13 = vunpack.c.l.b16 %v5803_v36  ;;  %v7932_v56 = vpop.eup %7931  ;;  %v5769_v36 = vmul.f32 %v7930_v30, %v5674_v10 }
 0x78b   : > { %v5176_v62 = vunpack.c.l.bf16 %v5114_v39  ;;  %v5177_v25 = vunpack.c.l.bf16 %v5115_v34  ;;  %v5178_v41 = vunpack.c.h.bf16 %v5114_v39  ;;  %v5179_v11 = vunpack.c.h.bf16 %v5115_v34  ;;  %v5466_v39 = vpop.xlane.xlu2 %5465  ;;  %v7934_v57 = vpop.eup %7933 }
 0x78c   : > { %v6196_v52 = vpack.c.b16 %v6171_v13, %v6170_v23  ;;  %v5801_v13 = vpack.c.bf16 %v5769_v36, %v5769_v36  ;;  %v5800_v35 = vpack.c.bf16 %v5768_v28, %v5768_v28 }
 0x78d   : > { %v5300_v47 = vmul.f32 1.442695, %v5176_v62  ;;  %v5302_v17 = vmul.f32 1.442695, %v5177_v25  ;;  %v5304_v53 = vmul.f32 1.442695, %v5178_v41  ;;  %v7936_v26 = vpop.eup %7935 }
 0x78e   : > { %v5306_v48 = vmul.f32 1.442695, %v5179_v11  ;;  %v11279_v5 = vpop.xlane.xlu0 %5450  ;;  %6218 = vrot.lane.b32.xlu2 %v6196_v52, %s8139_s12  ;;  %v5691_v63 = vpop.f32.mrf.mxu2  ;;  %v12327_v25 = vld [vmem:[#allocation90_spill] sm:$0xff]  ;;  %v12328_v41 = vld [vmem:[#allocation92_spill] sm:$0xff]  ;;  %v12330_v52 = vpack.c.b16 %v11031_v37, %v11029_v42  ;;  %v6168_v28 = vunpack.c.l.b16 %v5800_v35 }
 0x78f   : > { %7939 = vpow2.f32 %v5300_v47  ;;  %v5692_v7 = vadd.f32 %v5691_v63, %v5602_v14  ;;  %v5604_v58 = vpop.f32.mrf.mxu1  ;;  %v7938_v23 = vpop.eup %7937  ;;  %v2134_v3 = vadd.f32 %v12328_v41, %v12327_v25  ;;  %v12329_v14 = vld [vmem:[#allocation89_spill] sm:$0xff]  ;;  %v12332_v63 = vld [vmem:[#allocation64_spill] sm:$0xff] }
 0x790   : > { %7941 = vpow2.f32 %v5302_v17  ;;  %v2228_v61 = vmul.f32 %v7934_v57, %v12329_v14  ;;  %v5469_v42 = vpop.xlane.xlu1 %5468 }
 0x791   : > { %7943 = vpow2.f32 %v5304_v53  ;;  %5492 = vadd.xlane.f32.xlu0 %v5491_v50  ;;  %v11282_v34 = vmul.f32 %v7932_v56, %v5692_v7  ;;  %v2229_v17 = vmul.f32 %v7936_v26, %v2134_v3  ;;  %v6169_v50 = vunpack.c.l.b16 %v5801_v13  ;;  %v12333_v13 = vld [vmem:[#allocation53_spill] sm:$0xff] }
 0x792   : > { %7945 = vpow2.f32 %v5306_v48  ;;  %v12331_v48 = vld [vmem:[#allocation57_spill] sm:$0xff]  ;;  %v2260_v57 = vpack.c.bf16 %v2228_v61, %v2228_v61 }
 0x793   : > { %v4514_v30 = vadd.f32 %v12332_v63, %v12331_v48  ;;  %v6195_v41 = vpack.c.b16 %v6169_v50, %v6168_v28 }
 0x795   : > { %v7940_v62 = vpop.eup %7939  ;;  %v4597_v25 = vmul.f32 %v7938_v23, %v4514_v30 }
 0x796   : > { %v7942_v11 = vpop.eup %7941  ;;  %v4280_v10 = vpop.xlane.xlu0 %4279  ;;  %6124 = vrot.lane.b32.xlu2 %v12330_v52, %s8140_s13 }
 0x797   : > { %v5693_v9 = vpop.f32.mrf.mxu2  ;;  %v7944_v47 = vpop.eup %7943  ;;  %7947 = vrcp.f32 %v4280_v10  ;;  %v5864_v10 = vunpack.c.l.b16 %v2260_v57  ;;  %v4629_v52 = vpack.c.bf16 %v4597_v25, %v4597_v25 }
 0x798   : > { %v5694_v53 = vadd.f32 %v5693_v9, %v5604_v58  ;;  %v5607_v16 = vpop.f32.mrf.mxu1  ;;  %v7946_v19 = vpop.eup %7945  ;;  %v5338_v7 = vpack.c.bf16 %v7944_v47, %v7940_v62  ;;  %7949 = vrcp.f32 %v5466_v39  ;;  %v2261_v58 = vpack.c.bf16 %v2229_v17, %v2229_v17 }
 0x799   : > { %v5339_v56 = vpack.c.bf16 %v7946_v19, %v7942_v11  ;;  %v11293_v36 = vpop.xlane.xlu2 %5474  ;;  %7951 = vrcp.f32 %v5469_v42  ;;  %v11297_v63 = vunpack.c.l.b16 %v4629_v52 }
 0x79a   : > { %5631 = vmatmul.bf16.gmra.mxu1 %v5338_v7  ;;  %v5402_v37 = vunpack.c.h.bf16 %v5338_v7  ;;  %v5865_v35 = vunpack.c.l.b16 %v2261_v58 }
 0x79b   : > { %5720 = vmatmul.bf16.gmra.mxu2 %v5339_v56  ;;  %v5403_v26 = vunpack.c.h.bf16 %v5339_v56 }
 0x79c   : > { %v5891_v48 = vpack.c.b16 %v5865_v35, %v5864_v10  ;;  %v5808_v10 = vpack.c.bf16 %v11282_v34, %v11282_v34  ;;  %v12335_v34 = vld [vmem:[#allocation79_spill] sm:$0xff] }
 0x79d   : > { %v7948_v3 = vpop.eup %7947  ;;  %v5497_v14 = vadd.f32 %v5403_v26, %v5402_v37  ;;  %v12334_v37 = vld [vmem:[#allocation48_spill] sm:$0xff] }
 0x79e   : > { %v4596_v62 = vmul.f32 %v7948_v3, %v12333_v13  ;;  %v5472_v11 = vpop.xlane.xlu0 %5471  ;;  %6216 = vrot.lane.b32.xlu2 %v6195_v41, %s8139_s12  ;;  %v7950_v9 = vpop.eup %7949  ;;  %v5400_v41 = vunpack.c.l.bf16 %v5338_v7  ;;  %v5401_v3 = vunpack.c.l.bf16 %v5339_v56 }
 0x79f   : > { %v5696_v61 = vpop.f32.mrf.mxu2  ;;  %5498 = vadd.xlane.f32.xlu0 %v5497_v14  ;;  %v7952_v42 = vpop.eup %7951 }
 0x7a0   : > { %v5697_v23 = vadd.f32 %v5696_v61, %v5607_v16  ;;  %v5609_v39 = vpop.f32.mrf.mxu1  ;;  %v4628_v47 = vpack.c.bf16 %v4596_v62, %v4596_v62  ;;  %v5494_v35 = vadd.f32 %v5401_v3, %v5400_v41  ;;  %v12337_v41 = vld [vmem:[#allocation12_spill] sm:$0xff] }
 0x7a1   : > { %v5463_v19 = vpop.xlane.xlu2 %5462 }
 0x7a2   : > { %v5778_v17 = vmul.f32 %v7950_v9, %v5697_v23  ;;  %v11299_v30 = vunpack.c.l.b16 %v4628_v47  ;;  %7953 = vrcp.f32 %v5463_v19  ;;  %v5993_v50 = vpop.permute.xlu1 %5992  ;;  %v11310_v47 = vunpack.c.l.b16 %v5808_v10 }
 0x7a3   : > { %v11302_v57 = vsel %vm1109_vm2, %v5891_v48, %v5993_v50 }
 0x7a4   : > { %v5810_v13 = vpack.c.bf16 %v5778_v17, %v5778_v17 }
 0x7a5   : > { %5489 = vadd.xlane.f32.xlu1 %v11216_v15 }
 0x7a6   : > { %v1836_v28 = vpop.xlane.xlu0 %1835 }
 0x7a7   : > { %v5698_v25 = vpop.f32.mrf.mxu2  ;;  %4273 = vadd.xlane.f32.xlu0 %v12334_v37  ;;  %7955 = vrcp.f32 %v1836_v28 }
 0x7a8   : > { %v5699_v26 = vadd.f32 %v5698_v25, %v5609_v39  ;;  %v5612_v58 = vpop.f32.mrf.mxu1  ;;  %v7954_v14 = vpop.eup %7953  ;;  %7957 = vrcp.f32 %v5472_v11  ;;  %v11314_v39 = vunpack.c.l.b16 %v5810_v13 }
 0x7a9   : > { %v5777_v52 = vmul.f32 %v7954_v14, %v5694_v53  ;;  %v5478_v62 = vpop.xlane.xlu2 %5477  ;;  %7959 = vrcp.f32 %v11279_v5 }
 0x7aa   : > { %v5779_v61 = vmul.f32 %v7952_v42, %v5699_v26  ;;  %v12336_v26 = vld [vmem:[#allocation80_spill] sm:$0xff] }
 0x7ab   : > { %v5809_v15 = vpack.c.bf16 %v5777_v52, %v5777_v52  ;;  %v2124_v3 = vadd.f32 %v12337_v41, %v12336_v26 }
 0x7ac   : > { %v5811_v23 = vpack.c.bf16 %v5779_v61, %v5779_v61 }
 0x7ad   : > { %v7956_v9 = vpop.eup %7955  ;;  %v11312_v19 = vunpack.c.l.b16 %v5809_v15  ;;  %5495 = vadd.xlane.f32.xlu1 %v5494_v35  ;;  %v12338_v15 = vld [vmem:[#allocation65_spill] sm:$0xff] }
 0x7ae   : > { %v11316_v7 = vunpack.c.l.b16 %v5811_v23  ;;  %v2224_v53 = vmul.f32 %v7956_v9, %v12335_v34  ;;  %v1839_v56 = vpop.xlane.xlu0 %1838  ;;  %v7958_v25 = vpop.eup %7957 }
 0x7af   : > { %v5701_v17 = vpop.f32.mrf.mxu2  ;;  %5456 = vadd.xlane.f32.xlu0 %v10985_v40  ;;  %7961 = vrcp.f32 %v1839_v56  ;;  %v7960_v37 = vpop.eup %7959  ;;  %v5682_v40 = vadd.f32 %v11236_v51, %v11231_v29 }
 0x7b0   : > { %v5702_v48 = vadd.f32 %v5701_v17, %v5612_v58  ;;  %v5614_v50 = vpop.f32.mrf.mxu1  ;;  %7963 = vrcp.f32 %v11293_v36  ;;  %v5684_v58 = vadd.f32 %v11250_v20, %v11242_v0  ;;  %v2256_v10 = vpack.c.bf16 %v2224_v53, %v2224_v53  ;;  %v12339_v17 = vld [vmem:[#allocation15_spill] sm:$0xff] }
 0x7b1   : > { %v3094_v42 = vpop.xlane.xlu2 %3093 }
 0x7b2   : > { %v5780_v5 = vmul.f32 %v7958_v25, %v5702_v48  ;;  %7965 = vrcp.f32 %v3094_v42  ;;  %v5773_v35 = vmul.f32 %v7960_v37, %v5684_v58  ;;  %v11335_v53 = vunpack.c.l.b16 %v2256_v10 }
 0x7b3   : > { %7967 = vrcp.f32 %v11260_v2 }
 0x7b4   : > { %v5812_v51 = vpack.c.bf16 %v5780_v5, %v5780_v5  ;;  %v5805_v26 = vpack.c.bf16 %v5773_v35, %v5773_v35  ;;  %v12344_v35 = vld [vmem:[#allocation130_spill] sm:$0xff] }
 0x7b5   : > { %v7962_v14 = vpop.eup %7961 }
 0x7b6   : > { %v2225_v52 = vmul.f32 %v7962_v14, %v2124_v3  ;;  %v1896_v13 = vpop.xlane.xlu0 %1895  ;;  %v7964_v61 = vpop.eup %7963  ;;  %v11341_v41 = vunpack.c.l.b16 %v5812_v51  ;;  %v12340_v3 = vld [vmem:[#allocation126_spill] sm:$0xff]  ;;  %v12341_v14 = vld [vmem:[#allocation76_spill] sm:$0xff] }
 0x7b7   : > { %v5703_v36 = vpop.f32.mrf.mxu2  ;;  %1832 = vadd.xlane.f32.xlu0 %v12338_v15  ;;  %7969 = vrcp.f32 %v1896_v13  ;;  %v12346_v51 = vld [vmem:[#allocation26_spill] sm:$0xff] }
 0x7b8   : > { %v5704_v2 = vadd.f32 %v5703_v36, %v5614_v50  ;;  %v7966_v23 = vpop.eup %7965  ;;  %v2257_v9 = vpack.c.bf16 %v2225_v52, %v2225_v52  ;;  %v5617_v34 = vpop.f32.mrf.mxu1  ;;  %7971 = vrcp.f32 %v5478_v62  ;;  %v12342_v36 = vld [vmem:[#allocation87_spill] sm:$0xff] }
 0x7b9   : > { %v7968_v56 = vpop.eup %7967  ;;  %v3414_v29 = vmul.f32 %v7966_v23, %v12339_v17  ;;  %v3097_v48 = vpop.xlane.xlu2 %3096  ;;  %v6173_v23 = vunpack.c.l.b16 %v5805_v26 }
 0x7ba   : > { %v5781_v0 = vmul.f32 %v7964_v61, %v5704_v2  ;;  %v5772_v20 = vmul.f32 %v7968_v56, %v5682_v40  ;;  %7973 = vrcp.f32 %v3097_v48  ;;  %v11337_v25 = vunpack.c.l.b16 %v2257_v9  ;;  %v12343_v2 = vld [vmem:[#allocation139_spill] sm:$0xff]  ;;  %v12345_v9 = vld [vmem:[#allocation133_spill] sm:$0xff] }
 0x7bb   : > { %7975 = vrcp.f32 %v12340_v3  ;;  %v3359_v56 = vadd.f32 %v12345_v9, %v12344_v35  ;;  %v3446_v17 = vpack.c.bf16 %v3414_v29, %v3414_v29  ;;  %v12348_v29 = vld [vmem:[#allocation40_spill] sm:$0xff] }
 0x7bc   : > { %v5813_v42 = vpack.c.bf16 %v5781_v0, %v5781_v0  ;;  %v5804_v5 = vpack.c.bf16 %v5772_v20, %v5772_v20 }
 0x7bd   : > { %v7970_v37 = vpop.eup %7969 }
 0x7be   : > { %v11343_v62 = vunpack.c.l.b16 %v5813_v42  ;;  %v2244_v40 = vmul.f32 %v7970_v37, %v12341_v14  ;;  %v1899_v58 = vpop.xlane.xlu0 %1898  ;;  %v7972_v52 = vpop.eup %7971  ;;  %v6172_v20 = vunpack.c.l.b16 %v5804_v5 }
 0x7bf   : > { %v5706_v10 = vpop.f32.mrf.mxu2  ;;  %1892 = vadd.xlane.f32.xlu0 %v12342_v36  ;;  %7977 = vrcp.f32 %v1899_v58  ;;  %v11354_v58 = vunpack.c.l.b16 %v3446_v17  ;;  %v12350_v17 = vld [vmem:[#allocation150_spill] sm:$0xff] }
 0x7c0   : > { %v5707_v61 = vadd.f32 %v5706_v10, %v5617_v34  ;;  %v7974_v15 = vpop.eup %7973  ;;  %7979 = vrcp.f32 %v12343_v2  ;;  %v5619_v42 = vpop.f32.mrf.mxu1  ;;  %v6197_v14 = vpack.c.b16 %v6173_v23, %v6172_v20  ;;  %v2276_v26 = vpack.c.bf16 %v2244_v40, %v2244_v40  ;;  %v12347_v2 = vld [vmem:[#allocation19_spill] sm:$0xff] }
 0x7c1   : > { %v3415_v48 = vmul.f32 %v7974_v15, %v12346_v51  ;;  %v7976_v3 = vpop.eup %7975  ;;  %v12349_v15 = vld [vmem:[#allocation166_spill] sm:$0xff] }
 0x7c2   : > { %v5782_v0 = vmul.f32 %v7972_v52, %v5707_v61  ;;  %v3427_v36 = vmul.f32 %v7976_v3, %v3359_v56  ;;  %7981 = vrcp.f32 %v12349_v15  ;;  %v11365_v56 = vunpack.c.l.b16 %v2276_v26 }
 0x7c3   : > { %v3447_v37 = vpack.c.bf16 %v3415_v48, %v3415_v48  ;;  %7983 = vrcp.f32 %v12350_v17 }
 0x7c4   : > { %v3459_v9 = vpack.c.bf16 %v3427_v36, %v3427_v36  ;;  %v5814_v17 = vpack.c.bf16 %v5782_v0, %v5782_v0 }
 0x7c5   : > { %v7978_v16 = vpop.eup %7977  ;;  %v11356_v34 = vunpack.c.l.b16 %v3447_v37 }
 0x7c6   : > { %v7980_v10 = vpop.eup %7979  ;;  %v2245_v28 = vmul.f32 %v7978_v16, %v12347_v2  ;;  %6220 = vrot.lane.b32.xlu1 %v6197_v14, %s8139_s12  ;;  %v12351_v14 = vld [vmem:[#allocation163_spill] sm:$0xff] }
 0x7c7   : > { %v5708_v35 = vpop.f32.mrf.mxu2  ;;  %v3426_v52 = vmul.f32 %v7980_v10, %v12348_v29  ;;  %5453 = vadd.xlane.f32.xlu2 %v10987_v12  ;;  %v5963_v12 = vunpack.c.l.b16 %v3459_v9  ;;  %v5487_v10 = vpop.xlane.xlu0 %5486 }
 0x7c8   : > { %v5709_v5 = vadd.f32 %v5708_v35, %v5619_v42  ;;  %v2277_v23 = vpack.c.bf16 %v2245_v28, %v2245_v28  ;;  %v5622_v51 = vpop.f32.mrf.mxu1  ;;  %v7982_v42 = vpop.eup %7981  ;;  %v12352_v28 = vld [vmem:[#allocation167_spill] sm:$0xff] }
 0x7c9   : > { %v3458_v16 = vpack.c.bf16 %v3426_v52, %v3426_v52  ;;  %v4489_v36 = vadd.f32 %v12352_v28, %v12351_v14  ;;  %v7984_v29 = vpop.eup %7983  ;;  %v12353_v52 = vld [vmem:[#allocation162_spill] sm:$0xff] }
 0x7ca   : > { %v11367_v40 = vunpack.c.l.b16 %v2277_v23  ;;  %v4586_v15 = vmul.f32 %v7984_v29, %v12353_v52  ;;  %v12357_v29 = vpack.c.b16 %v11001_v24, %v10999_v59  ;;  %v12358_v24 = vld [vmem:[#allocation134_spill] sm:$0xff] }
 0x7cb   : > { %v5962_v3 = vunpack.c.l.b16 %v3458_v16  ;;  %v4587_v35 = vmul.f32 %v7982_v42, %v4489_v36 }
 0x7cc   : > { %v4618_v50 = vpack.c.bf16 %v4586_v15, %v4586_v15 }
 0x7cd   : > { %v5481_v20 = vpop.xlane.xlu1 %5480  ;;  %v5980_v2 = vpack.c.b16 %v5963_v12, %v5962_v3  ;;  %v4619_v9 = vpack.c.bf16 %v4587_v35, %v4587_v35  ;;  %v11376_v12 = vunpack.c.l.b16 %v5814_v17 }
 0x7ce   : > { %7985 = vrcp.f32 %v5481_v20 }
 0x7cf   : > { %v5711_v37 = vpop.f32.mrf.mxu2  ;;  %7987 = vrcp.f32 %v5487_v10  ;;  %v6055_v36 = vunpack.c.l.b16 %v4619_v9  ;;  %v12354_v10 = vld [vmem:[#allocation108_spill] sm:$0xff] }
 0x7d0   : > { %v5712_v26 = vadd.f32 %v5711_v37, %v5622_v51  ;;  %v5624_v11 = vpop.f32.mrf.mxu1 }
 0x7d3   : > { %6010 = vrot.lane.b32.xlu0 %v5980_v2, %s8141_s14  ;;  %v12355_v2 = vld [vmem:[#allocation22_spill] sm:$0xff] }
 0x7d4   : > { %v7986_v23 = vpop.eup %7985  ;;  %v12356_v35 = vpack.c.b16 %v12354_v10, %v12355_v2 }
 0x7d5   : > { %v5783_v61 = vmul.f32 %v7986_v23, %v5709_v5  ;;  %v5484_v20 = vpop.xlane.xlu1 %5483  ;;  %v7988_v51 = vpop.eup %7987  ;;  %v6054_v5 = vunpack.c.l.b16 %v4618_v50 }
 0x7d6   : > { %7989 = vrcp.f32 %v5484_v20 }
 0x7d7   : > { %v5713_v16 = vpop.f32.mrf.mxu2  ;;  %v5815_v14 = vpack.c.bf16 %v5783_v61, %v5783_v61  ;;  %v6082_v23 = vpack.c.b16 %v6055_v36, %v6054_v5 }
 0x7d8   : > { %v5714_v28 = vadd.f32 %v5713_v16, %v5624_v11 }
 0x7d9   : > { %v11378_v42 = vunpack.c.l.b16 %v5815_v14  ;;  %v6013_v37 = vpop.permute.xlu0 %6012 }
 0x7da   : > { %v5785_v3 = vmul.f32 %v7988_v51, %v5714_v28  ;;  %v6285_v0 = vsel %vm1109_vm2, %v12356_v35, %v6013_v37  ;;  %v12360_v28 = vld [vmem:[#allocation88_spill] sm:$0xff]  ;;  %v12361_v51 = vld [vmem:[#allocation77_spill] sm:$0xff]  ;;  %v5627_v37 = vpop.f32.mrf.mxu1 }
 0x7db   : > { %6122 = vrot.lane.b32.xlu0 %v12357_v29, %s8140_s13 }
 0x7dc   : > { %v7990_v61 = vpop.eup %7989  ;;  %v5817_v15 = vpack.c.bf16 %v5785_v3, %v5785_v3 }
 0x7dd   : > { %v5784_v52 = vmul.f32 %v7990_v61, %v5712_v26  ;;  %v12359_v26 = vld [vmem:[#allocation66_spill] sm:$0xff] }
 0x7de   : > { %v11393_v20 = vunpack.c.l.b16 %v5817_v15 }
 0x7df   : > { %v5816_v17 = vpack.c.bf16 %v5784_v52, %v5784_v52  ;;  %6102 = vrot.lane.b32.xlu2 %v6082_v23, %s8140_s13  ;;  %v5716_v36 = vpop.f32.mrf.mxu2  ;;  %v12363_v52 = vld [vmem:[#allocation25_spill] sm:$0xff] }
 0x7e1   : > { %v11391_v9 = vunpack.c.l.b16 %v5816_v17 }
 0x7e2   : > { %v5629_v35 = vpop.f32.mrf.mxu1 }
 0x7e3   : > { %v6203_v50 = vpack.c.b16 %v11393_v20, %v11391_v9 }
 0x7e7   : > { %v5718_v5 = vpop.f32.mrf.mxu2 }
 0x7e8   : > { %v11397_v16 = vpop.permute.xlu2 %6218  ;;  %v5719_v23 = vadd.f32 %v5718_v5, %v5629_v35 }
 0x7ed   : > { %v11406_v10 = vpop.permute.xlu1 %6104 }
 0x7f0   : > { %v6125_v59 = vpop.permute.xlu2 %6124  ;;  %4276 = vadd.xlane.f32.xlu1 %v12358_v24 }
 0x7f1   : > { %v11401_v14 = vsel %vm6286_vm3, %v6285_v0, %v6125_v59  ;;  %v12362_v0 = vld [vmem:[#allocation121_spill] sm:$0xff] }
 0x7f2   : > { %v12364_v15 = vpack.c.b16 %v12362_v0, %v12363_v52  ;;  %v12366_v0 = vld [vmem:[#allocation122_spill] sm:$0xff] }
 0x7f8   : > { %1829 = vadd.xlane.f32.xlu1 %v12359_v26  ;;  %v5717_v26 = vadd.f32 %v5716_v36, %v5627_v37 }
 0x800   : > { %1889 = vadd.xlane.f32.xlu1 %v12360_v28 }
 0x804   : > { %v5493_v3 = vpop.xlane.xlu0 %5492 }
 0x805   : > { %7991 = vrcp.f32 %v5493_v3 }
 0x808   : > { %1883 = vadd.xlane.f32.xlu2 %v12361_v51 }
 0x80b   : > { %v7992_v61 = vpop.eup %7991 }
 0x80c   : > { %v5787_v59 = vmul.f32 %v7992_v61, %v5719_v23 }
 0x80e   : > { %v5819_v13 = vpack.c.bf16 %v5787_v59, %v5787_v59 }
 0x810   : > { %v6187_v37 = vunpack.c.l.b16 %v5819_v13 }
 0x812   : > { %v5499_v2 = vpop.xlane.xlu0 %5498 }
 0x817   : > { %v5632_v24 = vpop.f32.mrf.mxu1 }
 0x818   : > { %v5490_v29 = vpop.xlane.xlu1 %5489 }
 0x819   : > { %7993 = vrcp.f32 %v5490_v29  ;;  %5990 = vrot.lane.b32.xlu1 %v12364_v15, %s8141_s14  ;;  %v12365_v29 = vpack.c.b16 %v11151_v54, %v11149_v44 }
 0x81a   : > { %v4274_v17 = vpop.xlane.xlu0 %4273 }
 0x81b   : > { %7995 = vrcp.f32 %v4274_v17 }
 0x81e   : > { %v5721_v28 = vpop.f32.mrf.mxu2 }
 0x81f   : > { %v7994_v51 = vpop.eup %7993  ;;  %v5722_v52 = vadd.f32 %v5721_v28, %v5632_v24  ;;  %v5634_v15 = vpop.f32.mrf.mxu1 }
 0x820   : > { %v5786_v3 = vmul.f32 %v7994_v51, %v5717_v26  ;;  %v5496_v11 = vpop.xlane.xlu1 %5495  ;;  %v6217_v24 = vpop.permute.xlu2 %6216 }
 0x821   : > { %v7996_v48 = vpop.eup %7995  ;;  %7997 = vrcp.f32 %v5496_v11  ;;  %6214 = vrot.lane.b32.xlu1 %v12365_v29, %s8139_s12 }
 0x822   : > { %7999 = vrcp.f32 %v5499_v2  ;;  %v11417_v35 = vmul.f32 %v7996_v48, %v12366_v0  ;;  %v5818_v5 = vpack.c.bf16 %v5786_v3, %v5786_v3  ;;  %v5457_v61 = vpop.xlane.xlu0 %5456 }
 0x823   : > { %8001 = vrcp.f32 %v5457_v61 }
 0x824   : > { %v6186_v36 = vunpack.c.l.b16 %v5818_v5 }
 0x826   : > { %v5723_v23 = vpop.f32.mrf.mxu2  ;;  %v6204_v17 = vpack.c.b16 %v6187_v37, %v6186_v36  ;;  %v12367_v36 = vld [vmem:[#allocation115_spill] sm:$0xff] }
 0x827   : > { %v7998_v59 = vpop.eup %7997  ;;  %v5724_v11 = vadd.f32 %v5723_v23, %v5634_v15  ;;  %v12370_v23 = vld [vmem:[#allocation39_spill] sm:$0xff] }
 0x828   : > { %v8000_v26 = vpop.eup %7999  ;;  %v5788_v51 = vmul.f32 %v7998_v59, %v5722_v52  ;;  %6234 = vrot.lane.b32.xlu0 %v6204_v17, %s8139_s12  ;;  %v12368_v52 = vld [vmem:[#allocation24_spill] sm:$0xff] }
 0x829   : > { %v8002_v44 = vpop.eup %8001  ;;  %v5789_v54 = vmul.f32 %v8000_v26, %v5724_v11  ;;  %v12369_v15 = vpack.c.b16 %v12367_v36, %v12368_v52  ;;  %v12371_v26 = vpack.c.b16 %v11120_v22, %v11118_v55  ;;  %v6298_v22 = vsel %vm6286_vm3, %v11302_v57, %v11406_v10  ;;  %v12380_v52 = vld [vmem:[#allocation155_spill] sm:$0xff] }
 0x82a   : > { %v5775_v48 = vmul.f32 %v8002_v44, %v11258_v60  ;;  %v5820_v2 = vpack.c.bf16 %v5788_v51, %v5788_v51  ;;  %v1833_v3 = vpop.xlane.xlu0 %1832  ;;  %v6339_v51 = vsel %vm6319_vm4, %v11209_v8, %v11397_v16  ;;  %v6336_v8 = vsel %vm6319_vm4, %v6298_v22, %v6217_v24  ;;  %v12373_v16 = vld [vmem:[#allocation62_spill] sm:$0xff]  ;;  %v12386_v22 = vld [vmem:[#allocation59_spill] sm:$0xff] }
 0x82b   : > { %v5821_v29 = vpack.c.bf16 %v5789_v54, %v5789_v54 }
 0x82c   : > { %v6188_v0 = vunpack.c.l.b16 %v5820_v2  ;;  %v5807_v44 = vpack.c.bf16 %v5775_v48, %v5775_v48  ;;  %v12374_v48 = vld [vmem:[#allocation63_spill] sm:$0xff] }
 0x82d   : > { %v6189_v13 = vunpack.c.l.b16 %v5821_v29 }
 0x82e   : > { %v11439_v29 = vunpack.c.l.b16 %v5807_v44 }
 0x82f   : > { %v6205_v5 = vpack.c.b16 %v6189_v13, %v6188_v0  ;;  %v12372_v13 = vpack.c.b16 %v11229_v43, %v11227_v49  ;;  %v12376_v49 = vld [vmem:[#allocation158_spill] sm:$0xff] }
 0x830   : > { %v12377_v43 = vld [vmem:[#allocation146_spill] sm:$0xff] }
 0x831   : > { %6236 = vrot.lane.b32.xlu2 %v6205_v5, %s8139_s12  ;;  %v12375_v5 = vld [vmem:[#allocation78_spill] sm:$0xff] }
 0x832   : > { %v1893_v28 = vpop.xlane.xlu0 %1892 }
 0x833   : > { %8003 = vrcp.f32 %v1893_v28 }
 0x838   : > { %v6221_v61 = vpop.permute.xlu1 %6220 }
 0x839   : > { %v8004_v37 = vpop.eup %8003  ;;  %6008 = vrot.lane.b32.xlu2 %v12369_v15, %s8141_s14  ;;  %v6342_v60 = vsel %vm6319_vm4, %v10949_v18, %v6221_v61  ;;  %v12378_v61 = vld [vmem:[#allocation156_spill] sm:$0xff] }
 0x83a   : > { %v11429_v17 = vmul.f32 %v8004_v37, %v12370_v23  ;;  %v5454_v59 = vpop.xlane.xlu2 %5453  ;;  %6375 = vmatpush.bf16.xpose.msrb.mxu3 %v6342_v60  ;;  %v12379_v37 = vld [vmem:[#allocation159_spill] sm:$0xff] }
 0x83b   : > { %8005 = vrcp.f32 %v5454_v59  ;;  %v4484_v57 = vadd.f32 %v12379_v37, %v12378_v61  ;;  %v12381_v59 = vld [vmem:[#allocation120_spill] sm:$0xff]  ;;  %v12389_v37 = vpack.c.b16 %v10955_v1, %v10953_v46 }
 0x83c   : > { %8007 = vrcp.f32 %v12376_v49  ;;  %v12387_v49 = vld [vmem:[#allocation75_spill] sm:$0xff] }
 0x83d   : > { %8009 = vrcp.f32 %v12377_v43  ;;  %v12388_v43 = vld [vmem:[#allocation36_spill] sm:$0xff] }
 0x841   : > { %v8006_v11 = vpop.eup %8005  ;;  %6212 = vrot.lane.b32.xlu2 %v12371_v26, %s8139_s12 }
 0x842   : > { %v5774_v54 = vmul.f32 %v8006_v11, %v11255_v38  ;;  %6376 = vmatpush.bf16.xpose.msrb.mxu3 %v6339_v51  ;;  %v8008_v28 = vpop.eup %8007  ;;  %v12382_v11 = vld [vmem:[#allocation67_spill] sm:$0xff] }
 0x843   : > { %v4585_v10 = vmul.f32 %v8008_v28, %v4484_v57  ;;  %v8010_v36 = vpop.eup %8009  ;;  %v12383_v26 = vpack.c.b16 %v12381_v59, %v12382_v11  ;;  %v2119_v28 = vadd.f32 %v12388_v43, %v12387_v49  ;;  %v12397_v49 = vld [vmem:[#allocation112_spill] sm:$0xff] }
 0x844   : > { %v5806_v18 = vpack.c.bf16 %v5774_v54, %v5774_v54  ;;  %v4584_v15 = vmul.f32 %v8010_v36, %v12380_v52  ;;  %v12384_v54 = vld [vmem:[#allocation29_spill] sm:$0xff] }
 0x845   : > { %v6011_v2 = vpop.permute.xlu0 %6010  ;;  %v4617_v24 = vpack.c.bf16 %v4585_v10, %v4585_v10 }
 0x846   : > { %v11441_v0 = vunpack.c.l.b16 %v5806_v18  ;;  %v11447_v55 = vsel %vm1109_vm2, %v12372_v13, %v6011_v2  ;;  %v4616_v23 = vpack.c.bf16 %v4584_v15, %v4584_v15  ;;  %v12385_v18 = vld [vmem:[#allocation107_spill] sm:$0xff] }
 0x847   : > { %v6053_v51 = vunpack.c.l.b16 %v4617_v24  ;;  %v4509_v2 = vadd.f32 %v12385_v18, %v12384_v54  ;;  %v6103_v24 = vpop.permute.xlu2 %6102  ;;  %v12391_v54 = vld [vmem:[#allocation55_spill] sm:$0xff] }
 0x848   : > { %v6198_v38 = vpack.c.b16 %v11439_v29, %v11441_v0  ;;  %v6052_v44 = vunpack.c.l.b16 %v4616_v23 }
 0x84a   : > { %6377 = vmatpush.bf16.xpose.msrb.mxu3 %v6336_v8  ;;  %v6081_v8 = vpack.c.b16 %v6053_v51, %v6052_v44  ;;  %v2275_v44 = vpack.c.bf16 %v11429_v17, %v11429_v17 }
 0x84b   : > { %1823 = vadd.xlane.f32.xlu1 %v12373_v16  ;;  %v4626_v16 = vpack.c.bf16 %v11417_v35, %v11417_v35 }
 0x84c   : > { %v11501_v9 = vunpack.c.l.b16 %v2275_v44 }
 0x84d   : > { %v11479_v57 = vunpack.c.l.b16 %v4626_v16  ;;  %v12393_v16 = vld [vmem:[#allocation116_spill] sm:$0xff] }
 0x852   : > { %1826 = vadd.xlane.f32.xlu0 %v12374_v48 }
 0x853   : > { %1886 = vadd.xlane.f32.xlu1 %v12375_v5 }
 0x863   : > { %v4277_v60 = vpop.xlane.xlu1 %4276 }
 0x864   : > { %8011 = vrcp.f32 %v4277_v60  ;;  %v12390_v60 = vld [vmem:[#allocation11_spill] sm:$0xff] }
 0x865   : > { %8013 = vrcp.f32 %v1833_v3 }
 0x866   : > { %5988 = vrot.lane.b32.xlu0 %v12383_v26, %s8141_s14 }
 0x86a   : > { %v8012_v13 = vpop.eup %8011  ;;  %1820 = vadd.xlane.f32.xlu2 %v12386_v22 }
 0x86b   : > { %v4595_v48 = vmul.f32 %v8012_v13, %v4509_v2  ;;  %v1830_v5 = vpop.xlane.xlu1 %1829  ;;  %v8014_v3 = vpop.eup %8013 }
 0x86c   : > { %8015 = vrcp.f32 %v1830_v5  ;;  %6100 = vrot.lane.b32.xlu1 %v6081_v8, %s8140_s13  ;;  %v2223_v10 = vmul.f32 %v8014_v3, %v2119_v28  ;;  %v12392_v8 = vld [vmem:[#allocation117_spill] sm:$0xff] }
 0x86d   : > { %v4627_v61 = vpack.c.bf16 %v4595_v48, %v4595_v48  ;;  %v12394_v48 = vpack.c.b16 %v12392_v8, %v12393_v16  ;;  %v12395_v5 = vld [vmem:[#allocation45_spill] sm:$0xff] }
 0x86e   : > { %6120 = vrot.lane.b32.xlu0 %v12389_v37, %s8140_s13  ;;  %v2255_v15 = vpack.c.bf16 %v2223_v10, %v2223_v10  ;;  %v12396_v3 = vld [vmem:[#allocation125_spill] sm:$0xff]  ;;  %v12399_v10 = vpack.c.b16 %v11218_v33, %v11211_v4 }
 0x86f   : > { %v11481_v36 = vunpack.c.l.b16 %v4627_v61  ;;  %v12398_v43 = vpack.c.b16 %v12396_v3, %v12397_v49 }
 0x870   : > { %v11492_v11 = vunpack.c.l.b16 %v2255_v15  ;;  %v6123_v15 = vpop.permute.xlu0 %6122 }
 0x871   : > { %v6086_v35 = vpack.c.b16 %v11481_v36, %v11479_v57  ;;  %v6316_v33 = vsel %vm6286_vm3, %v11447_v55, %v6123_v15  ;;  %v12411_v15 = vld [vmem:[#allocation127_spill] sm:$0xff] }
 0x872   : > { %v8016_v52 = vpop.eup %8015 }
 0x873   : > { %v2222_v23 = vmul.f32 %v8016_v52, %v12390_v60  ;;  %v1890_v59 = vpop.xlane.xlu1 %1889 }
 0x874   : > { %8017 = vrcp.f32 %v1890_v59  ;;  %6232 = vrot.lane.b32.xlu1 %v6203_v50, %s8139_s12 }
 0x875   : > { %v2254_v46 = vpack.c.bf16 %v2222_v23, %v2222_v23 }
 0x877   : > { %v11490_v1 = vunpack.c.l.b16 %v2254_v46  ;;  %v12400_v46 = vpack.c.b16 %v11367_v40, %v11365_v56  ;;  %v12404_v56 = vld [vmem:[#allocation85_spill] sm:$0xff]  ;;  %v12405_v40 = vld [vmem:[#allocation148_spill] sm:$0xff] }
 0x879   : > { %v5888_v26 = vpack.c.b16 %v11492_v11, %v11490_v1 }
 0x87a   : > { %v8018_v51 = vpop.eup %8017 }
 0x87b   : > { %v2242_v18 = vmul.f32 %v8018_v51, %v12391_v54  ;;  %v1884_v2 = vpop.xlane.xlu2 %1883 }
 0x87c   : > { %8019 = vrcp.f32 %v1884_v2  ;;  %v12406_v2 = vld [vmem:[#allocation152_spill] sm:$0xff] }
 0x87d   : > { %v2274_v13 = vpack.c.bf16 %v2242_v18, %v2242_v18  ;;  %v12402_v18 = vld [vmem:[#allocation41_spill] sm:$0xff] }
 0x87f   : > { %v11499_v22 = vunpack.c.l.b16 %v2274_v13  ;;  %v12407_v13 = vld [vmem:[#allocation50_spill] sm:$0xff] }
 0x881   : > { %v5898_v20 = vpack.c.b16 %v11501_v9, %v11499_v22 }
 0x882   : > { %v8020_v50 = vpop.eup %8019  ;;  %5986 = vrot.lane.b32.xlu2 %v12394_v48, %s8141_s14 }
 0x883   : > { %v11510_v17 = vmul.f32 %v8020_v50, %v12395_v5  ;;  %v4479_v50 = vadd.f32 %v12407_v13, %v12406_v2  ;;  %v12408_v5 = vld [vmem:[#allocation151_spill] sm:$0xff]  ;;  %v12420_v13 = vld [vmem:[#allocation114_spill] sm:$0xff] }
 0x88a   : > { %6118 = vrot.lane.b32.xlu2 %v12398_v43, %s8140_s13 }
 0x88b   : > { %v6237_v28 = vpop.permute.xlu2 %6236  ;;  %v5991_v61 = vpop.permute.xlu1 %5990 }
 0x88c   : > { %v11518_v37 = vsel %vm6319_vm4, %v11401_v14, %v6237_v28  ;;  %v6252_v52 = vsel %vm1109_vm2, %v12399_v10, %v5991_v61  ;;  %v12401_v14 = vld [vmem:[#allocation60_spill] sm:$0xff]  ;;  %v12409_v10 = vld [vmem:[#allocation81_spill] sm:$0xff] }
 0x88d   : > { %v6296_v59 = vsel %vm6286_vm3, %v6252_v52, %v6103_v24  ;;  %v12403_v24 = vld [vmem:[#allocation132_spill] sm:$0xff] }
 0x88e   : > { %8021 = vrcp.f32 %v12403_v24  ;;  %v12410_v52 = vld [vmem:[#allocation128_spill] sm:$0xff] }
 0x88f   : > { %8023 = vrcp.f32 %v12405_v40  ;;  %v12417_v24 = vld [vmem:[#allocation8_spill] sm:$0xff] }
 0x893   : > { %v6009_v60 = vpop.permute.xlu2 %6008  ;;  %v6215_v23 = vpop.permute.xlu1 %6214 }
 0x894   : > { %v11529_v51 = vsel %vm1109_vm2, %v12400_v46, %v6009_v60  ;;  %v6333_v44 = vsel %vm6319_vm4, %v6296_v59, %v6215_v23  ;;  %v8022_v8 = vpop.eup %8021  ;;  %v12412_v60 = vpack.c.b16 %v12410_v52, %v12411_v15  ;;  %v12413_v23 = vpack.c.b16 %v11107_v27, %v11105_v45  ;;  %v12418_v45 = vld [vmem:[#allocation144_spill] sm:$0xff]  ;;  %v12419_v27 = vld [vmem:[#allocation149_spill] sm:$0xff] }
 0x895   : > { %6378 = vmatpush.bf16.xpose.msrb.mxu3 %v6333_v44  ;;  %v4583_v16 = vmul.f32 %v8022_v8, %v4479_v50  ;;  %v8024_v48 = vpop.eup %8023  ;;  %v12414_v46 = vpack.c.b16 %v11378_v42, %v11376_v12  ;;  %v12415_v44 = vld [vmem:[#allocation68_spill] sm:$0xff]  ;;  %v4474_v2 = vadd.f32 %v12419_v27, %v12418_v45  ;;  %v12421_v50 = vld [vmem:[#allocation23_spill] sm:$0xff]  ;;  %v2272_v15 = vpack.c.bf16 %v11510_v17, %v11510_v17 }
 0x896   : > { %v4582_v55 = vmul.f32 %v8024_v48, %v12408_v5  ;;  %v12422_v12 = vpack.c.b16 %v12420_v13, %v12421_v50  ;;  %v12423_v42 = vld [vmem:[#allocation143_spill] sm:$0xff]  ;;  %v12424_v48 = vld [vmem:[#allocation54_spill] sm:$0xff]  ;;  %v12425_v5 = vld [vmem:[#allocation21_spill] sm:$0xff] }
 0x897   : > { %v4615_v3 = vpack.c.bf16 %v4583_v16, %v4583_v16  ;;  %v12432_v50 = vld [vmem:[#allocation38_spill] sm:$0xff] }
 0x898   : > { %1817 = vadd.xlane.f32.xlu0 %v12401_v14  ;;  %v4614_v49 = vpack.c.bf16 %v4582_v55, %v4582_v55  ;;  %v12416_v14 = vld [vmem:[#allocation119_spill] sm:$0xff]  ;;  %v2114_v55 = vadd.f32 %v12425_v5, %v12424_v48  ;;  %v12435_v48 = vld [vmem:[#allocation10_spill] sm:$0xff] }
 0x899   : > { %v6051_v43 = vunpack.c.l.b16 %v4615_v3  ;;  %v12436_v5 = vld [vmem:[#allocation30_spill] sm:$0xff] }
 0x89a   : > { %v6235_v4 = vpop.permute.xlu0 %6234  ;;  %v6050_v28 = vunpack.c.l.b16 %v4614_v49  ;;  %v12426_v49 = vpack.c.b16 %v11343_v62, %v11341_v41 }
 0x89b   : > { %v11536_v54 = vsel %vm6319_vm4, %v6316_v33, %v6235_v4 }
 0x89c   : > { %v6080_v61 = vpack.c.b16 %v6051_v43, %v6050_v28 }
 0x89e   : > { %1877 = vadd.xlane.f32.xlu1 %v12402_v18 }
 0x8a0   : > { %1880 = vadd.xlane.f32.xlu0 %v12404_v56 }
 0x8b3   : > { %1871 = vadd.xlane.f32.xlu2 %v12409_v10 }
 0x8b4   : > { %6098 = vrot.lane.b32.xlu0 %v6080_v61, %s8140_s13 }
 0x8b7   : > { %6006 = vrot.lane.b32.xlu1 %v12412_v60, %s8141_s14  ;;  %v12427_v60 = vld [vmem:[#allocation18_spill] sm:$0xff] }
 0x8bc   : > { %6210 = vrot.lane.b32.xlu0 %v12413_v23, %s8139_s12 }
 0x8be   : > { %v1824_v59 = vpop.xlane.xlu1 %1823 }
 0x8bf   : > { %8025 = vrcp.f32 %v1824_v59  ;;  %6230 = vrot.lane.b32.xlu1 %v12414_v46, %s8139_s12 }
 0x8c0   : > { %8027 = vrcp.f32 %v12415_v44  ;;  %v12428_v44 = vld [vmem:[#allocation74_spill] sm:$0xff] }
 0x8c1   : > { %8029 = vrcp.f32 %v12416_v14  ;;  %v12429_v14 = vld [vmem:[#allocation71_spill] sm:$0xff] }
 0x8c5   : > { %v8026_v33 = vpop.eup %8025  ;;  %v1827_v4 = vpop.xlane.xlu0 %1826 }
 0x8c6   : > { %v8028_v18 = vpop.eup %8027  ;;  %v2220_v56 = vmul.f32 %v8026_v33, %v12417_v24  ;;  %8031 = vrcp.f32 %v1827_v4  ;;  %v1887_v40 = vpop.xlane.xlu1 %1886  ;;  %v12430_v33 = vpack.c.b16 %v12428_v44, %v12429_v14  ;;  %v12451_v14 = vld [vmem:[#allocation49_spill] sm:$0xff] }
 0x8c7   : > { %8033 = vrcp.f32 %v1887_v40  ;;  %5984 = vrot.lane.b32.xlu1 %v12422_v12, %s8141_s14  ;;  %v4580_v8 = vmul.f32 %v8028_v18, %v12423_v42  ;;  %v8030_v16 = vpop.eup %8029  ;;  %v12431_v40 = vpack.c.b16 %v10989_v32, %v10991_v6  ;;  %v12433_v12 = vpack.c.b16 %v11035_v21, %v12432_v50  ;;  %v12457_v50 = vld [vmem:[#allocation42_spill] sm:$0xff] }
 0x8c8   : > { %v4581_v3 = vmul.f32 %v8030_v16, %v4474_v2  ;;  %v2252_v10 = vpack.c.bf16 %v2220_v56, %v2220_v56  ;;  %v11588_v56 = vunpack.c.l.b16 %v2272_v15  ;;  %v12434_v42 = vpack.c.b16 %v11337_v25, %v11335_v53  ;;  %v12439_v25 = vld [vmem:[#allocation82_spill] sm:$0xff]  ;;  %v12444_v15 = vld [vmem:[#allocation37_spill] sm:$0xff] }
 0x8c9   : > { %v4612_v61 = vpack.c.bf16 %v4580_v8, %v4580_v8  ;;  %v6213_v8 = vpop.permute.xlu2 %6212  ;;  %v12438_v53 = vpack.c.b16 %v11316_v7, %v11314_v39  ;;  %v12445_v39 = vld [vmem:[#allocation17_spill] sm:$0xff] }
 0x8ca   : > { %v4613_v59 = vpack.c.bf16 %v4581_v3, %v4581_v3  ;;  %v11582_v62 = vunpack.c.l.b16 %v2252_v10  ;;  %v12446_v7 = vld [vmem:[#allocation141_spill] sm:$0xff] }
 0x8cb   : > { %6228 = vrot.lane.b32.xlu2 %v12426_v49, %s8139_s12  ;;  %v6048_v41 = vunpack.c.l.b16 %v4612_v61  ;;  %v12441_v61 = vld [vmem:[#allocation153_spill] sm:$0xff] }
 0x8cc   : > { %v8032_v43 = vpop.eup %8031  ;;  %v6049_v17 = vunpack.c.l.b16 %v4613_v59  ;;  %v12448_v59 = vld [vmem:[#allocation142_spill] sm:$0xff] }
 0x8cd   : > { %v8034_v28 = vpop.eup %8033  ;;  %v2221_v52 = vmul.f32 %v8032_v43, %v2114_v55  ;;  %v12437_v55 = vpack.c.b16 %v12435_v48, %v12436_v5  ;;  %v12458_v48 = vld [vmem:[#allocation43_spill] sm:$0xff] }
 0x8ce   : > { %v2241_v23 = vmul.f32 %v8034_v28, %v12427_v60  ;;  %v6079_v2 = vpack.c.b16 %v6049_v17, %v6048_v41  ;;  %v12440_v28 = vld [vmem:[#allocation31_spill] sm:$0xff]  ;;  %v12447_v60 = vpack.c.b16 %v12445_v39, %v12446_v7  ;;  %v12454_v17 = vld [vmem:[#allocation98_spill] sm:$0xff] }
 0x8cf   : > { %v2253_v46 = vpack.c.bf16 %v2221_v52, %v2221_v52  ;;  %6004 = vrot.lane.b32.xlu1 %v12430_v33, %s8141_s14  ;;  %v12442_v10 = vpack.c.b16 %v12440_v28, %v12441_v61  ;;  %v12452_v33 = vld [vmem:[#allocation46_spill] sm:$0xff] }
 0x8d0   : > { %v2273_v4 = vpack.c.bf16 %v2241_v23, %v2241_v23 }
 0x8d1   : > { %v11584_v18 = vunpack.c.l.b16 %v2253_v46  ;;  %v12449_v46 = vld [vmem:[#allocation145_spill] sm:$0xff] }
 0x8d2   : > { %v11586_v24 = vunpack.c.l.b16 %v2273_v4  ;;  %v12450_v44 = vpack.c.b16 %v12448_v59, %v12449_v46  ;;  %v2109_v4 = vadd.f32 %v12452_v33, %v12451_v14 }
 0x8d3   : > { %6002 = vrot.lane.b32.xlu2 %v12431_v40, %s8141_s14  ;;  %v5887_v45 = vpack.c.b16 %v11584_v18, %v11582_v62  ;;  %v12455_v40 = vld [vmem:[#allocation16_spill] sm:$0xff] }
 0x8d4   : > { %v5897_v27 = vpack.c.b16 %v11586_v24, %v11588_v56  ;;  %v12464_v56 = vld [vmem:[#allocation34_spill] sm:$0xff] }
 0x8d7   : > { %6096 = vrot.lane.b32.xlu1 %v6079_v2, %s8140_s13  ;;  %v12456_v2 = vpack.c.b16 %v12454_v17, %v12455_v40 }
 0x8d8   : > { %v5989_v13 = vpop.permute.xlu0 %5988 }
 0x8d9   : > { %v6249_v32 = vsel %vm1109_vm2, %v12434_v42, %v5989_v13 }
 0x8db   : > { %6114 = vrot.lane.b32.xlu2 %v12433_v12, %s8140_s13 }
 0x8dd   : > { %v1821_v23 = vpop.xlane.xlu2 %1820 }
 0x8de   : > { %v6101_v6 = vpop.permute.xlu1 %6100  ;;  %8035 = vrcp.f32 %v1821_v23  ;;  %v12463_v23 = vpack.c.b16 %v11297_v63, %v11299_v30 }
 0x8df   : > { %v6294_v16 = vsel %vm6286_vm3, %v6249_v32, %v6101_v6  ;;  %6116 = vrot.lane.b32.xlu1 %v12437_v55, %s8140_s13 }
 0x8e0   : > { %v6121_v3 = vpop.permute.xlu0 %6120  ;;  %v6330_v49 = vsel %vm6319_vm4, %v6294_v16, %v6213_v8 }
 0x8e1   : > { %v6314_v21 = vsel %vm6286_vm3, %v11529_v51, %v6121_v3  ;;  %6379 = vmatpush.bf16.xpose.msrb.mxu3 %v6330_v49  ;;  %v12443_v51 = vpack.c.b16 %v11312_v19, %v11310_v47  ;;  %v12459_v49 = vld [vmem:[#allocation160_spill] sm:$0xff] }
 0x8e3   : > { %6226 = vrot.lane.b32.xlu2 %v12438_v53, %s8139_s12 }
 0x8e4   : > { %v8036_v19 = vpop.eup %8035 }
 0x8e5   : > { %v2219_v57 = vmul.f32 %v8036_v19, %v2109_v4  ;;  %v5987_v39 = vpop.permute.xlu2 %5986 }
 0x8e6   : > { %1874 = vadd.xlane.f32.xlu0 %v12439_v25  ;;  %v6233_v43 = vpop.permute.xlu1 %6232  ;;  %v12461_v25 = vld [vmem:[#allocation35_spill] sm:$0xff] }
 0x8e7   : > { %6208 = vrot.lane.b32.xlu1 %v12442_v10, %s8139_s12  ;;  %v11625_v52 = vsel %vm6319_vm4, %v6314_v21, %v6233_v43  ;;  %v2251_v13 = vpack.c.bf16 %v2219_v57, %v2219_v57  ;;  %v12460_v21 = vpack.c.b16 %v11248_v31, %v12459_v49 }
 0x8e9   : > { %v5855_v8 = vunpack.c.l.b16 %v2251_v13 }
 0x8eb   : > { %6224 = vrot.lane.b32.xlu2 %v12443_v51, %s8139_s12 }
 0x8ee   : > { %1865 = vadd.xlane.f32.xlu0 %v12444_v15  ;;  %v12462_v15 = vpack.c.b16 %v11356_v34, %v11354_v58  ;;  %v6246_v58 = vsel %vm1109_vm2, %v5888_v26, %v5987_v39 }
 0x8f3   : > { %6110 = vrot.lane.b32.xlu2 %v6086_v35, %s8140_s13  ;;  %v12453_v35 = vld [vmem:[#allocation44_spill] sm:$0xff] }
 0x902   : > { %5982 = vrot.lane.b32.xlu0 %v12447_v60, %s8141_s14 }
 0x90a   : > { %6094 = vrot.lane.b32.xlu0 %v12450_v44, %s8140_s13 }
 0x90b   : > { %v1818_v47 = vpop.xlane.xlu0 %1817 }
 0x90c   : > { %8037 = vrcp.f32 %v1818_v47 }
 0x911   : > { %v1878_v36 = vpop.xlane.xlu1 %1877  ;;  %1868 = vadd.xlane.f32.xlu1 %v12453_v35 }
 0x912   : > { %v8038_v41 = vpop.eup %8037  ;;  %8039 = vrcp.f32 %v1878_v36  ;;  %6206 = vrot.lane.b32.xlu0 %v12456_v2, %s8139_s12  ;;  %v12465_v36 = vld [vmem:[#allocation32_spill] sm:$0xff]  ;;  %v12466_v2 = vld [vmem:[#allocation102_spill] sm:$0xff] }
 0x913   : > { %v2218_v12 = vmul.f32 %v8038_v41, %v12457_v50  ;;  %v1881_v42 = vpop.xlane.xlu0 %1880 }
 0x914   : > { %8041 = vrcp.f32 %v1881_v42 }
 0x915   : > { %v2250_v32 = vpack.c.bf16 %v2218_v12, %v2218_v12 }
 0x917   : > { %v5854_v6 = vunpack.c.l.b16 %v2250_v32 }
 0x918   : > { %v8040_v16 = vpop.eup %8039 }
 0x919   : > { %v2238_v5 = vmul.f32 %v8040_v16, %v12458_v48  ;;  %v5886_v55 = vpack.c.b16 %v5855_v8, %v5854_v6 }
 0x91a   : > { %v8042_v3 = vpop.eup %8041  ;;  %6000 = vrot.lane.b32.xlu0 %v12460_v21, %s8141_s14 }
 0x91b   : > { %v2270_v53 = vpack.c.bf16 %v2238_v5, %v2238_v5  ;;  %v2239_v43 = vmul.f32 %v8042_v3, %v12461_v25  ;;  %v12468_v25 = vld [vmem:[#allocation14_spill] sm:$0xff] }
 0x91d   : > { %v2271_v28 = vpack.c.bf16 %v2239_v43, %v2239_v43  ;;  %v11658_v61 = vunpack.c.l.b16 %v2270_v53  ;;  %v8142_v53 = vmov 0  }
 0x91e   : > { %7281 = vset.pattern.permute.xlu2 %v8142_v53  ;;  %7282 = vset.pattern.permute.xlu0 %v8142_v53 }
 0x91f   : > { %v11660_v10 = vunpack.c.l.b16 %v2271_v28 }
 0x921   : > { %v5896_v51 = vpack.c.b16 %v11660_v10, %v11658_v61 }
 0x922   : > { %5998 = vrot.lane.b32.xlu0 %v12462_v15, %s8141_s14 }
 0x926   : > { %v6099_v7 = vpop.permute.xlu0 %6098 }
 0x927   : > { %v6292_v34 = vsel %vm6286_vm3, %v6246_v58, %v6099_v7 }
 0x929   : > { %v6007_v31 = vpop.permute.xlu1 %6006 }
 0x92a   : > { %v6276_v60 = vsel %vm1109_vm2, %v5898_v20, %v6007_v31  ;;  %6112 = vrot.lane.b32.xlu1 %v12463_v23, %s8140_s13  ;;  %6222 = vrot.lane.b32.xlu0 %v6198_v38, %s8139_s12  ;;  %v6119_v20 = vpop.permute.xlu2 %6118  ;;  %s6404_s12 = scalar_lea.sflag [#allocation6], %s202_s29  ;;  %s8073_s13 = sshra.s32 %s6422_s11, 4  ;;  %s8074_s13 = int_to_ptr.hbm [resolvable:$true] %s8073_s13 }
 0x92b   : > { %v6312_v63 = vsel %vm6286_vm3, %v6276_v60, %v6119_v20  ;;  %s8075_s14 = scalar_lea.hbm %s8074_s13, 16  ;;  %p8080_p1 = scmp.lt.s32.totalorder %s8074_s13, %s11770_s4 }
 0x92c   : > { %p8076_p12 = scmp.ne.s32.totalorder %s8074_s13, %s8075_s14  ;;  %p8081_p2 = scmp.lt.s32.totalorder %s8079_s22, %s8075_s14 }
 0x92e   : > { %v6211_v22 = vpop.permute.xlu0 %6210  ;;  %p8077_p13 = pnand %p8076_p12, %p8208_p4  ;;  %p8082_p3 = por %p8081_p2, %p8080_p1 }
 0x92f   : > { %v6327_v9 = vsel %vm6319_vm4, %v6292_v34, %v6211_v22 }
 0x930   : > { %6380 = vmatpush.bf16.xpose.msrb.mxu3 %v6327_v9  ;;  %p8078_p0 = pneg %p8077_p13 }
 0x931   : > { %v6231_v59 = vpop.permute.xlu1 %6230 }
 0x932   : > { %v6357_v30 = vsel %vm6319_vm4, %v6312_v63, %v6231_v59  ;;  %v1872_v1 = vpop.xlane.xlu2 %1871  ;;  %p8083_p5 = pnand %p8082_p3, %p8078_p0 }
 0x933   : > { %8043 = vrcp.f32 %v1872_v1 }
 0x939   : > { %v5985_v46 = vpop.permute.xlu1 %5984  ;;  %v8044_v33 = vpop.eup %8043 }
 0x93a   : > { %v6243_v44 = vsel %vm1109_vm2, %v5887_v45, %v5985_v46  ;;  %v6229_v16 = vpop.permute.xlu2 %6228 }
 0x941   : > { %v6005_v29 = vpop.permute.xlu1 %6004 }
 0x942   : > { %v6273_v0 = vsel %vm1109_vm2, %v5897_v27, %v6005_v29  ;;  %v2236_v27 = vmul.f32 %v8044_v33, %v12464_v56  ;;  %v6003_v48 = vpop.permute.xlu2 %6002 }
 0x943   : > { %v6270_v39 = vsel %vm1109_vm2, %v5896_v51, %v6003_v48 }
 0x944   : > { %v2268_v57 = vpack.c.bf16 %v2236_v27, %v2236_v27 }
 0x946   : > { %v5872_v45 = vunpack.c.l.b16 %v2268_v57 }
 0x949   : > { %v6097_v38 = vpop.permute.xlu1 %6096 }
 0x94a   : > { %v6290_v47 = vsel %vm6286_vm3, %v6243_v44, %v6097_v38  ;;  %v6115_v5 = vpop.permute.xlu2 %6114 }
 0x94b   : > { %v6308_v7 = vsel %vm6286_vm3, %v6270_v39, %v6115_v5 }
 0x951   : > { %v6117_v11 = vpop.permute.xlu1 %6116 }
 0x952   : > { %v6310_v26 = vsel %vm6286_vm3, %v6273_v0, %v6117_v11  ;;  %v6227_v28 = vpop.permute.xlu2 %6226 }
 0x953   : > { %v6354_v49 = vsel %vm6319_vm4, %v6310_v26, %v6229_v16  ;;  %v6351_v60 = vsel %vm6319_vm4, %v6308_v7, %v6227_v28 }
 0x959   : > { %v1875_v19 = vpop.xlane.xlu0 %1874  ;;  %v6209_v14 = vpop.permute.xlu1 %6208 }
 0x95a   : > { %8045 = vrcp.f32 %v1875_v19  ;;  %v6324_v24 = vsel %vm6319_vm4, %v6290_v47, %v6209_v14  ;;  %v6225_v22 = vpop.permute.xlu2 %6224 }
 0x95b   : > { %6381 = vmatpush.bf16.xpose.msrb.mxu3 %v6324_v24 }
 0x960   : > { %v8046_v4 = vpop.eup %8045 }
 0x961   : > { %v2237_v35 = vmul.f32 %v8046_v4, %v12465_v36  ;;  %v1866_v41 = vpop.xlane.xlu0 %1865 }
 0x962   : > { %8047 = vrcp.f32 %v1866_v41  ;;  %v6111_v46 = vpop.permute.xlu2 %6110 }
 0x963   : > { %v2269_v62 = vpack.c.bf16 %v2237_v35, %v2237_v35 }
 0x965   : > { %v5873_v18 = vunpack.c.l.b16 %v2269_v62 }
 0x967   : > { %v5895_v17 = vpack.c.b16 %v5873_v18, %v5872_v45 }
 0x968   : > { %v8048_v40 = vpop.eup %8047 }
 0x969   : > { %v2234_v13 = vmul.f32 %v8048_v40, %v12466_v2 }
 0x96b   : > { %v2266_v23 = vpack.c.bf16 %v2234_v13, %v2234_v13 }
 0x96d   : > { %v5870_v63 = vunpack.c.l.b16 %v2266_v23 }
 0x974   : > { %v5983_v50 = vpop.permute.xlu0 %5982 }
 0x975   : > { %v6240_v42 = vsel %vm1109_vm2, %v5886_v55, %v5983_v50  ;;  %v6368_v55 = vld [vmem:[%s11768_s2] sm:$0xf] }
 0x97c   : > { %v6095_v12 = vpop.permute.xlu0 %6094 }
 0x97d   : > { %v6288_v32 = vsel %vm6286_vm3, %v6240_v42, %v6095_v12 }
 0x984   : > { %v6207_v6 = vpop.permute.xlu0 %6206  ;;  %v1869_v3 = vpop.xlane.xlu1 %1868 }
 0x985   : > { %v6321_v8 = vsel %vm6319_vm4, %v6288_v32, %v6207_v6  ;;  %8049 = vrcp.f32 %v1869_v3 }
 0x986   : > { %6382 = vmatpush.bf16.xpose.msrb.mxu3 %v6321_v8 }
 0x98b   : > { %v8050_v21 = vpop.eup %8049 }
 0x98d   : > { %6383 = vmatmul.bf16.vlgmr.msrb.gmra.mxu3 %v6368_v55 }
 0x98e   : > { %6388 = vmatpush.bf16.xpose.msra.mxu3 %v11518_v37  ;;  %v6369_v37 = vld [vmem:[%s11769_s3] sm:$0xff] }
 0x98f   : > { %6372 = vperm.xlu2 %7281, %v6369_v37  }
 0x996   : > { %6389 = vmatpush.bf16.xpose.msra.mxu3 %v11536_v54  ;;  %v6001_v54 = vpop.permute.xlu0 %6000 }
 0x997   : > { %v6267_v9 = vsel %vm1109_vm2, %v5895_v17, %v6001_v54 }
 0x99c   : > { %v6113_v58 = vpop.permute.xlu1 %6112 }
 0x99d   : > { %v6306_v59 = vsel %vm6286_vm3, %v6267_v9, %v6113_v58 }
 0x99e   : > { %6390 = vmatpush.bf16.xpose.msra.mxu3 %v11625_v52  ;;  %v12467_v52 = vld [vmem:[#allocation105_spill] sm:$0xff]  ;;  %v5999_v34 = vpop.permute.xlu0 %5998  ;;  %v6348_v10 = vsel %vm6319_vm4, %v6306_v59, %v6225_v22 }
 0x99f   : > { %v2149_v43 = vadd.f32 %v12468_v25, %v12467_v52 }
 0x9a1   : > { %v2235_v15 = vmul.f32 %v8050_v21, %v2149_v43 }
 0x9a3   : > { %v2267_v31 = vpack.c.bf16 %v2235_v15, %v2235_v15 }
 0x9a5   : > { %v5871_v20 = vunpack.c.l.b16 %v2267_v31 }
 0x9a6   : > { %6391 = vmatpush.bf16.xpose.msra.mxu3 %v6357_v30  ;;  %v6223_v30 = vpop.permute.xlu0 %6222 }
 0x9a7   : > { %v5894_v61 = vpack.c.b16 %v5871_v20, %v5870_v63 }
 0x9a9   : > { %v6264_v51 = vsel %vm1109_vm2, %v5894_v61, %v5999_v34 }
 0x9aa   : > { %v6304_v29 = vsel %vm6286_vm3, %v6264_v51, %v6111_v46 }
 0x9ab   : > { %v6345_v0 = vsel %vm6319_vm4, %v6304_v29, %v6223_v30 }
 0x9ae   : > { %6392 = vmatpush.bf16.xpose.msra.mxu3 %v6354_v49 }
 0x9b6   : > { %6393 = vmatpush.bf16.xpose.msra.mxu3 %v6351_v60 }
 0x9be   : > { %6394 = vmatpush.bf16.xpose.msra.mxu3 %v6348_v10 }
 0x9c6   : > { %6395 = vmatpush.bf16.xpose.msra.mxu3 %v6345_v0 }
 0x9cd   : > { %6396 = vmatmul.bf16.vlgmr.msra.gmra.mxu3 %v6368_v55 }
 0x9e9   : > { %v6373_v38 = vpop.permute.xlu2 %6372 }
 0xa10   : > { %v6384_v1 = vpop.f32.mrf.mxu3 }
 0xa11   : > { %v6385_v11 = vadd.f32 %v6384_v1, %v6373_v38 }
 0xa13   : > { %6401 = vst [vmem:[%s204_s5] sm:$0xff] %v6385_v11 }
 0xa18   : > { %v6386_v26 = vpop.f32.mrf.mxu3 }
 0xa50   : > { %v6397_v44 = vpop.f32.mrf.mxu3 }
 0xa51   : > { %v6398_v47 = vadd.f32 %v6397_v44, %v6373_v38 }
 0xa53   : > { %6402 = vst [vmem:[%s204_s5 + $0x8] sm:$0xff] %v6398_v47 }
 0xa54   : > { %8086 = shalt.err (!%p8083_p5)
}
 0xa55   : > { %7198 = dma.vmem_to_hbm [thread:$0]  (%p8208_p4), %s6420_s10, 256, %s6422_s11, %s6404_s12  }
 0xa58   : > { %v6399_v19 = vpop.f32.mrf.mxu3 }
 0xa59 PF: > { %p7204_p6 = scmp.ge.s32.totalorder %s8137_s20, 2  ;;  %s6433_s29 = sand.u32 1, %s8117_s15  }
 0xa5a   : > { %s6434_s30 = scalar_lea.sflag [#allocation6], %s6433_s29 }
 0xa5b   : > { %p7201_p7 = pnand %p7204_p6, %p8215_p8 }
 0xa5d   : > { %p7202_p9 = pneg %p7201_p7 }
 0xa5f   : > { %8112 = dma.done.wait (%p7202_p9), %s6434_s30, 256  }
 0xa60   : > { %8114 = vsyncadd (%p7202_p9), %s6434_s30, 4294967040  ;;  %s17_s20 = sadd.s32 1, %s8137_s20   ;;  %s12469_s15 = smov %s8121_s16 }
 0xa61   : > { %p14_p10 = scmp.ge.s32.totalorder %s17_s20, 4   ;;  %s12470_s16 = smov %s8125_s17 }
 0xa62   : > { %s12471_s17 = smov %s8221_s28  ;;  %s12472_s18 = smov %s8133_s19 }
 0xa63   : > { %s12473_s19 = smov %s12475_s23  ;;  %16 = sbr.rel (!%p14_p10) target bundleno = 4 (0x4), region = 76 }
 0xa68   :  { %6440 = vsyncpa [#allocation6], 1 }
 0xa69   :  { %6442 = vsyncpa [#allocation6 + $0x1], 1 }

</bundles_post_ra>
